<compile_context>
chip_gen: v7x
topology: tpu7x:2x2x1
jax: 0.10.0
libtpu: 0.0.40
codegen_flags: <defaults>
</compile_context>

<pallas_src>
import jax
import jax.numpy as jnp
from jax.experimental import pallas as pl
from jax.experimental.pallas import tpu as pltpu

N_EMBED = 384
N_HEAD = 6
HEAD_SIZE = N_EMBED // N_HEAD          # 64
FF_HIDDEN = 4 * N_EMBED                # 1536
LN_EPS = 1e-5
ATTN_SCALE = float(N_EMBED) ** (-0.5)  # C**-0.5 in the PyTorch code

# Row indices inside the packed (6, N_EMBED) vector bundle.
_LN1_G, _LN1_B, _LN2_G, _LN2_B, _BPROJ, _B2 = range(6)


def _layernorm(x, gamma, beta):
    """One-pass LayerNorm: mean and mean-of-squares computed from x directly."""
    mu = jnp.mean(x, axis=-1, keepdims=True)
    msq = jnp.mean(x * x, axis=-1, keepdims=True)
    var = jnp.maximum(msq - mu * mu, 0.0)
    xn = (x - mu) * jax.lax.rsqrt(var + LN_EPS)
    return xn * gamma + beta


def block_kernel(x_ref,
                 vecs_ref,           # (6, C): ln1_g, ln1_b, ln2_g, ln2_b, bproj, b2
                 wqkv_ref,           # (C, 3C) bf16, attention scale folded into Q cols
                 wproj_ref,          # (C, C)  bf16
                 w1_ref,             # (C, 4C) bf16
                 b1_ref,             # (1, 4C) f32
                 w2_ref,             # (4C, C) bf16
                 o_ref):
    bt, t, c = x_ref.shape                       # (B_TILE, T, C)
    m = bt * t

    # Flatten the batch tile so every dense matmul sees M = B_TILE*T rows.
    x = x_ref[...].reshape(m, c)                 # (M, C) f32

    # ---------------- self-attention branch: sa(ln1(x)) ----------------
    xn = _layernorm(x, vecs_ref[_LN1_G], vecs_ref[_LN1_B])

    # One fused QKV matmul (bf16 operands, f32 accumulation).
    qkv = jnp.dot(xn.astype(jnp.bfloat16), wqkv_ref[...],
                  preferred_element_type=jnp.float32)          # (M, 3C) f32

    # Additive causal mask computed ONCE, broadcast over batch (and heads).
    row = jax.lax.broadcasted_iota(jnp.int32, (t, t), 0)
    col = jax.lax.broadcasted_iota(jnp.int32, (t, t), 1)
    mask_add = jnp.where(row >= col, 0.0, -1e30).astype(jnp.float32)  # (T, T)

    # Per-head attention; head outputs gathered into one (M, C) buffer so the
    # output projection is a single K=384 matmul instead of six K=64 matmuls.
    head_outs = []
    for h in range(N_HEAD):                       # static unroll over 6 heads
        s = h * HEAD_SIZE
        qh = qkv[:, s:s + HEAD_SIZE].reshape(bt, t, HEAD_SIZE).astype(jnp.bfloat16)
        kh = qkv[:, N_EMBED + s:N_EMBED + s + HEAD_SIZE] \
            .reshape(bt, t, HEAD_SIZE).astype(jnp.bfloat16)
        vh = qkv[:, 2 * N_EMBED + s:2 * N_EMBED + s + HEAD_SIZE] \
            .reshape(bt, t, HEAD_SIZE).astype(jnp.bfloat16)

        wei = jnp.einsum('bqd,bkd->bqk', qh, kh,
                         preferred_element_type=jnp.float32)     # (bt, t, t)
        wei = wei + mask_add                                     # causal mask
        wei = wei - jnp.max(wei, axis=-1, keepdims=True)
        p = jnp.exp(wei)
        p = p * pl.reciprocal(jnp.sum(p, axis=-1, keepdims=True), approx=True)

        oh = jnp.einsum('bqk,bkd->bqd', p.astype(jnp.bfloat16), vh,
                        preferred_element_type=jnp.float32)      # (bt, t, 64)
        head_outs.append(oh.reshape(m, HEAD_SIZE))               # f32

    heads_cat = jnp.concatenate(head_outs, axis=-1)              # (M, C) f32
    sa = jnp.dot(heads_cat.astype(jnp.bfloat16), wproj_ref[...],
                 preferred_element_type=jnp.float32) + vecs_ref[_BPROJ]

    x1 = x + sa                                                  # residual 1

    # ---------------- feed-forward branch: ffwd(ln2(x1)) ----------------
    xn2 = _layernorm(x1, vecs_ref[_LN2_G], vecs_ref[_LN2_B])
    h1 = jnp.dot(xn2.astype(jnp.bfloat16), w1_ref[...],
                 preferred_element_type=jnp.float32) + b1_ref[0]
    h1 = jnp.maximum(h1, 0.0)                                    # ReLU
    ff = jnp.dot(h1.astype(jnp.bfloat16), w2_ref[...],
                 preferred_element_type=jnp.float32) + vecs_ref[_B2]

    out = x1 + ff                                                # residual 2
    o_ref[...] = out.reshape(bt, t, c).astype(o_ref.dtype)


def _pick_b_tile(B, T, target_rows=512):
    """Largest divisor of B with b_tile*T <= target_rows, capped at B//2 so
    the parallel grid axis has extent >= 2 (keeps both v7x TensorCores busy)."""
    max_tile = B if B < 2 else max(1, B // 2)
    best = 1
    for d in range(1, max_tile + 1):
        if B % d == 0 and d * T <= target_rows:
            best = d
    return best


def block_forward(x, params, *, b_tile=None, target_rows=512):
    B, T, C = x.shape
    assert C == N_EMBED
    if b_tile is None:
        b_tile = _pick_b_tile(B, T, target_rows=target_rows)
    assert B % b_tile == 0
    grid = (B // b_tile,)

    # Host-side weight prep: fuse Q|K|V, fold the attention scale into the Q
    # columns, cast matmul weights to bf16 (f32 accumulation in-kernel), and
    # pack the small per-channel vectors into one (6, C) array.
    wqkv = jnp.concatenate(
        [params["wq"] * ATTN_SCALE, params["wk"], params["wv"]],
        axis=1).astype(jnp.bfloat16)                              # (C, 3C)
    wproj = params["wproj"].astype(jnp.bfloat16)
    w1 = params["w1"].astype(jnp.bfloat16)
    w2 = params["w2"].astype(jnp.bfloat16)
    vecs = jnp.concatenate(
        [params["ln1_g"], params["ln1_b"], params["ln2_g"], params["ln2_b"],
         params["bproj"], params["b2"]], axis=0).astype(jnp.float32)  # (6, C)
    b1 = params["b1"].astype(jnp.float32)                             # (1, 4C)

    weights = [vecs, wqkv, wproj, w1, b1, w2]

    def full_spec(arr):
        nd = arr.ndim
        return pl.BlockSpec(arr.shape, lambda b, _nd=nd: (0,) * _nd)

    in_specs = [pl.BlockSpec((b_tile, T, C), lambda b: (b, 0, 0))]
    in_specs += [full_spec(w) for w in weights]

    return pl.pallas_call(
        block_kernel,
        out_shape=jax.ShapeDtypeStruct((B, T, C), x.dtype),
        grid=grid,
        in_specs=in_specs,
        out_specs=pl.BlockSpec((b_tile, T, C), lambda b: (b, 0, 0)),
        compiler_params=pltpu.CompilerParams(
            dimension_semantics=("parallel",),
            # Resident bf16 weights (~3.5 MB, double-buffered by the pipeline)
            # + activation tiles + f32 intermediates at M<=~512 rows stay well
            # under 48 MiB, which also fits v7x's 64 MiB physical VMEM.
            vmem_limit_bytes=48 * 1024 * 1024),
    )(x, *weights)


def make_params(key):
    """Deterministic synthetic parameters (shapes dictated by the module)."""
    ks = jax.random.split(key, 10)
    scale = 0.02
    params = {
        # LayerNorms (weight near 1, bias near 0 but non-trivial)
        "ln1_g": (1.0 + 0.1 * jax.random.normal(ks[0], (1, N_EMBED))).astype(jnp.float32),
        "ln1_b": (0.1 * jax.random.normal(ks[1], (1, N_EMBED))).astype(jnp.float32),
        "ln2_g": (1.0 + 0.1 * jax.random.normal(ks[2], (1, N_EMBED))).astype(jnp.float32),
        "ln2_b": (0.1 * jax.random.normal(ks[3], (1, N_EMBED))).astype(jnp.float32),
        # per-head K/Q/V projections, concatenated along the output axis:
        # columns [h*64:(h+1)*64] belong to head h  (in_features, n_head*head_size)
        "wq": (scale * jax.random.normal(ks[4], (N_EMBED, N_EMBED))).astype(jnp.float32),
        "wk": (scale * jax.random.normal(ks[5], (N_EMBED, N_EMBED))).astype(jnp.float32),
        "wv": (scale * jax.random.normal(ks[6], (N_EMBED, N_EMBED))).astype(jnp.float32),
        # output projection
        "wproj": (scale * jax.random.normal(ks[7], (N_EMBED, N_EMBED))).astype(jnp.float32),
        "bproj": jnp.zeros((1, N_EMBED), jnp.float32),
        # feed-forward
        "w1": (scale * jax.random.normal(ks[8], (N_EMBED, FF_HIDDEN))).astype(jnp.float32),
        "b1": jnp.zeros((1, FF_HIDDEN), jnp.float32),
        "w2": (scale * jax.random.normal(ks[9], (FF_HIDDEN, N_EMBED))).astype(jnp.float32),
        "b2": jnp.zeros((1, N_EMBED), jnp.float32),
    }
    return params


def block_reference(x, p):
    """Pure-JAX f32 reference mirroring the PyTorch forward (eval mode)."""
    def ln(z, g, b):
        mu = z.mean(-1, keepdims=True)
        var = ((z - mu) ** 2).mean(-1, keepdims=True)
        return (z - mu) / jnp.sqrt(var + LN_EPS) * g + b

    B, T, C = x.shape
    xn = ln(x, p["ln1_g"][0], p["ln1_b"][0])
    q = xn @ p["wq"]
    k = xn @ p["wk"]
    v = xn @ p["wv"]
    causal = jnp.tril(jnp.ones((T, T), bool))
    outs = []
    for h in range(N_HEAD):
        s = h * HEAD_SIZE
        qh, kh, vh = q[..., s:s + HEAD_SIZE], k[..., s:s + HEAD_SIZE], v[..., s:s + HEAD_SIZE]
        wei = jnp.einsum("btd,bsd->bts", qh, kh) * ATTN_SCALE
        wei = jnp.where(causal, wei, -jnp.inf)
        wei = jax.nn.softmax(wei, axis=-1)
        outs.append(jnp.einsum("bts,bsd->btd", wei, vh))
    sa = jnp.concatenate(outs, axis=-1) @ p["wproj"] + p["bproj"][0]
    x1 = x + sa
    xn2 = ln(x1, p["ln2_g"][0], p["ln2_b"][0])
    ff = jnp.maximum(xn2 @ p["w1"] + p["b1"][0], 0.0) @ p["w2"] + p["b2"][0]
    return x1 + ff


if __name__ == "__main__":
    key = jax.random.PRNGKey(0)
    k_x, k_p = jax.random.split(key)

    # Small test shapes (batch=4, seq=16, hidden fixed at n_embed=384 by the
    # module). NOTE: this shape is fixed-overhead bound; benchmark at
    # production B*T with xprof before trusting perf numbers.
    B, T = 4, 16
    x = jax.random.normal(k_x, (B, T, N_EMBED), dtype=jnp.float32)
    params = make_params(k_p)

    out = block_forward(x, params)
    out = jax.block_until_ready(out)

    ref = block_reference(x, params)
    assert out.shape == (B, T, N_EMBED)
    # Tolerance is loosened vs the pure-f32 reference because matmul operands
    # are bf16 (f32 accumulation) and the softmax denominator uses the
    # approximate EUP reciprocal; observed error is ~1e-3 at these shapes.
    assert jnp.allclose(out, ref, atol=2e-2, rtol=2e-2), \
        f"max abs err {jnp.max(jnp.abs(out - ref))}"

    print("KERNEL_OK")
</pallas_src>

<mosaic_0001>
module attributes {stable_mosaic.version = 11 : i64} {
  func.func @block_kernel(%arg0: i32, %arg1: memref<2x16x384xf32, #tpu.memory_space<vmem>>, %arg2: memref<6x384xf32, #tpu.memory_space<vmem>>, %arg3: memref<384x1152xbf16, #tpu.memory_space<vmem>>, %arg4: memref<384x384xbf16, #tpu.memory_space<vmem>>, %arg5: memref<384x1536xbf16, #tpu.memory_space<vmem>>, %arg6: memref<1x1536xf32, #tpu.memory_space<vmem>>, %arg7: memref<1536x384xbf16, #tpu.memory_space<vmem>>, %arg8: memref<2x16x384xf32, #tpu.memory_space<vmem>>) attributes {dimension_semantics = [#tpu.dimension_semantics<parallel>], iteration_bounds = array<i64: 2>, scalar_prefetch = 0 : i64, scratch_operands = 0 : i64, tpu.core_type = #tpu.core_type<tc>, window_params = [{transform_indices = @transform_0, window_bounds = array<i64: 2, 16, 384>}, {pipeline_mode = #tpu.pipeline_mode<synchronous>, transform_indices = @transform_1, window_bounds = array<i64: 6, 384>}, {pipeline_mode = #tpu.pipeline_mode<synchronous>, transform_indices = @transform_2, window_bounds = array<i64: 384, 1152>}, {pipeline_mode = #tpu.pipeline_mode<synchronous>, transform_indices = @transform_3, window_bounds = array<i64: 384, 384>}, {pipeline_mode = #tpu.pipeline_mode<synchronous>, transform_indices = @transform_4, window_bounds = array<i64: 384, 1536>}, {pipeline_mode = #tpu.pipeline_mode<synchronous>, transform_indices = @transform_5, window_bounds = array<i64: 1, 1536>}, {pipeline_mode = #tpu.pipeline_mode<synchronous>, transform_indices = @transform_6, window_bounds = array<i64: 1536, 384>}, {transform_indices = @transform_7, window_bounds = array<i64: 2, 16, 384>}]} {
    %c0 = arith.constant 0 : index
    %c0_0 = arith.constant 0 : index
    %c0_1 = arith.constant 0 : index
    %0 = vector.load %arg1[%c0, %c0_0, %c0_1] : memref<2x16x384xf32, #tpu.memory_space<vmem>>, vector<2x16x384xf32>
    %1 = vector.shape_cast %0 : vector<2x16x384xf32> to vector<32x384xf32>
    %c0_2 = arith.constant 0 : index
    %c0_3 = arith.constant 0 : index
    %2 = vector.load %arg2[%c0_2, %c0_3] : memref<6x384xf32, #tpu.memory_space<vmem>>, vector<1x384xf32>
    %3 = vector.shape_cast %2 : vector<1x384xf32> to vector<384xf32>
    %c1 = arith.constant 1 : index
    %c0_4 = arith.constant 0 : index
    %4 = vector.load %arg2[%c1, %c0_4] : memref<6x384xf32, #tpu.memory_space<vmem>>, vector<1x384xf32>
    %5 = vector.shape_cast %4 : vector<1x384xf32> to vector<384xf32>
    %cst = arith.constant dense<0.000000e+00> : vector<32xf32>
    %6 = vector.multi_reduction <add>, %1, %cst [1] : vector<32x384xf32> to vector<32xf32>
    %7 = vector.shape_cast %6 : vector<32xf32> to vector<32x1xf32>
    %cst_5 = arith.constant 3.840000e+02 : f32
    %8 = vector.broadcast %cst_5 : f32 to vector<32x1xf32>
    %9 = arith.divf %7, %8 : vector<32x1xf32>
    %10 = arith.mulf %1, %1 : vector<32x384xf32>
    %cst_6 = arith.constant dense<0.000000e+00> : vector<32xf32>
    %11 = vector.multi_reduction <add>, %10, %cst_6 [1] : vector<32x384xf32> to vector<32xf32>
    %12 = vector.shape_cast %11 : vector<32xf32> to vector<32x1xf32>
    %cst_7 = arith.constant 3.840000e+02 : f32
    %13 = vector.broadcast %cst_7 : f32 to vector<32x1xf32>
    %14 = arith.divf %12, %13 : vector<32x1xf32>
    %15 = arith.mulf %9, %9 : vector<32x1xf32>
    %16 = arith.subf %14, %15 : vector<32x1xf32>
    %cst_8 = arith.constant 0.000000e+00 : f32
    %17 = vector.broadcast %cst_8 : f32 to vector<32x1xf32>
    %18 = arith.maximumf %16, %17 : vector<32x1xf32>
    %19 = vector.broadcast %9 : vector<32x1xf32> to vector<32x384xf32>
    %20 = arith.subf %1, %19 : vector<32x384xf32>
    %cst_9 = arith.constant 9.99999974E-6 : f32
    %21 = vector.broadcast %cst_9 : f32 to vector<32x1xf32>
    %22 = arith.addf %18, %21 : vector<32x1xf32>
    %23 = math.rsqrt %22 : vector<32x1xf32>
    %24 = vector.broadcast %23 : vector<32x1xf32> to vector<32x384xf32>
    %25 = arith.mulf %20, %24 : vector<32x384xf32>
    %26 = vector.shape_cast %3 : vector<384xf32> to vector<1x384xf32>
    %27 = vector.broadcast %26 : vector<1x384xf32> to vector<32x384xf32>
    %28 = arith.mulf %25, %27 : vector<32x384xf32>
    %29 = vector.shape_cast %5 : vector<384xf32> to vector<1x384xf32>
    %30 = vector.broadcast %29 : vector<1x384xf32> to vector<32x384xf32>
    %31 = arith.addf %28, %30 : vector<32x384xf32>
    %32 = arith.truncf %31 : vector<32x384xf32> to vector<32x384xbf16>
    %c0_10 = arith.constant 0 : index
    %c0_11 = arith.constant 0 : index
    %33 = vector.load %arg3[%c0_10, %c0_11] : memref<384x1152xbf16, #tpu.memory_space<vmem>>, vector<384x1152xbf16>
    %cst_12 = arith.constant dense<0.000000e+00> : vector<32x1152xf32>
    %34 = tpu.matmul %32, %33, %cst_12 {dimension_numbers = #tpu.dot_dimension_numbers<[1], [0], [0], [1], [0, 0, 1, 1], [], []>} : vector<32x384xbf16>, vector<384x1152xbf16>, vector<32x1152xf32> -> vector<32x1152xf32>
    %35 = tpu.iota {dimensions = array<i32: 0>} : vector<16x16xi32>
    %36 = tpu.iota {dimensions = array<i32: 1>} : vector<16x16xi32>
    %37 = arith.cmpi sge, %35, %36 : vector<16x16xi32>
    %cst_13 = arith.constant 0.000000e+00 : f32
    %cst_14 = arith.constant -1.000000e+30 : f32
    %38 = vector.broadcast %cst_13 : f32 to vector<16x16xf32>
    %39 = vector.broadcast %cst_14 : f32 to vector<16x16xf32>
    %40 = arith.select %37, %38, %39 : vector<16x16xi1>, vector<16x16xf32>
    %41 = vector.extract_strided_slice %34 {offsets = [0, 0], sizes = [32, 64], strides = [1, 1]} : vector<32x1152xf32> to vector<32x64xf32>
    %42 = vector.shape_cast %41 : vector<32x64xf32> to vector<2x16x64xf32>
    %43 = arith.truncf %42 : vector<2x16x64xf32> to vector<2x16x64xbf16>
    %44 = vector.extract_strided_slice %34 {offsets = [0, 384], sizes = [32, 64], strides = [1, 1]} : vector<32x1152xf32> to vector<32x64xf32>
    %45 = vector.shape_cast %44 : vector<32x64xf32> to vector<2x16x64xf32>
    %46 = arith.truncf %45 : vector<2x16x64xf32> to vector<2x16x64xbf16>
    %47 = vector.extract_strided_slice %34 {offsets = [0, 768], sizes = [32, 64], strides = [1, 1]} : vector<32x1152xf32> to vector<32x64xf32>
    %48 = vector.shape_cast %47 : vector<32x64xf32> to vector<2x16x64xf32>
    %49 = arith.truncf %48 : vector<2x16x64xf32> to vector<2x16x64xbf16>
    "tpu.trace_start"() <{level = 10 : i32, message = "bqd,bkd->bqk"}> : () -> ()
    %cst_15 = arith.constant dense<0.000000e+00> : vector<2x16x16xf32>
    %50 = tpu.matmul %43, %46, %cst_15 {dimension_numbers = #tpu.dot_dimension_numbers<[2], [2], [1], [1], [0, 0, 0, 1, 1, 1], [0], [0]>} : vector<2x16x64xbf16>, vector<2x16x64xbf16>, vector<2x16x16xf32> -> vector<2x16x16xf32>
    "tpu.trace_stop"() : () -> ()
    %51 = vector.shape_cast %40 : vector<16x16xf32> to vector<1x16x16xf32>
    %52 = vector.broadcast %51 : vector<1x16x16xf32> to vector<2x16x16xf32>
    %53 = arith.addf %50, %52 : vector<2x16x16xf32>
    %cst_16 = arith.constant dense<0xFF800000> : vector<2x16xf32>
    %54 = vector.multi_reduction <maximumf>, %53, %cst_16 [2] : vector<2x16x16xf32> to vector<2x16xf32>
    %55 = vector.shape_cast %54 : vector<2x16xf32> to vector<2x16x1xf32>
    %56 = vector.broadcast %55 : vector<2x16x1xf32> to vector<2x16x16xf32>
    %57 = arith.subf %53, %56 : vector<2x16x16xf32>
    %58 = math.exp %57 : vector<2x16x16xf32>
    %cst_17 = arith.constant dense<0.000000e+00> : vector<2x16xf32>
    %59 = vector.multi_reduction <add>, %58, %cst_17 [2] : vector<2x16x16xf32> to vector<2x16xf32>
    %60 = vector.shape_cast %59 : vector<2x16xf32> to vector<2x16x1xf32>
    %61 = tpu.reciprocal %60 {approx = true} : vector<2x16x1xf32> -> vector<2x16x1xf32>
    %62 = vector.broadcast %61 : vector<2x16x1xf32> to vector<2x16x16xf32>
    %63 = arith.mulf %58, %62 : vector<2x16x16xf32>
    %64 = arith.truncf %63 : vector<2x16x16xf32> to vector<2x16x16xbf16>
    "tpu.trace_start"() <{level = 10 : i32, message = "bqk,bkd->bqd"}> : () -> ()
    %cst_18 = arith.constant dense<0.000000e+00> : vector<2x16x64xf32>
    %65 = tpu.matmul %64, %49, %cst_18 {dimension_numbers = #tpu.dot_dimension_numbers<[2], [1], [1], [2], [0, 0, 0, 1, 1, 2], [0], [0]>} : vector<2x16x16xbf16>, vector<2x16x64xbf16>, vector<2x16x64xf32> -> vector<2x16x64xf32>
    "tpu.trace_stop"() : () -> ()
    %66 = vector.shape_cast %65 : vector<2x16x64xf32> to vector<32x64xf32>
    %67 = vector.extract_strided_slice %34 {offsets = [0, 64], sizes = [32, 64], strides = [1, 1]} : vector<32x1152xf32> to vector<32x64xf32>
    %68 = vector.shape_cast %67 : vector<32x64xf32> to vector<2x16x64xf32>
    %69 = arith.truncf %68 : vector<2x16x64xf32> to vector<2x16x64xbf16>
    %70 = vector.extract_strided_slice %34 {offsets = [0, 448], sizes = [32, 64], strides = [1, 1]} : vector<32x1152xf32> to vector<32x64xf32>
    %71 = vector.shape_cast %70 : vector<32x64xf32> to vector<2x16x64xf32>
    %72 = arith.truncf %71 : vector<2x16x64xf32> to vector<2x16x64xbf16>
    %73 = vector.extract_strided_slice %34 {offsets = [0, 832], sizes = [32, 64], strides = [1, 1]} : vector<32x1152xf32> to vector<32x64xf32>
    %74 = vector.shape_cast %73 : vector<32x64xf32> to vector<2x16x64xf32>
    %75 = arith.truncf %74 : vector<2x16x64xf32> to vector<2x16x64xbf16>
    "tpu.trace_start"() <{level = 10 : i32, message = "bqd,bkd->bqk"}> : () -> ()
    %cst_19 = arith.constant dense<0.000000e+00> : vector<2x16x16xf32>
    %76 = tpu.matmul %69, %72, %cst_19 {dimension_numbers = #tpu.dot_dimension_numbers<[2], [2], [1], [1], [0, 0, 0, 1, 1, 1], [0], [0]>} : vector<2x16x64xbf16>, vector<2x16x64xbf16>, vector<2x16x16xf32> -> vector<2x16x16xf32>
    "tpu.trace_stop"() : () -> ()
    %77 = vector.shape_cast %40 : vector<16x16xf32> to vector<1x16x16xf32>
    %78 = vector.broadcast %77 : vector<1x16x16xf32> to vector<2x16x16xf32>
    %79 = arith.addf %76, %78 : vector<2x16x16xf32>
    %cst_20 = arith.constant dense<0xFF800000> : vector<2x16xf32>
    %80 = vector.multi_reduction <maximumf>, %79, %cst_20 [2] : vector<2x16x16xf32> to vector<2x16xf32>
    %81 = vector.shape_cast %80 : vector<2x16xf32> to vector<2x16x1xf32>
    %82 = vector.broadcast %81 : vector<2x16x1xf32> to vector<2x16x16xf32>
    %83 = arith.subf %79, %82 : vector<2x16x16xf32>
    %84 = math.exp %83 : vector<2x16x16xf32>
    %cst_21 = arith.constant dense<0.000000e+00> : vector<2x16xf32>
    %85 = vector.multi_reduction <add>, %84, %cst_21 [2] : vector<2x16x16xf32> to vector<2x16xf32>
    %86 = vector.shape_cast %85 : vector<2x16xf32> to vector<2x16x1xf32>
    %87 = tpu.reciprocal %86 {approx = true} : vector<2x16x1xf32> -> vector<2x16x1xf32>
    %88 = vector.broadcast %87 : vector<2x16x1xf32> to vector<2x16x16xf32>
    %89 = arith.mulf %84, %88 : vector<2x16x16xf32>
    %90 = arith.truncf %89 : vector<2x16x16xf32> to vector<2x16x16xbf16>
    "tpu.trace_start"() <{level = 10 : i32, message = "bqk,bkd->bqd"}> : () -> ()
    %cst_22 = arith.constant dense<0.000000e+00> : vector<2x16x64xf32>
    %91 = tpu.matmul %90, %75, %cst_22 {dimension_numbers = #tpu.dot_dimension_numbers<[2], [1], [1], [2], [0, 0, 0, 1, 1, 2], [0], [0]>} : vector<2x16x16xbf16>, vector<2x16x64xbf16>, vector<2x16x64xf32> -> vector<2x16x64xf32>
    "tpu.trace_stop"() : () -> ()
    %92 = vector.shape_cast %91 : vector<2x16x64xf32> to vector<32x64xf32>
    %93 = vector.extract_strided_slice %34 {offsets = [0, 128], sizes = [32, 64], strides = [1, 1]} : vector<32x1152xf32> to vector<32x64xf32>
    %94 = vector.shape_cast %93 : vector<32x64xf32> to vector<2x16x64xf32>
    %95 = arith.truncf %94 : vector<2x16x64xf32> to vector<2x16x64xbf16>
    %96 = vector.extract_strided_slice %34 {offsets = [0, 512], sizes = [32, 64], strides = [1, 1]} : vector<32x1152xf32> to vector<32x64xf32>
    %97 = vector.shape_cast %96 : vector<32x64xf32> to vector<2x16x64xf32>
    %98 = arith.truncf %97 : vector<2x16x64xf32> to vector<2x16x64xbf16>
    %99 = vector.extract_strided_slice %34 {offsets = [0, 896], sizes = [32, 64], strides = [1, 1]} : vector<32x1152xf32> to vector<32x64xf32>
    %100 = vector.shape_cast %99 : vector<32x64xf32> to vector<2x16x64xf32>
    %101 = arith.truncf %100 : vector<2x16x64xf32> to vector<2x16x64xbf16>
    "tpu.trace_start"() <{level = 10 : i32, message = "bqd,bkd->bqk"}> : () -> ()
    %cst_23 = arith.constant dense<0.000000e+00> : vector<2x16x16xf32>
    %102 = tpu.matmul %95, %98, %cst_23 {dimension_numbers = #tpu.dot_dimension_numbers<[2], [2], [1], [1], [0, 0, 0, 1, 1, 1], [0], [0]>} : vector<2x16x64xbf16>, vector<2x16x64xbf16>, vector<2x16x16xf32> -> vector<2x16x16xf32>
    "tpu.trace_stop"() : () -> ()
    %103 = vector.shape_cast %40 : vector<16x16xf32> to vector<1x16x16xf32>
    %104 = vector.broadcast %103 : vector<1x16x16xf32> to vector<2x16x16xf32>
    %105 = arith.addf %102, %104 : vector<2x16x16xf32>
    %cst_24 = arith.constant dense<0xFF800000> : vector<2x16xf32>
    %106 = vector.multi_reduction <maximumf>, %105, %cst_24 [2] : vector<2x16x16xf32> to vector<2x16xf32>
    %107 = vector.shape_cast %106 : vector<2x16xf32> to vector<2x16x1xf32>
    %108 = vector.broadcast %107 : vector<2x16x1xf32> to vector<2x16x16xf32>
    %109 = arith.subf %105, %108 : vector<2x16x16xf32>
    %110 = math.exp %109 : vector<2x16x16xf32>
    %cst_25 = arith.constant dense<0.000000e+00> : vector<2x16xf32>
    %111 = vector.multi_reduction <add>, %110, %cst_25 [2] : vector<2x16x16xf32> to vector<2x16xf32>
    %112 = vector.shape_cast %111 : vector<2x16xf32> to vector<2x16x1xf32>
    %113 = tpu.reciprocal %112 {approx = true} : vector<2x16x1xf32> -> vector<2x16x1xf32>
    %114 = vector.broadcast %113 : vector<2x16x1xf32> to vector<2x16x16xf32>
    %115 = arith.mulf %110, %114 : vector<2x16x16xf32>
    %116 = arith.truncf %115 : vector<2x16x16xf32> to vector<2x16x16xbf16>
    "tpu.trace_start"() <{level = 10 : i32, message = "bqk,bkd->bqd"}> : () -> ()
    %cst_26 = arith.constant dense<0.000000e+00> : vector<2x16x64xf32>
    %117 = tpu.matmul %116, %101, %cst_26 {dimension_numbers = #tpu.dot_dimension_numbers<[2], [1], [1], [2], [0, 0, 0, 1, 1, 2], [0], [0]>} : vector<2x16x16xbf16>, vector<2x16x64xbf16>, vector<2x16x64xf32> -> vector<2x16x64xf32>
    "tpu.trace_stop"() : () -> ()
    %118 = vector.shape_cast %117 : vector<2x16x64xf32> to vector<32x64xf32>
    %119 = vector.extract_strided_slice %34 {offsets = [0, 192], sizes = [32, 64], strides = [1, 1]} : vector<32x1152xf32> to vector<32x64xf32>
    %120 = vector.shape_cast %119 : vector<32x64xf32> to vector<2x16x64xf32>
    %121 = arith.truncf %120 : vector<2x16x64xf32> to vector<2x16x64xbf16>
    %122 = vector.extract_strided_slice %34 {offsets = [0, 576], sizes = [32, 64], strides = [1, 1]} : vector<32x1152xf32> to vector<32x64xf32>
    %123 = vector.shape_cast %122 : vector<32x64xf32> to vector<2x16x64xf32>
    %124 = arith.truncf %123 : vector<2x16x64xf32> to vector<2x16x64xbf16>
    %125 = vector.extract_strided_slice %34 {offsets = [0, 960], sizes = [32, 64], strides = [1, 1]} : vector<32x1152xf32> to vector<32x64xf32>
    %126 = vector.shape_cast %125 : vector<32x64xf32> to vector<2x16x64xf32>
    %127 = arith.truncf %126 : vector<2x16x64xf32> to vector<2x16x64xbf16>
    "tpu.trace_start"() <{level = 10 : i32, message = "bqd,bkd->bqk"}> : () -> ()
    %cst_27 = arith.constant dense<0.000000e+00> : vector<2x16x16xf32>
    %128 = tpu.matmul %121, %124, %cst_27 {dimension_numbers = #tpu.dot_dimension_numbers<[2], [2], [1], [1], [0, 0, 0, 1, 1, 1], [0], [0]>} : vector<2x16x64xbf16>, vector<2x16x64xbf16>, vector<2x16x16xf32> -> vector<2x16x16xf32>
    "tpu.trace_stop"() : () -> ()
    %129 = vector.shape_cast %40 : vector<16x16xf32> to vector<1x16x16xf32>
    %130 = vector.broadcast %129 : vector<1x16x16xf32> to vector<2x16x16xf32>
    %131 = arith.addf %128, %130 : vector<2x16x16xf32>
    %cst_28 = arith.constant dense<0xFF800000> : vector<2x16xf32>
    %132 = vector.multi_reduction <maximumf>, %131, %cst_28 [2] : vector<2x16x16xf32> to vector<2x16xf32>
    %133 = vector.shape_cast %132 : vector<2x16xf32> to vector<2x16x1xf32>
    %134 = vector.broadcast %133 : vector<2x16x1xf32> to vector<2x16x16xf32>
    %135 = arith.subf %131, %134 : vector<2x16x16xf32>
    %136 = math.exp %135 : vector<2x16x16xf32>
    %cst_29 = arith.constant dense<0.000000e+00> : vector<2x16xf32>
    %137 = vector.multi_reduction <add>, %136, %cst_29 [2] : vector<2x16x16xf32> to vector<2x16xf32>
    %138 = vector.shape_cast %137 : vector<2x16xf32> to vector<2x16x1xf32>
    %139 = tpu.reciprocal %138 {approx = true} : vector<2x16x1xf32> -> vector<2x16x1xf32>
    %140 = vector.broadcast %139 : vector<2x16x1xf32> to vector<2x16x16xf32>
    %141 = arith.mulf %136, %140 : vector<2x16x16xf32>
    %142 = arith.truncf %141 : vector<2x16x16xf32> to vector<2x16x16xbf16>
    "tpu.trace_start"() <{level = 10 : i32, message = "bqk,bkd->bqd"}> : () -> ()
    %cst_30 = arith.constant dense<0.000000e+00> : vector<2x16x64xf32>
    %143 = tpu.matmul %142, %127, %cst_30 {dimension_numbers = #tpu.dot_dimension_numbers<[2], [1], [1], [2], [0, 0, 0, 1, 1, 2], [0], [0]>} : vector<2x16x16xbf16>, vector<2x16x64xbf16>, vector<2x16x64xf32> -> vector<2x16x64xf32>
    "tpu.trace_stop"() : () -> ()
    %144 = vector.shape_cast %143 : vector<2x16x64xf32> to vector<32x64xf32>
    %145 = vector.extract_strided_slice %34 {offsets = [0, 256], sizes = [32, 64], strides = [1, 1]} : vector<32x1152xf32> to vector<32x64xf32>
    %146 = vector.shape_cast %145 : vector<32x64xf32> to vector<2x16x64xf32>
    %147 = arith.truncf %146 : vector<2x16x64xf32> to vector<2x16x64xbf16>
    %148 = vector.extract_strided_slice %34 {offsets = [0, 640], sizes = [32, 64], strides = [1, 1]} : vector<32x1152xf32> to vector<32x64xf32>
    %149 = vector.shape_cast %148 : vector<32x64xf32> to vector<2x16x64xf32>
    %150 = arith.truncf %149 : vector<2x16x64xf32> to vector<2x16x64xbf16>
    %151 = vector.extract_strided_slice %34 {offsets = [0, 1024], sizes = [32, 64], strides = [1, 1]} : vector<32x1152xf32> to vector<32x64xf32>
    %152 = vector.shape_cast %151 : vector<32x64xf32> to vector<2x16x64xf32>
    %153 = arith.truncf %152 : vector<2x16x64xf32> to vector<2x16x64xbf16>
    "tpu.trace_start"() <{level = 10 : i32, message = "bqd,bkd->bqk"}> : () -> ()
    %cst_31 = arith.constant dense<0.000000e+00> : vector<2x16x16xf32>
    %154 = tpu.matmul %147, %150, %cst_31 {dimension_numbers = #tpu.dot_dimension_numbers<[2], [2], [1], [1], [0, 0, 0, 1, 1, 1], [0], [0]>} : vector<2x16x64xbf16>, vector<2x16x64xbf16>, vector<2x16x16xf32> -> vector<2x16x16xf32>
    "tpu.trace_stop"() : () -> ()
    %155 = vector.shape_cast %40 : vector<16x16xf32> to vector<1x16x16xf32>
    %156 = vector.broadcast %155 : vector<1x16x16xf32> to vector<2x16x16xf32>
    %157 = arith.addf %154, %156 : vector<2x16x16xf32>
    %cst_32 = arith.constant dense<0xFF800000> : vector<2x16xf32>
    %158 = vector.multi_reduction <maximumf>, %157, %cst_32 [2] : vector<2x16x16xf32> to vector<2x16xf32>
    %159 = vector.shape_cast %158 : vector<2x16xf32> to vector<2x16x1xf32>
    %160 = vector.broadcast %159 : vector<2x16x1xf32> to vector<2x16x16xf32>
    %161 = arith.subf %157, %160 : vector<2x16x16xf32>
    %162 = math.exp %161 : vector<2x16x16xf32>
    %cst_33 = arith.constant dense<0.000000e+00> : vector<2x16xf32>
    %163 = vector.multi_reduction <add>, %162, %cst_33 [2] : vector<2x16x16xf32> to vector<2x16xf32>
    %164 = vector.shape_cast %163 : vector<2x16xf32> to vector<2x16x1xf32>
    %165 = tpu.reciprocal %164 {approx = true} : vector<2x16x1xf32> -> vector<2x16x1xf32>
    %166 = vector.broadcast %165 : vector<2x16x1xf32> to vector<2x16x16xf32>
    %167 = arith.mulf %162, %166 : vector<2x16x16xf32>
    %168 = arith.truncf %167 : vector<2x16x16xf32> to vector<2x16x16xbf16>
    "tpu.trace_start"() <{level = 10 : i32, message = "bqk,bkd->bqd"}> : () -> ()
    %cst_34 = arith.constant dense<0.000000e+00> : vector<2x16x64xf32>
    %169 = tpu.matmul %168, %153, %cst_34 {dimension_numbers = #tpu.dot_dimension_numbers<[2], [1], [1], [2], [0, 0, 0, 1, 1, 2], [0], [0]>} : vector<2x16x16xbf16>, vector<2x16x64xbf16>, vector<2x16x64xf32> -> vector<2x16x64xf32>
    "tpu.trace_stop"() : () -> ()
    %170 = vector.shape_cast %169 : vector<2x16x64xf32> to vector<32x64xf32>
    %171 = vector.extract_strided_slice %34 {offsets = [0, 320], sizes = [32, 64], strides = [1, 1]} : vector<32x1152xf32> to vector<32x64xf32>
    %172 = vector.shape_cast %171 : vector<32x64xf32> to vector<2x16x64xf32>
    %173 = arith.truncf %172 : vector<2x16x64xf32> to vector<2x16x64xbf16>
    %174 = vector.extract_strided_slice %34 {offsets = [0, 704], sizes = [32, 64], strides = [1, 1]} : vector<32x1152xf32> to vector<32x64xf32>
    %175 = vector.shape_cast %174 : vector<32x64xf32> to vector<2x16x64xf32>
    %176 = arith.truncf %175 : vector<2x16x64xf32> to vector<2x16x64xbf16>
    %177 = vector.extract_strided_slice %34 {offsets = [0, 1088], sizes = [32, 64], strides = [1, 1]} : vector<32x1152xf32> to vector<32x64xf32>
    %178 = vector.shape_cast %177 : vector<32x64xf32> to vector<2x16x64xf32>
    %179 = arith.truncf %178 : vector<2x16x64xf32> to vector<2x16x64xbf16>
    "tpu.trace_start"() <{level = 10 : i32, message = "bqd,bkd->bqk"}> : () -> ()
    %cst_35 = arith.constant dense<0.000000e+00> : vector<2x16x16xf32>
    %180 = tpu.matmul %173, %176, %cst_35 {dimension_numbers = #tpu.dot_dimension_numbers<[2], [2], [1], [1], [0, 0, 0, 1, 1, 1], [0], [0]>} : vector<2x16x64xbf16>, vector<2x16x64xbf16>, vector<2x16x16xf32> -> vector<2x16x16xf32>
    "tpu.trace_stop"() : () -> ()
    %181 = vector.shape_cast %40 : vector<16x16xf32> to vector<1x16x16xf32>
    %182 = vector.broadcast %181 : vector<1x16x16xf32> to vector<2x16x16xf32>
    %183 = arith.addf %180, %182 : vector<2x16x16xf32>
    %cst_36 = arith.constant dense<0xFF800000> : vector<2x16xf32>
    %184 = vector.multi_reduction <maximumf>, %183, %cst_36 [2] : vector<2x16x16xf32> to vector<2x16xf32>
    %185 = vector.shape_cast %184 : vector<2x16xf32> to vector<2x16x1xf32>
    %186 = vector.broadcast %185 : vector<2x16x1xf32> to vector<2x16x16xf32>
    %187 = arith.subf %183, %186 : vector<2x16x16xf32>
    %188 = math.exp %187 : vector<2x16x16xf32>
    %cst_37 = arith.constant dense<0.000000e+00> : vector<2x16xf32>
    %189 = vector.multi_reduction <add>, %188, %cst_37 [2] : vector<2x16x16xf32> to vector<2x16xf32>
    %190 = vector.shape_cast %189 : vector<2x16xf32> to vector<2x16x1xf32>
    %191 = tpu.reciprocal %190 {approx = true} : vector<2x16x1xf32> -> vector<2x16x1xf32>
    %192 = vector.broadcast %191 : vector<2x16x1xf32> to vector<2x16x16xf32>
    %193 = arith.mulf %188, %192 : vector<2x16x16xf32>
    %194 = arith.truncf %193 : vector<2x16x16xf32> to vector<2x16x16xbf16>
    "tpu.trace_start"() <{level = 10 : i32, message = "bqk,bkd->bqd"}> : () -> ()
    %cst_38 = arith.constant dense<0.000000e+00> : vector<2x16x64xf32>
    %195 = tpu.matmul %194, %179, %cst_38 {dimension_numbers = #tpu.dot_dimension_numbers<[2], [1], [1], [2], [0, 0, 0, 1, 1, 2], [0], [0]>} : vector<2x16x16xbf16>, vector<2x16x64xbf16>, vector<2x16x64xf32> -> vector<2x16x64xf32>
    "tpu.trace_stop"() : () -> ()
    %196 = vector.shape_cast %195 : vector<2x16x64xf32> to vector<32x64xf32>
    %197 = tpu.concatenate %66, %92, %118, %144, %170, %196 in 1 : vector<32x64xf32>, vector<32x64xf32>, vector<32x64xf32>, vector<32x64xf32>, vector<32x64xf32>, vector<32x64xf32> -> vector<32x384xf32>
    %198 = arith.truncf %197 : vector<32x384xf32> to vector<32x384xbf16>
    %c0_39 = arith.constant 0 : index
    %c0_40 = arith.constant 0 : index
    %199 = vector.load %arg4[%c0_39, %c0_40] : memref<384x384xbf16, #tpu.memory_space<vmem>>, vector<384x384xbf16>
    %cst_41 = arith.constant dense<0.000000e+00> : vector<32x384xf32>
    %200 = tpu.matmul %198, %199, %cst_41 {dimension_numbers = #tpu.dot_dimension_numbers<[1], [0], [0], [1], [0, 0, 1, 1], [], []>} : vector<32x384xbf16>, vector<384x384xbf16>, vector<32x384xf32> -> vector<32x384xf32>
    %c4 = arith.constant 4 : index
    %c0_42 = arith.constant 0 : index
    %201 = vector.load %arg2[%c4, %c0_42] : memref<6x384xf32, #tpu.memory_space<vmem>>, vector<1x384xf32>
    %202 = vector.shape_cast %201 : vector<1x384xf32> to vector<384xf32>
    %203 = vector.shape_cast %202 : vector<384xf32> to vector<1x384xf32>
    %204 = vector.broadcast %203 : vector<1x384xf32> to vector<32x384xf32>
    %205 = arith.addf %200, %204 : vector<32x384xf32>
    %206 = arith.addf %1, %205 : vector<32x384xf32>
    %c2 = arith.constant 2 : index
    %c0_43 = arith.constant 0 : index
    %207 = vector.load %arg2[%c2, %c0_43] : memref<6x384xf32, #tpu.memory_space<vmem>>, vector<1x384xf32>
    %208 = vector.shape_cast %207 : vector<1x384xf32> to vector<384xf32>
    %c3 = arith.constant 3 : index
    %c0_44 = arith.constant 0 : index
    %209 = vector.load %arg2[%c3, %c0_44] : memref<6x384xf32, #tpu.memory_space<vmem>>, vector<1x384xf32>
    %210 = vector.shape_cast %209 : vector<1x384xf32> to vector<384xf32>
    %cst_45 = arith.constant dense<0.000000e+00> : vector<32xf32>
    %211 = vector.multi_reduction <add>, %206, %cst_45 [1] : vector<32x384xf32> to vector<32xf32>
    %212 = vector.shape_cast %211 : vector<32xf32> to vector<32x1xf32>
    %cst_46 = arith.constant 3.840000e+02 : f32
    %213 = vector.broadcast %cst_46 : f32 to vector<32x1xf32>
    %214 = arith.divf %212, %213 : vector<32x1xf32>
    %215 = arith.mulf %206, %206 : vector<32x384xf32>
    %cst_47 = arith.constant dense<0.000000e+00> : vector<32xf32>
    %216 = vector.multi_reduction <add>, %215, %cst_47 [1] : vector<32x384xf32> to vector<32xf32>
    %217 = vector.shape_cast %216 : vector<32xf32> to vector<32x1xf32>
    %cst_48 = arith.constant 3.840000e+02 : f32
    %218 = vector.broadcast %cst_48 : f32 to vector<32x1xf32>
    %219 = arith.divf %217, %218 : vector<32x1xf32>
    %220 = arith.mulf %214, %214 : vector<32x1xf32>
    %221 = arith.subf %219, %220 : vector<32x1xf32>
    %cst_49 = arith.constant 0.000000e+00 : f32
    %222 = vector.broadcast %cst_49 : f32 to vector<32x1xf32>
    %223 = arith.maximumf %221, %222 : vector<32x1xf32>
    %224 = vector.broadcast %214 : vector<32x1xf32> to vector<32x384xf32>
    %225 = arith.subf %206, %224 : vector<32x384xf32>
    %cst_50 = arith.constant 9.99999974E-6 : f32
    %226 = vector.broadcast %cst_50 : f32 to vector<32x1xf32>
    %227 = arith.addf %223, %226 : vector<32x1xf32>
    %228 = math.rsqrt %227 : vector<32x1xf32>
    %229 = vector.broadcast %228 : vector<32x1xf32> to vector<32x384xf32>
    %230 = arith.mulf %225, %229 : vector<32x384xf32>
    %231 = vector.shape_cast %208 : vector<384xf32> to vector<1x384xf32>
    %232 = vector.broadcast %231 : vector<1x384xf32> to vector<32x384xf32>
    %233 = arith.mulf %230, %232 : vector<32x384xf32>
    %234 = vector.shape_cast %210 : vector<384xf32> to vector<1x384xf32>
    %235 = vector.broadcast %234 : vector<1x384xf32> to vector<32x384xf32>
    %236 = arith.addf %233, %235 : vector<32x384xf32>
    %237 = arith.truncf %236 : vector<32x384xf32> to vector<32x384xbf16>
    %c0_51 = arith.constant 0 : index
    %c0_52 = arith.constant 0 : index
    %238 = vector.load %arg5[%c0_51, %c0_52] : memref<384x1536xbf16, #tpu.memory_space<vmem>>, vector<384x1536xbf16>
    %cst_53 = arith.constant dense<0.000000e+00> : vector<32x1536xf32>
    %239 = tpu.matmul %237, %238, %cst_53 {dimension_numbers = #tpu.dot_dimension_numbers<[1], [0], [0], [1], [0, 0, 1, 1], [], []>} : vector<32x384xbf16>, vector<384x1536xbf16>, vector<32x1536xf32> -> vector<32x1536xf32>
    %c0_54 = arith.constant 0 : index
    %c0_55 = arith.constant 0 : index
    %240 = vector.load %arg6[%c0_54, %c0_55] : memref<1x1536xf32, #tpu.memory_space<vmem>>, vector<1x1536xf32>
    %241 = vector.shape_cast %240 : vector<1x1536xf32> to vector<1536xf32>
    %242 = vector.shape_cast %241 : vector<1536xf32> to vector<1x1536xf32>
    %243 = vector.broadcast %242 : vector<1x1536xf32> to vector<32x1536xf32>
    %244 = arith.addf %239, %243 : vector<32x1536xf32>
    %cst_56 = arith.constant 0.000000e+00 : f32
    %245 = vector.broadcast %cst_56 : f32 to vector<32x1536xf32>
    %246 = arith.maximumf %244, %245 : vector<32x1536xf32>
    %247 = arith.truncf %246 : vector<32x1536xf32> to vector<32x1536xbf16>
    %c0_57 = arith.constant 0 : index
    %c0_58 = arith.constant 0 : index
    %248 = vector.load %arg7[%c0_57, %c0_58] : memref<1536x384xbf16, #tpu.memory_space<vmem>>, vector<1536x384xbf16>
    %cst_59 = arith.constant dense<0.000000e+00> : vector<32x384xf32>
    %249 = tpu.matmul %247, %248, %cst_59 {dimension_numbers = #tpu.dot_dimension_numbers<[1], [0], [0], [1], [0, 0, 1, 1], [], []>} : vector<32x1536xbf16>, vector<1536x384xbf16>, vector<32x384xf32> -> vector<32x384xf32>
    %c5 = arith.constant 5 : index
    %c0_60 = arith.constant 0 : index
    %250 = vector.load %arg2[%c5, %c0_60] : memref<6x384xf32, #tpu.memory_space<vmem>>, vector<1x384xf32>
    %251 = vector.shape_cast %250 : vector<1x384xf32> to vector<384xf32>
    %252 = vector.shape_cast %251 : vector<384xf32> to vector<1x384xf32>
    %253 = vector.broadcast %252 : vector<1x384xf32> to vector<32x384xf32>
    %254 = arith.addf %249, %253 : vector<32x384xf32>
    %255 = arith.addf %206, %254 : vector<32x384xf32>
    %256 = vector.shape_cast %255 : vector<32x384xf32> to vector<2x16x384xf32>
    %c0_61 = arith.constant 0 : index
    %c0_62 = arith.constant 0 : index
    %c0_63 = arith.constant 0 : index
    %257 = vector.load %arg8[%c0_61, %c0_62, %c0_63] : memref<2x16x384xf32, #tpu.memory_space<vmem>>, vector<2x16x384xf32>
    tpu.vector_store %arg8[%c0_61, %c0_62, %c0_63], %256 {strides = array<i32>} : memref<2x16x384xf32, #tpu.memory_space<vmem>>, vector<2x16x384xf32>,
    return
  }
  func.func @transform_0(%arg0: i32) -> (i32, i32, i32) {
    %c0_i32 = arith.constant 0 : i32
    %c0_i32_0 = arith.constant 0 : i32
    %c0_i32_1 = arith.constant 0 : i32
    return %arg0, %c0_i32, %c0_i32_0 : i32, i32, i32
  }
  func.func @transform_1(%arg0: i32) -> (i32, i32) {
    %c0_i32 = arith.constant 0 : i32
    %c0_i32_0 = arith.constant 0 : i32
    %c0_i32_1 = arith.constant 0 : i32
    return %c0_i32, %c0_i32_0 : i32, i32
  }
  func.func @transform_2(%arg0: i32) -> (i32, i32) {
    %c0_i32 = arith.constant 0 : i32
    %c0_i32_0 = arith.constant 0 : i32
    %c0_i32_1 = arith.constant 0 : i32
    return %c0_i32, %c0_i32_0 : i32, i32
  }
  func.func @transform_3(%arg0: i32) -> (i32, i32) {
    %c0_i32 = arith.constant 0 : i32
    %c0_i32_0 = arith.constant 0 : i32
    %c0_i32_1 = arith.constant 0 : i32
    return %c0_i32, %c0_i32_0 : i32, i32
  }
  func.func @transform_4(%arg0: i32) -> (i32, i32) {
    %c0_i32 = arith.constant 0 : i32
    %c0_i32_0 = arith.constant 0 : i32
    %c0_i32_1 = arith.constant 0 : i32
    return %c0_i32, %c0_i32_0 : i32, i32
  }
  func.func @transform_5(%arg0: i32) -> (i32, i32) {
    %c0_i32 = arith.constant 0 : i32
    %c0_i32_0 = arith.constant 0 : i32
    %c0_i32_1 = arith.constant 0 : i32
    return %c0_i32, %c0_i32_0 : i32, i32
  }
  func.func @transform_6(%arg0: i32) -> (i32, i32) {
    %c0_i32 = arith.constant 0 : i32
    %c0_i32_0 = arith.constant 0 : i32
    %c0_i32_1 = arith.constant 0 : i32
    return %c0_i32, %c0_i32_0 : i32, i32
  }
  func.func @transform_7(%arg0: i32) -> (i32, i32, i32) {
    %c0_i32 = arith.constant 0 : i32
    %c0_i32_0 = arith.constant 0 : i32
    %c0_i32_1 = arith.constant 0 : i32
    return %arg0, %c0_i32, %c0_i32_0 : i32, i32, i32
  }
}

</mosaic_0001>

<bundles_post_ra>
// kernel: tpu_custom_call.1
= control target key start
LH: loop header
LB: loop body
LE: loop exit
PB: predicated region body
PF: predicated region fallthrough
CT: control target
= control target key end

     0   :  { %s14757_s0 = inlined_call_operand.hbm [shape: f32[4,16,384], index: 0, kind: input, shape index: {}]   ;;  %s14758_s1 = inlined_call_operand.hbm [shape: f32[6,384], index: 1, kind: input, shape index: {}]   ;;  %s14759_s2 = inlined_call_operand.hbm [shape: bf16[384,1152], index: 2, kind: input, shape index: {}]   ;;  %s14760_s3 = inlined_call_operand.hbm [shape: bf16[384,384], index: 3, kind: input, shape index: {}]   ;;  %s14761_s4 = inlined_call_operand.hbm [shape: bf16[384,1536], index: 4, kind: input, shape index: {}]   ;;  %s14762_s5 = inlined_call_operand.hbm [shape: f32[1,1536], index: 5, kind: input, shape index: {}]   ;;  %s14763_s6 = inlined_call_operand.hbm [shape: bf16[1536,384], index: 6, kind: input, shape index: {}]   ;;  %s14764_s7 = inlined_call_operand.hbm [shape: f32[4,16,384], index: 7, kind: output, shape index: {}]  }
   0x1   :  { %14769 = sst [smem:[#allocation20_spill]] %s14758_s1 }
   0x2   :  { %12 = vsyncpa [#allocation3], 0 }
   0x3   :  { %14 = vsyncpa [#allocation3 + $0x1], 0 }
   0x4   :  { %15 = vsyncpa [#allocation6], 0 }
   0x5   :  { %16 = vsyncpa [#allocation9], 0 }
   0x6   :  { %17 = vsyncpa [#allocation12], 0 }
   0x7   :  { %18 = vsyncpa [#allocation4], 0 }
   0x8   :  { %20 = vsyncpa [#allocation4 + $0x1], 0  ;;  %s13479_s24 = smov 0   ;;  %s13481_s25 = smov 0  }
   0x9   :  { %s13483_s26 = smov 0   ;;  %s13485_s27 = smov 0  }
   0xa LB: > { %s13416_s28 = smov [#allocation5]   ;;  %s13500_s30 = sadd.s32 4294967295, %s13414_s27   ;;  %s13414_s27 = sphi %s13485_s27, %s14793_s27   ;;  %s13410_s26 = sphi %s13483_s26, %s14792_s26   ;;  %s13406_s25 = sphi %s13481_s25, %s14791_s25   ;;  %s13402_s24 = sphi %s13479_s24, %s14790_s24  }
   0xb   : > { %s222_s29 = sshll.u32 %s13416_s28, 4  ;;  %p10043_p0 = scmp.ge.s32.totalorder %s13414_s27, 1  ;;  %s223_s29 = int_to_ptr.vmem [resolvable:$true] %s222_s29 }
   0xc   : > { %p14765_p1 = scmp.eq.s32.totalorder %s13500_s30, 0  ;;  %p209_p2 = scmp.lt.s32.totalorder %s13414_s27, 3 }
   0xd   : > { %s13417_s9 = smov [#allocation8]   ;;  %s13418_s12 = smov [#allocation11]  }
   0xe   : > { %p13505_p3 = pnand %p10043_p0, %p209_p2  ;;  %s245_s10 = sshll.u32 %s13417_s9, 4  ;;  %s13512_s10 = int_to_ptr.vmem [resolvable:$true] %s245_s10 }
   0xf   : > { %s272_s13 = sshll.u32 %s13418_s12, 4  ;;  %s14772_s1 = sld [smem:[#allocation20_spill]]  ;;  %s13520_s13 = int_to_ptr.vmem [resolvable:$true] %s272_s13 }
  0x10   : > { %s14770_s8 = scalar_select %p13505_p3, 1, 0 }
  0x11   : > { %p11654_p5 = pneg %p13505_p3 }
  0x13   : > { %p13516_p6 = pnand %p11654_p5, %p14765_p1 }
  0x15   : > { %s13138_s16 = scalar_lea.hbm %s14772_s1, 384  ;;  %p13530_p8 = pneg %p13516_p6 }
  0x16   : > { %p13139_p7 = scmp.ne.s32.totalorder %s14772_s1, %s13138_s16  ;;  %p13145_p11 = scmp.lt.u32.totalorder %s13138_s16, %s14772_s1 }
  0x18   : > { %p13141_p9 = pnand %p13530_p8, %p13139_p7 }
  0x1a   : > { %p13142_p10 = pneg %p13141_p9 }
  0x1c   : > { %p13147_p12 = pnand %p13145_p11, %p13142_p10 }
  0x1e   : > { %13150 = shalt.err (!%p13147_p12)
}
  0x1f   : > { %s13151_s22 = scalar_lea.vmem %s223_s29, 384  ;;  %p13159_p5 = scmp.lt.s32.totalorder %s223_s29, %s223_s29 }
  0x20   : > { %p13152_p13 = scmp.ne.s32.totalorder %s223_s29, %s13151_s22  ;;  %p13160_p4 = scmp.lt.s32.totalorder %s13151_s22, %s13151_s22 }
  0x22   : > { %p13154_p0 = pnand %p13152_p13, %p13530_p8  ;;  %p13161_p1 = por %p13160_p4, %p13159_p5 }
  0x24   : > { %p13155_p2 = pneg %p13154_p0 }
  0x26   : > { %p13162_p3 = pnand %p13161_p1, %p13155_p2 }
  0x28   : > { %13165 = shalt.err (!%p13162_p3)
}
  0x29   : > { %11657 = dma.hbm_to_vmem [thread:$0]  (!%p13516_p6), %s14772_s1, 384, %s223_s29, [#allocation6]  }
  0x2a   : > { %s13166_s14 = scalar_lea.hbm %s14760_s3, 9216 }
  0x2b   : > { %p13167_p7 = scmp.ne.s32.totalorder %s14760_s3, %s13166_s14  ;;  %p13173_p1 = scmp.lt.u32.totalorder %s13166_s14, %s14760_s3 }
  0x2d   : > { %p13169_p9 = pnand %p13167_p7, %p13530_p8 }
  0x2f   : > { %p13170_p4 = pneg %p13169_p9 }
  0x31   : > { %p13175_p3 = pnand %p13173_p1, %p13170_p4 }
  0x33   : > { %13178 = shalt.err (!%p13175_p3)
}
  0x34   : > { %s13179_s29 = scalar_lea.vmem %s13512_s10, 9216  ;;  %p13187_p13 = scmp.lt.s32.totalorder %s13512_s10, %s13512_s10 }
  0x35   : > { %p13180_p10 = scmp.ne.s32.totalorder %s13512_s10, %s13179_s29  ;;  %p13188_p0 = scmp.lt.s32.totalorder %s13179_s29, %s13179_s29 }
  0x37   : > { %p13182_p11 = pnand %p13180_p10, %p13530_p8  ;;  %p13189_p2 = por %p13188_p0, %p13187_p13 }
  0x39   : > { %p13183_p12 = pneg %p13182_p11 }
  0x3b   : > { %p13190_p5 = pnand %p13189_p2, %p13183_p12 }
  0x3d   : > { %13193 = shalt.err (!%p13190_p5)
}
  0x3e   : > { %s14767_s20 = smov 192   ;;  %s13420_s21 = smov 12  }
  0x3f   : > { %11663 = dma.hbm_to_vmem [thread:$0]  (!%p13516_p6), %s14760_s3, 9216, %s13512_s10, [#allocation9], %s14767_s20, %s14767_s20, %s13420_s21  }
  0x40   : > { %s13194_s12 = scalar_lea.hbm %s14762_s5, 192 }
  0x41   : > { %p13195_p7 = scmp.ne.s32.totalorder %s14762_s5, %s13194_s12  ;;  %p13201_p1 = scmp.lt.u32.totalorder %s13194_s12, %s14762_s5 }
  0x43   : > { %p13197_p9 = pnand %p13195_p7, %p13530_p8 }
  0x45   : > { %p13198_p4 = pneg %p13197_p9 }
  0x47   : > { %p13203_p3 = pnand %p13201_p1, %p13198_p4 }
  0x49   : > { %13206 = shalt.err (!%p13203_p3)
}
  0x4a   : > { %s13207_s10 = scalar_lea.vmem %s13520_s13, 192  ;;  %p13215_p13 = scmp.lt.s32.totalorder %s13520_s13, %s13520_s13 }
  0x4b   : > { %p13208_p10 = scmp.ne.s32.totalorder %s13520_s13, %s13207_s10  ;;  %p13216_p0 = scmp.lt.s32.totalorder %s13207_s10, %s13207_s10 }
  0x4d   : > { %p13210_p11 = pnand %p13208_p10, %p13530_p8  ;;  %p13217_p2 = por %p13216_p0, %p13215_p13 }
  0x4f   : > { %p13211_p12 = pneg %p13210_p11 }
  0x51   : > { %p13218_p5 = pnand %p13217_p2, %p13211_p12 }
  0x53   : > { %13221 = shalt.err (!%p13218_p5)
}
  0x54   : > { %11669 = dma.hbm_to_vmem [thread:$0]  (!%p13516_p6), %s14762_s5, 192, %s13520_s13, [#allocation12]  }
  0x55   : > { %s13421_s22 = smov [#allocation7]   ;;  %s13222_s12 = scalar_lea.hbm %s14759_s2, 27648 }
  0x56   : > { %s232_s23 = sshll.u32 %s13421_s22, 4  ;;  %p13223_p7 = scmp.ne.s32.totalorder %s14759_s2, %s13222_s12  ;;  %s233_s23 = int_to_ptr.vmem [resolvable:$true] %s232_s23 }
  0x57   : > { %p13229_p1 = scmp.lt.u32.totalorder %s13222_s12, %s14759_s2 }
  0x58   : > { %p13225_p9 = pnand %p13223_p7, %p13530_p8 }
  0x5a   : > { %p13226_p4 = pneg %p13225_p9 }
  0x5c   : > { %p13231_p3 = pnand %p13229_p1, %p13226_p4 }
  0x5e   : > { %13234 = shalt.err (!%p13231_p3)
}
  0x5f   : > { %s13235_s13 = scalar_lea.vmem %s233_s23, 27648  ;;  %p13243_p13 = scmp.lt.s32.totalorder %s233_s23, %s233_s23 }
  0x60   : > { %p13236_p10 = scmp.ne.s32.totalorder %s233_s23, %s13235_s13  ;;  %p13244_p0 = scmp.lt.s32.totalorder %s13235_s13, %s13235_s13 }
  0x62   : > { %p13238_p11 = pnand %p13236_p10, %p13530_p8  ;;  %p13245_p2 = por %p13244_p0, %p13243_p13 }
  0x64   : > { %p13239_p12 = pneg %p13238_p11 }
  0x66   : > { %p13246_p5 = pnand %p13245_p2, %p13239_p12 }
  0x68   : > { %13249 = shalt.err (!%p13246_p5)
}
  0x69   : > { %s13422_s10 = smov 576   ;;  %s13423_s18 = smov 36  }
  0x6a   : > { %11660 = dma.hbm_to_vmem [thread:$0]  (!%p13516_p6), %s14759_s2, 27648, %s233_s23, [#allocation6], %s13422_s10, %s13422_s10, %s13423_s18  }
  0x6b   : > { %s13424_s28 = smov [#allocation10]   ;;  %s13250_s15 = scalar_lea.hbm %s14761_s4, 36864 }
  0x6c   : > { %s258_s9 = sshll.u32 %s13424_s28, 4  ;;  %p13251_p7 = scmp.ne.s32.totalorder %s14761_s4, %s13250_s15  ;;  %s259_s9 = int_to_ptr.vmem [resolvable:$true] %s258_s9 }
  0x6d   : > { %p13257_p1 = scmp.lt.u32.totalorder %s13250_s15, %s14761_s4 }
  0x6e   : > { %p13253_p9 = pnand %p13251_p7, %p13530_p8 }
  0x70   : > { %p13254_p4 = pneg %p13253_p9 }
  0x72   : > { %p13259_p3 = pnand %p13257_p1, %p13254_p4 }
  0x74   : > { %13262 = shalt.err (!%p13259_p3)
}
  0x75   : > { %s13263_s23 = scalar_lea.vmem %s259_s9, 36864  ;;  %p13271_p13 = scmp.lt.s32.totalorder %s259_s9, %s259_s9 }
  0x76   : > { %p13264_p10 = scmp.ne.s32.totalorder %s259_s9, %s13263_s23  ;;  %p13272_p0 = scmp.lt.s32.totalorder %s13263_s23, %s13263_s23 }
  0x78   : > { %p13266_p11 = pnand %p13264_p10, %p13530_p8  ;;  %p13273_p2 = por %p13272_p0, %p13271_p13 }
  0x7a   : > { %p13267_p12 = pneg %p13266_p11 }
  0x7c   : > { %p13274_p5 = pnand %p13273_p2, %p13267_p12 }
  0x7e   : > { %13277 = shalt.err (!%p13274_p5)
}
  0x7f   : > { %s13425_s10 = smov 768   ;;  %s13426_s18 = smov 48  }
  0x80   : > { %11666 = dma.hbm_to_vmem [thread:$0]  (!%p13516_p6), %s14761_s4, 36864, %s259_s9, [#allocation9], %s13425_s10, %s13425_s10, %s13426_s18  }
  0x81   : > { %s13427_s22 = smov [#allocation13]   ;;  %s13278_s15 = scalar_lea.hbm %s14763_s6, 36864 }
  0x82   : > { %s282_s28 = sshll.u32 %s13427_s22, 4  ;;  %p13279_p7 = scmp.ne.s32.totalorder %s14763_s6, %s13278_s15  ;;  %s283_s28 = int_to_ptr.vmem [resolvable:$true] %s282_s28 }
  0x83   : > { %p13285_p1 = scmp.lt.u32.totalorder %s13278_s15, %s14763_s6 }
  0x84   : > { %p13281_p9 = pnand %p13279_p7, %p13530_p8 }
  0x86   : > { %p13282_p4 = pneg %p13281_p9 }
  0x88   : > { %p13287_p3 = pnand %p13285_p1, %p13282_p4 }
  0x8a   : > { %13290 = shalt.err (!%p13287_p3)
}
  0x8b   : > { %s13291_s9 = scalar_lea.vmem %s283_s28, 36864  ;;  %p13299_p13 = scmp.lt.s32.totalorder %s283_s28, %s283_s28 }
  0x8c   : > { %p13292_p10 = scmp.ne.s32.totalorder %s283_s28, %s13291_s9  ;;  %p13300_p0 = scmp.lt.s32.totalorder %s13291_s9, %s13291_s9 }
  0x8e   : > { %p13294_p11 = pnand %p13292_p10, %p13530_p8  ;;  %p13301_p2 = por %p13300_p0, %p13299_p13 }
  0x90   : > { %p13295_p12 = pneg %p13294_p11 }
  0x92   : > { %p13302_p5 = pnand %p13301_p2, %p13295_p12 }
  0x94   : > { %13305 = shalt.err (!%p13302_p5)
}
  0x95   : > { %s14774_s10 = smov 192   ;;  %s10042_s11 = sadd.s32 4294967294, %s13414_s27  }
  0x96   : > { %11672 = dma.hbm_to_vmem [thread:$0]  (!%p13516_p6), %s14763_s6, 36864, %s283_s28, [#allocation12], %s14774_s10, %s14774_s10, %s13420_s21  }
  0x97   : > { %s13654_s19 = sadd.s32 1, %s13414_s27   ;;  %s33_s22 = sadd.s32 1, %s13410_s26 }
  0x98   : > { %s30_s29 = ssub.s32 %s13414_s27, %s13654_s19  ;;  %p40_p7 = scmp.ne.s32.totalorder %s13410_s26, %s13406_s25 }
  0x99   : > { %p31_p8 = scmp.eq.s32.totalorder %s30_s29, 0  ;;  %p41_p9 = scmp.eq.s32.totalorder %s13414_s27, 0 }
  0x9a   : > { %p46_p4 = scmp.ne.s32.totalorder %s13406_s25, %s13402_s24  ;;  %p14775_p3 = scmp.eq.s32.totalorder %s13500_s30, 0 }
  0x9b   : > { %s13665_s12 = scalar_select %p31_p8, %s13410_s26, %s33_s22  }
  0x9c   : > { %p42_p1 = por %p41_p9, %p40_p7  ;;  %p13669_p10 = por %p14775_p3, %p46_p4 }
  0x9d   : > { %p196_p6 = scmp.eq.s32.totalorder %s13500_s30, 1  ;;  %p202_p11 = scmp.eq.s32.totalorder %s10042_s11, 1 }
  0x9e   : > { %p11687_p12 = scmp.lt.s32.totalorder %s13414_s27, 2  ;;  %s296_s21 = sand.u32 1, %s13410_s26  }
  0x9f   : > { %p13676_p13 = por %p196_p6, %p40_p7  ;;  %p13680_p0 = por %p202_p11, %p46_p4 }
  0xa0   : > { %s11622_s16 = smul.u32 96, %s296_s21  ;;  %p13685_p2 = pnand %p11687_p12, %p42_p1 }
  0xa1   : > { %s14777_s28 = scalar_select %p13676_p13, 1, 0 }
  0xa2   : > { %s14778_s15 = scalar_select %p13680_p0, 1, 0 }
  0xa3   : > { %s11623_s17 = smul.u32 1536, %s13414_s27  ;;  %s300_s18 = scalar_lea.vmem [#allocation2], %s11622_s16 }
  0xa4   : > { %s308_s20 = sshll.u32 %s300_s18, 4  ;;  %s13696_s11 = scalar_lea.sflag [#allocation3], %s296_s21  ;;  %s13694_s20 = int_to_ptr.vmem [resolvable:$true] %s308_s20 }
  0xa5   : > { %s13692_s10 = scalar_lea.hbm %s14757_s0, %s11623_s17  ;;  %p13308_p8 = pneg %p13685_p2 }
  0xa6   : > { %s13306_s29 = scalar_lea.hbm %s13692_s10, 1536  ;;  %s13311_s23 = scalar_lea.hbm %s14757_s0, 3072 }
  0xa7   : > { %p13307_p5 = scmp.ne.s32.totalorder %s13692_s10, %s13306_s29  ;;  %p13312_p4 = scmp.lt.u32.totalorder %s13692_s10, %s14757_s0 }
  0xa8   : > { %p13313_p1 = scmp.lt.u32.totalorder %s13311_s23, %s13306_s29  ;;  %p13315_p6 = scmp.lt.u32.totalorder %s13306_s29, %s13692_s10 }
  0xa9   : > { %p13309_p7 = pnand %p13308_p8, %p13307_p5 }
  0xaa   : > { %p13314_p3 = por %p13313_p1, %p13312_p4 }
  0xab   : > { %p13310_p9 = pneg %p13309_p7 }
  0xac   : > { %p13316_p11 = por %p13315_p6, %p13314_p3 }
  0xae   : > { %p13317_p12 = pnand %p13316_p11, %p13310_p9 }
  0xb0   : > { %13320 = shalt.err (!%p13317_p12)
}
  0xb1   : > { %s13321_s21 = scalar_lea.vmem %s13694_s20, 1536  ;;  %s13428_s16 = smov [#allocation2]  }
  0xb2   : > { %p13322_p5 = scmp.ne.s32.totalorder %s13694_s20, %s13321_s21  ;;  %s13326_s18 = sshll.u32 %s13428_s16, 4  ;;  %s13327_s18 = int_to_ptr.vmem [resolvable:$false] %s13326_s18 }
  0xb3   : > { %s13328_s1 = scalar_lea.vmem %s13327_s18, 3072  ;;  %p13329_p13 = scmp.lt.s32.totalorder %s13694_s20, %s13327_s18 }
  0xb4   : > { %p13324_p7 = pnand %p13322_p5, %p13308_p8  ;;  %p13330_p4 = scmp.lt.s32.totalorder %s13328_s1, %s13321_s21 }
  0xb6   : > { %p13325_p0 = pneg %p13324_p7  ;;  %p13331_p1 = por %p13330_p4, %p13329_p13 }
  0xb8   : > { %p13332_p3 = pnand %p13331_p1, %p13325_p0 }
  0xba   : > { %13335 = shalt.err (!%p13332_p3)
}
  0xbb   : > { %s13429_s29 = smov 384   ;;  %s13430_s22 = smov 24  }
  0xbc   : > { %11676 = dma.hbm_to_vmem [thread:$0]  (!%p13685_p2), %s13692_s10, 1536, %s13694_s20, %s13696_s11, %s13429_s29, %s13429_s29, %s13430_s22  }
  0xbd   : > { %p14780_p8 = scmp.ne.s32.totalorder %s14770_s8, 0 }
  0xbe   : > { %s13727_s17 = sand.u32 (!%p14780_p8), 1, %s13406_s25  }
  0xbf   : > { %320 = sbr.rel (%p14780_p8) target bundleno = 5712 (0x1650), region = 48  ;;  %s323_s9 = scalar_lea.sflag (!%p14780_p8), [#allocation3], %s13727_s17 }
  0xc0   : > { %s11624_s23 = smul.u32 (!%p14780_p8), 96, %s13727_s17 }
  0xc2   : > { %s13733_s21 = scalar_lea.vmem (!%p14780_p8), [#allocation2], %s11624_s23 }
  0xc6   : > { %13381 = dma.done.wait (%p13669_p10), %s323_s9, 1536  }
  0xc7   : > { %13383 = vsyncadd (%p13669_p10), %s323_s9, 4294965760  ;;  %p14781_p13 = scmp.eq.s32.totalorder %s13500_s30, 0 }
  0xc9   : > { %13385 = dma.done.wait (%p14781_p13), [#allocation6], 28032   ;;  %p14782_p0 = pmov %p14781_p13 }
  0xcb   : > { %13387 = vsyncadd (%p14782_p0), [#allocation6], 4294939264  ;;  %p14783_p2 = pmov %p14782_p0 }
  0xcc   : > { %p14784_p9 = pmov %p14782_p0 }
  0xcd   : > { %13389 = dma.done.wait (%p14783_p2), [#allocation9], 46080  }
  0xce   : > { %13391 = vsyncadd (%p14784_p9), [#allocation9], 4294921216  ;;  %p14785_p6 = pmov %p14782_p0 }
  0xcf   : > { %p14786_p11 = pmov %p14782_p0 }
  0xd0   : > { %13393 = dma.done.wait (%p14785_p6), [#allocation12], 37056  }
  0xd1   : > { %13395 = vsyncadd (%p14786_p11), [#allocation12], 4294930240  ;;  %v384_v0 = vld [vmem:[%s13733_s21] sm:$0xff]  ;;  %v385_v1 = vld [vmem:[%s13733_s21 + $0x8] sm:$0xff]  ;;  %vm13433_vm0 = vmmov 0   ;;  %vm2439_vm1 = vcmask 523264  }
  0xd2   : > { %v386_v2 = vld [vmem:[%s13733_s21 + $0x10] sm:$0xff]  ;;  %v399_v3 = vadd.f32 %v385_v1, %v384_v0  ;;  %v420_v4 = vmul.f32 %v384_v0, %v384_v0  ;;  %v421_v5 = vmul.f32 %v385_v1, %v385_v1  ;;  %v387_v7 = vld [vmem:[%s13733_s21 + $0x18] sm:$0xff]  ;;  %v388_v8 = vld [vmem:[%s13733_s21 + $0x20] sm:$0xff]  ;;  %vm2534_vm4 = vcmask 130048   ;;  %s13435_s8 = smov 64   ;;  %s14677_s14 = scalar_lea.vmem [#allocation14], %s11624_s23 }
  0xd3   : > { %v422_v6 = vmul.f32 %v386_v2, %v386_v2  ;;  %v389_v9 = vld [vmem:[%s13733_s21 + $0x28] sm:$0xff]  ;;  %v403_v10 = vadd.f32 %v388_v8, %v387_v7  ;;  %v423_v11 = vmul.f32 %v387_v7, %v387_v7  ;;  %v424_v12 = vmul.f32 %v388_v8, %v388_v8  ;;  %v390_v13 = vld [vmem:[%s13733_s21 + $0x30] sm:$0xff]  ;;  %v391_v14 = vld [vmem:[%s13733_s21 + $0x38] sm:$0xff]  ;;  %s11625_s13 = smul.u32 1536, %s13500_s30  ;;  %s9912_s10 = sshll.u32 %s14677_s14, 4  ;;  %s14709_s10 = int_to_ptr.vmem [resolvable:$true] %s9912_s10 }
  0xd4   : > { %v400_v15 = vadd.f32 %v399_v3, %v386_v2  ;;  %v432_v16 = vadd.f32 %v421_v5, %v420_v4  ;;  %v425_v17 = vmul.f32 %v389_v9, %v389_v9  ;;  %v393_v18 = vld [vmem:[%s13733_s21 + $0x48] sm:$0xff]  ;;  %v394_v19 = vld [vmem:[%s13733_s21 + $0x50] sm:$0xff]  ;;  %v392_v21 = vld [vmem:[%s13733_s21 + $0x40] sm:$0xff]  ;;  %v407_v22 = vadd.f32 %v391_v14, %v390_v13  ;;  %s9898_s16 = scalar_lea.sflag [#allocation4], %s13727_s17  ;;  %s13336_s18 = scalar_lea.vmem %s14709_s10, 1536 }
  0xd5   : > { %v436_v20 = vadd.f32 %v424_v12, %v423_v11  ;;  %v11778_v23 = vld [vmem:[#allocation7 + $0x4] ss:$36 sps:$4 sm:$0xff]   ;;  %v404_v25 = vadd.f32 %v403_v10, %v389_v9  ;;  %v426_v26 = vmul.f32 %v390_v13, %v390_v13  ;;  %v427_v27 = vmul.f32 %v391_v14, %v391_v14  ;;  %v11780_v28 = vld [vmem:[#allocation7 + $0x14] ss:$36 sps:$4 sm:$0xff]   ;;  %v11784_v36 = vld [vmem:[#allocation7 + $0x4c] ss:$36 sps:$4 sm:$0xff]   ;;  %s14707_s30 = scalar_lea.hbm %s14764_s7, %s11625_s13  ;;  %p13337_p10 = scmp.ne.s32.totalorder %s14709_s10, %s13336_s18 }
  0xd6   : > { %401 = vadd.xlane.f32.xlu0 %v400_v15  ;;  %v433_v24 = vadd.f32 %v432_v16, %v422_v6  ;;  %v395_v29 = vld [vmem:[%s13733_s21 + $0x58] sm:$0xff]  ;;  %v411_v30 = vadd.f32 %v394_v19, %v393_v18  ;;  %1902 = vmatprep.subr.bf16.mxu1 %v11778_v23  ;;  %v11783_v32 = vld [vmem:[#allocation7 + $0x10] ss:$36 sps:$4 sm:$0xff]   ;;  %v429_v34 = vmul.f32 %v393_v18, %v393_v18  ;;  %v11788_v38 = vld [vmem:[#allocation7 + $0x48] ss:$36 sps:$4 sm:$0xff]   ;;  %p14787_p12 = scmp.ne.s32.totalorder %s14777_s28, 0 }
  0xd7   : > { %v11782_v31 = vld [vmem:[#allocation7] ss:$36 sps:$4 sm:$0xff]   ;;  %v437_v33 = vadd.f32 %v436_v20, %v425_v17  ;;  %v430_v35 = vmul.f32 %v394_v19, %v394_v19  ;;  %2114 = vmatprep.subr.bf16.mxu0 %v11780_v28  ;;  %v408_v39 = vadd.f32 %v407_v22, %v392_v21  ;;  %v428_v40 = vmul.f32 %v392_v21, %v392_v21  ;;  %v11789_v42 = vld [vmem:[#allocation7 + $0x58] ss:$36 sps:$4 sm:$0xff]   ;;  %v11794_v48 = vld [vmem:[#allocation7 + $0x90] ss:$36 sps:$4 sm:$0xff]  }
  0xd8   : > { %434 = vadd.xlane.f32.xlu1 %v433_v24  ;;  %1903 = vmatpush1.bf16.msra.mxu1 %v11782_v31  ;;  %v11786_v37 = vld [vmem:[#allocation7 + $0x5c] ss:$36 sps:$4 sm:$0xff]   ;;  %v440_v41 = vadd.f32 %v427_v27, %v426_v26  ;;  %v11790_v43 = vld [vmem:[#allocation7 + $0x94] ss:$36 sps:$4 sm:$0xff]   ;;  %v412_v44 = vadd.f32 %v411_v30, %v395_v29  ;;  %v431_v45 = vmul.f32 %v395_v29, %v395_v29  ;;  %v11792_v47 = vld [vmem:[#allocation7 + $0xa4] ss:$36 sps:$4 sm:$0xff]   ;;  %p13338_p5 = pnand %p13337_p10, %p14787_p12 }
  0xd9   : > { %2115 = vmatpush1.bf16.msra.mxu0 %v11783_v32  ;;  %1904 = vmatprep.subr.bf16.mxu1 %v11784_v36  ;;  %v444_v46 = vadd.f32 %v430_v35, %v429_v34  ;;  %v11795_v49 = vld [vmem:[#allocation7 + $0xa0] ss:$36 sps:$4 sm:$0xff]   ;;  %v11798_v52 = vld [vmem:[#allocation7 + $0xec] ss:$36 sps:$4 sm:$0xff]   ;;  %v11800_v54 = vld [vmem:[#allocation7 + $0xd8] ss:$36 sps:$4 sm:$0xff]  }
  0xda   : > { %405 = vadd.xlane.f32.xlu0 %v404_v25  ;;  %2116 = vmatprep.subr.bf16.mxu0 %v11786_v37  ;;  %v441_v50 = vadd.f32 %v440_v41, %v428_v40  ;;  %v11796_v51 = vld [vmem:[#allocation7 + $0xdc] ss:$36 sps:$4 sm:$0xff]   ;;  %v11801_v55 = vld [vmem:[#allocation7 + $0xe8] ss:$36 sps:$4 sm:$0xff]   ;;  %v11804_v57 = vld [vmem:[#allocation7 + $0x134] ss:$36 sps:$4 sm:$0xff]   ;;  %p13339_p7 = pneg %p13338_p5 }
  0xdb   : > { %v445_v53 = vadd.f32 %v444_v46, %v431_v45  ;;  %v11802_v56 = vld [vmem:[#allocation7 + $0x124] ss:$36 sps:$4 sm:$0xff]   ;;  %v11807_v59 = vld [vmem:[#allocation7 + $0x130] ss:$36 sps:$4 sm:$0xff]   ;;  %v11810_v61 = vld [vmem:[#allocation7 + $0x17c] ss:$36 sps:$4 sm:$0xff]  }
  0xdc   : > { %438 = vadd.xlane.f32.xlu1 %v437_v33  ;;  %1905 = vmatpush1.bf16.msra.mxu1 %v11788_v38  ;;  %v11806_v58 = vld [vmem:[#allocation7 + $0x120] ss:$36 sps:$4 sm:$0xff]   ;;  %v11808_v60 = vld [vmem:[#allocation7 + $0x16c] ss:$36 sps:$4 sm:$0xff]   ;;  %v11813_v63 = vld [vmem:[#allocation7 + $0x178] ss:$36 sps:$4 sm:$0xff]  }
  0xdd   : > { %2117 = vmatpush1.bf16.msra.mxu0 %v11789_v42  ;;  %1906 = vmatprep.subr.bf16.mxu1 %v11790_v43  ;;  %v11812_v62 = vld [vmem:[#allocation7 + $0x168] ss:$36 sps:$4 sm:$0xff]   ;;  %v11814_v0 = vld [vmem:[#allocation7 + $0x1b4] ss:$36 sps:$4 sm:$0xff]   ;;  %v11819_v3 = vld [vmem:[#allocation7 + $0x1c0] ss:$36 sps:$4 sm:$0xff]  }
  0xde   : > { %409 = vadd.xlane.f32.xlu0 %v408_v39  ;;  %2118 = vmatprep.subr.bf16.mxu0 %v11792_v47  ;;  %v11816_v1 = vld [vmem:[#allocation7 + $0x1c4] ss:$36 sps:$4 sm:$0xff]   ;;  %v11818_v2 = vld [vmem:[#allocation7 + $0x1b0] ss:$36 sps:$4 sm:$0xff]   ;;  %v11820_v4 = vld [vmem:[#allocation7 + $0x1fc] ss:$36 sps:$4 sm:$0xff]  }
  0xdf   : > { %v11822_v5 = vld [vmem:[#allocation7 + $0x20c] ss:$36 sps:$4 sm:$0xff]   ;;  %v11824_v6 = vld [vmem:[#allocation7 + $0x1f8] ss:$36 sps:$4 sm:$0xff]   ;;  %v11826_v8 = vld [vmem:[#allocation7 + $0x244] ss:$36 sps:$4 sm:$0xff]  }
  0xe0   : > { %413 = vadd.xlane.f32.xlu1 %v412_v44  ;;  %1907 = vmatpush1.bf16.msra.mxu1 %v11794_v48  ;;  %v11825_v7 = vld [vmem:[#allocation7 + $0x208] ss:$36 sps:$4 sm:$0xff]   ;;  %v11828_v9 = vld [vmem:[#allocation7 + $0x254] ss:$36 sps:$4 sm:$0xff]   ;;  %v11830_v10 = vld [vmem:[#allocation7 + $0x240] ss:$36 sps:$4 sm:$0xff]  }
  0xe1   : > { %2119 = vmatpush1.bf16.msra.mxu0 %v11795_v49  ;;  %1908 = vmatprep.subr.bf16.mxu1 %v11796_v51  ;;  %v11831_v11 = vld [vmem:[#allocation7 + $0x250] ss:$36 sps:$4 sm:$0xff]   ;;  %v11834_v13 = vld [vmem:[#allocation7 + $0x29c] ss:$36 sps:$4 sm:$0xff]   ;;  %v11836_v14 = vld [vmem:[#allocation7 + $0x288] ss:$36 sps:$4 sm:$0xff]  }
  0xe2   : > { %442 = vadd.xlane.f32.xlu0 %v441_v50  ;;  %2120 = vmatprep.subr.bf16.mxu0 %v11798_v52  ;;  %v11832_v12 = vld [vmem:[#allocation7 + $0x28c] ss:$36 sps:$4 sm:$0xff]   ;;  %v11837_v15 = vld [vmem:[#allocation7 + $0x298] ss:$36 sps:$4 sm:$0xff]   ;;  %v11840_v17 = vld [vmem:[#allocation7 + $0x2e4] ss:$36 sps:$4 sm:$0xff]  }
  0xe3   : > { %v11838_v16 = vld [vmem:[#allocation7 + $0x2d4] ss:$36 sps:$4 sm:$0xff]   ;;  %v11843_v19 = vld [vmem:[#allocation7 + $0x2e0] ss:$36 sps:$4 sm:$0xff]   ;;  %v11846_v21 = vld [vmem:[#allocation7 + $0x32c] ss:$36 sps:$4 sm:$0xff]  }
  0xe4   : > { %446 = vadd.xlane.f32.xlu1 %v445_v53  ;;  %1909 = vmatpush1.bf16.msra.mxu1 %v11800_v54  ;;  %v11842_v18 = vld [vmem:[#allocation7 + $0x2d0] ss:$36 sps:$4 sm:$0xff]   ;;  %v11844_v20 = vld [vmem:[#allocation7 + $0x31c] ss:$36 sps:$4 sm:$0xff]   ;;  %v11849_v23 = vld [vmem:[#allocation7 + $0x328] ss:$36 sps:$4 sm:$0xff]  }
  0xe5   : > { %2121 = vmatpush1.bf16.msra.mxu0 %v11801_v55  ;;  %1910 = vmatprep.subr.bf16.mxu1 %v11802_v56  ;;  %v11848_v22 = vld [vmem:[#allocation7 + $0x318] ss:$36 sps:$4 sm:$0xff]   ;;  %v11850_v24 = vld [vmem:[#allocation7 + $0x364] ss:$36 sps:$4 sm:$0xff]   ;;  %v11855_v27 = vld [vmem:[#allocation7 + $0x370] ss:$36 sps:$4 sm:$0xff]   ;;  %v497_v56 = vlaneseq }
  0xe6   : > { %2122 = vmatprep.subr.bf16.mxu0 %v11804_v57  ;;  %v11852_v25 = vld [vmem:[#allocation7 + $0x374] ss:$36 sps:$4 sm:$0xff]   ;;  %v11854_v26 = vld [vmem:[#allocation7 + $0x360] ss:$36 sps:$4 sm:$0xff]   ;;  %v11856_v28 = vld [vmem:[#allocation7 + $0x3ac] ss:$36 sps:$4 sm:$0xff]  }
  0xe7   : > { %v11858_v29 = vld [vmem:[#allocation7 + $0x3bc] ss:$36 sps:$4 sm:$0xff]   ;;  %v11860_v30 = vld [vmem:[#allocation7 + $0x3a8] ss:$36 sps:$4 sm:$0xff]   ;;  %v11862_v32 = vld [vmem:[#allocation7 + $0x3f4] ss:$36 sps:$4 sm:$0xff]  }
  0xe8   : > { %1911 = vmatpush1.bf16.msra.mxu1 %v11806_v58  ;;  %v11861_v31 = vld [vmem:[#allocation7 + $0x3b8] ss:$36 sps:$4 sm:$0xff]   ;;  %v11864_v33 = vld [vmem:[#allocation7 + $0x404] ss:$36 sps:$4 sm:$0xff]   ;;  %v11866_v34 = vld [vmem:[#allocation7 + $0x3f0] ss:$36 sps:$4 sm:$0xff]  }
  0xe9   : > { %2123 = vmatpush1.bf16.msra.mxu0 %v11807_v59  ;;  %1912 = vmatprep.subr.bf16.mxu1 %v11808_v60  ;;  %v11867_v35 = vld [vmem:[#allocation7 + $0x400] ss:$36 sps:$4 sm:$0xff]   ;;  %v11870_v37 = vld [vmem:[#allocation7 + $0x44c] ss:$36 sps:$4 sm:$0xff]   ;;  %v11872_v38 = vld [vmem:[#allocation7 + $0x438] ss:$36 sps:$4 sm:$0xff]  }
  0xea   : > { %2124 = vmatprep.subr.bf16.mxu0 %v11810_v61  ;;  %v11868_v36 = vld [vmem:[#allocation7 + $0x43c] ss:$36 sps:$4 sm:$0xff]   ;;  %v11873_v39 = vld [vmem:[#allocation7 + $0x448] ss:$36 sps:$4 sm:$0xff]   ;;  %v11879_v41 = vld [vmem:[#allocation7 + $0x494] ss:$36 sps:$4 sm:$0xff]  }
  0xeb   : > { %v11876_v40 = vld [vmem:[#allocation7 + $0x484] ss:$36 sps:$4 sm:$0xff]   ;;  %s13436_s1 = smov [#allocation14]  }
  0xec   : > { %1913 = vmatpush1.bf16.msra.mxu1 %v11812_v62  ;;  %s13340_s29 = sshll.u32 %s13436_s1, 4  ;;  %s13341_s29 = int_to_ptr.vmem [resolvable:$false] %s13340_s29 }
  0xed   : > { %2125 = vmatpush1.bf16.msra.mxu0 %v11813_v63  ;;  %1914 = vmatprep.subr.bf16.mxu1 %v11814_v0  ;;  %s13342_s22 = scalar_lea.vmem %s13341_s29, 3072  ;;  %p13343_p4 = scmp.lt.s32.totalorder %s14709_s10, %s13341_s29 }
  0xee   : > { %2126 = vmatprep.subr.bf16.mxu0 %v11816_v1  ;;  %v13778_v1 = vshrl.u32 %v497_v56, 7  ;;  %p13344_p1 = scmp.lt.s32.totalorder %s13342_s22, %s13336_s18 }
  0xf0   : > { %1915 = vmatpush1.bf16.msra.mxu1 %v11818_v2  ;;  %p13345_p3 = por %p13344_p1, %p13343_p4 }
  0xf1   : > { %2127 = vmatpush1.bf16.msra.mxu0 %v11819_v3  ;;  %1916 = vmatprep.subr.bf16.mxu1 %v11820_v4 }
  0xf2   : > { %2128 = vmatprep.subr.bf16.mxu0 %v11822_v5  ;;  %p13346_p8 = pnand %p13345_p3, %p13339_p7 }
  0xf4   : > { %1917 = vmatpush1.bf16.msra.mxu1 %v11824_v6 }
  0xf5   : > { %2129 = vmatpush1.bf16.msra.mxu0 %v11825_v7  ;;  %1918 = vmatprep.subr.bf16.mxu1 %v11826_v8 }
  0xf6   : > { %2130 = vmatprep.subr.bf16.mxu0 %v11828_v9  ;;  %v13782_v9 = vld [vmem:[#allocation5] ss:$8 sm:$0x7] }
  0xf8   : > { %1919 = vmatpush1.bf16.msra.mxu1 %v11830_v10  ;;  %v13785_v10 = vsub.s32 1, %v13778_v1 }
  0xf9   : > { %2131 = vmatpush1.bf16.msra.mxu0 %v11831_v11  ;;  %1920 = vmatprep.subr.bf16.mxu1 %v11832_v12  ;;  %v13788_v11 = vsub.s32 0, %v13778_v1 }
  0xfa   : > { %2132 = vmatprep.subr.bf16.mxu0 %v11834_v13 }
  0xfc   : > { %1921 = vmatpush1.bf16.msra.mxu1 %v11836_v14  ;;  %v13114_v14 = vld [vmem:[%s13733_s21] sm:$0xff] }
  0xfd   : > { %2133 = vmatpush1.bf16.msra.mxu0 %v11837_v15  ;;  %1922 = vmatprep.subr.bf16.mxu1 %v11838_v16  ;;  %v13115_v16 = vld [vmem:[%s13733_s21 + $0x8] sm:$0xff] }
  0xfe   : > { %2134 = vmatprep.subr.bf16.mxu0 %v11840_v17 }
 0x100   : > { %1923 = vmatpush1.bf16.msra.mxu1 %v11842_v18 }
 0x101   : > { %2135 = vmatpush1.bf16.msra.mxu0 %v11843_v19  ;;  %1924 = vmatprep.subr.bf16.mxu1 %v11844_v20  ;;  %v13794_v19 = vld [vmem:[#allocation5 + $0x1] ss:$8 sm:$0x7] }
 0x102   : > { %2136 = vmatprep.subr.bf16.mxu0 %v11846_v21  ;;  %v504_v21 = vrot.slane %v13782_v9, %v13785_v10 }
 0x104   : > { %1925 = vmatpush1.bf16.msra.mxu1 %v11848_v22 }
 0x105   : > { %2137 = vmatpush1.bf16.msra.mxu0 %v11849_v23  ;;  %1926 = vmatprep.subr.bf16.mxu1 %v11850_v24  ;;  %v500_v24 = vrot.slane %v13782_v9, %v13788_v11 }
 0x106   : > { %2138 = vmatprep.subr.bf16.mxu0 %v11852_v25  ;;  %v13116_v25 = vld [vmem:[%s13733_s21 + $0x18] sm:$0xff] }
 0x108   : > { %1927 = vmatpush1.bf16.msra.mxu1 %v11854_v26 }
 0x109   : > { %2139 = vmatpush1.bf16.msra.mxu0 %v11855_v27  ;;  %1928 = vmatprep.subr.bf16.mxu1 %v11856_v28  ;;  %v13117_v27 = vld [vmem:[%s13733_s21 + $0x20] sm:$0xff] }
 0x10a   : > { %2140 = vmatprep.subr.bf16.mxu0 %v11858_v29 }
 0x10c   : > { %1929 = vmatpush1.bf16.msra.mxu1 %v11860_v30  ;;  %v532_v30 = vrot.slane %v13794_v19, %v13785_v10 }
 0x10d   : > { %2141 = vmatpush1.bf16.msra.mxu0 %v11861_v31  ;;  %1930 = vmatprep.subr.bf16.mxu1 %v11862_v32  ;;  %v528_v31 = vrot.slane %v13794_v19, %v13788_v11 }
 0x10e   : > { %2142 = vmatprep.subr.bf16.mxu0 %v11864_v33 }
 0x110   : > { %1931 = vmatpush1.bf16.msra.mxu1 %v11866_v34 }
 0x111   : > { %2143 = vmatpush1.bf16.msra.mxu0 %v11867_v35  ;;  %1932 = vmatprep.subr.bf16.mxu1 %v11868_v36  ;;  %v13118_v36 = vld [vmem:[%s13733_s21 + $0x30] sm:$0xff] }
 0x112   : > { %2144 = vmatprep.subr.bf16.mxu0 %v11870_v37 }
 0x114   : > { %1933 = vmatpush1.bf16.msra.mxu1 %v11872_v38  ;;  %v13119_v38 = vld [vmem:[%s13733_s21 + $0x38] sm:$0xff] }
 0x115   : > { %2145 = vmatpush1.bf16.msra.mxu0 %v11873_v39  ;;  %1955 = vmatprep.subr.bf16.mxu1 %v11876_v40 }
 0x116   : > { %2167 = vmatprep.subr.bf16.mxu0 %v11879_v41 }
 0x163   : > { %v402_v42 = vpop.xlane.xlu0 %401 }
 0x164   : > { %v13763_v43 = vmul.f32 0.0026041667, %v402_v42 }
 0x165   : > { %v435_v44 = vpop.xlane.xlu1 %434 }
 0x166   : > { %v448_v45 = vmul.f32 0.0026041667, %v435_v44  ;;  %v452_v46 = vmul.f32 %v13763_v43, %v13763_v43  ;;  %v464_v15 = vsub.f32 %v13114_v14, %v13763_v43  ;;  %v465_v17 = vsub.f32 %v13115_v16, %v13763_v43  ;;  %v11888_v14 = vld [vmem:[#allocation7 + $0x514] ss:$36 sps:$4 sm:$0xff]  }
 0x167   : > { %v406_v47 = vpop.xlane.xlu0 %405 }
 0x168   : > { %v13767_v48 = vmul.f32 0.0026041667, %v406_v47  ;;  %v456_v49 = vsub.f32 %v448_v45, %v452_v46  ;;  %v11874_v46 = vld [vmem:[#allocation7 + $0x480] ss:$36 sps:$4 sm:$0xff]   ;;  %v11877_v47 = vld [vmem:[#allocation7 + $0x490] ss:$36 sps:$4 sm:$0xff]  }
 0x169   : > { %v439_v50 = vpop.xlane.xlu1 %438 }
 0x16a   : > { %v449_v51 = vmul.f32 0.0026041667, %v439_v50  ;;  %v460_v52 = vmax.f32 %v456_v49, 0.0  ;;  %v453_v53 = vmul.f32 %v13767_v48, %v13767_v48  ;;  %v467_v26 = vsub.f32 %v13116_v25, %v13767_v48 }
 0x16b   : > { %v410_v54 = vpop.xlane.xlu0 %409  ;;  %v468_v28 = vsub.f32 %v13117_v27, %v13767_v48  ;;  %v11894_v27 = vld [vmem:[#allocation7 + $0x55c] ss:$36 sps:$4 sm:$0xff]  }
 0x16c   : > { %v13771_v55 = vmul.f32 0.0026041667, %v410_v54  ;;  %v476_v57 = vadd.f32 1e-05, %v460_v52  ;;  %v457_v58 = vsub.f32 %v449_v51, %v453_v53  ;;  %v13120_v51 = vld [vmem:[%s13733_s21 + $0x48] sm:$0xff]  ;;  %v13121_v53 = vld [vmem:[%s13733_s21 + $0x50] sm:$0xff] }
 0x16d   : > { %v414_v59 = vpop.xlane.xlu1 %413 }
 0x16e   : > { %v13773_v60 = vmul.f32 0.0026041667, %v414_v59  ;;  %13002 = vrsqrt.f32 %v476_v57  ;;  %v461_v61 = vmax.f32 %v457_v58, 0.0  ;;  %v454_v62 = vmul.f32 %v13771_v55, %v13771_v55  ;;  %v11882_v57 = vld [vmem:[#allocation7 + $0x4cc] ss:$36 sps:$4 sm:$0xff]  }
 0x16f   : > { %v443_v63 = vpop.xlane.xlu0 %442  ;;  %v470_v37 = vsub.f32 %v13118_v36, %v13771_v55  ;;  %v471_v39 = vsub.f32 %v13119_v38, %v13771_v55  ;;  %v11885_v58 = vld [vmem:[#allocation7 + $0x4dc] ss:$36 sps:$4 sm:$0xff]  }
 0x170   : > { %v450_v0 = vmul.f32 0.0026041667, %v443_v63  ;;  %v477_v2 = vadd.f32 1e-05, %v461_v61  ;;  %v455_v3 = vmul.f32 %v13773_v60, %v13773_v60  ;;  %v473_v52 = vsub.f32 %v13120_v51, %v13773_v60  ;;  %v11909_v36 = vld [vmem:[#allocation7 + $0x5fc] ss:$36 sps:$4 sm:$0xff]  }
 0x171   : > { %v447_v4 = vpop.xlane.xlu1 %446  ;;  %v474_v54 = vsub.f32 %v13121_v53, %v13773_v60  ;;  %v11907_v38 = vld [vmem:[#allocation7 + $0x5f8] ss:$36 sps:$4 sm:$0xff]   ;;  %v11913_v51 = vld [vmem:[#allocation7 + $0x640] ss:$36 sps:$4 sm:$0xff]  }
 0x172   : > { %v458_v5 = vsub.f32 %v450_v0, %v454_v62  ;;  %v451_v6 = vmul.f32 0.0026041667, %v447_v4  ;;  %13004 = vrsqrt.f32 %v477_v2  ;;  %v11918_v53 = vld [vmem:[#allocation7 + $0x67c] ss:$36 sps:$4 sm:$0xff]  }
 0x174   : > { %v462_v7 = vmax.f32 %v458_v5, 0.0  ;;  %v459_v8 = vsub.f32 %v451_v6, %v455_v3  ;;  %v11880_v6 = vld [vmem:[#allocation7 + $0x4c8] ss:$36 sps:$4 sm:$0xff]  }
 0x176   : > { %v478_v12 = vadd.f32 1e-05, %v462_v7  ;;  %v463_v13 = vmax.f32 %v459_v8, 0.0  ;;  %v11883_v7 = vld [vmem:[#allocation7 + $0x4d8] ss:$36 sps:$4 sm:$0xff]  }
 0x178   : > { %13006 = vrsqrt.f32 %v478_v12  ;;  %v479_v18 = vadd.f32 1e-05, %v463_v13  ;;  %v13796_v20 = vpop.eup %13002 }
 0x179   : > { %v485_v22 = vmul.f32 %v13796_v20, %v465_v17  ;;  %v484_v23 = vmul.f32 %v13796_v20, %v464_v15  ;;  %v11891_v15 = vld [vmem:[#allocation7 + $0x524] ss:$36 sps:$4 sm:$0xff]  }
 0x17a   : > { %13008 = vrsqrt.f32 %v479_v18 }
 0x17b   : > { %v513_v33 = vmul.f32 %v504_v21, %v485_v22  ;;  %v512_v35 = vmul.f32 %v500_v24, %v484_v23  ;;  %v11886_v22 = vld [vmem:[#allocation7 + $0x510] ss:$36 sps:$4 sm:$0xff]   ;;  %v11889_v23 = vld [vmem:[#allocation7 + $0x520] ss:$36 sps:$4 sm:$0xff]  }
 0x17c   : > { %v13808_v29 = vpop.eup %13004 }
 0x17d   : > { %v488_v32 = vmul.f32 %v13808_v29, %v468_v28  ;;  %v487_v34 = vmul.f32 %v13808_v29, %v467_v26  ;;  %v541_v44 = vadd.f32 %v532_v30, %v513_v33  ;;  %v540_v49 = vadd.f32 %v528_v31, %v512_v35  ;;  %v11897_v28 = vld [vmem:[#allocation7 + $0x56c] ss:$36 sps:$4 sm:$0xff]  }
 0x17e   : > { %v11901_v33 = vld [vmem:[#allocation7 + $0x5b0] ss:$36 sps:$4 sm:$0xff]  }
 0x17f   : > { %v516_v40 = vmul.f32 %v504_v21, %v488_v32  ;;  %v515_v41 = vmul.f32 %v500_v24, %v487_v34  ;;  %v11898_v32 = vld [vmem:[#allocation7 + $0x5a0] ss:$36 sps:$4 sm:$0xff]   ;;  %v13431_v34 = vmov 0   ;;  %v11906_v35 = vld [vmem:[#allocation7 + $0x5ec] ss:$36 sps:$4 sm:$0xff]  }
 0x181   : > { %v544_v45 = vadd.f32 %v532_v30, %v516_v40  ;;  %v543_v50 = vadd.f32 %v528_v31, %v515_v41  ;;  %v13853_v41 = vsub.s32 2, %v13778_v1 }
 0x182   : > { %v13820_v42 = vpop.eup %13006 }
 0x183   : > { %v491_v59 = vmul.f32 %v13820_v42, %v471_v39  ;;  %v490_v61 = vmul.f32 %v13820_v42, %v470_v37  ;;  %v13830_v63 = vpack.c.bf16 %v544_v45, %v541_v44  ;;  %v13832_v0 = vpack.c.bf16 %v543_v50, %v540_v49  ;;  %v11904_v37 = vld [vmem:[#allocation7 + $0x5e8] ss:$36 sps:$4 sm:$0xff]   ;;  %v13122_v39 = vld [vmem:[%s13733_s21 + $0x28] sm:$0xff] }
 0x184   : > { %v13828_v62 = vpop.eup %13008  ;;  %v469_v40 = vsub.f32 %v13122_v39, %v13767_v48  ;;  %v11912_v44 = vld [vmem:[#allocation7 + $0x634] ss:$36 sps:$4 sm:$0xff]   ;;  %v11915_v45 = vld [vmem:[#allocation7 + $0x644] ss:$36 sps:$4 sm:$0xff]  }
 0x185   : > { %v494_v2 = vmul.f32 %v13828_v62, %v474_v54  ;;  %v519_v3 = vmul.f32 %v504_v21, %v491_v59  ;;  %v493_v4 = vmul.f32 %v13828_v62, %v473_v52  ;;  %v518_v5 = vmul.f32 %v500_v24, %v490_v61  ;;  %1934 = vmatprep.mubr.bf16.mxu1 %v13830_v63  ;;  %v11910_v50 = vld [vmem:[#allocation7 + $0x630] ss:$36 sps:$4 sm:$0xff]   ;;  %v13124_v59 = vld [vmem:[%s13733_s21 + $0x40] sm:$0xff]  ;;  %v13125_v61 = vld [vmem:[%s13733_s21 + $0x58] sm:$0xff] }
 0x186   : > { %2146 = vmatprep.mubr.bf16.mxu0 %v13830_v63  ;;  %1935 = vmatmul.mubr.bf16.vlgmr.msra.gmra.mrb[0].mxu1 %v13832_v0  ;;  %v489_v49 = vmul.f32 %v13808_v29, %v469_v40  ;;  %v508_v52 = vrot.slane %v13782_v9, %v13853_v41  ;;  %v11921_v54 = vld [vmem:[#allocation7 + $0x68c] ss:$36 sps:$4 sm:$0xff]   ;;  %v472_v29 = vsub.f32 %v13124_v59, %v13771_v55  ;;  %v11973_v59 = vld [vmem:[#allocation7 + $0x324] ss:$36 sps:$4 sm:$0xff]  }
 0x187   : > { %2147 = vmatmul.mubr.bf16.vlgmr.msra.gmra.mrb[0].mxu0 %v13832_v0  ;;  %v522_v8 = vmul.f32 %v504_v21, %v494_v2  ;;  %v521_v12 = vmul.f32 %v500_v24, %v493_v4  ;;  %1956 = vmatpush1.bf16.msra.mxu1 %v11874_v46  ;;  %v547_v13 = vadd.f32 %v532_v30, %v519_v3  ;;  %v11892_v21 = vld [vmem:[#allocation7 + $0x558] ss:$36 sps:$4 sm:$0xff]   ;;  %v11895_v24 = vld [vmem:[#allocation7 + $0x568] ss:$36 sps:$4 sm:$0xff]   ;;  %v11925_v4 = vld [vmem:[#allocation7 + $0x260] ss:$36 sps:$4 sm:$0xff]  }
 0x188   : > { %2168 = vmatpush1.bf16.msra.mxu0 %v11877_v47  ;;  %1957 = vmatprep.subr.bf16.mxu1 %v11882_v57  ;;  %v546_v17 = vadd.f32 %v528_v31, %v518_v5  ;;  %v13123_v46 = vld [vmem:[%s13733_s21 + $0x10] sm:$0xff]  ;;  %v475_v2 = vsub.f32 %v13125_v61, %v13773_v60  ;;  %v11924_v9 = vld [vmem:[#allocation7 + $0xc] ss:$36 sps:$4 sm:$0xff]   ;;  %v492_v55 = vmul.f32 %v13820_v42, %v472_v29  ;;  %v11971_v29 = vld [vmem:[#allocation7 + $0x320] ss:$36 sps:$4 sm:$0xff]  }
 0x189   : > { %2169 = vmatprep.subr.bf16.mxu0 %v11885_v58  ;;  %v550_v16 = vadd.f32 %v532_v30, %v522_v8  ;;  %v549_v18 = vadd.f32 %v528_v31, %v521_v12  ;;  %v11900_v30 = vld [vmem:[#allocation7 + $0x5a4] ss:$36 sps:$4 sm:$0xff]   ;;  %v11903_v31 = vld [vmem:[#allocation7 + $0x5b4] ss:$36 sps:$4 sm:$0xff]   ;;  %v466_v47 = vsub.f32 %v13123_v46, %v13763_v43  ;;  %v517_v43 = vmul.f32 %v508_v52, %v489_v49  ;;  %v11976_v61 = vld [vmem:[#allocation7 + $0x36c] ss:$36 sps:$4 sm:$0xff]  }
 0x18a   : > { %v11916_v57 = vld [vmem:[#allocation7 + $0x678] ss:$36 sps:$4 sm:$0xff]   ;;  %v11919_v58 = vld [vmem:[#allocation7 + $0x688] ss:$36 sps:$4 sm:$0xff]   ;;  %v11926_v8 = vld [vmem:[#allocation7 + $0x20] ss:$36 sps:$4 sm:$0xff]  }
 0x18b   : > { %v13840_v25 = vpack.c.bf16 %v550_v16, %v547_v13  ;;  %v13842_v26 = vpack.c.bf16 %v549_v18, %v546_v17  ;;  %1958 = vmatpush1.bf16.msra.mxu1 %v11880_v6  ;;  %v486_v48 = vmul.f32 %v13796_v20, %v466_v47  ;;  %v536_v20 = vrot.slane %v13794_v19, %v13853_v41  ;;  %v11929_v60 = vld [vmem:[#allocation7 + $0x54] ss:$36 sps:$4 sm:$0xff]   ;;  %v11930_v13 = vld [vmem:[#allocation7 + $0x2a8] ss:$36 sps:$4 sm:$0xff]   ;;  %v11934_v17 = vld [vmem:[#allocation7 + $0x9c] ss:$36 sps:$4 sm:$0xff]  }
 0x18c   : > { %2170 = vmatpush1.bf16.msra.mxu0 %v11883_v7  ;;  %1959 = vmatprep.subr.bf16.mxu1 %v11888_v14  ;;  %v495_v6 = vmul.f32 %v13828_v62, %v475_v2  ;;  %v11922_v7 = vld [vmem:[#allocation7 + $0x8] ss:$36 sps:$4 sm:$0xff]   ;;  %v520_v62 = vmul.f32 %v508_v52, %v492_v55  ;;  %v11935_v42 = vld [vmem:[#allocation7 + $0x2f0] ss:$36 sps:$4 sm:$0xff]   ;;  %v11952_v46 = vld [vmem:[#allocation7 + $0x1b8] ss:$36 sps:$4 sm:$0xff]  }
 0x18d   : > { %1944 = vmatprep.mubr.bf16.mxu1 %v13840_v25  ;;  %2156 = vmatprep.mubr.bf16.mxu0 %v13840_v25  ;;  %v514_v3 = vmul.f32 %v508_v52, %v486_v48  ;;  %v545_v5 = vadd.f32 %v536_v20, %v517_v43  ;;  %v11931_v16 = vld [vmem:[#allocation7 + $0x68] ss:$36 sps:$4 sm:$0xff]   ;;  %v11947_v39 = vld [vmem:[#allocation7 + $0x170] ss:$36 sps:$4 sm:$0xff]   ;;  %v11961_v48 = vld [vmem:[#allocation7 + $0x218] ss:$36 sps:$4 sm:$0xff]  }
 0x18e   : > { %2171 = vmatprep.subr.bf16.mxu0 %v11891_v15  ;;  %1945 = vmatmul.mubr.bf16.gmra.mrb[4].mxu1 %v13842_v26  ;;  %v523_v19 = vmul.f32 %v508_v52, %v495_v6  ;;  %v11927_v15 = vld [vmem:[#allocation7 + $0x50] ss:$36 sps:$4 sm:$0xff]   ;;  %v11951_v40 = vld [vmem:[#allocation7 + $0x188] ss:$36 sps:$4 sm:$0xff]   ;;  %v11983_v6 = vld [vmem:[#allocation7 + $0x440] ss:$36 sps:$4 sm:$0xff]  }
 0x18f   : > { %2157 = vmatmul.mubr.bf16.gmra.mrb[4].mxu0 %v13842_v26  ;;  %1960 = vmatpush1.bf16.msra.mxu1 %v11886_v22  ;;  %v542_v12 = vadd.f32 %v536_v20, %v514_v3  ;;  %v11932_v22 = vld [vmem:[#allocation7 + $0x98] ss:$36 sps:$4 sm:$0xff]   ;;  %v11956_v47 = vld [vmem:[#allocation7 + $0x1d0] ss:$36 sps:$4 sm:$0xff]   ;;  %v11959_v49 = vld [vmem:[#allocation7 + $0x204] ss:$36 sps:$4 sm:$0xff]  }
 0x190   : > { %2172 = vmatpush1.bf16.msra.mxu0 %v11889_v23  ;;  %1961 = vmatprep.subr.bf16.mxu1 %v11894_v27  ;;  %v551_v18 = vadd.f32 %v536_v20, %v523_v19  ;;  %v548_v23 = vadd.f32 %v536_v20, %v520_v62  ;;  %v11936_v27 = vld [vmem:[#allocation7 + $0xb0] ss:$36 sps:$4 sm:$0xff]   ;;  %v11974_v2 = vld [vmem:[#allocation7 + $0x368] ss:$36 sps:$4 sm:$0xff]  }
 0x191   : > { %2173 = vmatprep.subr.bf16.mxu0 %v11897_v28  ;;  %1987 = vmatprep.mubr.bf16.mxu1 %v13431_v34  ;;  %v13869_v14 = vpack.c.bf16 %v545_v5, %v542_v12  ;;  %v11939_v28 = vld [vmem:[#allocation7 + $0xe4] ss:$36 sps:$4 sm:$0xff]   ;;  %v11964_v52 = vld [vmem:[#allocation7 + $0x24c] ss:$36 sps:$4 sm:$0xff]   ;;  %v11979_v3 = vld [vmem:[#allocation7 + $0x3b4] ss:$36 sps:$4 sm:$0xff]  }
 0x192   : > { %2199 = vmatprep.mubr.bf16.mxu0 %v13431_v34  ;;  %v11965_v43 = vld [vmem:[#allocation7 + $0x290] ss:$36 sps:$4 sm:$0xff]   ;;  %v11985_v5 = vld [vmem:[#allocation7 + $0x444] ss:$36 sps:$4 sm:$0xff]  }
 0x193   : > { %1962 = vmatpush1.bf16.msra.mxu1 %v11892_v21  ;;  %v11940_v21 = vld [vmem:[#allocation7 + $0x338] ss:$36 sps:$4 sm:$0xff]   ;;  %v11977_v20 = vld [vmem:[#allocation7 + $0x3b0] ss:$36 sps:$4 sm:$0xff]   ;;  %v11997_v19 = vld [vmem:[#allocation7 + $0x564] ss:$36 sps:$4 sm:$0xff]  }
 0x194   : > { %2174 = vmatpush1.bf16.msra.mxu0 %v11895_v24  ;;  %1963 = vmatprep.subr.bf16.mxu1 %v11900_v30  ;;  %v13875_v24 = vpack.c.bf16 %v551_v18, %v548_v23  ;;  %v11937_v30 = vld [vmem:[#allocation7 + $0xe0] ss:$36 sps:$4 sm:$0xff]   ;;  %v11991_v12 = vld [vmem:[#allocation7 + $0x4d4] ss:$36 sps:$4 sm:$0xff]   ;;  %v11998_v62 = vld [vmem:[#allocation7 + $0x5a8] ss:$36 sps:$4 sm:$0xff]  }
 0x195   : > { %2175 = vmatprep.subr.bf16.mxu0 %v11903_v31  ;;  %v11941_v31 = vld [vmem:[#allocation7 + $0xf8] ss:$36 sps:$4 sm:$0xff]   ;;  %v11989_v55 = vld [vmem:[#allocation7 + $0x4d0] ss:$36 sps:$4 sm:$0xff]   ;;  %v12009_v23 = vld [vmem:[#allocation7 + $0x684] ss:$36 sps:$4 sm:$0xff]  }
 0x196   : > { %v12006_v18 = vld [vmem:[#allocation7 + $0x63c] ss:$36 sps:$4 sm:$0xff]  }
 0x197   : > { %1964 = vmatpush1.bf16.msra.mxu1 %v11898_v32  ;;  %v11944_v32 = vld [vmem:[#allocation7 + $0x12c] ss:$36 sps:$4 sm:$0xff]  }
 0x198   : > { %2176 = vmatpush1.bf16.msra.mxu0 %v11901_v33  ;;  %1965 = vmatprep.subr.bf16.mxu1 %v11906_v35  ;;  %v11945_v33 = vld [vmem:[#allocation7 + $0x380] ss:$36 sps:$4 sm:$0xff]   ;;  %v11942_v35 = vld [vmem:[#allocation7 + $0x128] ss:$36 sps:$4 sm:$0xff]  }
 0x199   : > { %2177 = vmatprep.subr.bf16.mxu0 %v11909_v36  ;;  %v11946_v36 = vld [vmem:[#allocation7 + $0x140] ss:$36 sps:$4 sm:$0xff]  }
 0x19b   : > { %1966 = vmatpush1.bf16.msra.mxu1 %v11904_v37  ;;  %v11949_v37 = vld [vmem:[#allocation7 + $0x174] ss:$36 sps:$4 sm:$0xff]  }
 0x19c   : > { %2178 = vmatpush1.bf16.msra.mxu0 %v11907_v38  ;;  %1967 = vmatprep.subr.bf16.mxu1 %v11912_v44  ;;  %v11950_v38 = vld [vmem:[#allocation7 + $0x3c8] ss:$36 sps:$4 sm:$0xff]   ;;  %v11954_v44 = vld [vmem:[#allocation7 + $0x1bc] ss:$36 sps:$4 sm:$0xff]  }
 0x19d   : > { %2179 = vmatprep.subr.bf16.mxu0 %v11915_v45  ;;  %v11955_v45 = vld [vmem:[#allocation7 + $0x410] ss:$36 sps:$4 sm:$0xff]  }
 0x19f   : > { %1968 = vmatpush1.bf16.msra.mxu1 %v11910_v50  ;;  %v11960_v50 = vld [vmem:[#allocation7 + $0x458] ss:$36 sps:$4 sm:$0xff]  }
 0x1a0   : > { %2180 = vmatpush1.bf16.msra.mxu0 %v11913_v51  ;;  %1969 = vmatprep.subr.bf16.mxu1 %v11918_v53  ;;  %v11957_v51 = vld [vmem:[#allocation7 + $0x200] ss:$36 sps:$4 sm:$0xff]   ;;  %v11962_v53 = vld [vmem:[#allocation7 + $0x248] ss:$36 sps:$4 sm:$0xff]  }
 0x1a1   : > { %2181 = vmatprep.subr.bf16.mxu0 %v11921_v54  ;;  %v11967_v54 = vld [vmem:[#allocation7 + $0x294] ss:$36 sps:$4 sm:$0xff]  }
 0x1a3   : > { %1970 = vmatpush1.bf16.msra.mxu1 %v11916_v57  ;;  %v11970_v57 = vld [vmem:[#allocation7 + $0x2dc] ss:$36 sps:$4 sm:$0xff]  }
 0x1a4   : > { %2182 = vmatpush1.bf16.msra.mxu0 %v11919_v58  ;;  %2008 = vmatprep.subr.bf16.mxu1 %v11924_v9  ;;  %v11968_v58 = vld [vmem:[#allocation7 + $0x2d8] ss:$36 sps:$4 sm:$0xff]  }
 0x1a5   : > { %10954 = vmatprep.subr.bf16.mxu0 %v11925_v4  ;;  %v11982_v9 = vld [vmem:[#allocation7 + $0x3fc] ss:$36 sps:$4 sm:$0xff]  }
 0x1a6   : > { %1988 = vmatmul.mubr.bf16.vlgmr.msra.gmra.mrb[0].mxu1 %v13869_v14  ;;  %v11980_v4 = vld [vmem:[#allocation7 + $0x3f8] ss:$36 sps:$4 sm:$0xff]  }
 0x1a7   : > { %2200 = vmatmul.mubr.bf16.vlgmr.msra.gmra.mrb[0].mxu0 %v13869_v14  ;;  %2009 = vmatpush1.bf16.msra.mxu1 %v11922_v7  ;;  %v11988_v7 = vld [vmem:[#allocation7 + $0x48c] ss:$36 sps:$4 sm:$0xff]  }
 0x1a8   : > { %10955 = vmatpush3.bf16.msra.mxu0 %v11926_v8  ;;  %2010 = vmatprep.subr.bf16.mxu1 %v11929_v60  ;;  %v11986_v8 = vld [vmem:[#allocation7 + $0x488] ss:$36 sps:$4 sm:$0xff]   ;;  %v11994_v60 = vld [vmem:[#allocation7 + $0x51c] ss:$36 sps:$4 sm:$0xff]  }
 0x1a9   : > { %10956 = vmatprep.subr.bf16.mxu0 %v11930_v13  ;;  %1997 = vmatprep.mubr.bf16.mxu1 %v13431_v34  ;;  %v11992_v13 = vld [vmem:[#allocation7 + $0x518] ss:$36 sps:$4 sm:$0xff]  }
 0x1aa   : > { %2209 = vmatprep.mubr.bf16.mxu0 %v13431_v34 }
 0x1ab   : > { %2011 = vmatpush1.bf16.msra.mxu1 %v11927_v15  ;;  %v11995_v15 = vld [vmem:[#allocation7 + $0x560] ss:$36 sps:$4 sm:$0xff]  }
 0x1ac   : > { %10957 = vmatpush3.bf16.msra.mxu0 %v11931_v16  ;;  %2012 = vmatprep.subr.bf16.mxu1 %v11934_v17  ;;  %v12000_v16 = vld [vmem:[#allocation7 + $0x5ac] ss:$36 sps:$4 sm:$0xff]   ;;  %v12003_v17 = vld [vmem:[#allocation7 + $0x5f4] ss:$36 sps:$4 sm:$0xff]  }
 0x1ad   : > { %10958 = vmatprep.subr.bf16.mxu0 %v11935_v42  ;;  %v12001_v42 = vld [vmem:[#allocation7 + $0x5f0] ss:$36 sps:$4 sm:$0xff]  }
 0x1ae   : > { %1998 = vmatmul.mubr.bf16.gmra.mrb[4].mxu1 %v13875_v24 }
 0x1af   : > { %2210 = vmatmul.mubr.bf16.gmra.mrb[4].mxu0 %v13875_v24  ;;  %2013 = vmatpush1.bf16.msra.mxu1 %v11932_v22  ;;  %v12004_v22 = vld [vmem:[#allocation7 + $0x638] ss:$36 sps:$4 sm:$0xff]  }
 0x1b0   : > { %2040 = vmatprep.mubr.bf16.mxu1 %v13830_v63  ;;  %10959 = vmatpush3.bf16.msra.mxu0 %v11936_v27  ;;  %v12007_v27 = vld [vmem:[#allocation7 + $0x680] ss:$36 sps:$4 sm:$0xff]  }
 0x1b1   : > { %2358 = vmatprep.mubr.bf16.mxu0 %v13830_v63  ;;  %2014 = vmatprep.subr.bf16.mxu1 %v11939_v28  ;;  %v12012_v28 = vld [vmem:[#allocation7 + $0x1c] ss:$36 sps:$4 sm:$0xff]  }
 0x1b2   : > { %10960 = vmatprep.subr.bf16.mxu0 %v11940_v21  ;;  %v12010_v21 = vld [vmem:[#allocation7 + $0x18] ss:$36 sps:$4 sm:$0xff]  }
 0x1b3   : > { %2015 = vmatpush1.bf16.msra.mxu1 %v11937_v30  ;;  %v12015_v30 = vld [vmem:[#allocation7 + $0x64] ss:$36 sps:$4 sm:$0xff]  }
 0x1b4   : > { %10961 = vmatpush3.bf16.msra.mxu0 %v11941_v31  ;;  %2016 = vmatprep.subr.bf16.mxu1 %v11944_v32  ;;  %v12013_v31 = vld [vmem:[#allocation7 + $0x60] ss:$36 sps:$4 sm:$0xff]   ;;  %v12018_v32 = vld [vmem:[#allocation7 + $0xac] ss:$36 sps:$4 sm:$0xff]  }
 0x1b5   : > { %10962 = vmatprep.subr.bf16.mxu0 %v11945_v33  ;;  %v12016_v33 = vld [vmem:[#allocation7 + $0xa8] ss:$36 sps:$4 sm:$0xff]  }
 0x1b7   : > { %2017 = vmatpush1.bf16.msra.mxu1 %v11942_v35  ;;  %v12021_v35 = vld [vmem:[#allocation7 + $0xf4] ss:$36 sps:$4 sm:$0xff]  }
 0x1b8   : > { %10963 = vmatpush3.bf16.msra.mxu0 %v11946_v36  ;;  %2018 = vmatprep.subr.bf16.mxu1 %v11949_v37  ;;  %v12019_v36 = vld [vmem:[#allocation7 + $0xf0] ss:$36 sps:$4 sm:$0xff]   ;;  %v12024_v37 = vld [vmem:[#allocation7 + $0x13c] ss:$36 sps:$4 sm:$0xff]  }
 0x1b9   : > { %10964 = vmatprep.subr.bf16.mxu0 %v11950_v38  ;;  %v12022_v38 = vld [vmem:[#allocation7 + $0x138] ss:$36 sps:$4 sm:$0xff]  }
 0x1bb   : > { %2019 = vmatpush1.bf16.msra.mxu1 %v11947_v39  ;;  %v12027_v39 = vld [vmem:[#allocation7 + $0x184] ss:$36 sps:$4 sm:$0xff]  }
 0x1bc   : > { %10965 = vmatpush3.bf16.msra.mxu0 %v11951_v40  ;;  %2020 = vmatprep.subr.bf16.mxu1 %v11954_v44  ;;  %v12025_v40 = vld [vmem:[#allocation7 + $0x180] ss:$36 sps:$4 sm:$0xff]   ;;  %v12030_v44 = vld [vmem:[#allocation7 + $0x1cc] ss:$36 sps:$4 sm:$0xff]  }
 0x1bd   : > { %10966 = vmatprep.subr.bf16.mxu0 %v11955_v45  ;;  %v12028_v45 = vld [vmem:[#allocation7 + $0x1c8] ss:$36 sps:$4 sm:$0xff]  }
 0x1bf   : > { %2021 = vmatpush1.bf16.msra.mxu1 %v11952_v46  ;;  %v12033_v46 = vld [vmem:[#allocation7 + $0x214] ss:$36 sps:$4 sm:$0xff]  }
 0x1c0   : > { %10967 = vmatpush3.bf16.msra.mxu0 %v11956_v47  ;;  %2022 = vmatprep.subr.bf16.mxu1 %v11959_v49  ;;  %v12031_v47 = vld [vmem:[#allocation7 + $0x210] ss:$36 sps:$4 sm:$0xff]   ;;  %v12036_v49 = vld [vmem:[#allocation7 + $0x25c] ss:$36 sps:$4 sm:$0xff]  }
 0x1c1   : > { %10968 = vmatprep.subr.bf16.mxu0 %v11960_v50  ;;  %v12034_v50 = vld [vmem:[#allocation7 + $0x258] ss:$36 sps:$4 sm:$0xff]  }
 0x1c3   : > { %2023 = vmatpush1.bf16.msra.mxu1 %v11957_v51  ;;  %v12039_v51 = vld [vmem:[#allocation7 + $0x2a4] ss:$36 sps:$4 sm:$0xff]  }
 0x1c4   : > { %10969 = vmatpush3.bf16.msra.mxu0 %v11961_v48  ;;  %2024 = vmatprep.subr.bf16.mxu1 %v11964_v52  ;;  %v12042_v48 = vld [vmem:[#allocation7 + $0x2ec] ss:$36 sps:$4 sm:$0xff]  }
 0x1c5   : > { %v12040_v52 = vld [vmem:[#allocation7 + $0x2e8] ss:$36 sps:$4 sm:$0xff]  }
 0x1c7   : > { %2359 = vmatmul.mubr.bf16.vlgmr.msra.gmra.mrb[8].mxu0 %v13832_v0  ;;  %2025 = vmatpush1.bf16.msra.mxu1 %v11962_v53  ;;  %v12045_v53 = vld [vmem:[#allocation7 + $0x334] ss:$36 sps:$4 sm:$0xff]  }
 0x1c8   : > { %2366 = vmatprep.mubr.bf16.mxu0 %v13840_v25  ;;  %2026 = vmatprep.subr.bf16.mxu1 %v11967_v54  ;;  %v12043_v54 = vld [vmem:[#allocation7 + $0x330] ss:$36 sps:$4 sm:$0xff]  }
 0x1cb   : > { %2027 = vmatpush1.bf16.msra.mxu1 %v11965_v43  ;;  %v12048_v43 = vld [vmem:[#allocation7 + $0x37c] ss:$36 sps:$4 sm:$0xff]  }
 0x1cc   : > { %2028 = vmatprep.subr.bf16.mxu1 %v11970_v57  ;;  %v12046_v57 = vld [vmem:[#allocation7 + $0x378] ss:$36 sps:$4 sm:$0xff]  }
 0x1cf   : > { %2367 = vmatmul.mubr.bf16.gmra.mrb[12].mxu0 %v13842_v26  ;;  %2029 = vmatpush1.bf16.msra.mxu1 %v11968_v58  ;;  %v12051_v58 = vld [vmem:[#allocation7 + $0x3c4] ss:$36 sps:$4 sm:$0xff]  }
 0x1d0   : > { %2030 = vmatprep.subr.bf16.mxu1 %v11973_v59  ;;  %v12049_v59 = vld [vmem:[#allocation7 + $0x3c0] ss:$36 sps:$4 sm:$0xff]  }
 0x1d3   : > { %2031 = vmatpush1.bf16.msra.mxu1 %v11971_v29  ;;  %v12054_v29 = vld [vmem:[#allocation7 + $0x40c] ss:$36 sps:$4 sm:$0xff]  }
 0x1d4   : > { %2032 = vmatprep.subr.bf16.mxu1 %v11976_v61  ;;  %v12052_v61 = vld [vmem:[#allocation7 + $0x408] ss:$36 sps:$4 sm:$0xff]  }
 0x1d7   : > { %2033 = vmatpush1.bf16.msra.mxu1 %v11974_v2  ;;  %v12057_v2 = vld [vmem:[#allocation7 + $0x454] ss:$36 sps:$4 sm:$0xff]  }
 0x1d8   : > { %2034 = vmatprep.subr.bf16.mxu1 %v11979_v3  ;;  %v12055_v3 = vld [vmem:[#allocation7 + $0x450] ss:$36 sps:$4 sm:$0xff]  }
 0x1db   : > { %2035 = vmatpush1.bf16.msra.mxu1 %v11977_v20  ;;  %v12060_v20 = vld [vmem:[#allocation7 + $0x49c] ss:$36 sps:$4 sm:$0xff]  }
 0x1dc   : > { %2036 = vmatprep.subr.bf16.mxu1 %v11982_v9  ;;  %v12058_v9 = vld [vmem:[#allocation7 + $0x498] ss:$36 sps:$4 sm:$0xff]  }
 0x1df   : > { %2037 = vmatpush1.bf16.msra.mxu1 %v11980_v4  ;;  %v12063_v4 = vld [vmem:[#allocation7 + $0x4e4] ss:$36 sps:$4 sm:$0xff]  }
 0x1e0   : > { %2038 = vmatprep.subr.bf16.mxu1 %v11985_v5  ;;  %v12061_v5 = vld [vmem:[#allocation7 + $0x4e0] ss:$36 sps:$4 sm:$0xff]  }
 0x1e3   : > { %2039 = vmatpush1.bf16.msra.mxu1 %v11983_v6  ;;  %v12066_v6 = vld [vmem:[#allocation7 + $0x52c] ss:$36 sps:$4 sm:$0xff]  }
 0x1e4   : > { %2061 = vmatprep.subr.bf16.mxu1 %v11988_v7  ;;  %v12064_v7 = vld [vmem:[#allocation7 + $0x528] ss:$36 sps:$4 sm:$0xff]  }
 0x1e6   : > { %2041 = vmatmul.mubr.bf16.vlgmr.msra.gmra.mrb[8].mxu1 %v13832_v0 }
 0x1e7   : > { %2050 = vmatprep.mubr.bf16.mxu1 %v13840_v25  ;;  %2062 = vmatpush1.bf16.msra.mxu1 %v11986_v8  ;;  %v12069_v8 = vld [vmem:[#allocation7 + $0x574] ss:$36 sps:$4 sm:$0xff]  }
 0x1e8   : > { %2063 = vmatprep.subr.bf16.mxu1 %v11991_v12  ;;  %v12067_v12 = vld [vmem:[#allocation7 + $0x570] ss:$36 sps:$4 sm:$0xff]  }
 0x1eb   : > { %2064 = vmatpush1.bf16.msra.mxu1 %v11989_v55  ;;  %v12072_v55 = vld [vmem:[#allocation7 + $0x5bc] ss:$36 sps:$4 sm:$0xff]  }
 0x1ec   : > { %2065 = vmatprep.subr.bf16.mxu1 %v11994_v60  ;;  %v12070_v60 = vld [vmem:[#allocation7 + $0x5b8] ss:$36 sps:$4 sm:$0xff]  }
 0x1ee   : > { %2051 = vmatmul.mubr.bf16.gmra.mrb[12].mxu1 %v13842_v26 }
 0x1ef   : > { %2066 = vmatpush1.bf16.msra.mxu1 %v11992_v13  ;;  %2093 = vmatprep.mubr.bf16.mxu1 %v13431_v34  ;;  %v12075_v13 = vld [vmem:[#allocation7 + $0x604] ss:$36 sps:$4 sm:$0xff]  }
 0x1f0   : > { %2067 = vmatprep.subr.bf16.mxu1 %v11997_v19  ;;  %v12076_v19 = vld [vmem:[#allocation7 + $0x648] ss:$36 sps:$4 sm:$0xff]  }
 0x1f3   : > { %2068 = vmatpush1.bf16.msra.mxu1 %v11995_v15  ;;  %v12081_v15 = vld [vmem:[#allocation7 + $0x694] ss:$36 sps:$4 sm:$0xff]  }
 0x1f4   : > { %2069 = vmatprep.subr.bf16.mxu1 %v12000_v16  ;;  %v12079_v16 = vld [vmem:[#allocation7 + $0x690] ss:$36 sps:$4 sm:$0xff]  }
 0x1f7   : > { %2070 = vmatpush1.bf16.msra.mxu1 %v11998_v62  ;;  %v12082_v62 = vld [vmem:[#allocation7 + $0x4a0] ss:$36 sps:$4 sm:$0xff]  }
 0x1f8   : > { %2071 = vmatprep.subr.bf16.mxu1 %v12003_v17  ;;  %v12083_v17 = vld [vmem:[#allocation7 + $0x4e8] ss:$36 sps:$4 sm:$0xff]  }
 0x1fb   : > { %2072 = vmatpush1.bf16.msra.mxu1 %v12001_v42  ;;  %v12084_v42 = vld [vmem:[#allocation7 + $0x530] ss:$36 sps:$4 sm:$0xff]  }
 0x1fc   : > { %2073 = vmatprep.subr.bf16.mxu1 %v12006_v18  ;;  %v12085_v18 = vld [vmem:[#allocation7 + $0x578] ss:$36 sps:$4 sm:$0xff]  }
 0x1ff   : > { %2074 = vmatpush1.bf16.msra.mxu1 %v12004_v22  ;;  %v12086_v22 = vld [vmem:[#allocation7 + $0x5c0] ss:$36 sps:$4 sm:$0xff]  }
 0x200   : > { %2075 = vmatprep.subr.bf16.mxu1 %v12009_v23  ;;  %v12087_v23 = vld [vmem:[#allocation7 + $0x608] ss:$36 sps:$4 sm:$0xff]  }
 0x203   : > { %2076 = vmatpush1.bf16.msra.mxu1 %v12007_v27  ;;  %v12088_v27 = vld [vmem:[#allocation7 + $0x650] ss:$36 sps:$4 sm:$0xff]  }
 0x204   : > { %2220 = vmatprep.subr.bf16.mxu1 %v12012_v28 }
 0x206   : > { %2094 = vmatmul.mubr.bf16.vlgmr.msra.gmra.mrb[8].mxu1 %v13869_v14 }
 0x207   : > { %2221 = vmatpush1.bf16.msra.mxu1 %v12010_v21  ;;  %2103 = vmatprep.mubr.bf16.mxu1 %v13431_v34 }
 0x208   : > { %2222 = vmatprep.subr.bf16.mxu1 %v12015_v30 }
 0x20b   : > { %2223 = vmatpush1.bf16.msra.mxu1 %v12013_v31 }
 0x20c   : > { %2224 = vmatprep.subr.bf16.mxu1 %v12018_v32 }
 0x20e   : > { %2104 = vmatmul.mubr.bf16.gmra.mrb[12].mxu1 %v13875_v24 }
 0x20f   : > { %2225 = vmatpush1.bf16.msra.mxu1 %v12016_v33  ;;  %2252 = vmatprep.mubr.bf16.mxu1 %v13830_v63  ;;  %v12037_v63 = vld [vmem:[#allocation7 + $0x2a0] ss:$36 sps:$4 sm:$0xff]  }
 0x210   : > { %2226 = vmatprep.subr.bf16.mxu1 %v12021_v35 }
 0x213   : > { %2227 = vmatpush1.bf16.msra.mxu1 %v12019_v36 }
 0x214   : > { %2228 = vmatprep.subr.bf16.mxu1 %v12024_v37 }
 0x217   : > { %2229 = vmatpush1.bf16.msra.mxu1 %v12022_v38  ;;  %v12089_v38 = vld [vmem:[#allocation7 + $0x698] ss:$36 sps:$4 sm:$0xff]  }
 0x218   : > { %2230 = vmatprep.subr.bf16.mxu1 %v12027_v39 }
 0x21b   : > { %2231 = vmatpush1.bf16.msra.mxu1 %v12025_v40 }
 0x21c   : > { %2232 = vmatprep.subr.bf16.mxu1 %v12030_v44 }
 0x21f   : > { %2233 = vmatpush1.bf16.msra.mxu1 %v12028_v45 }
 0x220   : > { %2234 = vmatprep.subr.bf16.mxu1 %v12033_v46 }
 0x223   : > { %2235 = vmatpush1.bf16.msra.mxu1 %v12031_v47 }
 0x224   : > { %2236 = vmatprep.subr.bf16.mxu1 %v12036_v49 }
 0x227   : > { %2237 = vmatpush1.bf16.msra.mxu1 %v12034_v50 }
 0x228   : > { %2238 = vmatprep.subr.bf16.mxu1 %v12039_v51 }
 0x22b   : > { %2239 = vmatpush1.bf16.msra.mxu1 %v12037_v63 }
 0x22c   : > { %2240 = vmatprep.subr.bf16.mxu1 %v12042_v48 }
 0x22f   : > { %2241 = vmatpush1.bf16.msra.mxu1 %v12040_v52 }
 0x230   : > { %2242 = vmatprep.subr.bf16.mxu1 %v12045_v53 }
 0x233   : > { %2243 = vmatpush1.bf16.msra.mxu1 %v12043_v54 }
 0x234   : > { %2244 = vmatprep.subr.bf16.mxu1 %v12048_v43 }
 0x237   : > { %2245 = vmatpush1.bf16.msra.mxu1 %v12046_v57 }
 0x238   : > { %2246 = vmatprep.subr.bf16.mxu1 %v12051_v58 }
 0x23b   : > { %2247 = vmatpush1.bf16.msra.mxu1 %v12049_v59 }
 0x23c   : > { %2248 = vmatprep.subr.bf16.mxu1 %v12054_v29 }
 0x23f   : > { %2249 = vmatpush1.bf16.msra.mxu1 %v12052_v61 }
 0x240   : > { %2250 = vmatprep.subr.bf16.mxu1 %v12057_v2 }
 0x243   : > { %2251 = vmatpush1.bf16.msra.mxu1 %v12055_v3 }
 0x244   : > { %2273 = vmatprep.subr.bf16.mxu1 %v12060_v20 }
 0x246   : > { %2253 = vmatmul.mubr.bf16.vlgmr.msra.gmra.mrb[16].mxu1 %v13832_v0  ;;  %v12073_v0 = vld [vmem:[#allocation7 + $0x600] ss:$36 sps:$4 sm:$0xff]  }
 0x247   : > { %2262 = vmatprep.mubr.bf16.mxu1 %v13840_v25  ;;  %2274 = vmatpush1.bf16.msra.mxu1 %v12058_v9  ;;  %v12078_v25 = vld [vmem:[#allocation7 + $0x64c] ss:$36 sps:$4 sm:$0xff]  }
 0x248   : > { %2275 = vmatprep.subr.bf16.mxu1 %v12063_v4 }
 0x24b   : > { %2276 = vmatpush1.bf16.msra.mxu1 %v12061_v5 }
 0x24c   : > { %2277 = vmatprep.subr.bf16.mxu1 %v12066_v6 }
 0x24e   : > { %2263 = vmatmul.mubr.bf16.gmra.mrb[20].mxu1 %v13842_v26  ;;  %v13432_v26 = vmov 0.0  }
 0x24f   : > { %2278 = vmatpush1.bf16.msra.mxu1 %v12064_v7  ;;  %2305 = vmatprep.mubr.bf16.mxu1 %v13431_v34 }
 0x250   : > { %2279 = vmatprep.subr.bf16.mxu1 %v12069_v8  ;;  %11266 = vmatprep.subr.bf16.mxu0 %v13432_v26 }
 0x251   : > { %11268 = vmatprep.mubr.msk.bf16.mxu0 %vm13433_vm0, %v13432_v26 }
 0x253   : > { %2280 = vmatpush1.bf16.msra.mxu1 %v12067_v12 }
 0x254   : > { %2281 = vmatprep.subr.bf16.mxu1 %v12072_v55 }
 0x257   : > { %2282 = vmatpush1.bf16.msra.mxu1 %v12070_v60 }
 0x258   : > { %2283 = vmatprep.subr.bf16.mxu1 %v12075_v13 }
 0x25b   : > { %2284 = vmatpush1.bf16.msra.mxu1 %v12073_v0 }
 0x25c   : > { %2285 = vmatprep.subr.bf16.mxu1 %v12078_v25 }
 0x25f   : > { %2286 = vmatpush1.bf16.msra.mxu1 %v12076_v19 }
 0x260   : > { %2287 = vmatprep.subr.bf16.mxu1 %v12081_v15 }
 0x263   : > { %2288 = vmatpush1.bf16.msra.mxu1 %v12079_v16 }
 0x264   : > { %11246 = vmatprep.subr.bf16.mxu1 %v12082_v62 }
 0x266   : > { %2306 = vmatmul.mubr.bf16.vlgmr.msra.gmra.mrb[16].mxu1 %v13869_v14 }
 0x267   : > { %11247 = vmatpush3.bf16.msra.mxu1 %v12082_v62  ;;  %2315 = vmatprep.mubr.bf16.mxu1 %v13431_v34 }
 0x268   : > { %11248 = vmatprep.subr.bf16.mxu1 %v12083_v17 }
 0x26b   : > { %11249 = vmatpush3.bf16.msra.mxu1 %v12083_v17 }
 0x26c   : > { %11250 = vmatprep.subr.bf16.mxu1 %v12084_v42 }
 0x26e   : > { %2316 = vmatmul.mubr.bf16.gmra.mrb[20].mxu1 %v13875_v24 }
 0x26f   : > { %11251 = vmatpush3.bf16.msra.mxu1 %v12084_v42  ;;  %11262 = vmatprep.mubr.bf16.mxu1 %v13869_v14 }
 0x270   : > { %11252 = vmatprep.subr.bf16.mxu1 %v12085_v18 }
 0x273   : > { %11253 = vmatpush3.bf16.msra.mxu1 %v12085_v18 }
 0x274   : > { %11254 = vmatprep.subr.bf16.mxu1 %v12086_v22 }
 0x277   : > { %11255 = vmatpush3.bf16.msra.mxu1 %v12086_v22 }
 0x278   : > { %11256 = vmatprep.subr.bf16.mxu1 %v12087_v23 }
 0x279   : > { %v1989_v28 = vpop.f32.mrb[0].mxu1 }
 0x27a   : > { %v2201_v21 = vpop.f32.mrb[0].mxu0  ;;  %v1991_v30 = vpop.f32.mrb[1].mxu1 }
 0x27b   : > { %v2203_v31 = vpop.f32.mrb[1].mxu0  ;;  %v1993_v32 = vpop.f32.mrb[2].mxu1  ;;  %11257 = vmatpush3.bf16.msra.mxu1 %v12087_v23 }
 0x27c   : > { %v2205_v33 = vpop.f32.mrb[2].mxu0  ;;  %v13903_v35 = vpack.c.bf16 %v1993_v32, %v1989_v28  ;;  %v1995_v14 = vpop.f32.mrb[3].mxu1  ;;  %11258 = vmatprep.subr.bf16.mxu1 %v12088_v27 }
 0x27d   : > { %v13905_v36 = vpack.c.bf16 %v2205_v33, %v2201_v21  ;;  %v2207_v37 = vpop.f32.mrb[3].mxu0  ;;  %v13907_v39 = vpack.c.bf16 %v1995_v14, %v1991_v30 }
 0x27e   : > { %v13909_v40 = vpack.c.bf16 %v2207_v37, %v2203_v31 }
 0x27f   : > { %11259 = vmatpush3.bf16.msra.mxu1 %v12088_v27 }
 0x280   : > { %11260 = vmatprep.subr.bf16.mxu1 %v12089_v38 }
 0x281   : > { %v1999_v44 = vpop.f32.mrb[4].mxu1 }
 0x282   : > { %v2211_v45 = vpop.f32.mrb[4].mxu0  ;;  %v2001_v46 = vpop.f32.mrb[5].mxu1 }
 0x283   : > { %v2213_v47 = vpop.f32.mrb[5].mxu0  ;;  %v2003_v49 = vpop.f32.mrb[6].mxu1  ;;  %11261 = vmatpush3.bf16.msra.mxu1 %v12089_v38 }
 0x284   : > { %v2215_v50 = vpop.f32.mrb[6].mxu0  ;;  %v13911_v51 = vpack.c.bf16 %v2003_v49, %v1999_v44  ;;  %v2005_v48 = vpop.f32.mrb[7].mxu1  ;;  %11278 = vmatprep.subr.bf16.mxu1 %v13432_v26 }
 0x285   : > { %v13913_v63 = vpack.c.bf16 %v2215_v50, %v2211_v45  ;;  %v2217_v52 = vpop.f32.mrb[7].mxu0  ;;  %v13916_v53 = vpack.c.bf16 %v2005_v48, %v2001_v46 }
 0x286   : > { %v13918_v54 = vpack.c.bf16 %v2217_v52, %v2213_v47  ;;  %11263 = vmatmul.mubr.bf16.vlgmr.msra.gmra.mrb[24].mxu1 %v13875_v24  ;;  %v2428_v52 = vand.u32 127, %v497_v56 }
 0x287   : > { %11280 = vmatprep.mubr.msk.bf16.mxu1 %vm13433_vm0, %v13432_v26 }
 0x288   : > { %vm2429_vm2 = vcmp.ge.s32.totalorder %v13778_v1, %v2428_v52 }
 0x29a   : > { %v10970_v43 = vpop.f32.mrb[8].mxu0 }
 0x29b   : > { %v10971_v57 = vpop.f32.mrb[9].mxu0 }
 0x29c   : > { %v10972_v58 = vadd.f32 %v10971_v57, %v10970_v43  ;;  %v10973_v59 = vpop.f32.mrb[10].mxu0  ;;  %v2426_v43 = vadd.s32 8, %v13778_v1  ;;  %v13434_v57 = vmov -1e+30  }
 0x29d   : > { %v10974_v29 = vpop.f32.mrb[11].mxu0 }
 0x29e   : > { %v10975_v61 = vadd.f32 %v10974_v29, %v10973_v59  ;;  %vm2430_vm3 = vcmp.ge.s32.totalorder %v2426_v43, %v2428_v52  ;;  %v13964_v59 = vsel %vm2429_vm2, 0.0, %v13434_v57 }
 0x2a2   : > { %v10976_v2 = vpop.f32.mrb[12].mxu0 }
 0x2a3   : > { %v10977_v3 = vpop.f32.mrb[13].mxu0 }
 0x2a4   : > { %v10978_v20 = vadd.f32 %v10977_v3, %v10976_v2  ;;  %v10979_v9 = vpop.f32.mrb[14].mxu0 }
 0x2a5   : > { %v10980_v4 = vpop.f32.mrb[15].mxu0 }
 0x2a6   : > { %v10981_v5 = vadd.f32 %v10980_v4, %v10979_v9 }
 0x2d9   : > { %v2095_v6 = vpop.f32.mrb[8].mxu1 }
 0x2da   : > { %v2097_v7 = vpop.f32.mrb[9].mxu1 }
 0x2db   : > { %v2099_v8 = vpop.f32.mrb[10].mxu1 }
 0x2dc   : > { %v13923_v12 = vpack.c.bf16 %v2099_v8, %v2095_v6  ;;  %v2101_v24 = vpop.f32.mrb[11].mxu1 }
 0x2dd   : > { %v13925_v55 = vpack.c.bf16 %v2101_v24, %v2097_v7 }
 0x2df   : > { %v2444_v60 = vsel %vm2439_vm1, %v13925_v55, 0 }
 0x2e0   : > { %11267 = vmatpush3.bf16.xpose.msra.mxu0 %v2444_v60 }
 0x2e1   : > { %v2105_v13 = vpop.f32.mrb[12].mxu1  ;;  %11272 = vmatprep.subr.bf16.mxu0 %v13432_v26 }
 0x2e2   : > { %v2107_v0 = vpop.f32.mrb[13].mxu1 }
 0x2e3   : > { %v2109_v25 = vpop.f32.mrb[14].mxu1 }
 0x2e4   : > { %v13930_v19 = vpack.c.bf16 %v2109_v25, %v2105_v13  ;;  %v2111_v15 = vpop.f32.mrb[15].mxu1 }
 0x2e5   : > { %v13932_v16 = vpack.c.bf16 %v2111_v15, %v2107_v0 }
 0x2e7   : > { %v2491_v62 = vsel %vm2439_vm1, %v13932_v16, 0  ;;  %11269 = vmatmul.mubr.msk.bf16.vlgmr.msra.gmra.mrb[16].mxu0 %vm2439_vm1, %v13903_v35 }
 0x2e8   : > { %11273 = vmatpush3.bf16.xpose.msra.mxu0 %v2491_v62  ;;  %11274 = vmatprep.mubr.msk.bf16.mxu0 %vm13433_vm0, %v13432_v26 }
 0x2e9   : > { %11284 = vmatprep.subr.bf16.mxu0 %v13432_v26 }
 0x2ef   : > { %11275 = vmatmul.mubr.msk.bf16.vlgmr.msra.gmra.mrb[20].mxu0 %vm2439_vm1, %v13911_v51 }
 0x2f0   : > { %11286 = vmatprep.mubr.msk.bf16.mxu0 %vm13433_vm0, %v13432_v26 }
 0x339   : > { %v2307_v17 = vpop.f32.mrb[16].mxu1 }
 0x33a   : > { %v2309_v42 = vpop.f32.mrb[17].mxu1 }
 0x33b   : > { %v2311_v18 = vpop.f32.mrb[18].mxu1 }
 0x33c   : > { %v13945_v22 = vpack.c.bf16 %v2311_v18, %v2307_v17  ;;  %v2313_v23 = vpop.f32.mrb[19].mxu1 }
 0x33d   : > { %v13947_v27 = vpack.c.bf16 %v2313_v23, %v2309_v42 }
 0x33e   : > { %11279 = vmatpush3.bf16.msra.mxu1 %v13945_v22 }
 0x33f   : > { %11290 = vmatprep.subr.bf16.mxu1 %v13432_v26 }
 0x341   : > { %v2317_v28 = vpop.f32.mrb[20].mxu1 }
 0x342   : > { %v2319_v21 = vpop.f32.mrb[21].mxu1 }
 0x343   : > { %v2321_v30 = vpop.f32.mrb[22].mxu1 }
 0x344   : > { %v13951_v31 = vpack.c.bf16 %v2321_v30, %v2317_v28  ;;  %v2323_v32 = vpop.f32.mrb[23].mxu1 }
 0x345   : > { %v13953_v33 = vpack.c.bf16 %v2323_v32, %v2319_v21 }
 0x346   : > { %11285 = vmatpush3.bf16.msra.mxu0 %v13951_v31 }
 0x347   : > { %11296 = vmatprep.subr.bf16.mxu0 %v13432_v26 }
 0x359   : > { %v11264_v14 = vpop.f32.mrb[24].mxu1 }
 0x35a   : > { %v2418_v37 = vadd.f32 %v11264_v14, %v10978_v20  ;;  %v2409_v38 = vpop.f32.mrb[25].mxu1 }
 0x35b   : > { %v2410_v44 = vadd.f32 %v10972_v58, %v2409_v38  ;;  %v11265_v45 = vpop.f32.mrb[26].mxu1  ;;  %v13966_v58 = vsel %vm2430_vm3, 0.0, %v13434_v57 }
 0x35c   : > { %v2421_v46 = vadd.f32 %v11265_v45, %v10981_v5  ;;  %v2412_v47 = vpop.f32.mrb[27].mxu1 }
 0x35d   : > { %v2413_v49 = vadd.f32 %v10975_v61, %v2412_v47 }
 0x35e   : > { %v13957_v50 = vpack.c.bf16 %v2421_v46, %v2418_v37 }
 0x35f   : > { %v13959_v48 = vpack.c.bf16 %v2413_v49, %v2410_v44 }
 0x3ba   : > { %v2480_v29 = vpop.f32.mrb[16].mxu0 }
 0x3bb   : > { %v2481_v61 = vadd.f32 %v2480_v29, %v13964_v59  ;;  %v11270_v2 = vpop.f32.mrb[17].mxu0 }
 0x3bc   : > { %v2483_v3 = vpop.f32.mrb[18].mxu0 }
 0x3bd   : > { %v2484_v20 = vadd.f32 %v2483_v3, %v13966_v58  ;;  %v11271_v9 = vpop.f32.mrb[19].mxu0  ;;  %v2535_v56 = vsel %vm2534_vm4, %v2481_v61, -inf }
 0x3be   : > { %2536 = vmax.xlane.f32.xlu0 %v2535_v56 }
 0x3bf   : > { %v2538_v4 = vsel %vm2534_vm4, %v2484_v20, -inf }
 0x3c0   : > { %2539 = vmax.xlane.f32.xlu1 %v2538_v4 }
 0x3c2   : > { %v2527_v5 = vpop.f32.mrb[20].mxu0 }
 0x3c3   : > { %v2528_v6 = vadd.f32 %v2527_v5, %v13964_v59  ;;  %v11276_v7 = vpop.f32.mrb[21].mxu0 }
 0x3c4   : > { %v2530_v8 = vpop.f32.mrb[22].mxu0 }
 0x3c5   : > { %v2531_v24 = vadd.f32 %v2530_v8, %v13966_v58  ;;  %v11277_v60 = vpop.f32.mrb[23].mxu0  ;;  %v2541_v13 = vsel %vm2534_vm4, %v2528_v6, -inf }
 0x3c6   : > { %2542 = vmax.xlane.f32.xlu0 %v2541_v13 }
 0x3c7   : > { %v2544_v0 = vsel %vm2534_vm4, %v2531_v24, -inf }
 0x3c8   : > { %2545 = vmax.xlane.f32.xlu1 %v2544_v0 }
 0x44b   : > { %v2537_v25 = vpop.xlane.xlu0 %2536 }
 0x44c   : > { %v2547_v15 = vsub.f32 %v2481_v61, %v2537_v25 }
 0x44d   : > { %v2540_v62 = vpop.xlane.xlu1 %2539 }
 0x44e   : > { %v2551_v17 = vmul.f32 1.442695, %v2547_v15  ;;  %v2548_v42 = vsub.f32 %v2484_v20, %v2540_v62 }
 0x450   : > { %13010 = vpow2.f32 %v2551_v17  ;;  %v2553_v18 = vmul.f32 1.442695, %v2548_v42 }
 0x452   : > { %13012 = vpow2.f32 %v2553_v18 }
 0x453   : > { %v2543_v23 = vpop.xlane.xlu0 %2542 }
 0x454   : > { %v2549_v28 = vsub.f32 %v2528_v6, %v2543_v23 }
 0x455   : > { %v2546_v45 = vpop.xlane.xlu1 %2545 }
 0x456   : > { %v2555_v21 = vmul.f32 1.442695, %v2549_v28  ;;  %v2550_v46 = vsub.f32 %v2531_v24, %v2546_v45 }
 0x458   : > { %13014 = vpow2.f32 %v2555_v21  ;;  %v2557_v47 = vmul.f32 1.442695, %v2550_v46 }
 0x45a   : > { %v13011_v30 = vpop.eup %13010  ;;  %13016 = vpow2.f32 %v2557_v47 }
 0x45b   : > { %v2559_v32 = vsel %vm2534_vm4, %v13011_v30, 0.0 }
 0x45c   : > { %v13013_v14 = vpop.eup %13012  ;;  %2560 = vadd.xlane.f32.xlu0 %v2559_v32 }
 0x45d   : > { %v2562_v37 = vsel %vm2534_vm4, %v13013_v14, 0.0 }
 0x45e   : > { %2563 = vadd.xlane.f32.xlu1 %v2562_v37 }
 0x462   : > { %v13015_v38 = vpop.eup %13014 }
 0x463   : > { %v2565_v44 = vsel %vm2534_vm4, %v13015_v38, 0.0 }
 0x464   : > { %2566 = vadd.xlane.f32.xlu0 %v2565_v44  ;;  %v13017_v49 = vpop.eup %13016 }
 0x465   : > { %v2568_v52 = vsel %vm2534_vm4, %v13017_v49, 0.0 }
 0x46f   : > { %2726 = vrot.lane.b32.xlu1 %v13932_v16, %s13435_s8 }
 0x47a   : > { %2673 = vrot.lane.b32.xlu0 %v13925_v55, %s13435_s8 }
 0x493   : > { %2569 = vadd.xlane.f32.xlu1 %v2568_v52 }
 0x4a4   : > { %2670 = vrot.lane.b32.xlu1 %v13903_v35, %s13435_s8 }
 0x4a8   : > { %2723 = vrot.lane.b32.xlu1 %v13911_v51, %s13435_s8 }
 0x4e9   : > { %v2561_v43 = vpop.xlane.xlu0 %2560 }
 0x4ea   : > { %13018 = vrcp.f32 %v2561_v43 }
 0x4eb   : > { %v2564_v16 = vpop.xlane.xlu1 %2563 }
 0x4ec   : > { %13020 = vrcp.f32 %v2564_v16 }
 0x4ef   : > { %v2727_v35 = vpop.permute.xlu1 %2726 }
 0x4f0   : > { %v2732_v24 = vsel %vm2439_vm1, %v2727_v35, 0 }
 0x4f1   : > { %v2567_v57 = vpop.xlane.xlu0 %2566 }
 0x4f2   : > { %13022 = vrcp.f32 %v2567_v57 }
 0x4f4   : > { %v13019_v29 = vpop.eup %13018 }
 0x4f5   : > { %v2575_v61 = vmul.f32 %v13019_v29, %v13011_v30  ;;  %v2674_v3 = vpop.permute.xlu0 %2673 }
 0x4f6   : > { %v13021_v55 = vpop.eup %13020  ;;  %v2679_v9 = vsel %vm2439_vm1, %v2674_v3, 0 }
 0x4f7   : > { %v2576_v2 = vmul.f32 %v13021_v55, %v13013_v14 }
 0x4f9   : > { %v2579_v20 = vpack.c.bf16 %v2576_v2, %v2575_v61 }
 0x4fb   : > { %11281 = vmatmul.mubr.msk.bf16.vlgmr.msra.gmra.mrb[28].mxu1 %vm2534_vm4, %v2579_v20 }
 0x4fc   : > { %11291 = vmatpush3.bf16.xpose.msra.mxu1 %v2679_v9  ;;  %11292 = vmatprep.mubr.msk.bf16.mxu1 %vm13433_vm0, %v13432_v26  ;;  %v13023_v4 = vpop.eup %13022 }
 0x4fd   : > { %11302 = vmatprep.subr.bf16.mxu1 %v13432_v26  ;;  %v2577_v6 = vmul.f32 %v13023_v4, %v13015_v38 }
 0x520   : > { %v2570_v51 = vpop.xlane.xlu1 %2569 }
 0x521   : > { %13024 = vrcp.f32 %v2570_v51 }
 0x524   : > { %v2671_v56 = vpop.permute.xlu1 %2670 }
 0x525   : > { %11293 = vmatmul.mubr.msk.bf16.vlgmr.msra.gmra.mrb[32].mxu1 %vm2439_vm1, %v2671_v56 }
 0x526   : > { %11304 = vmatprep.mubr.msk.bf16.mxu1 %vm13433_vm0, %v13432_v26 }
 0x528   : > { %v2724_v60 = vpop.permute.xlu1 %2723 }
 0x52b   : > { %v13025_v5 = vpop.eup %13024 }
 0x52c   : > { %v2578_v7 = vmul.f32 %v13025_v5, %v13017_v49 }
 0x52e   : > { %v2580_v8 = vpack.c.bf16 %v2578_v7, %v2577_v6 }
 0x530   : > { %11287 = vmatmul.mubr.msk.bf16.vlgmr.msra.gmra.mrb[24].mxu0 %vm2534_vm4, %v2580_v8 }
 0x531   : > { %11297 = vmatpush3.bf16.xpose.msra.mxu0 %v2732_v24  ;;  %11298 = vmatprep.mubr.msk.bf16.mxu0 %vm13433_vm0, %v13432_v26 }
 0x532   : > { %11308 = vmatprep.subr.bf16.mxu0 %v13432_v26 }
 0x538   : > { %11299 = vmatmul.mubr.msk.bf16.vlgmr.msra.gmra.mrb[28].mxu0 %vm2439_vm1, %v2724_v60 }
 0x539   : > { %11310 = vmatprep.mubr.msk.bf16.mxu0 %vm13433_vm0, %v13432_v26 }
 0x5ce   : > { %v14004_v13 = vpop.f32.mrb[28].mxu1 }
 0x5cf   : > { %v11282_v0 = vpop.f32.mrb[29].mxu1 }
 0x5d0   : > { %v14006_v25 = vpop.f32.mrb[30].mxu1 }
 0x5d1   : > { %v11283_v15 = vpop.f32.mrb[31].mxu1 }
 0x5f8   : > { %v2715_v62 = vpop.f32.mrb[32].mxu1 }
 0x5f9   : > { %v2716_v17 = vadd.f32 %v2715_v62, %v13964_v59  ;;  %v11294_v42 = vpop.f32.mrb[33].mxu1 }
 0x5fa   : > { %v2718_v18 = vpop.f32.mrb[34].mxu1 }
 0x5fb   : > { %v2719_v23 = vadd.f32 %v2718_v18, %v13966_v58  ;;  %v11295_v28 = vpop.f32.mrb[35].mxu1  ;;  %v2775_v21 = vsel %vm2534_vm4, %v2716_v17, -inf }
 0x5fc   : > { %2776 = vmax.xlane.f32.xlu0 %v2775_v21 }
 0x5fd   : > { %v2778_v30 = vsel %vm2534_vm4, %v2719_v23, -inf }
 0x5fe   : > { %2779 = vmax.xlane.f32.xlu1 %v2778_v30 }
 0x603   : > { %v14012_v32 = vpop.f32.mrb[24].mxu0 }
 0x604   : > { %v11288_v14 = vpop.f32.mrb[25].mxu0 }
 0x605   : > { %v14014_v37 = vpop.f32.mrb[26].mxu0 }
 0x606   : > { %v11289_v38 = vpop.f32.mrb[27].mxu0 }
 0x60b   : > { %v2768_v44 = vpop.f32.mrb[28].mxu0 }
 0x60c   : > { %v2769_v45 = vadd.f32 %v2768_v44, %v13964_v59  ;;  %v11300_v46 = vpop.f32.mrb[29].mxu0  ;;  %v2927_v44 = vsel %vm2439_vm1, %v13905_v36, 0 }
 0x60d   : > { %v2771_v47 = vpop.f32.mrb[30].mxu0 }
 0x60e   : > { %v2772_v49 = vadd.f32 %v2771_v47, %v13966_v58  ;;  %v11301_v52 = vpop.f32.mrb[31].mxu0  ;;  %v2781_v43 = vsel %vm2534_vm4, %v2769_v45, -inf }
 0x60f   : > { %2782 = vmax.xlane.f32.xlu0 %v2781_v43  ;;  %v2974_v52 = vsel %vm2439_vm1, %v13913_v63, 0 }
 0x610   : > { %v2784_v16 = vsel %vm2534_vm4, %v2772_v49, -inf }
 0x613   : > { %2785 = vmax.xlane.f32.xlu0 %v2784_v16 }
 0x689   : > { %v2777_v57 = vpop.xlane.xlu0 %2776 }
 0x68a   : > { %v2787_v29 = vsub.f32 %v2716_v17, %v2777_v57 }
 0x68b   : > { %v2780_v55 = vpop.xlane.xlu1 %2779 }
 0x68c   : > { %v2791_v61 = vmul.f32 1.442695, %v2787_v29  ;;  %v2788_v2 = vsub.f32 %v2719_v23, %v2780_v55 }
 0x68e   : > { %13026 = vpow2.f32 %v2791_v61  ;;  %v2793_v3 = vmul.f32 1.442695, %v2788_v2 }
 0x690   : > { %13028 = vpow2.f32 %v2793_v3 }
 0x698   : > { %v13027_v20 = vpop.eup %13026 }
 0x699   : > { %v2799_v9 = vsel %vm2534_vm4, %v13027_v20, 0.0 }
 0x69a   : > { %v13029_v35 = vpop.eup %13028  ;;  %2800 = vadd.xlane.f32.xlu0 %v2799_v9 }
 0x69b   : > { %v2802_v51 = vsel %vm2534_vm4, %v13029_v35, 0.0 }
 0x69c   : > { %v2783_v56 = vpop.xlane.xlu0 %2782  ;;  %2803 = vadd.xlane.f32.xlu1 %v2802_v51 }
 0x69d   : > { %v2789_v4 = vsub.f32 %v2769_v45, %v2783_v56 }
 0x69f   : > { %v2795_v5 = vmul.f32 1.442695, %v2789_v4 }
 0x6a0   : > { %v2786_v6 = vpop.xlane.xlu0 %2785 }
 0x6a1   : > { %13030 = vpow2.f32 %v2795_v5  ;;  %v2790_v7 = vsub.f32 %v2772_v49, %v2786_v6 }
 0x6a3   : > { %v2797_v8 = vmul.f32 1.442695, %v2790_v7 }
 0x6a5   : > { %13032 = vpow2.f32 %v2797_v8 }
 0x6ab   : > { %v13031_v24 = vpop.eup %13030 }
 0x6ac   : > { %v2805_v60 = vsel %vm2534_vm4, %v13031_v24, 0.0 }
 0x6ad   : > { %2806 = vadd.xlane.f32.xlu0 %v2805_v60 }
 0x6af   : > { %v13033_v0 = vpop.eup %13032 }
 0x6b0   : > { %v2808_v15 = vsel %vm2534_vm4, %v13033_v0, 0.0 }
 0x6b1   : > { %2809 = vadd.xlane.f32.xlu1 %v2808_v15 }
 0x6c2   : > { %2870 = vrot.lane.b32.xlu1 %v13951_v31, %s13435_s8 }
 0x6c3   : > { %2822 = vrot.lane.b32.xlu0 %v13945_v22, %s13435_s8 }
 0x727   : > { %v2801_v17 = vpop.xlane.xlu0 %2800 }
 0x729   : > { %v2804_v62 = vpop.xlane.xlu1 %2803 }
 0x72a   : > { %13034 = vrcp.f32 %v2804_v62 }
 0x72b   : > { %13036 = vrcp.f32 %v2801_v17 }
 0x734   : > { %v13035_v42 = vpop.eup %13034 }
 0x735   : > { %v13037_v23 = vpop.eup %13036  ;;  %v2816_v28 = vmul.f32 %v13035_v42, %v13029_v35 }
 0x736   : > { %v2815_v21 = vmul.f32 %v13037_v23, %v13027_v20 }
 0x738   : > { %v2819_v38 = vpack.c.bf16 %v2816_v28, %v2815_v21 }
 0x73a   : > { %v2807_v18 = vpop.xlane.xlu0 %2806 }
 0x73b   : > { %13038 = vrcp.f32 %v2807_v18 }
 0x73e   : > { %v2823_v30 = vpop.permute.xlu0 %2822  ;;  %v2810_v14 = vpop.xlane.xlu1 %2809 }
 0x73f   : > { %13040 = vrcp.f32 %v2810_v14  ;;  %11303 = vmatpush3.bf16.msra.mxu1 %v2823_v30 }
 0x740   : > { %11314 = vmatprep.subr.bf16.mxu1 %v13432_v26 }
 0x742   : > { %11305 = vmatmul.mubr.msk.bf16.vlgmr.msra.gmra.mrb[36].mxu1 %vm2534_vm4, %v2819_v38  ;;  %v2871_v22 = vpop.permute.xlu1 %2870 }
 0x743   : > { %11309 = vmatpush3.bf16.msra.mxu0 %v2871_v22  ;;  %11316 = vmatprep.mubr.msk.bf16.mxu1 %vm13433_vm0, %v13432_v26 }
 0x744   : > { %11320 = vmatprep.subr.bf16.mxu0 %v13432_v26 }
 0x745   : > { %v13039_v31 = vpop.eup %13038 }
 0x746   : > { %v2817_v46 = vmul.f32 %v13039_v31, %v13031_v24 }
 0x748   : > { %11315 = vmatpush3.bf16.xpose.msra.mxu1 %v2927_v44 }
 0x749   : > { %v13041_v45 = vpop.eup %13040  ;;  %11326 = vmatprep.subr.bf16.mxu1 %v13432_v26 }
 0x74a   : > { %v2818_v47 = vmul.f32 %v13041_v45, %v13033_v0 }
 0x74c   : > { %v2820_v49 = vpack.c.bf16 %v2818_v47, %v2817_v46 }
 0x74e   : > { %11311 = vmatmul.mubr.msk.bf16.vlgmr.msra.gmra.mrb[32].mxu0 %vm2534_vm4, %v2820_v49 }
 0x74f   : > { %11321 = vmatpush3.bf16.xpose.msra.mxu0 %v2974_v52  ;;  %11317 = vmatmul.mubr.msk.bf16.vlgmr.msra.gmra.mrb[40].mxu1 %vm2439_vm1, %v13907_v39 }
 0x750   : > { %11327 = vmatpush3.bf16.msra.mxu1 %v13947_v27  ;;  %11322 = vmatprep.mubr.msk.bf16.mxu0 %vm13433_vm0, %v13432_v26 }
 0x751   : > { %11332 = vmatprep.subr.bf16.mxu0 %v13432_v26  ;;  %11328 = vmatprep.mubr.msk.bf16.mxu1 %vm13433_vm0, %v13432_v26 }
 0x752   : > { %11338 = vmatprep.subr.bf16.mxu1 %v13432_v26 }
 0x756   : > { %11323 = vmatmul.mubr.msk.bf16.vlgmr.msra.gmra.mrb[36].mxu0 %vm2439_vm1, %v13916_v53 }
 0x757   : > { %11333 = vmatpush3.bf16.msra.mxu0 %v13953_v33  ;;  %11334 = vmatprep.mubr.msk.bf16.mxu0 %vm13433_vm0, %v13432_v26 }
 0x758   : > { %11344 = vmatprep.subr.bf16.mxu0 %v13432_v26 }
 0x815   : > { %v14054_v43 = vpop.f32.mrb[36].mxu1 }
 0x816   : > { %v11306_v16 = vpop.f32.mrb[37].mxu1 }
 0x817   : > { %v14056_v57 = vpop.f32.mrb[38].mxu1 }
 0x818   : > { %v11753_v29 = vpack.i.bf16 %v14056_v57, %v14054_v43  ;;  %v11307_v55 = vpop.f32.mrb[39].mxu1  ;;  %v12090_v43 = vld [vmem:[#allocation8] ss:$12 sps:$4 sm:$0xff]  }
 0x821   : > { %v14060_v61 = vpop.f32.mrb[32].mxu0 }
 0x822   : > { %v11312_v2 = vpop.f32.mrb[33].mxu0  ;;  %v2963_v3 = vpop.f32.mrb[40].mxu1 }
 0x823   : > { %v2964_v20 = vadd.f32 %v2963_v3, %v13964_v59  ;;  %v14063_v9 = vpop.f32.mrb[34].mxu0  ;;  %v11318_v35 = vpop.f32.mrb[41].mxu1 }
 0x824   : > { %v11763_v51 = vpack.i.bf16 %v14063_v9, %v14060_v61  ;;  %v11313_v56 = vpop.f32.mrb[35].mxu0  ;;  %v2966_v4 = vpop.f32.mrb[42].mxu1  ;;  %v12099_v61 = vld [vmem:[#allocation8 + $0xc8] ss:$12 sps:$4 sm:$0xff]  }
 0x825   : > { %v2967_v5 = vadd.f32 %v2966_v4, %v13966_v58  ;;  %v11319_v6 = vpop.f32.mrb[43].mxu1  ;;  %v3017_v7 = vsel %vm2534_vm4, %v2964_v20, -inf }
 0x826   : > { %3018 = vmax.xlane.f32.xlu1 %v3017_v7 }
 0x827   : > { %v3020_v8 = vsel %vm2534_vm4, %v2967_v5, -inf }
 0x828   : > { %3021 = vmax.xlane.f32.xlu0 %v3020_v8 }
 0x829   : > { %v3010_v24 = vpop.f32.mrb[36].mxu0 }
 0x82a   : > { %v3011_v60 = vadd.f32 %v3010_v24, %v13964_v59  ;;  %v11324_v0 = vpop.f32.mrb[37].mxu0 }
 0x82b   : > { %v3013_v15 = vpop.f32.mrb[38].mxu0 }
 0x82c   : > { %v3014_v62 = vadd.f32 %v3013_v15, %v13966_v58  ;;  %v11325_v17 = vpop.f32.mrb[39].mxu0  ;;  %v3023_v42 = vsel %vm2534_vm4, %v3011_v60, -inf }
 0x82d   : > { %3024 = vmax.xlane.f32.xlu0 %v3023_v42 }
 0x82e   : > { %v3026_v18 = vsel %vm2534_vm4, %v3014_v62, -inf }
 0x82f   : > { %3027 = vmax.xlane.f32.xlu1 %v3026_v18 }
 0x8b3   : > { %v3019_v23 = vpop.xlane.xlu1 %3018 }
 0x8b4   : > { %v3029_v28 = vsub.f32 %v2964_v20, %v3019_v23 }
 0x8b5   : > { %v3022_v21 = vpop.xlane.xlu0 %3021 }
 0x8b6   : > { %v3033_v30 = vmul.f32 1.442695, %v3029_v28  ;;  %v3030_v14 = vsub.f32 %v2967_v5, %v3022_v21 }
 0x8b8   : > { %13042 = vpow2.f32 %v3033_v30  ;;  %v3035_v38 = vmul.f32 1.442695, %v3030_v14 }
 0x8ba   : > { %13044 = vpow2.f32 %v3035_v38  ;;  %v3025_v22 = vpop.xlane.xlu0 %3024 }
 0x8bb   : > { %v3031_v31 = vsub.f32 %v3011_v60, %v3025_v22 }
 0x8bc   : > { %v3028_v55 = vpop.xlane.xlu1 %3027 }
 0x8bd   : > { %v3037_v44 = vmul.f32 1.442695, %v3031_v31  ;;  %v3032_v2 = vsub.f32 %v3014_v62, %v3028_v55 }
 0x8bf   : > { %13046 = vpow2.f32 %v3037_v44  ;;  %v3039_v3 = vmul.f32 1.442695, %v3032_v2 }
 0x8c1   : > { %13048 = vpow2.f32 %v3039_v3 }
 0x8c2   : > { %v13043_v45 = vpop.eup %13042 }
 0x8c3   : > { %v3041_v46 = vsel %vm2534_vm4, %v13043_v45, 0.0 }
 0x8c4   : > { %v13045_v47 = vpop.eup %13044  ;;  %3042 = vadd.xlane.f32.xlu0 %v3041_v46 }
 0x8c5   : > { %v3044_v49 = vsel %vm2534_vm4, %v13045_v47, 0.0 }
 0x8c6   : > { %3045 = vadd.xlane.f32.xlu1 %v3044_v49 }
 0x8c9   : > { %v13047_v52 = vpop.eup %13046 }
 0x8ca   : > { %v3047_v16 = vsel %vm2534_vm4, %v13047_v52, 0.0 }
 0x8cb   : > { %3048 = vadd.xlane.f32.xlu0 %v3047_v16  ;;  %v13049_v20 = vpop.eup %13048 }
 0x8cc   : > { %v3050_v35 = vsel %vm2534_vm4, %v13049_v20, 0.0 }
 0x8d7   : > { %3208 = vrot.lane.b32.xlu1 %v13913_v63, %s13435_s8 }
 0x8e1   : > { %3155 = vrot.lane.b32.xlu0 %v13905_v36, %s13435_s8 }
 0x8fb   : > { %3051 = vadd.xlane.f32.xlu1 %v3050_v35 }
 0x90c   : > { %3152 = vrot.lane.b32.xlu1 %v13907_v39, %s13435_s8 }
 0x910   : > { %3205 = vrot.lane.b32.xlu1 %v13916_v53, %s13435_s8 }
 0x951   : > { %v3043_v56 = vpop.xlane.xlu0 %3042 }
 0x952   : > { %13050 = vrcp.f32 %v3043_v56 }
 0x953   : > { %v3046_v63 = vpop.xlane.xlu1 %3045 }
 0x954   : > { %13052 = vrcp.f32 %v3046_v63 }
 0x957   : > { %v3209_v39 = vpop.permute.xlu1 %3208 }
 0x958   : > { %v3049_v4 = vpop.xlane.xlu0 %3048  ;;  %v3214_v23 = vsel %vm2439_vm1, %v3209_v39, 0 }
 0x959   : > { %13054 = vrcp.f32 %v3049_v4 }
 0x95c   : > { %v13051_v36 = vpop.eup %13050  ;;  %v3156_v8 = vpop.permute.xlu0 %3155 }
 0x95d   : > { %v3057_v6 = vmul.f32 %v13051_v36, %v13043_v45  ;;  %v3161_v60 = vsel %vm2439_vm1, %v3156_v8, 0 }
 0x95e   : > { %v13053_v5 = vpop.eup %13052 }
 0x95f   : > { %v3058_v7 = vmul.f32 %v13053_v5, %v13045_v47 }
 0x961   : > { %v3061_v24 = vpack.c.bf16 %v3058_v7, %v3057_v6 }
 0x963   : > { %11329 = vmatmul.mubr.msk.bf16.vlgmr.msra.gmra.mrb[44].mxu1 %vm2534_vm4, %v3061_v24  ;;  %v13055_v15 = vpop.eup %13054 }
 0x964   : > { %11339 = vmatpush3.bf16.xpose.msra.mxu1 %v3161_v60  ;;  %11340 = vmatprep.mubr.msk.bf16.mxu1 %vm13433_vm0, %v13432_v26  ;;  %v3059_v17 = vmul.f32 %v13055_v15, %v13047_v52 }
 0x965   : > { %11350 = vmatprep.subr.bf16.mxu1 %v13432_v26 }
 0x988   : > { %v3052_v53 = vpop.xlane.xlu1 %3051 }
 0x989   : > { %13056 = vrcp.f32 %v3052_v53 }
 0x98c   : > { %v3153_v0 = vpop.permute.xlu1 %3152 }
 0x98d   : > { %11341 = vmatmul.mubr.msk.bf16.vlgmr.msra.gmra.mrb[48].mxu1 %vm2439_vm1, %v3153_v0 }
 0x98e   : > { %11352 = vmatprep.mubr.msk.bf16.mxu1 %vm13433_vm0, %v13432_v26 }
 0x990   : > { %v3206_v28 = vpop.permute.xlu1 %3205 }
 0x993   : > { %v13057_v62 = vpop.eup %13056 }
 0x994   : > { %v3060_v42 = vmul.f32 %v13057_v62, %v13049_v20 }
 0x996   : > { %v3062_v18 = vpack.c.bf16 %v3060_v42, %v3059_v17 }
 0x998   : > { %11335 = vmatmul.mubr.msk.bf16.vlgmr.msra.gmra.mrb[40].mxu0 %vm2534_vm4, %v3062_v18 }
 0x999   : > { %11345 = vmatpush3.bf16.xpose.msra.mxu0 %v3214_v23  ;;  %11346 = vmatprep.mubr.msk.bf16.mxu0 %vm13433_vm0, %v13432_v26 }
 0x99a   : > { %11356 = vmatprep.subr.bf16.mxu0 %v13432_v26 }
 0x9a0   : > { %11347 = vmatmul.mubr.msk.bf16.vlgmr.msra.gmra.mrb[44].mxu0 %vm2439_vm1, %v3206_v28 }
 0x9a1   : > { %11358 = vmatprep.mubr.msk.bf16.mxu0 %vm13433_vm0, %v13432_v26 }
 0xa36   : > { %v14102_v21 = vpop.f32.mrb[44].mxu1 }
 0xa37   : > { %v11330_v30 = vpop.f32.mrb[45].mxu1 }
 0xa38   : > { %v14104_v14 = vpop.f32.mrb[46].mxu1 }
 0xa39   : > { %v11331_v38 = vpop.f32.mrb[47].mxu1 }
 0xa60   : > { %v3197_v22 = vpop.f32.mrb[48].mxu1 }
 0xa61   : > { %v3198_v31 = vadd.f32 %v3197_v22, %v13964_v59  ;;  %v11342_v44 = vpop.f32.mrb[49].mxu1 }
 0xa62   : > { %v3200_v45 = vpop.f32.mrb[50].mxu1 }
 0xa63   : > { %v3201_v46 = vadd.f32 %v3200_v45, %v13966_v58  ;;  %v11343_v47 = vpop.f32.mrb[51].mxu1  ;;  %v3257_v49 = vsel %vm2534_vm4, %v3198_v31, -inf }
 0xa64   : > { %3258 = vmax.xlane.f32.xlu0 %v3257_v49 }
 0xa65   : > { %v3260_v52 = vsel %vm2534_vm4, %v3201_v46, -inf }
 0xa66   : > { %3261 = vmax.xlane.f32.xlu1 %v3260_v52 }
 0xa6b   : > { %v14110_v16 = vpop.f32.mrb[40].mxu0 }
 0xa6c   : > { %v11336_v55 = vpop.f32.mrb[41].mxu0 }
 0xa6d   : > { %v14112_v2 = vpop.f32.mrb[42].mxu0 }
 0xa6e   : > { %v11337_v3 = vpop.f32.mrb[43].mxu0 }
 0xa73   : > { %v3250_v20 = vpop.f32.mrb[44].mxu0 }
 0xa74   : > { %v3251_v35 = vadd.f32 %v3250_v20, %v13964_v59  ;;  %v11348_v56 = vpop.f32.mrb[45].mxu0 }
 0xa75   : > { %v3253_v63 = vpop.f32.mrb[46].mxu0 }
 0xa76   : > { %v3254_v4 = vadd.f32 %v3253_v63, %v13966_v58  ;;  %v11349_v36 = vpop.f32.mrb[47].mxu0  ;;  %v3263_v5 = vsel %vm2534_vm4, %v3251_v35, -inf }
 0xa77   : > { %3264 = vmax.xlane.f32.xlu0 %v3263_v5 }
 0xa78   : > { %v3266_v6 = vsel %vm2534_vm4, %v3254_v4, -inf }
 0xa7b   : > { %3267 = vmax.xlane.f32.xlu0 %v3266_v6 }
 0xaf1   : > { %v3259_v7 = vpop.xlane.xlu0 %3258 }
 0xaf2   : > { %v3269_v8 = vsub.f32 %v3198_v31, %v3259_v7 }
 0xaf3   : > { %v3262_v24 = vpop.xlane.xlu1 %3261 }
 0xaf4   : > { %v3273_v60 = vmul.f32 1.442695, %v3269_v8  ;;  %v3270_v39 = vsub.f32 %v3201_v46, %v3262_v24  ;;  %v3456_v8 = vsel %vm2439_vm1, %v13918_v54, 0 }
 0xaf6   : > { %13058 = vpow2.f32 %v3273_v60  ;;  %v3275_v53 = vmul.f32 1.442695, %v3270_v39 }
 0xaf8   : > { %13060 = vpow2.f32 %v3275_v53 }
 0xb00   : > { %v13059_v0 = vpop.eup %13058 }
 0xb01   : > { %v3281_v15 = vsel %vm2534_vm4, %v13059_v0, 0.0 }
 0xb02   : > { %v13061_v62 = vpop.eup %13060  ;;  %3282 = vadd.xlane.f32.xlu0 %v3281_v15 }
 0xb03   : > { %v3284_v17 = vsel %vm2534_vm4, %v13061_v62, 0.0 }
 0xb04   : > { %v3265_v42 = vpop.xlane.xlu0 %3264  ;;  %3285 = vadd.xlane.f32.xlu1 %v3284_v17 }
 0xb05   : > { %v3271_v18 = vsub.f32 %v3251_v35, %v3265_v42 }
 0xb07   : > { %v3277_v23 = vmul.f32 1.442695, %v3271_v18 }
 0xb08   : > { %v3268_v28 = vpop.xlane.xlu0 %3267 }
 0xb09   : > { %13062 = vpow2.f32 %v3277_v23  ;;  %v3272_v30 = vsub.f32 %v3254_v4, %v3268_v28  ;;  %v3409_v4 = vsel %vm2439_vm1, %v13909_v40, 0 }
 0xb0b   : > { %v3279_v38 = vmul.f32 1.442695, %v3272_v30 }
 0xb0d   : > { %13064 = vpow2.f32 %v3279_v38 }
 0xb13   : > { %v13063_v22 = vpop.eup %13062 }
 0xb14   : > { %v3287_v31 = vsel %vm2534_vm4, %v13063_v22, 0.0 }
 0xb15   : > { %3288 = vadd.xlane.f32.xlu0 %v3287_v31 }
 0xb17   : > { %v13065_v44 = vpop.eup %13064 }
 0xb18   : > { %v3290_v45 = vsel %vm2534_vm4, %v13065_v44, 0.0 }
 0xb19   : > { %3291 = vadd.xlane.f32.xlu1 %v3290_v45 }
 0xb2a   : > { %3352 = vrot.lane.b32.xlu1 %v13953_v33, %s13435_s8 }
 0xb2b   : > { %3304 = vrot.lane.b32.xlu0 %v13947_v27, %s13435_s8 }
 0xb8f   : > { %v3283_v47 = vpop.xlane.xlu0 %3282 }
 0xb91   : > { %v3286_v46 = vpop.xlane.xlu1 %3285 }
 0xb92   : > { %13066 = vrcp.f32 %v3286_v46 }
 0xb93   : > { %13068 = vrcp.f32 %v3283_v47 }
 0xb9c   : > { %v13067_v49 = vpop.eup %13066 }
 0xb9d   : > { %v13069_v55 = vpop.eup %13068  ;;  %v3298_v3 = vmul.f32 %v13067_v49, %v13061_v62 }
 0xb9e   : > { %v3297_v20 = vmul.f32 %v13069_v55, %v13059_v0 }
 0xba0   : > { %v3301_v63 = vpack.c.bf16 %v3298_v3, %v3297_v20 }
 0xba2   : > { %v3289_v52 = vpop.xlane.xlu0 %3288 }
 0xba3   : > { %13070 = vrcp.f32 %v3289_v52 }
 0xba6   : > { %v3305_v35 = vpop.permute.xlu0 %3304  ;;  %v3292_v56 = vpop.xlane.xlu1 %3291 }
 0xba7   : > { %13072 = vrcp.f32 %v3292_v56  ;;  %11351 = vmatpush3.bf16.msra.mxu1 %v3305_v35 }
 0xba8   : > { %11362 = vmatprep.subr.bf16.mxu1 %v13432_v26 }
 0xbaa   : > { %11353 = vmatmul.mubr.msk.bf16.vlgmr.msra.gmra.mrb[52].mxu1 %vm2534_vm4, %v3301_v63  ;;  %v3353_v27 = vpop.permute.xlu1 %3352 }
 0xbab   : > { %11357 = vmatpush3.bf16.msra.mxu0 %v3353_v27  ;;  %11364 = vmatprep.mubr.msk.bf16.mxu1 %vm13433_vm0, %v13432_v26 }
 0xbac   : > { %11368 = vmatprep.subr.bf16.mxu0 %v13432_v26 }
 0xbad   : > { %v13071_v33 = vpop.eup %13070 }
 0xbae   : > { %v3299_v5 = vmul.f32 %v13071_v33, %v13063_v22 }
 0xbb0   : > { %11363 = vmatpush3.bf16.xpose.msra.mxu1 %v3409_v4 }
 0xbb1   : > { %v13073_v36 = vpop.eup %13072  ;;  %11374 = vmatprep.subr.bf16.mxu1 %v13432_v26 }
 0xbb2   : > { %v3300_v6 = vmul.f32 %v13073_v36, %v13065_v44 }
 0xbb4   : > { %v3302_v7 = vpack.c.bf16 %v3300_v6, %v3299_v5 }
 0xbb6   : > { %11359 = vmatmul.mubr.msk.bf16.vlgmr.msra.gmra.mrb[48].mxu0 %vm2534_vm4, %v3302_v7 }
 0xbb7   : > { %11369 = vmatpush3.bf16.xpose.msra.mxu0 %v3456_v8  ;;  %11365 = vmatmul.mubr.msk.bf16.vlgmr.msra.gmra.mrb[56].mxu1 %vm2439_vm1, %v13923_v12 }
 0xbb8   : > { %11375 = vmatpush3.bf16.msra.mxu1 %v13959_v48  ;;  %11370 = vmatprep.mubr.msk.bf16.mxu0 %vm13433_vm0, %v13432_v26 }
 0xbb9   : > { %11380 = vmatprep.subr.bf16.mxu0 %v13432_v26  ;;  %11376 = vmatprep.mubr.msk.bf16.mxu1 %vm13433_vm0, %v13432_v26 }
 0xbba   : > { %11386 = vmatprep.subr.bf16.mxu1 %v13432_v26 }
 0xbbe   : > { %11371 = vmatmul.mubr.msk.bf16.vlgmr.msra.gmra.mrb[52].mxu0 %vm2439_vm1, %v13930_v19 }
 0xbbf   : > { %11381 = vmatpush3.bf16.msra.mxu0 %v13957_v50  ;;  %11382 = vmatprep.mubr.msk.bf16.mxu0 %vm13433_vm0, %v13432_v26 }
 0xbc0   : > { %11392 = vmatprep.subr.bf16.mxu0 %v13432_v26 }
 0xc7d   : > { %v14152_v24 = vpop.f32.mrb[52].mxu1 }
 0xc7e   : > { %v11354_v60 = vpop.f32.mrb[53].mxu1 }
 0xc7f   : > { %v14154_v39 = vpop.f32.mrb[54].mxu1 }
 0xc80   : > { %v11748_v53 = vpack.i.bf16 %v14154_v39, %v14152_v24  ;;  %v11355_v0 = vpop.f32.mrb[55].mxu1 }
 0xc89   : > { %v14158_v15 = vpop.f32.mrb[48].mxu0 }
 0xc8a   : > { %v11360_v62 = vpop.f32.mrb[49].mxu0  ;;  %v3445_v17 = vpop.f32.mrb[56].mxu1 }
 0xc8b   : > { %v3446_v42 = vadd.f32 %v3445_v17, %v13964_v59  ;;  %v14161_v18 = vpop.f32.mrb[50].mxu0  ;;  %v11366_v23 = vpop.f32.mrb[57].mxu1 }
 0xc8c   : > { %v11758_v28 = vpack.i.bf16 %v14161_v18, %v14158_v15  ;;  %v11361_v30 = vpop.f32.mrb[51].mxu0  ;;  %v3448_v38 = vpop.f32.mrb[58].mxu1  ;;  %v12092_v15 = vld [vmem:[#allocation8 + $0x4] ss:$12 sps:$4 sm:$0xff]  }
 0xc8d   : > { %v3449_v22 = vadd.f32 %v3448_v38, %v13966_v58  ;;  %v11367_v31 = vpop.f32.mrb[59].mxu1  ;;  %v3499_v44 = vsel %vm2534_vm4, %v3446_v42, -inf }
 0xc8e   : > { %3500 = vmax.xlane.f32.xlu1 %v3499_v44 }
 0xc8f   : > { %v3502_v45 = vsel %vm2534_vm4, %v3449_v22, -inf }
 0xc90   : > { %3503 = vmax.xlane.f32.xlu0 %v3502_v45 }
 0xc91   : > { %v3492_v46 = vpop.f32.mrb[52].mxu0 }
 0xc92   : > { %v3493_v47 = vadd.f32 %v3492_v46, %v13964_v59  ;;  %v11372_v49 = vpop.f32.mrb[53].mxu0 }
 0xc93   : > { %v3495_v52 = vpop.f32.mrb[54].mxu0 }
 0xc94   : > { %v3496_v55 = vadd.f32 %v3495_v52, %v13966_v58  ;;  %v11373_v3 = vpop.f32.mrb[55].mxu0  ;;  %v3505_v20 = vsel %vm2534_vm4, %v3493_v47, -inf }
 0xc95   : > { %3506 = vmax.xlane.f32.xlu0 %v3505_v20 }
 0xc96   : > { %v3508_v35 = vsel %vm2534_vm4, %v3496_v55, -inf }
 0xc97   : > { %3509 = vmax.xlane.f32.xlu1 %v3508_v35 }
 0xd1b   : > { %v3501_v56 = vpop.xlane.xlu1 %3500 }
 0xd1c   : > { %v3511_v63 = vsub.f32 %v3446_v42, %v3501_v56 }
 0xd1d   : > { %v3504_v27 = vpop.xlane.xlu0 %3503 }
 0xd1e   : > { %v3515_v33 = vmul.f32 1.442695, %v3511_v63  ;;  %v3512_v4 = vsub.f32 %v3449_v22, %v3504_v27 }
 0xd20   : > { %13074 = vpow2.f32 %v3515_v33  ;;  %v3517_v36 = vmul.f32 1.442695, %v3512_v4 }
 0xd22   : > { %13076 = vpow2.f32 %v3517_v36  ;;  %v3507_v5 = vpop.xlane.xlu0 %3506 }
 0xd23   : > { %v3513_v6 = vsub.f32 %v3493_v47, %v3507_v5 }
 0xd24   : > { %v3510_v23 = vpop.xlane.xlu1 %3509 }
 0xd25   : > { %v3519_v7 = vmul.f32 1.442695, %v3513_v6  ;;  %v3514_v30 = vsub.f32 %v3496_v55, %v3510_v23 }
 0xd27   : > { %13078 = vpow2.f32 %v3519_v7  ;;  %v3521_v38 = vmul.f32 1.442695, %v3514_v30 }
 0xd29   : > { %13080 = vpow2.f32 %v3521_v38 }
 0xd2a   : > { %v13075_v8 = vpop.eup %13074 }
 0xd2b   : > { %v3523_v60 = vsel %vm2534_vm4, %v13075_v8, 0.0 }
 0xd2c   : > { %v13077_v0 = vpop.eup %13076  ;;  %3524 = vadd.xlane.f32.xlu0 %v3523_v60 }
 0xd2d   : > { %v3526_v62 = vsel %vm2534_vm4, %v13077_v0, 0.0 }
 0xd2e   : > { %3527 = vadd.xlane.f32.xlu1 %v3526_v62 }
 0xd31   : > { %v13079_v17 = vpop.eup %13078 }
 0xd32   : > { %v3529_v42 = vsel %vm2534_vm4, %v13079_v17, 0.0 }
 0xd33   : > { %3530 = vadd.xlane.f32.xlu0 %v3529_v42  ;;  %v13081_v22 = vpop.eup %13080 }
 0xd34   : > { %v3532_v31 = vsel %vm2534_vm4, %v13081_v22, 0.0 }
 0xd3f   : > { %3690 = vrot.lane.b32.xlu1 %v13918_v54, %s13435_s8 }
 0xd49   : > { %3637 = vrot.lane.b32.xlu0 %v13909_v40, %s13435_s8 }
 0xd63   : > { %3533 = vadd.xlane.f32.xlu1 %v3532_v31 }
 0xd74   : > { %3634 = vrot.lane.b32.xlu1 %v13923_v12, %s13435_s8 }
 0xd78   : > { %3687 = vrot.lane.b32.xlu1 %v13930_v19, %s13435_s8 }
 0xdb9   : > { %v3525_v44 = vpop.xlane.xlu0 %3524 }
 0xdba   : > { %13082 = vrcp.f32 %v3525_v44 }
 0xdbb   : > { %v3528_v54 = vpop.xlane.xlu1 %3527 }
 0xdbc   : > { %13084 = vrcp.f32 %v3528_v54 }
 0xdbf   : > { %v3691_v12 = vpop.permute.xlu1 %3690 }
 0xdc0   : > { %v3531_v45 = vpop.xlane.xlu0 %3530  ;;  %v3696_v4 = vsel %vm2439_vm1, %v3691_v12, 0 }
 0xdc1   : > { %13086 = vrcp.f32 %v3531_v45 }
 0xdc4   : > { %v13083_v40 = vpop.eup %13082  ;;  %v3638_v52 = vpop.permute.xlu0 %3637 }
 0xdc5   : > { %v3539_v47 = vmul.f32 %v13083_v40, %v13075_v8  ;;  %v3643_v3 = vsel %vm2439_vm1, %v3638_v52, 0 }
 0xdc6   : > { %v13085_v46 = vpop.eup %13084 }
 0xdc7   : > { %v3540_v49 = vmul.f32 %v13085_v46, %v13077_v0 }
 0xdc9   : > { %v3543_v55 = vpack.c.bf16 %v3540_v49, %v3539_v47 }
 0xdcb   : > { %11377 = vmatmul.mubr.msk.bf16.vlgmr.msra.gmra.mrb[60].mxu1 %vm2534_vm4, %v3543_v55  ;;  %v13087_v35 = vpop.eup %13086 }
 0xdcc   : > { %11387 = vmatpush3.bf16.xpose.msra.mxu1 %v3643_v3  ;;  %11388 = vmatprep.mubr.msk.bf16.mxu1 %vm13433_vm0, %v13432_v26  ;;  %v3541_v63 = vmul.f32 %v13087_v35, %v13079_v17 }
 0xdcd   : > { %11398 = vmatprep.subr.bf16.mxu1 %v13432_v26 }
 0xdf0   : > { %v3534_v19 = vpop.xlane.xlu1 %3533 }
 0xdf1   : > { %13088 = vrcp.f32 %v3534_v19 }
 0xdf4   : > { %v3635_v20 = vpop.permute.xlu1 %3634 }
 0xdf5   : > { %11389 = vmatmul.mubr.msk.bf16.vlgmr.msra.gmra.mrb[64].mxu1 %vm2439_vm1, %v3635_v20 }
 0xdf6   : > { %11400 = vmatprep.mubr.msk.bf16.mxu1 %vm13433_vm0, %v13432_v26 }
 0xdf8   : > { %v3688_v36 = vpop.permute.xlu1 %3687 }
 0xdfb   : > { %v13089_v56 = vpop.eup %13088 }
 0xdfc   : > { %v3542_v27 = vmul.f32 %v13089_v56, %v13081_v22 }
 0xdfe   : > { %v3544_v33 = vpack.c.bf16 %v3542_v27, %v3541_v63 }
 0xe00   : > { %11383 = vmatmul.mubr.msk.bf16.vlgmr.msra.gmra.mrb[56].mxu0 %vm2534_vm4, %v3544_v33 }
 0xe01   : > { %11393 = vmatpush3.bf16.xpose.msra.mxu0 %v3696_v4  ;;  %11394 = vmatprep.mubr.msk.bf16.mxu0 %vm13433_vm0, %v13432_v26 }
 0xe02   : > { %11404 = vmatprep.subr.bf16.mxu0 %v13432_v26 }
 0xe08   : > { %11395 = vmatmul.mubr.msk.bf16.vlgmr.msra.gmra.mrb[60].mxu0 %vm2439_vm1, %v3688_v36 }
 0xe09   : > { %11406 = vmatprep.mubr.msk.bf16.mxu0 %vm13433_vm0, %v13432_v26 }
 0xe9e   : > { %v14200_v5 = vpop.f32.mrb[60].mxu1 }
 0xe9f   : > { %v11378_v6 = vpop.f32.mrb[61].mxu1 }
 0xea0   : > { %v14202_v7 = vpop.f32.mrb[62].mxu1 }
 0xea1   : > { %v11379_v8 = vpop.f32.mrb[63].mxu1 }
 0xec8   : > { %v3679_v60 = vpop.f32.mrb[64].mxu1 }
 0xec9   : > { %v3680_v0 = vadd.f32 %v3679_v60, %v13964_v59  ;;  %v11390_v62 = vpop.f32.mrb[65].mxu1 }
 0xeca   : > { %v3682_v17 = vpop.f32.mrb[66].mxu1 }
 0xecb   : > { %v3683_v42 = vadd.f32 %v3682_v17, %v13966_v58  ;;  %v11391_v23 = vpop.f32.mrb[67].mxu1  ;;  %v3739_v30 = vsel %vm2534_vm4, %v3680_v0, -inf }
 0xecc   : > { %3740 = vmax.xlane.f32.xlu0 %v3739_v30 }
 0xecd   : > { %v3742_v38 = vsel %vm2534_vm4, %v3683_v42, -inf }
 0xece   : > { %3743 = vmax.xlane.f32.xlu1 %v3742_v38 }
 0xed3   : > { %v14208_v26 = vpop.f32.mrb[56].mxu0 }
 0xed4   : > { %v11384_v22 = vpop.f32.mrb[57].mxu0 }
 0xed5   : > { %v14210_v31 = vpop.f32.mrb[58].mxu0 }
 0xed6   : > { %v11385_v44 = vpop.f32.mrb[59].mxu0 }
 0xed7   : > { %v12093_v44 = vld [vmem:[#allocation8 + $0x18] ss:$12 sps:$4 sm:$0xff]  }
 0xedb   : > { %v3732_v54 = vpop.f32.mrb[60].mxu0 }
 0xedc   : > { %v3733_v45 = vadd.f32 %v3732_v54, %v13964_v59  ;;  %v11396_v40 = vpop.f32.mrb[61].mxu0  ;;  %v12098_v54 = vld [vmem:[#allocation8 + $0x34] ss:$12 sps:$4 sm:$0xff]  }
 0xedd   : > { %v3735_v46 = vpop.f32.mrb[62].mxu0 }
 0xede   : > { %v3736_v47 = vadd.f32 %v3735_v46, %v13966_v58  ;;  %v11397_v49 = vpop.f32.mrb[63].mxu0  ;;  %v3745_v52 = vsel %vm2534_vm4, %v3733_v45, -inf }
 0xedf   : > { %3746 = vmax.xlane.f32.xlu0 %v3745_v52 }
 0xee0   : > { %v3748_v55 = vsel %vm2534_vm4, %v3736_v47, -inf }
 0xee3   : > { %3749 = vmax.xlane.f32.xlu0 %v3748_v55 }
 0xf59   : > { %v3741_v3 = vpop.xlane.xlu0 %3740 }
 0xf5a   : > { %v3751_v12 = vsub.f32 %v3680_v0, %v3741_v3  ;;  %v12096_v3 = vld [vmem:[#allocation8 + $0x30] ss:$12 sps:$4 sm:$0xff]  }
 0xf5b   : > { %v3744_v19 = vpop.xlane.xlu1 %3743 }
 0xf5c   : > { %v3755_v20 = vmul.f32 1.442695, %v3751_v12  ;;  %v3752_v35 = vsub.f32 %v3683_v42, %v3744_v19  ;;  %v12102_v12 = vld [vmem:[#allocation8 + $0x4c] ss:$12 sps:$4 sm:$0xff]  }
 0xf5e   : > { %13090 = vpow2.f32 %v3755_v20  ;;  %v3757_v56 = vmul.f32 1.442695, %v3752_v35 }
 0xf60   : > { %13092 = vpow2.f32 %v3757_v56 }
 0xf68   : > { %v13091_v59 = vpop.eup %13090 }
 0xf69   : > { %v3763_v63 = vsel %vm2534_vm4, %v13091_v59, 0.0 }
 0xf6a   : > { %v13093_v27 = vpop.eup %13092  ;;  %3764 = vadd.xlane.f32.xlu0 %v3763_v63 }
 0xf6b   : > { %v3766_v58 = vsel %vm2534_vm4, %v13093_v27, 0.0 }
 0xf6c   : > { %v3747_v33 = vpop.xlane.xlu0 %3746  ;;  %3767 = vadd.xlane.f32.xlu1 %v3766_v58  ;;  %v12100_v58 = vld [vmem:[#allocation8 + $0x48] ss:$12 sps:$4 sm:$0xff]  }
 0xf6d   : > { %v3753_v4 = vsub.f32 %v3733_v45, %v3747_v33  ;;  %v12103_v33 = vld [vmem:[#allocation8 + $0x8] ss:$12 sps:$4 sm:$0xff]  }
 0xf6f   : > { %v3759_v36 = vmul.f32 1.442695, %v3753_v4 }
 0xf70   : > { %v3750_v6 = vpop.xlane.xlu0 %3749 }
 0xf71   : > { %13094 = vpow2.f32 %v3759_v36  ;;  %v3754_v8 = vsub.f32 %v3736_v47, %v3750_v6  ;;  %v12104_v36 = vld [vmem:[#allocation8 + $0xe0] ss:$12 sps:$4 sm:$0xff]  }
 0xf73   : > { %v3761_v60 = vmul.f32 1.442695, %v3754_v8 }
 0xf75   : > { %13096 = vpow2.f32 %v3761_v60 }
 0xf7b   : > { %v13095_v0 = vpop.eup %13094 }
 0xf7c   : > { %v3769_v62 = vsel %vm2534_vm4, %v13095_v0, 0.0 }
 0xf7d   : > { %3770 = vadd.xlane.f32.xlu0 %v3769_v62 }
 0xf7f   : > { %v13097_v17 = vpop.eup %13096 }
 0xf80   : > { %v3772_v42 = vsel %vm2534_vm4, %v13097_v17, 0.0 }
 0xf81   : > { %3773 = vadd.xlane.f32.xlu1 %v3772_v42  ;;  %v12108_v42 = vld [vmem:[#allocation8 + $0x20] ss:$12 sps:$4 sm:$0xff]  }
 0xf92   : > { %3834 = vrot.lane.b32.xlu1 %v13957_v50, %s13435_s8 }
 0xf93   : > { %3786 = vrot.lane.b32.xlu0 %v13959_v48, %s13435_s8 }
 0xf96   : > { %11749 = vrot.lane.b32.xlu1 %v11748_v53, %s13435_s8 }
 0xf97   : > { %11759 = vrot.lane.b32.xlu0 %v11758_v28, %s13435_s8 }
 0xf9a   : > { %11754 = vrot.lane.b32.xlu1 %v11753_v29, %s13435_s8  ;;  %v12095_v29 = vld [vmem:[#allocation8 + $0x1c] ss:$12 sps:$4 sm:$0xff]  }
 0xf9e   : > { %11764 = vrot.lane.b32.xlu1 %v11763_v51, %s13435_s8 }
 0xff7   : > { %v3765_v48 = vpop.xlane.xlu0 %3764 }
 0xff9   : > { %v3768_v50 = vpop.xlane.xlu1 %3767 }
 0xffa   : > { %13098 = vrcp.f32 %v3768_v50  ;;  %v12109_v50 = vld [vmem:[#allocation8 + $0xf8] ss:$12 sps:$4 sm:$0xff]  }
 0xffb   : > { %13100 = vrcp.f32 %v3765_v48  ;;  %v12112_v48 = vld [vmem:[#allocation8 + $0x7c] ss:$12 sps:$4 sm:$0xff]  }
0x1004   : > { %v13099_v24 = vpop.eup %13098 }
0x1005   : > { %v13101_v53 = vpop.eup %13100  ;;  %v3780_v23 = vmul.f32 %v13099_v24, %v13093_v27 }
0x1006   : > { %v3779_v18 = vmul.f32 %v13101_v53, %v13091_v59  ;;  %v12113_v53 = vld [vmem:[#allocation8 + $0x38] ss:$12 sps:$4 sm:$0xff]  }
0x1008   : > { %v3783_v57 = vpack.c.bf16 %v3780_v23, %v3779_v18  ;;  %v12114_v23 = vld [vmem:[#allocation8 + $0x110] ss:$12 sps:$4 sm:$0xff]  }
0x1009   : > { %v12115_v18 = vld [vmem:[#allocation8 + $0x90] ss:$12 sps:$4 sm:$0xff]  }
0x100a   : > { %v3771_v39 = vpop.xlane.xlu0 %3770 }
0x100b   : > { %13102 = vrcp.f32 %v3771_v39  ;;  %v12110_v39 = vld [vmem:[#allocation8 + $0x78] ss:$12 sps:$4 sm:$0xff]  }
0x100e   : > { %v3787_v28 = vpop.permute.xlu0 %3786  ;;  %v3774_v30 = vpop.xlane.xlu1 %3773 }
0x100f   : > { %13104 = vrcp.f32 %v3774_v30  ;;  %11399 = vmatpush3.bf16.msra.mxu1 %v3787_v28  ;;  %v12118_v28 = vld [vmem:[#allocation8 + $0x50] ss:$12 sps:$4 sm:$0xff]   ;;  %v12122_v30 = vld [vmem:[#allocation8 + $0xac] ss:$12 sps:$4 sm:$0xff]  }
0x1010   : > { %4445 = vmatprep.subr.bf16.mxu1 %v12092_v15  ;;  %v12117_v15 = vld [vmem:[#allocation8 + $0x94] ss:$12 sps:$4 sm:$0xff]  }
0x1012   : > { %v11760_v9 = vpop.permute.xlu0 %11759  ;;  %11401 = vmatmul.mubr.msk.bf16.vlgmr.msra.gmra.mrb[68].mxu1 %vm2534_vm4, %v3783_v57  ;;  %v3835_v51 = vpop.permute.xlu1 %3834  ;;  %v12124_v57 = vld [vmem:[#allocation8 + $0x140] ss:$12 sps:$4 sm:$0xff]  }
0x1013   : > { %v11762_v38 = vunpack.i.h.bf16 %v11760_v9  ;;  %v11761_v22 = vunpack.i.l.bf16 %v11760_v9  ;;  %11405 = vmatpush3.bf16.msra.mxu0 %v3835_v51  ;;  %4446 = vmatpush1.bf16.msra.mxu1 %v12090_v43  ;;  %v12123_v43 = vld [vmem:[#allocation8 + $0x68] ss:$12 sps:$4 sm:$0xff]   ;;  %v12128_v9 = vld [vmem:[#allocation8 + $0x80] ss:$12 sps:$4 sm:$0xff]   ;;  %v12129_v51 = vld [vmem:[#allocation8 + $0x158] ss:$12 sps:$4 sm:$0xff]  }
0x1014   : > { %4447 = vmatprep.subr.bf16.mxu1 %v12095_v29  ;;  %11040 = vmatprep.subr.bf16.mxu0 %v12099_v61  ;;  %v12127_v29 = vld [vmem:[#allocation8 + $0xc4] ss:$12 sps:$4 sm:$0xff]   ;;  %v12125_v61 = vld [vmem:[#allocation8 + $0xc0] ss:$12 sps:$4 sm:$0xff]  }
0x1015   : > { %v3935_v45 = vsel %vm2439_vm1, %v14110_v16, %v11761_v22  ;;  %v3936_v40 = vsel %vm2439_vm1, %v14112_v2, %v11762_v38  ;;  %v13103_v49 = vpop.eup %13102  ;;  %v12132_v38 = vld [vmem:[#allocation8 + $0xdc] ss:$12 sps:$4 sm:$0xff]   ;;  %v12130_v22 = vld [vmem:[#allocation8 + $0xd8] ss:$12 sps:$4 sm:$0xff]  }
0x1016   : > { %v11750_v46 = vpop.permute.xlu1 %11749  ;;  %v14245_v47 = vpack.c.bf16 %v3936_v40, %v3935_v45  ;;  %v3781_v35 = vmul.f32 %v13103_v49, %v13095_v0  ;;  %v12137_v45 = vld [vmem:[#allocation8 + $0xf4] ss:$12 sps:$4 sm:$0xff]   ;;  %v12135_v40 = vld [vmem:[#allocation8 + $0xf0] ss:$12 sps:$4 sm:$0xff]   ;;  %v12141_v49 = vld [vmem:[#allocation8 + $0x10c] ss:$12 sps:$4 sm:$0xff]  }
0x1017   : > { %v11752_v52 = vunpack.i.h.bf16 %v11750_v46  ;;  %v11751_v55 = vunpack.i.l.bf16 %v11750_v46  ;;  %4448 = vmatpush1.bf16.msra.mxu1 %v12093_v44  ;;  %v12133_v44 = vld [vmem:[#allocation8 + $0x98] ss:$12 sps:$4 sm:$0xff]   ;;  %v12138_v46 = vld [vmem:[#allocation8 + $0xb0] ss:$12 sps:$4 sm:$0xff]  }
0x1018   : > { %4449 = vmatprep.subr.bf16.mxu1 %v12098_v54  ;;  %v12134_v54 = vld [vmem:[#allocation8 + $0x170] ss:$12 sps:$4 sm:$0xff]  }
0x1019   : > { %v13105_v19 = vpop.eup %13104  ;;  %v3933_v20 = vsel %vm2439_vm1, %v14102_v21, %v11751_v55  ;;  %v3934_v16 = vsel %vm2439_vm1, %v14104_v14, %v11752_v52  ;;  %v12107_v14 = vld [vmem:[#allocation8 + $0x64] ss:$12 sps:$4 sm:$0xff]   ;;  %v12139_v52 = vld [vmem:[#allocation8 + $0x108] ss:$12 sps:$4 sm:$0xff]  }
0x101a   : > { %v3782_v56 = vmul.f32 %v13105_v19, %v13097_v17  ;;  %v11755_v2 = vpop.permute.xlu1 %11754  ;;  %v3942_v59 = vpack.c.bf16 %v3934_v16, %v3933_v20  ;;  %v12105_v17 = vld [vmem:[#allocation8 + $0x60] ss:$12 sps:$4 sm:$0xff]   ;;  %v12144_v55 = vld [vmem:[#allocation8 + $0x124] ss:$12 sps:$4 sm:$0xff]  }
0x101b   : > { %v11757_v63 = vunpack.i.h.bf16 %v11755_v2  ;;  %v11756_v27 = vunpack.i.l.bf16 %v11755_v2  ;;  %4450 = vmatpush1.bf16.msra.mxu1 %v12096_v3  ;;  %v12142_v3 = vld [vmem:[#allocation8 + $0x120] ss:$12 sps:$4 sm:$0xff]   ;;  %v12145_v19 = vld [vmem:[#allocation8 + $0x138] ss:$12 sps:$4 sm:$0xff]   ;;  %v12148_v16 = vld [vmem:[#allocation8 + $0x150] ss:$12 sps:$4 sm:$0xff]  }
0x101c   : > { %4477 = vmatprep.mubr.bf16.mxu1 %v3942_v59  ;;  %v3784_v4 = vpack.c.bf16 %v3782_v56, %v3781_v35  ;;  %4451 = vmatprep.subr.bf16.mxu1 %v12102_v12  ;;  %v12147_v12 = vld [vmem:[#allocation8 + $0x13c] ss:$12 sps:$4 sm:$0xff]   ;;  %v12150_v20 = vld [vmem:[#allocation8 + $0x154] ss:$12 sps:$4 sm:$0xff]   ;;  %v12153_v35 = vld [vmem:[#allocation8 + $0x16c] ss:$12 sps:$4 sm:$0xff]  }
0x101d   : > { %v3930_v6 = vsel %vm2439_vm1, %v14006_v25, %v11757_v63  ;;  %v3929_v21 = vsel %vm2439_vm1, %v14004_v13, %v11756_v27  ;;  %v12151_v56 = vld [vmem:[#allocation8 + $0x168] ss:$12 sps:$4 sm:$0xff]   ;;  %v12154_v2 = vld [vmem:[#allocation8 + $0x180] ss:$12 sps:$4 sm:$0xff]  }
0x101e   : > { %v14255_v8 = vpack.c.bf16 %v3930_v6, %v3929_v21  ;;  %11407 = vmatmul.mubr.msk.bf16.vlgmr.msra.gmra.mrb[64].mxu0 %vm2534_vm4, %v3784_v4  ;;  %v11765_v60 = vpop.permute.xlu1 %11764  ;;  %v12159_v63 = vld [vmem:[#allocation8 + $0x19c] ss:$12 sps:$4 sm:$0xff]   ;;  %v12162_v4 = vld [vmem:[#allocation8 + $0x1b4] ss:$12 sps:$4 sm:$0xff]   ;;  %v12165_v6 = vld [vmem:[#allocation8 + $0x1cc] ss:$12 sps:$4 sm:$0xff]  }
0x101f   : > { %11041 = vmatpush3.bf16.msra.mxu0 %v12103_v33  ;;  %v11767_v0 = vunpack.i.h.bf16 %v11765_v60  ;;  %v11766_v62 = vunpack.i.l.bf16 %v11765_v60  ;;  %4452 = vmatpush1.bf16.msra.mxu1 %v12100_v58  ;;  %v12166_v27 = vld [vmem:[#allocation8 + $0x188] ss:$12 sps:$4 sm:$0xff]   ;;  %v12157_v58 = vld [vmem:[#allocation8 + $0x198] ss:$12 sps:$4 sm:$0xff]   ;;  %v12170_v33 = vld [vmem:[#allocation8 + $0x1a0] ss:$12 sps:$4 sm:$0xff]  }
0x1020   : > { %4583 = vmatprep.mubr.bf16.mxu0 %v3942_v59  ;;  %11042 = vmatprep.subr.bf16.mxu0 %v12104_v36  ;;  %v12156_v59 = vld [vmem:[#allocation8 + $0x184] ss:$12 sps:$4 sm:$0xff]   ;;  %v12167_v60 = vld [vmem:[#allocation8 + $0x1e0] ss:$12 sps:$4 sm:$0xff]  }
0x1021   : > { %4453 = vmatprep.subr.bf16.mxu1 %v12107_v14  ;;  %v3931_v13 = vsel %vm2439_vm1, %v14012_v32, %v11766_v62  ;;  %v3932_v25 = vsel %vm2439_vm1, %v14014_v37, %v11767_v0  ;;  %v12119_v32 = vld [vmem:[#allocation8 + $0x128] ss:$12 sps:$4 sm:$0xff]   ;;  %v12174_v36 = vld [vmem:[#allocation8 + $0x1b8] ss:$12 sps:$4 sm:$0xff]   ;;  %v12178_v21 = vld [vmem:[#allocation8 + $0x1d0] ss:$12 sps:$4 sm:$0xff]  }
0x1022   : > { %v14262_v24 = vpack.c.bf16 %v3932_v25, %v3931_v13  ;;  %v12120_v37 = vld [vmem:[#allocation8 + $0xa8] ss:$12 sps:$4 sm:$0xff]   ;;  %v12171_v62 = vld [vmem:[#allocation8 + $0x1f8] ss:$12 sps:$4 sm:$0xff]   ;;  %v12183_v25 = vld [vmem:[#allocation8 + $0x200] ss:$12 sps:$4 sm:$0xff]  }
0x1023   : > { %11043 = vmatpush3.bf16.msra.mxu0 %v12108_v42  ;;  %4454 = vmatpush1.bf16.msra.mxu1 %v12105_v17  ;;  %v12163_v14 = vld [vmem:[#allocation8 + $0x1c8] ss:$12 sps:$4 sm:$0xff]   ;;  %v12175_v42 = vld [vmem:[#allocation8 + $0x210] ss:$12 sps:$4 sm:$0xff]  }
0x1024   : > { %11044 = vmatprep.subr.bf16.mxu0 %v12109_v50  ;;  %4455 = vmatprep.subr.bf16.mxu1 %v12112_v48  ;;  %v12173_v0 = vld [vmem:[#allocation8 + $0x1fc] ss:$12 sps:$4 sm:$0xff]   ;;  %v12177_v17 = vld [vmem:[#allocation8 + $0x214] ss:$12 sps:$4 sm:$0xff]   ;;  %v12181_v50 = vld [vmem:[#allocation8 + $0x22c] ss:$12 sps:$4 sm:$0xff]  }
0x1025   : > { %v12182_v48 = vld [vmem:[#allocation8 + $0x1e8] ss:$12 sps:$4 sm:$0xff]  }
0x1026   : > { %v12179_v13 = vld [vmem:[#allocation8 + $0x228] ss:$12 sps:$4 sm:$0xff]  }
0x1027   : > { %11045 = vmatpush3.bf16.msra.mxu0 %v12113_v53  ;;  %4456 = vmatpush1.bf16.msra.mxu1 %v12110_v39 }
0x1028   : > { %11046 = vmatprep.subr.bf16.mxu0 %v12114_v23  ;;  %4457 = vmatprep.subr.bf16.mxu1 %v12117_v15 }
0x102b   : > { %11047 = vmatpush3.bf16.msra.mxu0 %v12118_v28  ;;  %4458 = vmatpush1.bf16.msra.mxu1 %v12115_v18  ;;  %v12185_v28 = vld [vmem:[#allocation8 + $0x230] ss:$12 sps:$4 sm:$0xff]  }
0x102c   : > { %11048 = vmatprep.subr.bf16.mxu0 %v12119_v32  ;;  %4459 = vmatprep.subr.bf16.mxu1 %v12122_v30 }
0x102f   : > { %11049 = vmatpush3.bf16.msra.mxu0 %v12123_v43  ;;  %4460 = vmatpush1.bf16.msra.mxu1 %v12120_v37 }
0x1030   : > { %11050 = vmatprep.subr.bf16.mxu0 %v12124_v57  ;;  %4461 = vmatprep.subr.bf16.mxu1 %v12127_v29 }
0x1033   : > { %11051 = vmatpush3.bf16.msra.mxu0 %v12128_v9  ;;  %4462 = vmatpush1.bf16.msra.mxu1 %v12125_v61 }
0x1034   : > { %11052 = vmatprep.subr.bf16.mxu0 %v12129_v51  ;;  %4463 = vmatprep.subr.bf16.mxu1 %v12132_v38 }
0x1037   : > { %11053 = vmatpush3.bf16.msra.mxu0 %v12133_v44  ;;  %4464 = vmatpush1.bf16.msra.mxu1 %v12130_v22 }
0x1038   : > { %11054 = vmatprep.subr.bf16.mxu0 %v12134_v54  ;;  %4465 = vmatprep.subr.bf16.mxu1 %v12137_v45 }
0x103b   : > { %11055 = vmatpush3.bf16.msra.mxu0 %v12138_v46  ;;  %4466 = vmatpush1.bf16.msra.mxu1 %v12135_v40 }
0x103c   : > { %4467 = vmatprep.subr.bf16.mxu1 %v12141_v49  ;;  %11410 = vmatprep.subr.bf16.mxu0 %v12166_v27 }
0x103e   : > { %4584 = vmatmul.mubr.bf16.vlgmr.msra.gmra.mrb[68].mxu0 %v14255_v8 }
0x103f   : > { %4591 = vmatprep.mubr.bf16.mxu0 %v14245_v47  ;;  %4468 = vmatpush1.bf16.msra.mxu1 %v12139_v52 }
0x1040   : > { %4469 = vmatprep.subr.bf16.mxu1 %v12144_v55  ;;  %11411 = vmatpush3.bf16.msra.mxu0 %v12166_v27  ;;  %v12188_v27 = vld [vmem:[#allocation10 + $0x4] ss:$48 sps:$4 sm:$0xff]  }
0x1041   : > { %11412 = vmatprep.subr.bf16.mxu0 %v12170_v33 }
0x1043   : > { %4470 = vmatpush1.bf16.msra.mxu1 %v12142_v3 }
0x1044   : > { %4471 = vmatprep.subr.bf16.mxu1 %v12147_v12  ;;  %11413 = vmatpush3.bf16.msra.mxu0 %v12170_v33  ;;  %v12194_v33 = vld [vmem:[#allocation10 + $0x64] ss:$48 sps:$4 sm:$0xff]  }
0x1045   : > { %11414 = vmatprep.subr.bf16.mxu0 %v12174_v36 }
0x1046   : > { %4592 = vmatmul.mubr.bf16.gmra.mrb[72].mxu0 %v14262_v24 }
0x1047   : > { %4472 = vmatpush1.bf16.msra.mxu1 %v12145_v19 }
0x1048   : > { %4473 = vmatprep.subr.bf16.mxu1 %v12150_v20  ;;  %11415 = vmatpush3.bf16.msra.mxu0 %v12174_v36  ;;  %v12192_v36 = vld [vmem:[#allocation10 + $0x60] ss:$48 sps:$4 sm:$0xff]  }
0x1049   : > { %11416 = vmatprep.subr.bf16.mxu0 %v12178_v21 }
0x104b   : > { %4474 = vmatpush1.bf16.msra.mxu1 %v12148_v16 }
0x104c   : > { %4475 = vmatprep.subr.bf16.mxu1 %v12153_v35  ;;  %11417 = vmatpush3.bf16.msra.mxu0 %v12178_v21  ;;  %v12201_v21 = vld [vmem:[#allocation10 + $0xc8] ss:$48 sps:$4 sm:$0xff]  }
0x104d   : > { %11418 = vmatprep.subr.bf16.mxu0 %v12182_v48 }
0x104f   : > { %4476 = vmatpush1.bf16.msra.mxu1 %v12151_v56 }
0x1050   : > { %4498 = vmatprep.subr.bf16.mxu1 %v12156_v59  ;;  %11419 = vmatpush3.bf16.msra.mxu0 %v12182_v48  ;;  %v12218_v48 = vld [vmem:[#allocation10 + $0x1e4] ss:$48 sps:$4 sm:$0xff]  }
0x1051   : > { %11420 = vmatprep.subr.bf16.mxu0 %v12183_v25 }
0x1052   : > { %4478 = vmatmul.mubr.bf16.vlgmr.msra.gmra.mrb[72].mxu1 %v14255_v8  ;;  %v12169_v8 = vld [vmem:[#allocation8 + $0x1e4] ss:$12 sps:$4 sm:$0xff]  }
0x1053   : > { %4487 = vmatprep.mubr.bf16.mxu1 %v14245_v47  ;;  %4499 = vmatpush1.bf16.msra.mxu1 %v12154_v2  ;;  %v12160_v47 = vld [vmem:[#allocation8 + $0x1b0] ss:$12 sps:$4 sm:$0xff]  }
0x1054   : > { %4500 = vmatprep.subr.bf16.mxu1 %v12159_v63  ;;  %11421 = vmatpush3.bf16.msra.mxu0 %v12183_v25  ;;  %v12216_v25 = vld [vmem:[#allocation10 + $0x1e0] ss:$48 sps:$4 sm:$0xff]  }
0x1057   : > { %4501 = vmatpush1.bf16.msra.mxu1 %v12157_v58  ;;  %v12191_v58 = vld [vmem:[#allocation10 + $0xc] ss:$48 sps:$4 sm:$0xff]  }
0x1058   : > { %4502 = vmatprep.subr.bf16.mxu1 %v12162_v4  ;;  %v12197_v4 = vld [vmem:[#allocation10 + $0x6c] ss:$48 sps:$4 sm:$0xff]  }
0x105a   : > { %4488 = vmatmul.mubr.bf16.gmra.mrb[76].mxu1 %v14262_v24  ;;  %v12184_v24 = vld [vmem:[#allocation8 + $0x218] ss:$12 sps:$4 sm:$0xff]  }
0x105b   : > { %4530 = vmatprep.mubr.bf16.mxu1 %v13431_v34  ;;  %4503 = vmatpush1.bf16.msra.mxu1 %v12160_v47  ;;  %v12195_v47 = vld [vmem:[#allocation10 + $0x68] ss:$48 sps:$4 sm:$0xff]  }
0x105c   : > { %4504 = vmatprep.subr.bf16.mxu1 %v12165_v6  ;;  %11422 = vmatprep.subr.bf16.mxu0 %v12184_v24  ;;  %v12203_v6 = vld [vmem:[#allocation10 + $0xcc] ss:$48 sps:$4 sm:$0xff]  }
0x105d   : > { %11423 = vmatpush3.bf16.msra.mxu0 %v12184_v24  ;;  %v12219_v24 = vld [vmem:[#allocation10 + $0x1e8] ss:$48 sps:$4 sm:$0xff]  }
0x105e   : > { %11424 = vmatprep.subr.bf16.mxu0 %v12185_v28 }
0x105f   : > { %4505 = vmatpush1.bf16.msra.mxu1 %v12163_v14  ;;  %v12206_v14 = vld [vmem:[#allocation10 + $0x124] ss:$48 sps:$4 sm:$0xff]  }
0x1060   : > { %4506 = vmatprep.subr.bf16.mxu1 %v12169_v8  ;;  %v12209_v8 = vld [vmem:[#allocation10 + $0x12c] ss:$48 sps:$4 sm:$0xff]  }
0x1061   : > { %11425 = vmatpush3.bf16.msra.mxu0 %v12185_v28  ;;  %v12233_v28 = vld [vmem:[#allocation10 + $0x2ac] ss:$48 sps:$4 sm:$0xff]  }
0x1062   : > { %6615 = vmatprep.subr.bf16.mxu0 %v12188_v27 }
0x1063   : > { %4507 = vmatpush1.bf16.msra.mxu1 %v12167_v60  ;;  %v12204_v60 = vld [vmem:[#allocation10 + $0x120] ss:$48 sps:$4 sm:$0xff]  }
0x1064   : > { %4508 = vmatprep.subr.bf16.mxu1 %v12173_v0  ;;  %v12207_v0 = vld [vmem:[#allocation10 + $0x128] ss:$48 sps:$4 sm:$0xff]  }
0x1067   : > { %4509 = vmatpush1.bf16.msra.mxu1 %v12171_v62  ;;  %v12212_v62 = vld [vmem:[#allocation10 + $0x184] ss:$48 sps:$4 sm:$0xff]  }
0x1068   : > { %4510 = vmatprep.subr.bf16.mxu1 %v12177_v17  ;;  %v12215_v17 = vld [vmem:[#allocation10 + $0x18c] ss:$48 sps:$4 sm:$0xff]  }
0x106b   : > { %4511 = vmatpush1.bf16.msra.mxu1 %v12175_v42  ;;  %v12210_v42 = vld [vmem:[#allocation10 + $0x180] ss:$48 sps:$4 sm:$0xff]  }
0x106c   : > { %4512 = vmatprep.subr.bf16.mxu1 %v12181_v50  ;;  %v12213_v50 = vld [vmem:[#allocation10 + $0x188] ss:$48 sps:$4 sm:$0xff]  }
0x106f   : > { %4513 = vmatpush1.bf16.msra.mxu1 %v12179_v13  ;;  %v12221_v13 = vld [vmem:[#allocation10 + $0x1ec] ss:$48 sps:$4 sm:$0xff]  }
0x1070   : > { %6721 = vmatprep.subr.bf16.mxu1 %v12191_v58 }
0x10e5   : > { %v3826_v39 = vpop.f32.mrb[68].mxu1 }
0x10e6   : > { %v11402_v53 = vpop.f32.mrb[69].mxu1 }
0x10e7   : > { %v3829_v23 = vpop.f32.mrb[70].mxu1  ;;  %v12227_v53 = vld [vmem:[#allocation10 + $0x24c] ss:$48 sps:$4 sm:$0xff]  }
0x10e8   : > { %v11768_v15 = vpack.i.bf16 %v3829_v23, %v3826_v39  ;;  %v11403_v18 = vpop.f32.mrb[71].mxu1  ;;  %v12224_v39 = vld [vmem:[#allocation10 + $0x244] ss:$48 sps:$4 sm:$0xff]   ;;  %v12222_v23 = vld [vmem:[#allocation10 + $0x240] ss:$48 sps:$4 sm:$0xff]  }
0x10e9   : > { %v12230_v18 = vld [vmem:[#allocation10 + $0x2a4] ss:$48 sps:$4 sm:$0xff]  }
0x10ea   : > { %11769 = vrot.lane.b32.xlu0 %v11768_v15, %s13435_s8  ;;  %v12225_v15 = vld [vmem:[#allocation10 + $0x248] ss:$48 sps:$4 sm:$0xff]  }
0x10f1   : > { %v3874_v32 = vpop.f32.mrb[64].mxu0 }
0x10f2   : > { %v11408_v30 = vpop.f32.mrb[65].mxu0 }
0x10f3   : > { %v3877_v37 = vpop.f32.mrb[66].mxu0  ;;  %v12231_v30 = vld [vmem:[#allocation10 + $0x2a8] ss:$48 sps:$4 sm:$0xff]  }
0x10f4   : > { %v11773_v43 = vpack.i.bf16 %v3877_v37, %v3874_v32  ;;  %v11409_v57 = vpop.f32.mrb[67].mxu0  ;;  %v12228_v32 = vld [vmem:[#allocation10 + $0x2a0] ss:$48 sps:$4 sm:$0xff]  }
0x10f5   : > { %v4044_v57 = vld [vmem:[#allocation5 + $0x4] ss:$8 sm:$0x7] }
0x10f6   : > { %11774 = vrot.lane.b32.xlu1 %v11773_v43, %s13435_s8 }
0x1111   : > { %v11056_v29 = vpop.f32.mrb[68].mxu0 }
0x1112   : > { %v11057_v61 = vpop.f32.mrb[69].mxu0 }
0x1113   : > { %v14273_v9 = vadd.f32 %v11057_v61, %v11056_v29  ;;  %v11059_v51 = vpop.f32.mrb[70].mxu0  ;;  %v4049_v61 = vrot.slane %v4044_v57, %v13788_v11 }
0x1114   : > { %v11060_v38 = vpop.f32.mrb[71].mxu0 }
0x1115   : > { %v14275_v22 = vadd.f32 %v11060_v38, %v11059_v51  ;;  %v4053_v51 = vrot.slane %v4044_v57, %v13785_v10 }
0x1119   : > { %v11062_v44 = vpop.f32.mrb[72].mxu0 }
0x111a   : > { %v11063_v54 = vpop.f32.mrb[73].mxu0 }
0x111b   : > { %v14277_v45 = vadd.f32 %v11063_v54, %v11062_v44  ;;  %v11065_v40 = vpop.f32.mrb[74].mxu0 }
0x111c   : > { %v11066_v46 = vpop.f32.mrb[75].mxu0 }
0x111d   : > { %v14279_v49 = vadd.f32 %v11066_v46, %v11065_v40  ;;  %v4057_v40 = vrot.slane %v4044_v57, %v13853_v41 }
0x115c   : > { %v11770_v52 = vpop.permute.xlu0 %11769 }
0x115d   : > { %v11772_v55 = vunpack.i.h.bf16 %v11770_v52  ;;  %v11771_v3 = vunpack.i.l.bf16 %v11770_v52 }
0x115f   : > { %v3938_v12 = vsel %vm2439_vm1, %v14202_v7, %v11772_v55  ;;  %v3937_v19 = vsel %vm2439_vm1, %v14200_v5, %v11771_v3  ;;  %v12186_v7 = vld [vmem:[#allocation10] ss:$48 sps:$4 sm:$0xff]   ;;  %v12189_v5 = vld [vmem:[#allocation10 + $0x8] ss:$48 sps:$4 sm:$0xff]  }
0x1160   : > { %v3943_v20 = vpack.c.bf16 %v3938_v12, %v3937_v19  ;;  %v13126_v55 = vld [vmem:[%s13733_s21] sm:$0xff]  ;;  %v13127_v12 = vld [vmem:[%s13733_s21 + $0x8] sm:$0xff] }
0x1162   : > { %4531 = vmatmul.mubr.bf16.vlgmr.msra.gmra.mrb[72].mxu1 %v3943_v20  ;;  %11426 = vmatprep.mubr.bf16.mxu0 %v3943_v20  ;;  %v4594_v20 = vadd.f32 %v14277_v45, %v4057_v40 }
0x1163   : > { %4540 = vmatprep.mubr.bf16.mxu1 %v13431_v34  ;;  %6722 = vmatpush1.bf16.msra.mxu1 %v12189_v5 }
0x1164   : > { %6723 = vmatprep.subr.bf16.mxu1 %v12197_v4 }
0x1167   : > { %6724 = vmatpush1.bf16.msra.mxu1 %v12195_v47  ;;  %v4589_v47 = vadd.f32 %v14275_v22, %v4057_v40 }
0x1168   : > { %v11775_v16 = vpop.permute.xlu1 %11774  ;;  %6725 = vmatprep.subr.bf16.mxu1 %v12203_v6 }
0x1169   : > { %v11777_v35 = vunpack.i.h.bf16 %v11775_v16  ;;  %v11776_v56 = vunpack.i.l.bf16 %v11775_v16 }
0x116b   : > { %v3939_v2 = vsel %vm2439_vm1, %v14208_v26, %v11776_v56  ;;  %v3940_v59 = vsel %vm2439_vm1, %v14210_v31, %v11777_v35  ;;  %v12200_v26 = vld [vmem:[#allocation10 + $0xc4] ss:$48 sps:$4 sm:$0xff]   ;;  %v12198_v31 = vld [vmem:[#allocation10 + $0xc0] ss:$48 sps:$4 sm:$0xff]   ;;  %6726 = vmatpush1.bf16.msra.mxu1 %v12201_v21  ;;  %v4586_v56 = vadd.f32 %v14273_v9, %v4057_v40 }
0x116c   : > { %v3946_v63 = vpack.c.bf16 %v3940_v59, %v3939_v2  ;;  %6727 = vmatprep.subr.bf16.mxu1 %v12209_v8  ;;  %v13128_v2 = vld [vmem:[%s13733_s21 + $0x18] sm:$0xff]  ;;  %v13130_v8 = vld [vmem:[%s13733_s21 + $0x10] sm:$0xff] }
0x116e   : > { %4541 = vmatmul.mubr.bf16.gmra.mrb[76].mxu1 %v3946_v63  ;;  %11427 = vmatmul.mubr.bf16.vlgmr.msra.gmra.mrb[76].mxu0 %v3946_v63  ;;  %v13129_v63 = vld [vmem:[%s13733_s21 + $0x20] sm:$0xff] }
0x116f   : > { %6616 = vmatpush1.bf16.msra.mxu0 %v12186_v7  ;;  %6728 = vmatpush1.bf16.msra.mxu1 %v12207_v0 }
0x1170   : > { %6617 = vmatprep.subr.bf16.mxu0 %v12194_v33  ;;  %6729 = vmatprep.subr.bf16.mxu1 %v12215_v17  ;;  %v4597_v33 = vadd.f32 %v14279_v49, %v4057_v40 }
0x1173   : > { %6618 = vmatpush1.bf16.msra.mxu0 %v12192_v36  ;;  %6730 = vmatpush1.bf16.msra.mxu1 %v12213_v50 }
0x1174   : > { %6619 = vmatprep.subr.bf16.mxu0 %v12200_v26  ;;  %6731 = vmatprep.subr.bf16.mxu1 %v12221_v13  ;;  %v13132_v13 = vld [vmem:[%s13733_s21 + $0x50] sm:$0xff] }
0x1177   : > { %6620 = vmatpush1.bf16.msra.mxu0 %v12198_v31  ;;  %6732 = vmatpush1.bf16.msra.mxu1 %v12219_v24  ;;  %v13133_v24 = vld [vmem:[%s13733_s21 + $0x28] sm:$0xff] }
0x1178   : > { %6621 = vmatprep.subr.bf16.mxu0 %v12206_v14  ;;  %6733 = vmatprep.subr.bf16.mxu1 %v12227_v53 }
0x117b   : > { %6622 = vmatpush1.bf16.msra.mxu0 %v12204_v60  ;;  %6734 = vmatpush1.bf16.msra.mxu1 %v12225_v15 }
0x117c   : > { %6623 = vmatprep.subr.bf16.mxu0 %v12212_v62  ;;  %6735 = vmatprep.subr.bf16.mxu1 %v12233_v28 }
0x117f   : > { %6624 = vmatpush1.bf16.msra.mxu0 %v12210_v42  ;;  %6736 = vmatpush1.bf16.msra.mxu1 %v12231_v30  ;;  %v13131_v42 = vld [vmem:[%s13733_s21 + $0x48] sm:$0xff] }
0x1180   : > { %6625 = vmatprep.subr.bf16.mxu0 %v12218_v48 }
0x1183   : > { %6626 = vmatpush1.bf16.msra.mxu0 %v12216_v25 }
0x1184   : > { %6627 = vmatprep.subr.bf16.mxu0 %v12224_v39 }
0x1187   : > { %6628 = vmatpush1.bf16.msra.mxu0 %v12222_v23 }
0x1188   : > { %6629 = vmatprep.subr.bf16.mxu0 %v12230_v18 }
0x118b   : > { %6630 = vmatpush1.bf16.msra.mxu0 %v12228_v32 }
0x1235   : > { %v4532_v37 = vpop.f32.mrb[72].mxu1 }
0x1236   : > { %v4534_v43 = vpop.f32.mrb[73].mxu1  ;;  %v11430_v44 = vadd.f32 %v4532_v37, %v4049_v61 }
0x1237   : > { %v4536_v29 = vpop.f32.mrb[74].mxu1  ;;  %v11431_v54 = vadd.f32 %v4534_v43, %v4053_v51  ;;  %v13134_v43 = vld [vmem:[%s13733_s21 + $0x30] sm:$0xff] }
0x1238   : > { %v4538_v38 = vpop.f32.mrb[75].mxu1  ;;  %v11432_v46 = vadd.f32 %v4536_v29, %v4049_v61  ;;  %v14294_v3 = vadd.f32 %v13126_v55, %v11430_v44 }
0x1239   : > { %v11433_v52 = vadd.f32 %v4538_v38, %v4053_v51  ;;  %v14297_v19 = vadd.f32 %v13127_v12, %v11431_v54  ;;  %v13136_v38 = vld [vmem:[%s13733_s21 + $0x58] sm:$0xff] }
0x123a   : > { %v14302_v59 = vadd.f32 %v13128_v2, %v11432_v46  ;;  %v4685_v21 = vmul.f32 %v14294_v3, %v14294_v3  ;;  %v13137_v2 = vld [vmem:[%s13733_s21 + $0x40] sm:$0xff] }
0x123b   : > { %v14305_v7 = vadd.f32 %v13129_v63, %v11433_v52  ;;  %v4686_v14 = vmul.f32 %v14297_v19, %v14297_v19  ;;  %v4665_v22 = vadd.f32 %v14297_v19, %v14294_v3 }
0x123c   : > { %v4688_v18 = vmul.f32 %v14302_v59, %v14302_v59 }
0x123d   : > { %v4669_v48 = vadd.f32 %v14305_v7, %v14302_v59  ;;  %v4697_v15 = vadd.f32 %v4686_v14, %v4685_v21  ;;  %v4689_v30 = vmul.f32 %v14305_v7, %v14305_v7  ;;  %v12243_v21 = vld [vmem:[#allocation10 + $0x368] ss:$48 sps:$4 sm:$0xff]   ;;  %v12248_v14 = vld [vmem:[#allocation10 + $0x3c4] ss:$48 sps:$4 sm:$0xff]  }
0x123f   : > { %v4701_v52 = vadd.f32 %v4689_v30, %v4688_v18  ;;  %v12264_v18 = vld [vmem:[#allocation10 + $0x4e0] ss:$48 sps:$4 sm:$0xff]  }
0x1240   : > { %v12270_v30 = vld [vmem:[#allocation10 + $0x540] ss:$48 sps:$4 sm:$0xff]  }
0x1241   : > { %v4542_v16 = vpop.f32.mrb[76].mxu1  ;;  %v11428_v35 = vpop.f32.mrb[76].mxu0 }
0x1242   : > { %v4643_v27 = vadd.f32 %v11428_v35, %v4594_v20  ;;  %v4544_v5 = vpop.f32.mrb[77].mxu1  ;;  %v4634_v58 = vpop.f32.mrb[77].mxu0  ;;  %v11434_v62 = vadd.f32 %v4542_v16, %v4049_v61 }
0x1243   : > { %v4635_v4 = vadd.f32 %v4634_v58, %v4586_v56  ;;  %v4546_v36 = vpop.f32.mrb[78].mxu1  ;;  %v11429_v45 = vpop.f32.mrb[78].mxu0  ;;  %v11435_v17 = vadd.f32 %v4544_v5, %v4053_v51 }
0x1244   : > { %v11436_v26 = vadd.f32 %v4546_v36, %v4049_v61  ;;  %v4646_v9 = vadd.f32 %v11429_v45, %v4597_v33  ;;  %v4548_v6 = vpop.f32.mrb[79].mxu1  ;;  %v4637_v31 = vpop.f32.mrb[79].mxu0  ;;  %v14342_v57 = vadd.f32 %v13134_v43, %v11434_v62  ;;  %v13135_v61 = vld [vmem:[%s13733_s21 + $0x38] sm:$0xff]  ;;  %v14364_v63 = vadd.f32 %v13137_v2, %v4643_v27  ;;  %v12257_v62 = vld [vmem:[#allocation10 + $0x42c] ss:$48 sps:$4 sm:$0xff]  }
0x1245   : > { %v14314_v49 = vadd.f32 %v13130_v8, %v4635_v4  ;;  %v11437_v60 = vadd.f32 %v4548_v6, %v4053_v51  ;;  %v4638_v0 = vadd.f32 %v4637_v31, %v4589_v47  ;;  %v14347_v51 = vadd.f32 %v13135_v61, %v11435_v17  ;;  %v12236_v45 = vld [vmem:[#allocation10 + $0x304] ss:$48 sps:$4 sm:$0xff]   ;;  %v12239_v47 = vld [vmem:[#allocation10 + $0x30c] ss:$48 sps:$4 sm:$0xff]   ;;  %v12240_v31 = vld [vmem:[#allocation10 + $0x360] ss:$48 sps:$4 sm:$0xff]  }
0x1246   : > { %v14319_v50 = vadd.f32 %v13131_v42, %v11436_v26  ;;  %v14350_v44 = vadd.f32 %v13136_v38, %v4646_v9  ;;  %v4691_v12 = vmul.f32 %v14342_v57, %v14342_v57  ;;  %v4693_v4 = vmul.f32 %v14364_v63, %v14364_v63  ;;  %v12234_v26 = vld [vmem:[#allocation10 + $0x300] ss:$48 sps:$4 sm:$0xff]   ;;  %v12237_v9 = vld [vmem:[#allocation10 + $0x308] ss:$48 sps:$4 sm:$0xff]   ;;  %6631 = vmatprep.subr.bf16.mxu0 %v12236_v45  ;;  %v12242_v27 = vld [vmem:[#allocation10 + $0x364] ss:$48 sps:$4 sm:$0xff]  }
0x1247   : > { %v14324_v25 = vadd.f32 %v13132_v13, %v11437_v60  ;;  %v14327_v39 = vadd.f32 %v13133_v24, %v4638_v0  ;;  %v4666_v53 = vadd.f32 %v4665_v22, %v14314_v49  ;;  %v4687_v23 = vmul.f32 %v14314_v49, %v14314_v49  ;;  %6737 = vmatprep.subr.bf16.mxu1 %v12239_v47  ;;  %v12245_v6 = vld [vmem:[#allocation10 + $0x36c] ss:$48 sps:$4 sm:$0xff]   ;;  %v12246_v60 = vld [vmem:[#allocation10 + $0x3c0] ss:$48 sps:$4 sm:$0xff]   ;;  %v12249_v0 = vld [vmem:[#allocation10 + $0x3c8] ss:$48 sps:$4 sm:$0xff]  }
0x1248   : > { %v4694_v37 = vmul.f32 %v14319_v50, %v14319_v50  ;;  %v4696_v16 = vmul.f32 %v14350_v44, %v14350_v44  ;;  %v4673_v35 = vadd.f32 %v14347_v51, %v14342_v57  ;;  %v4692_v56 = vmul.f32 %v14347_v51, %v14347_v51  ;;  %6632 = vmatpush1.bf16.msra.mxu0 %v12234_v26  ;;  %v12251_v8 = vld [vmem:[#allocation10 + $0x3cc] ss:$48 sps:$4 sm:$0xff]   ;;  %v12254_v22 = vld [vmem:[#allocation10 + $0x424] ss:$48 sps:$4 sm:$0xff]   ;;  %v12252_v17 = vld [vmem:[#allocation10 + $0x420] ss:$48 sps:$4 sm:$0xff]  }
0x1249   : > { %4667 = vadd.xlane.f32.xlu0 %v4666_v53  ;;  %v4670_v28 = vadd.f32 %v4669_v48, %v14327_v39  ;;  %v4677_v32 = vadd.f32 %v14324_v25, %v14319_v50  ;;  %v4695_v29 = vmul.f32 %v14324_v25, %v14324_v25  ;;  %v4698_v54 = vadd.f32 %v4697_v15, %v4687_v23  ;;  %v12255_v42 = vld [vmem:[#allocation10 + $0x428] ss:$48 sps:$4 sm:$0xff]   ;;  %v12260_v48 = vld [vmem:[#allocation10 + $0x484] ss:$48 sps:$4 sm:$0xff]   ;;  %v12263_v13 = vld [vmem:[#allocation10 + $0x48c] ss:$48 sps:$4 sm:$0xff]  }
0x124a   : > { %v4690_v40 = vmul.f32 %v14327_v39, %v14327_v39  ;;  %v4674_v58 = vadd.f32 %v4673_v35, %v14364_v63  ;;  %v4705_v33 = vadd.f32 %v4692_v56, %v4691_v12  ;;  %6738 = vmatpush1.bf16.msra.mxu1 %v12237_v9  ;;  %6633 = vmatprep.subr.bf16.mxu0 %v12242_v27  ;;  %v12258_v24 = vld [vmem:[#allocation10 + $0x480] ss:$48 sps:$4 sm:$0xff]   ;;  %v12261_v53 = vld [vmem:[#allocation10 + $0x488] ss:$48 sps:$4 sm:$0xff]   ;;  %v12266_v23 = vld [vmem:[#allocation10 + $0x4e4] ss:$48 sps:$4 sm:$0xff]  }
0x124b   : > { %4671 = vadd.xlane.f32.xlu1 %v4670_v28  ;;  %v4678_v46 = vadd.f32 %v4677_v32, %v14350_v44  ;;  %v4709_v55 = vadd.f32 %v4695_v29, %v4694_v37  ;;  %6739 = vmatprep.subr.bf16.mxu1 %v12245_v6  ;;  %v12269_v15 = vld [vmem:[#allocation10 + $0x4ec] ss:$48 sps:$4 sm:$0xff]   ;;  %v12267_v28 = vld [vmem:[#allocation10 + $0x4e8] ss:$48 sps:$4 sm:$0xff]   ;;  %v12272_v32 = vld [vmem:[#allocation10 + $0x544] ss:$48 sps:$4 sm:$0xff]  }
0x124c   : > { %v4702_v20 = vadd.f32 %v4701_v52, %v4690_v40  ;;  %v4706_v36 = vadd.f32 %v4705_v33, %v4693_v4  ;;  %6634 = vmatpush1.bf16.msra.mxu0 %v12240_v31  ;;  %v12273_v37 = vld [vmem:[#allocation10 + $0x548] ss:$48 sps:$4 sm:$0xff]   ;;  %v12275_v43 = vld [vmem:[#allocation10 + $0x54c] ss:$48 sps:$4 sm:$0xff]   ;;  %v12278_v29 = vld [vmem:[#allocation10 + $0x5a4] ss:$48 sps:$4 sm:$0xff]  }
0x124d   : > { %4699 = vadd.xlane.f32.xlu0 %v4698_v54  ;;  %v4710_v5 = vadd.f32 %v4709_v55, %v4696_v16  ;;  %6635 = vmatprep.subr.bf16.mxu0 %v12248_v14  ;;  %v12281_v61 = vld [vmem:[#allocation10 + $0x5ac] ss:$48 sps:$4 sm:$0xff]   ;;  %v12276_v38 = vld [vmem:[#allocation10 + $0x5a0] ss:$48 sps:$4 sm:$0xff]   ;;  %v12279_v54 = vld [vmem:[#allocation10 + $0x5a8] ss:$48 sps:$4 sm:$0xff]  }
0x124e   : > { %6740 = vmatpush1.bf16.msra.mxu1 %v12243_v21  ;;  %v12284_v40 = vld [vmem:[#allocation10 + $0x604] ss:$48 sps:$4 sm:$0xff]  }
0x124f   : > { %4679 = vadd.xlane.f32.xlu1 %v4678_v46  ;;  %6741 = vmatprep.subr.bf16.mxu1 %v12251_v8  ;;  %v12287_v46 = vld [vmem:[#allocation10 + $0x60c] ss:$48 sps:$4 sm:$0xff]  }
0x1250   : > { %6636 = vmatpush1.bf16.msra.mxu0 %v12246_v60 }
0x1251   : > { %4703 = vadd.xlane.f32.xlu0 %v4702_v20  ;;  %6637 = vmatprep.subr.bf16.mxu0 %v12254_v22 }
0x1252   : > { %6742 = vmatpush1.bf16.msra.mxu1 %v12249_v0 }
0x1253   : > { %4711 = vadd.xlane.f32.xlu1 %v4710_v5  ;;  %6743 = vmatprep.subr.bf16.mxu1 %v12257_v62 }
0x1254   : > { %6638 = vmatpush1.bf16.msra.mxu0 %v12252_v17 }
0x1255   : > { %4675 = vadd.xlane.f32.xlu0 %v4674_v58  ;;  %6639 = vmatprep.subr.bf16.mxu0 %v12260_v48 }
0x1256   : > { %6744 = vmatpush1.bf16.msra.mxu1 %v12255_v42 }
0x1257   : > { %6745 = vmatprep.subr.bf16.mxu1 %v12263_v13 }
0x1258   : > { %6640 = vmatpush1.bf16.msra.mxu0 %v12258_v24  ;;  %v14385_v24 = vld [vmem:[#allocation5 + $0x2] ss:$8 sm:$0x7] }
0x1259   : > { %4707 = vadd.xlane.f32.xlu0 %v4706_v36  ;;  %6641 = vmatprep.subr.bf16.mxu0 %v12266_v23 }
0x125a   : > { %6746 = vmatpush1.bf16.msra.mxu1 %v12261_v53 }
0x125b   : > { %6747 = vmatprep.subr.bf16.mxu1 %v12269_v15 }
0x125c   : > { %6642 = vmatpush1.bf16.msra.mxu0 %v12264_v18 }
0x125d   : > { %6643 = vmatprep.subr.bf16.mxu0 %v12272_v32  ;;  %v14395_v32 = vld [vmem:[#allocation5 + $0x3] ss:$8 sm:$0x7] }
0x125e   : > { %6748 = vmatpush1.bf16.msra.mxu1 %v12267_v28  ;;  %v4769_v28 = vrot.slane %v14385_v24, %v13785_v10 }
0x125f   : > { %6749 = vmatprep.subr.bf16.mxu1 %v12275_v43  ;;  %v4765_v43 = vrot.slane %v14385_v24, %v13788_v11 }
0x1260   : > { %6644 = vmatpush1.bf16.msra.mxu0 %v12270_v30 }
0x1261   : > { %6645 = vmatprep.subr.bf16.mxu0 %v12278_v29 }
0x1262   : > { %6750 = vmatpush1.bf16.msra.mxu1 %v12273_v37 }
0x1263   : > { %6751 = vmatprep.subr.bf16.mxu1 %v12281_v61 }
0x1264   : > { %6646 = vmatpush1.bf16.msra.mxu0 %v12276_v38 }
0x1265   : > { %6668 = vmatprep.subr.bf16.mxu0 %v12284_v40  ;;  %v4797_v40 = vrot.slane %v14395_v32, %v13785_v10 }
0x1266   : > { %6752 = vmatpush1.bf16.msra.mxu1 %v12279_v54 }
0x1267   : > { %6774 = vmatprep.subr.bf16.mxu1 %v12287_v46  ;;  %v4793_v46 = vrot.slane %v14395_v32, %v13788_v11 }
0x12d6   : > { %v4668_v52 = vpop.xlane.xlu0 %4667 }
0x12d7   : > { %v14369_v55 = vmul.f32 0.0026041667, %v4668_v52 }
0x12d8   : > { %v4672_v12 = vpop.xlane.xlu1 %4671 }
0x12d9   : > { %v4717_v16 = vmul.f32 %v14369_v55, %v14369_v55  ;;  %v14373_v56 = vmul.f32 0.0026041667, %v4672_v12  ;;  %v4729_v23 = vsub.f32 %v14294_v3, %v14369_v55  ;;  %v4730_v15 = vsub.f32 %v14297_v19, %v14369_v55 }
0x12da   : > { %v4700_v20 = vpop.xlane.xlu0 %4699 }
0x12db   : > { %v4713_v35 = vmul.f32 0.0026041667, %v4700_v20  ;;  %v4718_v36 = vmul.f32 %v14373_v56, %v14373_v56  ;;  %v4732_v29 = vsub.f32 %v14302_v59, %v14373_v56  ;;  %v4733_v61 = vsub.f32 %v14305_v7, %v14373_v56 }
0x12dc   : > { %v4680_v2 = vpop.xlane.xlu1 %4679 }
0x12dd   : > { %v4721_v5 = vsub.f32 %v4713_v35, %v4717_v16  ;;  %v14375_v58 = vmul.f32 0.0026041667, %v4680_v2 }
0x12de   : > { %v4704_v33 = vpop.xlane.xlu0 %4703 }
0x12df   : > { %v4725_v4 = vmax.f32 %v4721_v5, 0.0  ;;  %v4714_v45 = vmul.f32 0.0026041667, %v4704_v33  ;;  %v4720_v9 = vmul.f32 %v14375_v58, %v14375_v58  ;;  %v4739_v54 = vsub.f32 %v14324_v25, %v14375_v58 }
0x12e0   : > { %v4712_v47 = vpop.xlane.xlu1 %4711  ;;  %v4738_v2 = vsub.f32 %v14319_v50, %v14375_v58 }
0x12e1   : > { %v4741_v26 = vadd.f32 1e-05, %v4725_v4  ;;  %v4716_v27 = vmul.f32 0.0026041667, %v4712_v47  ;;  %v4722_v6 = vsub.f32 %v4714_v45, %v4718_v36 }
0x12e2   : > { %v4676_v31 = vpop.xlane.xlu0 %4675 }
0x12e3   : > { %13106 = vrsqrt.f32 %v4741_v26  ;;  %v4724_v21 = vsub.f32 %v4716_v27, %v4720_v9  ;;  %v14381_v14 = vmul.f32 0.0026041667, %v4676_v31  ;;  %v4726_v8 = vmax.f32 %v4722_v6, 0.0 }
0x12e5   : > { %v4728_v60 = vmax.f32 %v4724_v21, 0.0  ;;  %v4742_v0 = vadd.f32 1e-05, %v4726_v8  ;;  %v4719_v17 = vmul.f32 %v14381_v14, %v14381_v14  ;;  %v4735_v27 = vsub.f32 %v14342_v57, %v14381_v14  ;;  %v12282_v8 = vld [vmem:[#allocation10 + $0x600] ss:$48 sps:$4 sm:$0xff]  }
0x12e6   : > { %v4708_v22 = vpop.xlane.xlu0 %4707  ;;  %v4736_v6 = vsub.f32 %v14347_v51, %v14381_v14 }
0x12e7   : > { %v4744_v62 = vadd.f32 1e-05, %v4728_v60  ;;  %v4715_v42 = vmul.f32 0.0026041667, %v4708_v22  ;;  %13108 = vrsqrt.f32 %v4742_v0  ;;  %v12285_v60 = vld [vmem:[#allocation10 + $0x608] ss:$48 sps:$4 sm:$0xff]  }
0x12e9   : > { %13110 = vrsqrt.f32 %v4744_v62  ;;  %v4723_v48 = vsub.f32 %v4715_v42, %v4719_v17  ;;  %v12290_v62 = vld [vmem:[#allocation10 + $0x664] ss:$48 sps:$4 sm:$0xff]   ;;  %v12293_v17 = vld [vmem:[#allocation10 + $0x66c] ss:$48 sps:$4 sm:$0xff]  }
0x12eb   : > { %v4727_v13 = vmax.f32 %v4723_v48, 0.0 }
0x12ed   : > { %v14387_v53 = vpop.eup %13106  ;;  %v4743_v18 = vadd.f32 1e-05, %v4727_v13 }
0x12ee   : > { %v4750_v30 = vmul.f32 %v14387_v53, %v4730_v15  ;;  %v4749_v37 = vmul.f32 %v14387_v53, %v4729_v23 }
0x12ef   : > { %13112 = vrsqrt.f32 %v4743_v18  ;;  %v12288_v18 = vld [vmem:[#allocation10 + $0x660] ss:$48 sps:$4 sm:$0xff]  }
0x12f0   : > { %v4778_v20 = vmul.f32 %v4769_v28, %v4750_v30  ;;  %v4777_v35 = vmul.f32 %v4765_v43, %v4749_v37  ;;  %v12291_v30 = vld [vmem:[#allocation10 + $0x668] ss:$48 sps:$4 sm:$0xff]  }
0x12f1   : > { %v14405_v38 = vpop.eup %13108 }
0x12f2   : > { %v4753_v12 = vmul.f32 %v14405_v38, %v4733_v61  ;;  %v4752_v16 = vmul.f32 %v14405_v38, %v4732_v29  ;;  %v4806_v45 = vadd.f32 %v4797_v40, %v4778_v20  ;;  %v4805_v26 = vadd.f32 %v4793_v46, %v4777_v35  ;;  %v12296_v61 = vld [vmem:[#allocation10 + $0x6c4] ss:$48 sps:$4 sm:$0xff]   ;;  %v12299_v20 = vld [vmem:[#allocation10 + $0x6cc] ss:$48 sps:$4 sm:$0xff]  }
0x12f3   : > { %v14413_v52 = vpop.eup %13110 }
0x12f4   : > { %v4781_v5 = vmul.f32 %v4769_v28, %v4753_v12  ;;  %v4780_v33 = vmul.f32 %v4765_v43, %v4752_v16  ;;  %v4759_v4 = vmul.f32 %v14413_v52, %v4739_v54  ;;  %v4758_v36 = vmul.f32 %v14413_v52, %v4738_v2  ;;  %v12302_v2 = vld [vmem:[#allocation10 + $0x724] ss:$48 sps:$4 sm:$0xff]  }
0x12f6   : > { %v4809_v47 = vadd.f32 %v4797_v40, %v4781_v5  ;;  %v4808_v9 = vadd.f32 %v4793_v46, %v4780_v33  ;;  %v4787_v22 = vmul.f32 %v4769_v28, %v4759_v4  ;;  %v4786_v13 = vmul.f32 %v4765_v43, %v4758_v36  ;;  %v12305_v5 = vld [vmem:[#allocation10 + $0x72c] ss:$48 sps:$4 sm:$0xff]   ;;  %v12308_v33 = vld [vmem:[#allocation10 + $0x784] ss:$48 sps:$4 sm:$0xff]   ;;  %v12306_v36 = vld [vmem:[#allocation10 + $0x780] ss:$48 sps:$4 sm:$0xff]  }
0x12f7   : > { %v12311_v4 = vld [vmem:[#allocation10 + $0x78c] ss:$48 sps:$4 sm:$0xff]  }
0x12f8   : > { %v14427_v21 = vpack.c.bf16 %v4809_v47, %v4806_v45  ;;  %v14429_v0 = vpack.c.bf16 %v4808_v9, %v4805_v26  ;;  %v4815_v37 = vadd.f32 %v4797_v40, %v4787_v22  ;;  %v4814_v12 = vadd.f32 %v4793_v46, %v4786_v13  ;;  %v12309_v45 = vld [vmem:[#allocation10 + $0x788] ss:$48 sps:$4 sm:$0xff]   ;;  %v12314_v47 = vld [vmem:[#allocation10 + $0x7e4] ss:$48 sps:$4 sm:$0xff]   ;;  %v12317_v26 = vld [vmem:[#allocation10 + $0x7ec] ss:$48 sps:$4 sm:$0xff]  }
0x12f9   : > { %v14425_v31 = vpop.eup %13112  ;;  %v4734_v9 = vsub.f32 %v14327_v39, %v14373_v56  ;;  %v12323_v22 = vld [vmem:[#allocation10 + $0x84c] ss:$48 sps:$4 sm:$0xff]   ;;  %v12318_v56 = vld [vmem:[#allocation10 + $0x840] ss:$48 sps:$4 sm:$0xff]   ;;  %v12326_v13 = vld [vmem:[#allocation10 + $0x8a4] ss:$48 sps:$4 sm:$0xff]  }
0x12fa   : > { %v4756_v42 = vmul.f32 %v14425_v31, %v4736_v6  ;;  %v4755_v48 = vmul.f32 %v14425_v31, %v4735_v27  ;;  %6647 = vmatprep.mubr.bf16.mxu0 %v14427_v21  ;;  %6753 = vmatprep.mubr.bf16.mxu1 %v14427_v21  ;;  %v12312_v27 = vld [vmem:[#allocation10 + $0x7e0] ss:$48 sps:$4 sm:$0xff]   ;;  %v12315_v6 = vld [vmem:[#allocation10 + $0x7e8] ss:$48 sps:$4 sm:$0xff]  }
0x12fb   : > { %6648 = vmatmul.mubr.bf16.vlgmr.msra.gmra.mrb[80].mxu0 %v14429_v0  ;;  %6754 = vmatmul.mubr.bf16.vlgmr.msra.gmra.mrb[80].mxu1 %v14429_v0 }
0x12fc   : > { %v4784_v23 = vmul.f32 %v4769_v28, %v4756_v42  ;;  %v4783_v15 = vmul.f32 %v4765_v43, %v4755_v48  ;;  %6669 = vmatpush1.bf16.msra.mxu0 %v12282_v8  ;;  %6775 = vmatpush1.bf16.msra.mxu1 %v12285_v60  ;;  %v12294_v28 = vld [vmem:[#allocation10 + $0x6c0] ss:$48 sps:$4 sm:$0xff]   ;;  %v12297_v43 = vld [vmem:[#allocation10 + $0x6c8] ss:$48 sps:$4 sm:$0xff]   ;;  %v4731_v8 = vsub.f32 %v14314_v49, %v14369_v55  ;;  %v12320_v60 = vld [vmem:[#allocation10 + $0x844] ss:$48 sps:$4 sm:$0xff]  }
0x12fd   : > { %6670 = vmatprep.subr.bf16.mxu0 %v12290_v62  ;;  %6776 = vmatprep.subr.bf16.mxu1 %v12293_v17  ;;  %v4754_v62 = vmul.f32 %v14405_v38, %v4734_v9  ;;  %v4773_v42 = vrot.slane %v14385_v24, %v13853_v41  ;;  %v12321_v48 = vld [vmem:[#allocation10 + $0x848] ss:$48 sps:$4 sm:$0xff]   ;;  %v4801_v38 = vrot.slane %v14395_v32, %v13853_v41  ;;  %v12330_v32 = vld [vmem:[#allocation10 + $0x10] ss:$48 sps:$4 sm:$0xff]   ;;  %v12353_v9 = vld [vmem:[#allocation10 + $0x13c] ss:$48 sps:$4 sm:$0xff]  }
0x12fe   : > { %v4812_v29 = vadd.f32 %v4797_v40, %v4784_v23  ;;  %v4811_v54 = vadd.f32 %v4793_v46, %v4783_v15  ;;  %v12300_v40 = vld [vmem:[#allocation10 + $0x720] ss:$48 sps:$4 sm:$0xff]   ;;  %v12303_v46 = vld [vmem:[#allocation10 + $0x728] ss:$48 sps:$4 sm:$0xff]   ;;  %v4751_v17 = vmul.f32 %v14387_v53, %v4731_v8  ;;  %v12329_v23 = vld [vmem:[#allocation10 + $0x8ac] ss:$48 sps:$4 sm:$0xff]   ;;  %v4737_v15 = vsub.f32 %v14364_v63, %v14381_v14 }
0x12ff   : > { %v4782_v55 = vmul.f32 %v4773_v42, %v4754_v62  ;;  %v12324_v53 = vld [vmem:[#allocation10 + $0x8a0] ss:$48 sps:$4 sm:$0xff]   ;;  %v12327_v24 = vld [vmem:[#allocation10 + $0x8a8] ss:$48 sps:$4 sm:$0xff]   ;;  %v12356_v8 = vld [vmem:[#allocation10 + $0x194] ss:$48 sps:$4 sm:$0xff]  }
0x1300   : > { %v14437_v16 = vpack.c.bf16 %v4815_v37, %v4812_v29  ;;  %v14439_v35 = vpack.c.bf16 %v4814_v12, %v4811_v54  ;;  %6671 = vmatpush1.bf16.msra.mxu0 %v12288_v18  ;;  %6777 = vmatpush1.bf16.msra.mxu1 %v12291_v30  ;;  %v4779_v18 = vmul.f32 %v4773_v42, %v4751_v17  ;;  %v12332_v29 = vld [vmem:[#allocation10 + $0x14] ss:$48 sps:$4 sm:$0xff]   ;;  %v12357_v62 = vld [vmem:[#allocation10 + $0x198] ss:$48 sps:$4 sm:$0xff]  }
0x1301   : > { %6672 = vmatprep.subr.bf16.mxu0 %v12296_v61  ;;  %6778 = vmatprep.subr.bf16.mxu1 %v12299_v20  ;;  %v4740_v30 = vsub.f32 %v14350_v44, %v14375_v58  ;;  %v4810_v37 = vadd.f32 %v4801_v38, %v4782_v55  ;;  %v12335_v61 = vld [vmem:[#allocation10 + $0x1c] ss:$48 sps:$4 sm:$0xff]   ;;  %v4757_v54 = vmul.f32 %v14425_v31, %v4737_v15  ;;  %v12333_v20 = vld [vmem:[#allocation10 + $0x18] ss:$48 sps:$4 sm:$0xff]   ;;  %v12336_v31 = vld [vmem:[#allocation10 + $0x70] ss:$48 sps:$4 sm:$0xff]  }
0x1302   : > { %6657 = vmatprep.mubr.bf16.mxu0 %v14437_v16  ;;  %6763 = vmatprep.mubr.bf16.mxu1 %v14437_v16  ;;  %v4807_v12 = vadd.f32 %v4801_v38, %v4779_v18  ;;  %v12341_v58 = vld [vmem:[#allocation10 + $0x7c] ss:$48 sps:$4 sm:$0xff]   ;;  %v12362_v17 = vld [vmem:[#allocation10 + $0x1f4] ss:$48 sps:$4 sm:$0xff]   ;;  %v12366_v55 = vld [vmem:[#allocation10 + $0x250] ss:$48 sps:$4 sm:$0xff]  }
0x1303   : > { %6658 = vmatmul.mubr.bf16.gmra.mrb[84].mxu0 %v14439_v35  ;;  %6764 = vmatmul.mubr.bf16.gmra.mrb[84].mxu1 %v14439_v35  ;;  %v4760_v14 = vmul.f32 %v14413_v52, %v4740_v30  ;;  %v12339_v52 = vld [vmem:[#allocation10 + $0x78] ss:$48 sps:$4 sm:$0xff]   ;;  %v12374_v18 = vld [vmem:[#allocation10 + $0x2b4] ss:$48 sps:$4 sm:$0xff]  }
0x1304   : > { %6673 = vmatpush1.bf16.msra.mxu0 %v12294_v28  ;;  %6779 = vmatpush1.bf16.msra.mxu1 %v12297_v43  ;;  %v14463_v28 = vpack.c.bf16 %v4810_v37, %v4807_v12  ;;  %v12338_v43 = vld [vmem:[#allocation10 + $0x74] ss:$48 sps:$4 sm:$0xff]   ;;  %v12369_v15 = vld [vmem:[#allocation10 + $0x258] ss:$48 sps:$4 sm:$0xff]   ;;  %v12383_v37 = vld [vmem:[#allocation10 + $0x31c] ss:$48 sps:$4 sm:$0xff]  }
0x1305   : > { %6674 = vmatprep.subr.bf16.mxu0 %v12302_v2  ;;  %6780 = vmatprep.subr.bf16.mxu1 %v12305_v5  ;;  %v4785_v2 = vmul.f32 %v4773_v42, %v4757_v54  ;;  %v4788_v5 = vmul.f32 %v4773_v42, %v4760_v14  ;;  %v12365_v42 = vld [vmem:[#allocation10 + $0x1fc] ss:$48 sps:$4 sm:$0xff]   ;;  %v12380_v30 = vld [vmem:[#allocation10 + $0x314] ss:$48 sps:$4 sm:$0xff]   ;;  %v12384_v14 = vld [vmem:[#allocation10 + $0x370] ss:$48 sps:$4 sm:$0xff]  }
0x1306   : > { %6700 = vmatprep.mubr.bf16.mxu0 %v13431_v34  ;;  %6806 = vmatprep.mubr.bf16.mxu1 %v13431_v34  ;;  %v12386_v54 = vld [vmem:[#allocation10 + $0x374] ss:$48 sps:$4 sm:$0xff]   ;;  %v12389_v12 = vld [vmem:[#allocation10 + $0x37c] ss:$48 sps:$4 sm:$0xff]  }
0x1308   : > { %6675 = vmatpush1.bf16.msra.mxu0 %v12300_v40  ;;  %6781 = vmatpush1.bf16.msra.mxu1 %v12303_v46  ;;  %v4813_v40 = vadd.f32 %v4801_v38, %v4785_v2  ;;  %v12344_v46 = vld [vmem:[#allocation10 + $0xd4] ss:$48 sps:$4 sm:$0xff]   ;;  %v12393_v2 = vld [vmem:[#allocation10 + $0x3d8] ss:$48 sps:$4 sm:$0xff]  }
0x1309   : > { %6676 = vmatprep.subr.bf16.mxu0 %v12308_v33  ;;  %6782 = vmatprep.subr.bf16.mxu1 %v12311_v4  ;;  %v12347_v33 = vld [vmem:[#allocation10 + $0xdc] ss:$48 sps:$4 sm:$0xff]   ;;  %v4816_v4 = vadd.f32 %v4801_v38, %v4788_v5  ;;  %v12398_v5 = vld [vmem:[#allocation10 + $0x434] ss:$48 sps:$4 sm:$0xff]  }
0x130a   : > { %v12377_v38 = vld [vmem:[#allocation10 + $0x2bc] ss:$48 sps:$4 sm:$0xff]  }
0x130c   : > { %6677 = vmatpush1.bf16.msra.mxu0 %v12306_v36  ;;  %6783 = vmatpush1.bf16.msra.mxu1 %v12309_v45  ;;  %v12342_v36 = vld [vmem:[#allocation10 + $0xd0] ss:$48 sps:$4 sm:$0xff]   ;;  %v14469_v45 = vpack.c.bf16 %v4816_v4, %v4813_v40  ;;  %v12399_v40 = vld [vmem:[#allocation10 + $0x438] ss:$48 sps:$4 sm:$0xff]  }
0x130d   : > { %6678 = vmatprep.subr.bf16.mxu0 %v12314_v47  ;;  %6784 = vmatprep.subr.bf16.mxu1 %v12317_v26  ;;  %v12345_v47 = vld [vmem:[#allocation10 + $0xd8] ss:$48 sps:$4 sm:$0xff]   ;;  %v12350_v26 = vld [vmem:[#allocation10 + $0x134] ss:$48 sps:$4 sm:$0xff]   ;;  %v12402_v4 = vld [vmem:[#allocation10 + $0x490] ss:$48 sps:$4 sm:$0xff]  }
0x1310   : > { %6679 = vmatpush1.bf16.msra.mxu0 %v12312_v27  ;;  %6785 = vmatpush1.bf16.msra.mxu1 %v12315_v6  ;;  %v12348_v27 = vld [vmem:[#allocation10 + $0x130] ss:$48 sps:$4 sm:$0xff]   ;;  %v12351_v6 = vld [vmem:[#allocation10 + $0x138] ss:$48 sps:$4 sm:$0xff]  }
0x1311   : > { %6680 = vmatprep.subr.bf16.mxu0 %v12320_v60  ;;  %6786 = vmatprep.subr.bf16.mxu1 %v12323_v22  ;;  %v12359_v60 = vld [vmem:[#allocation10 + $0x19c] ss:$48 sps:$4 sm:$0xff]   ;;  %v12354_v22 = vld [vmem:[#allocation10 + $0x190] ss:$48 sps:$4 sm:$0xff]  }
0x1314   : > { %6681 = vmatpush1.bf16.msra.mxu0 %v12318_v56  ;;  %6787 = vmatpush1.bf16.msra.mxu1 %v12321_v48  ;;  %v12360_v56 = vld [vmem:[#allocation10 + $0x1f0] ss:$48 sps:$4 sm:$0xff]   ;;  %v12363_v48 = vld [vmem:[#allocation10 + $0x1f8] ss:$48 sps:$4 sm:$0xff]  }
0x1315   : > { %6682 = vmatprep.subr.bf16.mxu0 %v12326_v13  ;;  %6788 = vmatprep.subr.bf16.mxu1 %v12329_v23  ;;  %v12368_v13 = vld [vmem:[#allocation10 + $0x254] ss:$48 sps:$4 sm:$0xff]   ;;  %v12371_v23 = vld [vmem:[#allocation10 + $0x25c] ss:$48 sps:$4 sm:$0xff]  }
0x1318   : > { %6683 = vmatpush1.bf16.msra.mxu0 %v12324_v53  ;;  %6789 = vmatpush1.bf16.msra.mxu1 %v12327_v24  ;;  %v12372_v53 = vld [vmem:[#allocation10 + $0x2b0] ss:$48 sps:$4 sm:$0xff]   ;;  %v12375_v24 = vld [vmem:[#allocation10 + $0x2b8] ss:$48 sps:$4 sm:$0xff]  }
0x1319   : > { %6827 = vmatprep.subr.bf16.mxu0 %v12332_v29  ;;  %6933 = vmatprep.subr.bf16.mxu1 %v12335_v61  ;;  %v12378_v29 = vld [vmem:[#allocation10 + $0x310] ss:$48 sps:$4 sm:$0xff]   ;;  %v12381_v61 = vld [vmem:[#allocation10 + $0x318] ss:$48 sps:$4 sm:$0xff]  }
0x131b   : > { %6701 = vmatmul.mubr.bf16.vlgmr.msra.gmra.mrb[80].mxu0 %v14463_v28  ;;  %6807 = vmatmul.mubr.bf16.vlgmr.msra.gmra.mrb[80].mxu1 %v14463_v28 }
0x131c   : > { %6828 = vmatpush1.bf16.msra.mxu0 %v12330_v32  ;;  %6934 = vmatpush1.bf16.msra.mxu1 %v12333_v20  ;;  %v12387_v32 = vld [vmem:[#allocation10 + $0x378] ss:$48 sps:$4 sm:$0xff]   ;;  %v12392_v20 = vld [vmem:[#allocation10 + $0x3d4] ss:$48 sps:$4 sm:$0xff]  }
0x131d   : > { %6829 = vmatprep.subr.bf16.mxu0 %v12338_v43  ;;  %6935 = vmatprep.subr.bf16.mxu1 %v12341_v58  ;;  %v12395_v43 = vld [vmem:[#allocation10 + $0x3dc] ss:$48 sps:$4 sm:$0xff]   ;;  %v12390_v58 = vld [vmem:[#allocation10 + $0x3d0] ss:$48 sps:$4 sm:$0xff]  }
0x131e   : > { %6710 = vmatprep.mubr.bf16.mxu0 %v13431_v34  ;;  %6816 = vmatprep.mubr.bf16.mxu1 %v13431_v34 }
0x1320   : > { %6830 = vmatpush1.bf16.msra.mxu0 %v12336_v31  ;;  %6936 = vmatpush1.bf16.msra.mxu1 %v12339_v52  ;;  %v12401_v31 = vld [vmem:[#allocation10 + $0x43c] ss:$48 sps:$4 sm:$0xff]   ;;  %v12396_v52 = vld [vmem:[#allocation10 + $0x430] ss:$48 sps:$4 sm:$0xff]  }
0x1321   : > { %6831 = vmatprep.subr.bf16.mxu0 %v12344_v46  ;;  %6937 = vmatprep.subr.bf16.mxu1 %v12347_v33  ;;  %v12404_v46 = vld [vmem:[#allocation10 + $0x494] ss:$48 sps:$4 sm:$0xff]   ;;  %v12407_v33 = vld [vmem:[#allocation10 + $0x49c] ss:$48 sps:$4 sm:$0xff]  }
0x1323   : > { %6711 = vmatmul.mubr.bf16.gmra.mrb[84].mxu0 %v14469_v45  ;;  %6817 = vmatmul.mubr.bf16.gmra.mrb[84].mxu1 %v14469_v45 }
0x1324   : > { %6832 = vmatpush1.bf16.msra.mxu0 %v12342_v36  ;;  %6859 = vmatprep.mubr.bf16.mxu0 %v14427_v21  ;;  %v12405_v36 = vld [vmem:[#allocation10 + $0x498] ss:$48 sps:$4 sm:$0xff]  }
0x1325   : > { %6938 = vmatpush1.bf16.msra.mxu1 %v12345_v47  ;;  %6965 = vmatprep.mubr.bf16.mxu1 %v14427_v21  ;;  %v12410_v47 = vld [vmem:[#allocation10 + $0x4f4] ss:$48 sps:$4 sm:$0xff]  }
0x1326   : > { %6833 = vmatprep.subr.bf16.mxu0 %v12350_v26  ;;  %6939 = vmatprep.subr.bf16.mxu1 %v12353_v9  ;;  %v12413_v26 = vld [vmem:[#allocation10 + $0x4fc] ss:$48 sps:$4 sm:$0xff]   ;;  %v12408_v9 = vld [vmem:[#allocation10 + $0x4f0] ss:$48 sps:$4 sm:$0xff]  }
0x1328   : > { %6834 = vmatpush1.bf16.msra.mxu0 %v12348_v27  ;;  %v12411_v27 = vld [vmem:[#allocation10 + $0x4f8] ss:$48 sps:$4 sm:$0xff]  }
0x1329   : > { %6940 = vmatpush1.bf16.msra.mxu1 %v12351_v6  ;;  %6835 = vmatprep.subr.bf16.mxu0 %v12356_v8  ;;  %v12416_v6 = vld [vmem:[#allocation10 + $0x554] ss:$48 sps:$4 sm:$0xff]   ;;  %v12419_v8 = vld [vmem:[#allocation10 + $0x55c] ss:$48 sps:$4 sm:$0xff]  }
0x132a   : > { %6941 = vmatprep.subr.bf16.mxu1 %v12359_v60  ;;  %v12414_v60 = vld [vmem:[#allocation10 + $0x550] ss:$48 sps:$4 sm:$0xff]  }
0x132c   : > { %6836 = vmatpush1.bf16.msra.mxu0 %v12354_v22  ;;  %v12417_v22 = vld [vmem:[#allocation10 + $0x558] ss:$48 sps:$4 sm:$0xff]  }
0x132d   : > { %6942 = vmatpush1.bf16.msra.mxu1 %v12357_v62  ;;  %6837 = vmatprep.subr.bf16.mxu0 %v12362_v17  ;;  %v12422_v62 = vld [vmem:[#allocation10 + $0x5b4] ss:$48 sps:$4 sm:$0xff]   ;;  %v12425_v17 = vld [vmem:[#allocation10 + $0x5bc] ss:$48 sps:$4 sm:$0xff]  }
0x132e   : > { %6943 = vmatprep.subr.bf16.mxu1 %v12365_v42  ;;  %v12420_v42 = vld [vmem:[#allocation10 + $0x5b0] ss:$48 sps:$4 sm:$0xff]  }
0x1330   : > { %6838 = vmatpush1.bf16.msra.mxu0 %v12360_v56  ;;  %v12423_v56 = vld [vmem:[#allocation10 + $0x5b8] ss:$48 sps:$4 sm:$0xff]  }
0x1331   : > { %6944 = vmatpush1.bf16.msra.mxu1 %v12363_v48  ;;  %6839 = vmatprep.subr.bf16.mxu0 %v12368_v13  ;;  %v12428_v48 = vld [vmem:[#allocation10 + $0x614] ss:$48 sps:$4 sm:$0xff]   ;;  %v12431_v13 = vld [vmem:[#allocation10 + $0x61c] ss:$48 sps:$4 sm:$0xff]  }
0x1332   : > { %6945 = vmatprep.subr.bf16.mxu1 %v12371_v23  ;;  %v12426_v23 = vld [vmem:[#allocation10 + $0x610] ss:$48 sps:$4 sm:$0xff]  }
0x1334   : > { %6840 = vmatpush1.bf16.msra.mxu0 %v12366_v55  ;;  %v12429_v55 = vld [vmem:[#allocation10 + $0x618] ss:$48 sps:$4 sm:$0xff]  }
0x1335   : > { %6946 = vmatpush1.bf16.msra.mxu1 %v12369_v15  ;;  %6841 = vmatprep.subr.bf16.mxu0 %v12374_v18  ;;  %v12434_v15 = vld [vmem:[#allocation10 + $0x674] ss:$48 sps:$4 sm:$0xff]   ;;  %v12437_v18 = vld [vmem:[#allocation10 + $0x67c] ss:$48 sps:$4 sm:$0xff]  }
0x1336   : > { %6947 = vmatprep.subr.bf16.mxu1 %v12377_v38  ;;  %v12432_v38 = vld [vmem:[#allocation10 + $0x670] ss:$48 sps:$4 sm:$0xff]  }
0x1338   : > { %6842 = vmatpush1.bf16.msra.mxu0 %v12372_v53  ;;  %v12435_v53 = vld [vmem:[#allocation10 + $0x678] ss:$48 sps:$4 sm:$0xff]  }
0x1339   : > { %6948 = vmatpush1.bf16.msra.mxu1 %v12375_v24  ;;  %6843 = vmatprep.subr.bf16.mxu0 %v12380_v30  ;;  %v12440_v24 = vld [vmem:[#allocation10 + $0x6d4] ss:$48 sps:$4 sm:$0xff]   ;;  %v12443_v30 = vld [vmem:[#allocation10 + $0x6dc] ss:$48 sps:$4 sm:$0xff]  }
0x133a   : > { %6949 = vmatprep.subr.bf16.mxu1 %v12383_v37  ;;  %v12438_v37 = vld [vmem:[#allocation10 + $0x6d0] ss:$48 sps:$4 sm:$0xff]  }
0x133c   : > { %6844 = vmatpush1.bf16.msra.mxu0 %v12378_v29  ;;  %v12441_v29 = vld [vmem:[#allocation10 + $0x6d8] ss:$48 sps:$4 sm:$0xff]  }
0x133d   : > { %6950 = vmatpush1.bf16.msra.mxu1 %v12381_v61  ;;  %6845 = vmatprep.subr.bf16.mxu0 %v12386_v54  ;;  %v12446_v61 = vld [vmem:[#allocation10 + $0x734] ss:$48 sps:$4 sm:$0xff]   ;;  %v12449_v54 = vld [vmem:[#allocation10 + $0x73c] ss:$48 sps:$4 sm:$0xff]  }
0x133e   : > { %6951 = vmatprep.subr.bf16.mxu1 %v12389_v12  ;;  %v12444_v12 = vld [vmem:[#allocation10 + $0x730] ss:$48 sps:$4 sm:$0xff]  }
0x1340   : > { %6846 = vmatpush1.bf16.msra.mxu0 %v12384_v14  ;;  %v12447_v14 = vld [vmem:[#allocation10 + $0x738] ss:$48 sps:$4 sm:$0xff]  }
0x1341   : > { %6952 = vmatpush1.bf16.msra.mxu1 %v12387_v32  ;;  %6847 = vmatprep.subr.bf16.mxu0 %v12392_v20  ;;  %v12452_v32 = vld [vmem:[#allocation10 + $0x794] ss:$48 sps:$4 sm:$0xff]   ;;  %v12455_v20 = vld [vmem:[#allocation10 + $0x79c] ss:$48 sps:$4 sm:$0xff]  }
0x1342   : > { %6953 = vmatprep.subr.bf16.mxu1 %v12395_v43  ;;  %v12450_v43 = vld [vmem:[#allocation10 + $0x790] ss:$48 sps:$4 sm:$0xff]  }
0x1344   : > { %6848 = vmatpush1.bf16.msra.mxu0 %v12390_v58  ;;  %v12453_v58 = vld [vmem:[#allocation10 + $0x798] ss:$48 sps:$4 sm:$0xff]  }
0x1345   : > { %6954 = vmatpush1.bf16.msra.mxu1 %v12393_v2  ;;  %6849 = vmatprep.subr.bf16.mxu0 %v12398_v5  ;;  %v12458_v2 = vld [vmem:[#allocation10 + $0x7f4] ss:$48 sps:$4 sm:$0xff]   ;;  %v12461_v5 = vld [vmem:[#allocation10 + $0x7fc] ss:$48 sps:$4 sm:$0xff]  }
0x1346   : > { %6955 = vmatprep.subr.bf16.mxu1 %v12401_v31  ;;  %v12456_v31 = vld [vmem:[#allocation10 + $0x7f0] ss:$48 sps:$4 sm:$0xff]  }
0x1348   : > { %6850 = vmatpush1.bf16.msra.mxu0 %v12396_v52  ;;  %v12459_v52 = vld [vmem:[#allocation10 + $0x7f8] ss:$48 sps:$4 sm:$0xff]  }
0x1349   : > { %6956 = vmatpush1.bf16.msra.mxu1 %v12399_v40  ;;  %6851 = vmatprep.subr.bf16.mxu0 %v12404_v46  ;;  %v12464_v40 = vld [vmem:[#allocation10 + $0x854] ss:$48 sps:$4 sm:$0xff]   ;;  %v12467_v46 = vld [vmem:[#allocation10 + $0x85c] ss:$48 sps:$4 sm:$0xff]  }
0x134a   : > { %6957 = vmatprep.subr.bf16.mxu1 %v12407_v33  ;;  %v12462_v33 = vld [vmem:[#allocation10 + $0x850] ss:$48 sps:$4 sm:$0xff]  }
0x134c   : > { %6852 = vmatpush1.bf16.msra.mxu0 %v12402_v4  ;;  %v12465_v4 = vld [vmem:[#allocation10 + $0x858] ss:$48 sps:$4 sm:$0xff]  }
0x134d   : > { %6958 = vmatpush1.bf16.msra.mxu1 %v12405_v36  ;;  %6853 = vmatprep.subr.bf16.mxu0 %v12410_v47  ;;  %v12470_v36 = vld [vmem:[#allocation10 + $0x8b4] ss:$48 sps:$4 sm:$0xff]   ;;  %v12473_v47 = vld [vmem:[#allocation10 + $0x8bc] ss:$48 sps:$4 sm:$0xff]  }
0x134e   : > { %6959 = vmatprep.subr.bf16.mxu1 %v12413_v26  ;;  %v12468_v26 = vld [vmem:[#allocation10 + $0x8b0] ss:$48 sps:$4 sm:$0xff]  }
0x1350   : > { %6854 = vmatpush1.bf16.msra.mxu0 %v12408_v9  ;;  %v12471_v9 = vld [vmem:[#allocation10 + $0x8b8] ss:$48 sps:$4 sm:$0xff]  }
0x1351   : > { %6960 = vmatpush1.bf16.msra.mxu1 %v12411_v27  ;;  %6855 = vmatprep.subr.bf16.mxu0 %v12416_v6  ;;  %v12476_v27 = vld [vmem:[#allocation10 + $0x24] ss:$48 sps:$4 sm:$0xff]   ;;  %v12479_v6 = vld [vmem:[#allocation10 + $0x2c] ss:$48 sps:$4 sm:$0xff]  }
0x1352   : > { %6961 = vmatprep.subr.bf16.mxu1 %v12419_v8  ;;  %v12474_v8 = vld [vmem:[#allocation10 + $0x20] ss:$48 sps:$4 sm:$0xff]  }
0x1354   : > { %6856 = vmatpush1.bf16.msra.mxu0 %v12414_v60  ;;  %v12477_v60 = vld [vmem:[#allocation10 + $0x28] ss:$48 sps:$4 sm:$0xff]  }
0x1355   : > { %6962 = vmatpush1.bf16.msra.mxu1 %v12417_v22  ;;  %6857 = vmatprep.subr.bf16.mxu0 %v12422_v62  ;;  %v12482_v22 = vld [vmem:[#allocation10 + $0x84] ss:$48 sps:$4 sm:$0xff]   ;;  %v12485_v62 = vld [vmem:[#allocation10 + $0x8c] ss:$48 sps:$4 sm:$0xff]  }
0x1356   : > { %6963 = vmatprep.subr.bf16.mxu1 %v12425_v17  ;;  %v12480_v17 = vld [vmem:[#allocation10 + $0x80] ss:$48 sps:$4 sm:$0xff]  }
0x1358   : > { %6858 = vmatpush1.bf16.msra.mxu0 %v12420_v42  ;;  %v12483_v42 = vld [vmem:[#allocation10 + $0x88] ss:$48 sps:$4 sm:$0xff]  }
0x1359   : > { %6964 = vmatpush1.bf16.msra.mxu1 %v12423_v56  ;;  %6880 = vmatprep.subr.bf16.mxu0 %v12428_v48  ;;  %v12488_v56 = vld [vmem:[#allocation10 + $0xe4] ss:$48 sps:$4 sm:$0xff]   ;;  %v12491_v48 = vld [vmem:[#allocation10 + $0xec] ss:$48 sps:$4 sm:$0xff]  }
0x135a   : > { %6986 = vmatprep.subr.bf16.mxu1 %v12431_v13  ;;  %v12486_v13 = vld [vmem:[#allocation10 + $0xe0] ss:$48 sps:$4 sm:$0xff]  }
0x135b   : > { %6860 = vmatmul.mubr.bf16.vlgmr.msra.gmra.mrb[88].mxu0 %v14429_v0 }
0x135c   : > { %6966 = vmatmul.mubr.bf16.vlgmr.msra.gmra.mrb[88].mxu1 %v14429_v0  ;;  %6869 = vmatprep.mubr.bf16.mxu0 %v14437_v16 }
0x135d   : > { %6881 = vmatpush1.bf16.msra.mxu0 %v12426_v23  ;;  %6975 = vmatprep.mubr.bf16.mxu1 %v14437_v16  ;;  %v12489_v23 = vld [vmem:[#allocation10 + $0xe8] ss:$48 sps:$4 sm:$0xff]  }
0x135e   : > { %6987 = vmatpush1.bf16.msra.mxu1 %v12429_v55  ;;  %6882 = vmatprep.subr.bf16.mxu0 %v12434_v15  ;;  %v12494_v55 = vld [vmem:[#allocation10 + $0x144] ss:$48 sps:$4 sm:$0xff]   ;;  %v12497_v15 = vld [vmem:[#allocation10 + $0x14c] ss:$48 sps:$4 sm:$0xff]  }
0x135f   : > { %6988 = vmatprep.subr.bf16.mxu1 %v12437_v18  ;;  %v12492_v18 = vld [vmem:[#allocation10 + $0x140] ss:$48 sps:$4 sm:$0xff]  }
0x1361   : > { %6883 = vmatpush1.bf16.msra.mxu0 %v12432_v38  ;;  %v12495_v38 = vld [vmem:[#allocation10 + $0x148] ss:$48 sps:$4 sm:$0xff]  }
0x1362   : > { %6989 = vmatpush1.bf16.msra.mxu1 %v12435_v53  ;;  %6884 = vmatprep.subr.bf16.mxu0 %v12440_v24  ;;  %v12500_v53 = vld [vmem:[#allocation10 + $0x1a4] ss:$48 sps:$4 sm:$0xff]   ;;  %v12503_v24 = vld [vmem:[#allocation10 + $0x1ac] ss:$48 sps:$4 sm:$0xff]  }
0x1363   : > { %6870 = vmatmul.mubr.bf16.gmra.mrb[92].mxu0 %v14439_v35  ;;  %6990 = vmatprep.subr.bf16.mxu1 %v12443_v30  ;;  %v12498_v30 = vld [vmem:[#allocation10 + $0x1a0] ss:$48 sps:$4 sm:$0xff]  }
0x1364   : > { %6976 = vmatmul.mubr.bf16.gmra.mrb[92].mxu1 %v14439_v35  ;;  %6912 = vmatprep.mubr.bf16.mxu0 %v13431_v34 }
0x1365   : > { %6885 = vmatpush1.bf16.msra.mxu0 %v12438_v37  ;;  %7018 = vmatprep.mubr.bf16.mxu1 %v13431_v34  ;;  %v12501_v37 = vld [vmem:[#allocation10 + $0x1a8] ss:$48 sps:$4 sm:$0xff]  }
0x1366   : > { %6991 = vmatpush1.bf16.msra.mxu1 %v12441_v29  ;;  %6886 = vmatprep.subr.bf16.mxu0 %v12446_v61  ;;  %v12506_v29 = vld [vmem:[#allocation10 + $0x204] ss:$48 sps:$4 sm:$0xff]   ;;  %v12509_v61 = vld [vmem:[#allocation10 + $0x20c] ss:$48 sps:$4 sm:$0xff]  }
0x1367   : > { %6992 = vmatprep.subr.bf16.mxu1 %v12449_v54  ;;  %v12504_v54 = vld [vmem:[#allocation10 + $0x200] ss:$48 sps:$4 sm:$0xff]  }
0x1369   : > { %6887 = vmatpush1.bf16.msra.mxu0 %v12444_v12  ;;  %v12507_v12 = vld [vmem:[#allocation10 + $0x208] ss:$48 sps:$4 sm:$0xff]  }
0x136a   : > { %6993 = vmatpush1.bf16.msra.mxu1 %v12447_v14  ;;  %6888 = vmatprep.subr.bf16.mxu0 %v12452_v32  ;;  %v12512_v14 = vld [vmem:[#allocation10 + $0x264] ss:$48 sps:$4 sm:$0xff]   ;;  %v12515_v32 = vld [vmem:[#allocation10 + $0x26c] ss:$48 sps:$4 sm:$0xff]  }
0x136b   : > { %6994 = vmatprep.subr.bf16.mxu1 %v12455_v20  ;;  %v12513_v20 = vld [vmem:[#allocation10 + $0x268] ss:$48 sps:$4 sm:$0xff]  }
0x136d   : > { %6889 = vmatpush1.bf16.msra.mxu0 %v12450_v43  ;;  %v12518_v43 = vld [vmem:[#allocation10 + $0x2c4] ss:$48 sps:$4 sm:$0xff]  }
0x136e   : > { %6995 = vmatpush1.bf16.msra.mxu1 %v12453_v58  ;;  %6890 = vmatprep.subr.bf16.mxu0 %v12458_v2  ;;  %v12521_v58 = vld [vmem:[#allocation10 + $0x2cc] ss:$48 sps:$4 sm:$0xff]   ;;  %v12516_v2 = vld [vmem:[#allocation10 + $0x2c0] ss:$48 sps:$4 sm:$0xff]  }
0x136f   : > { %6996 = vmatprep.subr.bf16.mxu1 %v12461_v5  ;;  %v12519_v5 = vld [vmem:[#allocation10 + $0x2c8] ss:$48 sps:$4 sm:$0xff]  }
0x1371   : > { %6891 = vmatpush1.bf16.msra.mxu0 %v12456_v31  ;;  %v12524_v31 = vld [vmem:[#allocation10 + $0x324] ss:$48 sps:$4 sm:$0xff]  }
0x1372   : > { %6997 = vmatpush1.bf16.msra.mxu1 %v12459_v52  ;;  %6892 = vmatprep.subr.bf16.mxu0 %v12464_v40  ;;  %v12527_v52 = vld [vmem:[#allocation10 + $0x32c] ss:$48 sps:$4 sm:$0xff]   ;;  %v12522_v40 = vld [vmem:[#allocation10 + $0x320] ss:$48 sps:$4 sm:$0xff]  }
0x1373   : > { %6998 = vmatprep.subr.bf16.mxu1 %v12467_v46  ;;  %v12525_v46 = vld [vmem:[#allocation10 + $0x328] ss:$48 sps:$4 sm:$0xff]  }
0x1375   : > { %6893 = vmatpush1.bf16.msra.mxu0 %v12462_v33  ;;  %v12530_v33 = vld [vmem:[#allocation10 + $0x384] ss:$48 sps:$4 sm:$0xff]  }
0x1376   : > { %6999 = vmatpush1.bf16.msra.mxu1 %v12465_v4  ;;  %6894 = vmatprep.subr.bf16.mxu0 %v12470_v36  ;;  %v12533_v4 = vld [vmem:[#allocation10 + $0x38c] ss:$48 sps:$4 sm:$0xff]   ;;  %v12528_v36 = vld [vmem:[#allocation10 + $0x380] ss:$48 sps:$4 sm:$0xff]  }
0x1377   : > { %7000 = vmatprep.subr.bf16.mxu1 %v12473_v47  ;;  %v12531_v47 = vld [vmem:[#allocation10 + $0x388] ss:$48 sps:$4 sm:$0xff]  }
0x1379   : > { %6895 = vmatpush1.bf16.msra.mxu0 %v12468_v26  ;;  %v12536_v26 = vld [vmem:[#allocation10 + $0x3e4] ss:$48 sps:$4 sm:$0xff]  }
0x137a   : > { %7001 = vmatpush1.bf16.msra.mxu1 %v12471_v9  ;;  %7039 = vmatprep.subr.bf16.mxu0 %v12476_v27  ;;  %v12539_v9 = vld [vmem:[#allocation10 + $0x3ec] ss:$48 sps:$4 sm:$0xff]   ;;  %v12534_v27 = vld [vmem:[#allocation10 + $0x3e0] ss:$48 sps:$4 sm:$0xff]  }
0x137b   : > { %7145 = vmatprep.subr.bf16.mxu1 %v12479_v6  ;;  %v12537_v6 = vld [vmem:[#allocation10 + $0x3e8] ss:$48 sps:$4 sm:$0xff]  }
0x137c   : > { %6913 = vmatmul.mubr.bf16.vlgmr.msra.gmra.mrb[88].mxu0 %v14463_v28 }
0x137d   : > { %7019 = vmatmul.mubr.bf16.vlgmr.msra.gmra.mrb[88].mxu1 %v14463_v28  ;;  %7040 = vmatpush1.bf16.msra.mxu0 %v12474_v8  ;;  %v12542_v8 = vld [vmem:[#allocation10 + $0x444] ss:$48 sps:$4 sm:$0xff]  }
0x137e   : > { %7146 = vmatpush1.bf16.msra.mxu1 %v12477_v60  ;;  %7041 = vmatprep.subr.bf16.mxu0 %v12482_v22  ;;  %v12545_v60 = vld [vmem:[#allocation10 + $0x44c] ss:$48 sps:$4 sm:$0xff]   ;;  %v12540_v22 = vld [vmem:[#allocation10 + $0x440] ss:$48 sps:$4 sm:$0xff]  }
0x137f   : > { %7147 = vmatprep.subr.bf16.mxu1 %v12485_v62  ;;  %6922 = vmatprep.mubr.bf16.mxu0 %v13431_v34  ;;  %v12543_v62 = vld [vmem:[#allocation10 + $0x448] ss:$48 sps:$4 sm:$0xff]  }
0x1380   : > { %7028 = vmatprep.mubr.bf16.mxu1 %v13431_v34 }
0x1381   : > { %7042 = vmatpush1.bf16.msra.mxu0 %v12480_v17  ;;  %v12548_v17 = vld [vmem:[#allocation10 + $0x4a4] ss:$48 sps:$4 sm:$0xff]  }
0x1382   : > { %7148 = vmatpush1.bf16.msra.mxu1 %v12483_v42  ;;  %7043 = vmatprep.subr.bf16.mxu0 %v12488_v56  ;;  %v12551_v42 = vld [vmem:[#allocation10 + $0x4ac] ss:$48 sps:$4 sm:$0xff]   ;;  %v12546_v56 = vld [vmem:[#allocation10 + $0x4a0] ss:$48 sps:$4 sm:$0xff]  }
0x1383   : > { %7149 = vmatprep.subr.bf16.mxu1 %v12491_v48  ;;  %v12549_v48 = vld [vmem:[#allocation10 + $0x4a8] ss:$48 sps:$4 sm:$0xff]  }
0x1384   : > { %6923 = vmatmul.mubr.bf16.gmra.mrb[92].mxu0 %v14469_v45 }
0x1385   : > { %7029 = vmatmul.mubr.bf16.gmra.mrb[92].mxu1 %v14469_v45  ;;  %7044 = vmatpush1.bf16.msra.mxu0 %v12486_v13  ;;  %v12554_v13 = vld [vmem:[#allocation10 + $0x504] ss:$48 sps:$4 sm:$0xff]  }
0x1386   : > { %7071 = vmatprep.mubr.bf16.mxu0 %v14427_v21  ;;  %7150 = vmatpush1.bf16.msra.mxu1 %v12489_v23  ;;  %v12557_v23 = vld [vmem:[#allocation10 + $0x50c] ss:$48 sps:$4 sm:$0xff]  }
0x1387   : > { %7177 = vmatprep.mubr.bf16.mxu1 %v14427_v21  ;;  %7045 = vmatprep.subr.bf16.mxu0 %v12494_v55  ;;  %v12510_v21 = vld [vmem:[#allocation10 + $0x260] ss:$48 sps:$4 sm:$0xff]  }
0x1388   : > { %7151 = vmatprep.subr.bf16.mxu1 %v12497_v15  ;;  %v12552_v55 = vld [vmem:[#allocation10 + $0x500] ss:$48 sps:$4 sm:$0xff]   ;;  %v12555_v15 = vld [vmem:[#allocation10 + $0x508] ss:$48 sps:$4 sm:$0xff]  }
0x1389   : > { %7046 = vmatpush1.bf16.msra.mxu0 %v12492_v18  ;;  %v12560_v18 = vld [vmem:[#allocation10 + $0x564] ss:$48 sps:$4 sm:$0xff]  }
0x138a   : > { %7152 = vmatpush1.bf16.msra.mxu1 %v12495_v38  ;;  %7047 = vmatprep.subr.bf16.mxu0 %v12500_v53  ;;  %v12563_v38 = vld [vmem:[#allocation10 + $0x56c] ss:$48 sps:$4 sm:$0xff]   ;;  %v12558_v53 = vld [vmem:[#allocation10 + $0x560] ss:$48 sps:$4 sm:$0xff]  }
0x138b   : > { %7153 = vmatprep.subr.bf16.mxu1 %v12503_v24  ;;  %v12561_v24 = vld [vmem:[#allocation10 + $0x568] ss:$48 sps:$4 sm:$0xff]  }
0x138d   : > { %7048 = vmatpush1.bf16.msra.mxu0 %v12498_v30  ;;  %v12566_v30 = vld [vmem:[#allocation10 + $0x5c4] ss:$48 sps:$4 sm:$0xff]  }
0x138e   : > { %7154 = vmatpush1.bf16.msra.mxu1 %v12501_v37  ;;  %7049 = vmatprep.subr.bf16.mxu0 %v12506_v29  ;;  %v12569_v37 = vld [vmem:[#allocation10 + $0x5cc] ss:$48 sps:$4 sm:$0xff]   ;;  %v12564_v29 = vld [vmem:[#allocation10 + $0x5c0] ss:$48 sps:$4 sm:$0xff]  }
0x138f   : > { %7155 = vmatprep.subr.bf16.mxu1 %v12509_v61  ;;  %v12567_v61 = vld [vmem:[#allocation10 + $0x5c8] ss:$48 sps:$4 sm:$0xff]  }
0x1391   : > { %7050 = vmatpush1.bf16.msra.mxu0 %v12504_v54  ;;  %v12572_v54 = vld [vmem:[#allocation10 + $0x624] ss:$48 sps:$4 sm:$0xff]  }
0x1392   : > { %7156 = vmatpush1.bf16.msra.mxu1 %v12507_v12  ;;  %7051 = vmatprep.subr.bf16.mxu0 %v12512_v14  ;;  %v12575_v12 = vld [vmem:[#allocation10 + $0x62c] ss:$48 sps:$4 sm:$0xff]   ;;  %v12570_v14 = vld [vmem:[#allocation10 + $0x620] ss:$48 sps:$4 sm:$0xff]  }
0x1393   : > { %7157 = vmatprep.subr.bf16.mxu1 %v12515_v32  ;;  %v12573_v32 = vld [vmem:[#allocation10 + $0x628] ss:$48 sps:$4 sm:$0xff]  }
0x1395   : > { %7052 = vmatpush1.bf16.msra.mxu0 %v12510_v21  ;;  %v12578_v21 = vld [vmem:[#allocation10 + $0x684] ss:$48 sps:$4 sm:$0xff]  }
0x1396   : > { %7158 = vmatpush1.bf16.msra.mxu1 %v12513_v20  ;;  %7053 = vmatprep.subr.bf16.mxu0 %v12518_v43  ;;  %v12581_v20 = vld [vmem:[#allocation10 + $0x68c] ss:$48 sps:$4 sm:$0xff]   ;;  %v12576_v43 = vld [vmem:[#allocation10 + $0x680] ss:$48 sps:$4 sm:$0xff]  }
0x1397   : > { %7159 = vmatprep.subr.bf16.mxu1 %v12521_v58  ;;  %v12579_v58 = vld [vmem:[#allocation10 + $0x688] ss:$48 sps:$4 sm:$0xff]  }
0x1399   : > { %7054 = vmatpush1.bf16.msra.mxu0 %v12516_v2  ;;  %v12584_v2 = vld [vmem:[#allocation10 + $0x6e4] ss:$48 sps:$4 sm:$0xff]  }
0x139a   : > { %7160 = vmatpush1.bf16.msra.mxu1 %v12519_v5  ;;  %7055 = vmatprep.subr.bf16.mxu0 %v12524_v31  ;;  %v12587_v5 = vld [vmem:[#allocation10 + $0x6ec] ss:$48 sps:$4 sm:$0xff]   ;;  %v12582_v31 = vld [vmem:[#allocation10 + $0x6e0] ss:$48 sps:$4 sm:$0xff]  }
0x139b   : > { %7161 = vmatprep.subr.bf16.mxu1 %v12527_v52  ;;  %v12585_v52 = vld [vmem:[#allocation10 + $0x6e8] ss:$48 sps:$4 sm:$0xff]  }
0x139d   : > { %7056 = vmatpush1.bf16.msra.mxu0 %v12522_v40  ;;  %v12590_v40 = vld [vmem:[#allocation10 + $0x744] ss:$48 sps:$4 sm:$0xff]  }
0x139e   : > { %7162 = vmatpush1.bf16.msra.mxu1 %v12525_v46  ;;  %7057 = vmatprep.subr.bf16.mxu0 %v12530_v33  ;;  %v12591_v46 = vld [vmem:[#allocation10 + $0x748] ss:$48 sps:$4 sm:$0xff]   ;;  %v12596_v33 = vld [vmem:[#allocation10 + $0x7a4] ss:$48 sps:$4 sm:$0xff]  }
0x139f   : > { %7163 = vmatprep.subr.bf16.mxu1 %v12533_v4  ;;  %v12599_v4 = vld [vmem:[#allocation10 + $0x7ac] ss:$48 sps:$4 sm:$0xff]  }
0x13a1   : > { %7058 = vmatpush1.bf16.msra.mxu0 %v12528_v36  ;;  %v12594_v36 = vld [vmem:[#allocation10 + $0x7a0] ss:$48 sps:$4 sm:$0xff]  }
0x13a2   : > { %7164 = vmatpush1.bf16.msra.mxu1 %v12531_v47  ;;  %7059 = vmatprep.subr.bf16.mxu0 %v12536_v26  ;;  %v12597_v47 = vld [vmem:[#allocation10 + $0x7a8] ss:$48 sps:$4 sm:$0xff]   ;;  %v12602_v26 = vld [vmem:[#allocation10 + $0x804] ss:$48 sps:$4 sm:$0xff]  }
0x13a3   : > { %7165 = vmatprep.subr.bf16.mxu1 %v12539_v9  ;;  %v12600_v9 = vld [vmem:[#allocation10 + $0x800] ss:$48 sps:$4 sm:$0xff]  }
0x13a5   : > { %7060 = vmatpush1.bf16.msra.mxu0 %v12534_v27  ;;  %v12603_v27 = vld [vmem:[#allocation10 + $0x808] ss:$48 sps:$4 sm:$0xff]  }
0x13a6   : > { %7166 = vmatpush1.bf16.msra.mxu1 %v12537_v6  ;;  %7061 = vmatprep.subr.bf16.mxu0 %v12542_v8  ;;  %v12608_v6 = vld [vmem:[#allocation10 + $0x864] ss:$48 sps:$4 sm:$0xff]   ;;  %v12611_v8 = vld [vmem:[#allocation10 + $0x86c] ss:$48 sps:$4 sm:$0xff]  }
0x13a7   : > { %7167 = vmatprep.subr.bf16.mxu1 %v12545_v60  ;;  %v12606_v60 = vld [vmem:[#allocation10 + $0x860] ss:$48 sps:$4 sm:$0xff]  }
0x13a9   : > { %7062 = vmatpush1.bf16.msra.mxu0 %v12540_v22  ;;  %v12609_v22 = vld [vmem:[#allocation10 + $0x868] ss:$48 sps:$4 sm:$0xff]  }
0x13aa   : > { %7168 = vmatpush1.bf16.msra.mxu1 %v12543_v62  ;;  %7063 = vmatprep.subr.bf16.mxu0 %v12548_v17  ;;  %v12614_v62 = vld [vmem:[#allocation10 + $0x8c4] ss:$48 sps:$4 sm:$0xff]   ;;  %v12617_v17 = vld [vmem:[#allocation10 + $0x8cc] ss:$48 sps:$4 sm:$0xff]  }
0x13ab   : > { %7169 = vmatprep.subr.bf16.mxu1 %v12551_v42  ;;  %v12612_v42 = vld [vmem:[#allocation10 + $0x8c0] ss:$48 sps:$4 sm:$0xff]  }
0x13ad   : > { %7064 = vmatpush1.bf16.msra.mxu0 %v12546_v56  ;;  %v12615_v56 = vld [vmem:[#allocation10 + $0x8c8] ss:$48 sps:$4 sm:$0xff]  }
0x13ae   : > { %7170 = vmatpush1.bf16.msra.mxu1 %v12549_v48  ;;  %7065 = vmatprep.subr.bf16.mxu0 %v12554_v13  ;;  %v12620_v48 = vld [vmem:[#allocation13 + $0x4] ss:$12 sps:$4 sm:$0xff]   ;;  %v12621_v13 = vld [vmem:[#allocation13 + $0xc8] ss:$12 sps:$4 sm:$0xff]  }
0x13af   : > { %7171 = vmatprep.subr.bf16.mxu1 %v12557_v23  ;;  %v12618_v23 = vld [vmem:[#allocation13] ss:$12 sps:$4 sm:$0xff]  }
0x13b1   : > { %7066 = vmatpush1.bf16.msra.mxu0 %v12552_v55  ;;  %v12622_v55 = vld [vmem:[#allocation13 + $0x8] ss:$12 sps:$4 sm:$0xff]  }
0x13b2   : > { %7172 = vmatpush1.bf16.msra.mxu1 %v12555_v15  ;;  %7067 = vmatprep.subr.bf16.mxu0 %v12560_v18  ;;  %v12625_v15 = vld [vmem:[#allocation13 + $0x1c] ss:$12 sps:$4 sm:$0xff]   ;;  %v12626_v18 = vld [vmem:[#allocation13 + $0xe0] ss:$12 sps:$4 sm:$0xff]  }
0x13b3   : > { %7173 = vmatprep.subr.bf16.mxu1 %v12563_v38  ;;  %v12623_v38 = vld [vmem:[#allocation13 + $0x18] ss:$12 sps:$4 sm:$0xff]  }
0x13b5   : > { %7068 = vmatpush1.bf16.msra.mxu0 %v12558_v53  ;;  %v12627_v53 = vld [vmem:[#allocation13 + $0x20] ss:$12 sps:$4 sm:$0xff]  }
0x13b6   : > { %7174 = vmatpush1.bf16.msra.mxu1 %v12561_v24  ;;  %7069 = vmatprep.subr.bf16.mxu0 %v12566_v30  ;;  %v12630_v24 = vld [vmem:[#allocation13 + $0x34] ss:$12 sps:$4 sm:$0xff]   ;;  %v12631_v30 = vld [vmem:[#allocation13 + $0xf8] ss:$12 sps:$4 sm:$0xff]  }
0x13b7   : > { %7175 = vmatprep.subr.bf16.mxu1 %v12569_v37  ;;  %v12628_v37 = vld [vmem:[#allocation13 + $0x30] ss:$12 sps:$4 sm:$0xff]  }
0x13b9   : > { %7070 = vmatpush1.bf16.msra.mxu0 %v12564_v29  ;;  %v12632_v29 = vld [vmem:[#allocation13 + $0x38] ss:$12 sps:$4 sm:$0xff]  }
0x13ba   : > { %7176 = vmatpush1.bf16.msra.mxu1 %v12567_v61  ;;  %7092 = vmatprep.subr.bf16.mxu0 %v12572_v54  ;;  %v12635_v61 = vld [vmem:[#allocation13 + $0x4c] ss:$12 sps:$4 sm:$0xff]   ;;  %v12633_v54 = vld [vmem:[#allocation13 + $0x48] ss:$12 sps:$4 sm:$0xff]  }
0x13bb   : > { %7198 = vmatprep.subr.bf16.mxu1 %v12575_v12  ;;  %v12637_v12 = vld [vmem:[#allocation13 + $0x50] ss:$12 sps:$4 sm:$0xff]  }
0x13bc   : > { %7072 = vmatmul.mubr.bf16.vlgmr.msra.gmra.mrb[96].mxu0 %v14429_v0 }
0x13bd   : > { %7178 = vmatmul.mubr.bf16.vlgmr.msra.gmra.mrb[96].mxu1 %v14429_v0  ;;  %7081 = vmatprep.mubr.bf16.mxu0 %v14437_v16  ;;  %v12593_v0 = vld [vmem:[#allocation10 + $0x74c] ss:$48 sps:$4 sm:$0xff]  }
0x13be   : > { %7093 = vmatpush1.bf16.msra.mxu0 %v12570_v14  ;;  %7187 = vmatprep.mubr.bf16.mxu1 %v14437_v16  ;;  %v12588_v16 = vld [vmem:[#allocation10 + $0x740] ss:$48 sps:$4 sm:$0xff]  }
0x13bf   : > { %7199 = vmatpush1.bf16.msra.mxu1 %v12573_v32  ;;  %7094 = vmatprep.subr.bf16.mxu0 %v12578_v21  ;;  %v12640_v14 = vld [vmem:[#allocation13 + $0x64] ss:$12 sps:$4 sm:$0xff]   ;;  %v14505_v32 = vld [vmem:[#allocation11] sm:$0xff]  ;;  %v5129_v21 = vsub.s32 3, %v13778_v1 }
0x13c0   : > { %7200 = vmatprep.subr.bf16.mxu1 %v12581_v20  ;;  %v12638_v20 = vld [vmem:[#allocation13 + $0x60] ss:$12 sps:$4 sm:$0xff]  }
0x13c2   : > { %7095 = vmatpush1.bf16.msra.mxu0 %v12576_v43  ;;  %v12642_v43 = vld [vmem:[#allocation13 + $0x68] ss:$12 sps:$4 sm:$0xff]  }
0x13c3   : > { %7201 = vmatpush1.bf16.msra.mxu1 %v12579_v58  ;;  %7096 = vmatprep.subr.bf16.mxu0 %v12584_v2  ;;  %v14514_v58 = vrot.slane %v14505_v32, %v13853_v41  ;;  %v12645_v2 = vld [vmem:[#allocation13 + $0x7c] ss:$12 sps:$4 sm:$0xff]  }
0x13c4   : > { %7082 = vmatmul.mubr.bf16.gmra.mrb[100].mxu0 %v14439_v35  ;;  %7202 = vmatprep.subr.bf16.mxu1 %v12587_v5  ;;  %v14518_v5 = vrot.slane %v14505_v32, %v13785_v10 }
0x13c5   : > { %7188 = vmatmul.mubr.bf16.gmra.mrb[100].mxu1 %v14439_v35  ;;  %7124 = vmatprep.mubr.bf16.mxu0 %v13431_v34  ;;  %v12605_v35 = vld [vmem:[#allocation10 + $0x80c] ss:$48 sps:$4 sm:$0xff]  }
0x13c6   : > { %7097 = vmatpush1.bf16.msra.mxu0 %v12582_v31  ;;  %7230 = vmatprep.mubr.bf16.mxu1 %v13431_v34  ;;  %v14523_v31 = vrot.slane %v14505_v32, %v5129_v21 }
0x13c7   : > { %7203 = vmatpush1.bf16.msra.mxu1 %v12585_v52  ;;  %7098 = vmatprep.subr.bf16.mxu0 %v12590_v40  ;;  %v12646_v52 = vld [vmem:[#allocation13 + $0x140] ss:$12 sps:$4 sm:$0xff]  }
0x13c8   : > { %7204 = vmatprep.subr.bf16.mxu1 %v12593_v0 }
0x13ca   : > { %7099 = vmatpush1.bf16.msra.mxu0 %v12588_v16  ;;  %v12643_v16 = vld [vmem:[#allocation13 + $0x78] ss:$12 sps:$4 sm:$0xff]  }
0x13cb   : > { %7205 = vmatpush1.bf16.msra.mxu1 %v12591_v46  ;;  %7100 = vmatprep.subr.bf16.mxu0 %v12596_v33 }
0x13cc   : > { %7206 = vmatprep.subr.bf16.mxu1 %v12599_v4 }
0x13ce   : > { %7101 = vmatpush1.bf16.msra.mxu0 %v12594_v36 }
0x13cf   : > { %7207 = vmatpush1.bf16.msra.mxu1 %v12597_v47  ;;  %7102 = vmatprep.subr.bf16.mxu0 %v12602_v26  ;;  %v12647_v47 = vld [vmem:[#allocation13 + $0x80] ss:$12 sps:$4 sm:$0xff]  }
0x13d0   : > { %7208 = vmatprep.subr.bf16.mxu1 %v12605_v35  ;;  %v12650_v26 = vld [vmem:[#allocation13 + $0x94] ss:$12 sps:$4 sm:$0xff]  }
0x13d2   : > { %7103 = vmatpush1.bf16.msra.mxu0 %v12600_v9 }
0x13d3   : > { %7209 = vmatpush1.bf16.msra.mxu1 %v12603_v27  ;;  %7104 = vmatprep.subr.bf16.mxu0 %v12608_v6 }
0x13d4   : > { %7210 = vmatprep.subr.bf16.mxu1 %v12611_v8  ;;  %v12651_v8 = vld [vmem:[#allocation13 + $0x158] ss:$12 sps:$4 sm:$0xff]  }
0x13d6   : > { %7105 = vmatpush1.bf16.msra.mxu0 %v12606_v60 }
0x13d7   : > { %7211 = vmatpush1.bf16.msra.mxu1 %v12609_v22  ;;  %7106 = vmatprep.subr.bf16.mxu0 %v12614_v62 }
0x13d8   : > { %7212 = vmatprep.subr.bf16.mxu1 %v12617_v17 }
0x13da   : > { %7107 = vmatpush1.bf16.msra.mxu0 %v12612_v42 }
0x13db   : > { %7213 = vmatpush1.bf16.msra.mxu1 %v12615_v56  ;;  %9261 = vmatprep.subr.bf16.mxu0 %v12620_v48  ;;  %v12648_v48 = vld [vmem:[#allocation13 + $0x90] ss:$12 sps:$4 sm:$0xff]  }
0x13dc   : > { %11078 = vmatprep.subr.bf16.mxu1 %v12621_v13  ;;  %v12652_v13 = vld [vmem:[#allocation13 + $0x98] ss:$12 sps:$4 sm:$0xff]  }
0x13dd   : > { %7125 = vmatmul.mubr.bf16.vlgmr.msra.gmra.mrb[96].mxu0 %v14463_v28 }
0x13de   : > { %7231 = vmatmul.mubr.bf16.vlgmr.msra.gmra.mrb[96].mxu1 %v14463_v28  ;;  %9262 = vmatpush1.bf16.msra.mxu0 %v12618_v23  ;;  %v12636_v28 = vld [vmem:[#allocation13 + $0x110] ss:$12 sps:$4 sm:$0xff]  }
0x13df   : > { %11079 = vmatpush3.bf16.msra.mxu1 %v12622_v55  ;;  %9263 = vmatprep.subr.bf16.mxu0 %v12625_v15 }
0x13e0   : > { %11080 = vmatprep.subr.bf16.mxu1 %v12626_v18  ;;  %7134 = vmatprep.mubr.bf16.mxu0 %v13431_v34 }
0x13e1   : > { %7240 = vmatprep.mubr.bf16.mxu1 %v13431_v34  ;;  %v12641_v34 = vld [vmem:[#allocation13 + $0x128] ss:$12 sps:$4 sm:$0xff]  }
0x13e2   : > { %9264 = vmatpush1.bf16.msra.mxu0 %v12623_v38  ;;  %v12655_v38 = vld [vmem:[#allocation13 + $0xac] ss:$12 sps:$4 sm:$0xff]  }
0x13e3   : > { %11081 = vmatpush3.bf16.msra.mxu1 %v12627_v53  ;;  %9265 = vmatprep.subr.bf16.mxu0 %v12630_v24 }
0x13e4   : > { %11082 = vmatprep.subr.bf16.mxu1 %v12631_v30 }
0x13e5   : > { %7135 = vmatmul.mubr.bf16.gmra.mrb[100].mxu0 %v14469_v45 }
0x13e6   : > { %7241 = vmatmul.mubr.bf16.gmra.mrb[100].mxu1 %v14469_v45  ;;  %9266 = vmatpush1.bf16.msra.mxu0 %v12628_v37  ;;  %v14510_v45 = vrot.slane %v14505_v32, %v13788_v11 }
0x13e7   : > { %11083 = vmatpush3.bf16.msra.mxu1 %v12632_v29  ;;  %9267 = vmatprep.subr.bf16.mxu0 %v12635_v61  ;;  %v12656_v29 = vld [vmem:[#allocation13 + $0x170] ss:$12 sps:$4 sm:$0xff]  }
0x13e8   : > { %11084 = vmatprep.subr.bf16.mxu1 %v12636_v28 }
0x13ea   : > { %9268 = vmatpush1.bf16.msra.mxu0 %v12633_v54 }
0x13eb   : > { %11085 = vmatpush3.bf16.msra.mxu1 %v12637_v12  ;;  %9269 = vmatprep.subr.bf16.mxu0 %v12640_v14 }
0x13ec   : > { %11086 = vmatprep.subr.bf16.mxu1 %v12641_v34 }
0x13ee   : > { %9270 = vmatpush1.bf16.msra.mxu0 %v12638_v20  ;;  %v6702_v40 = vpop.f32.mrb[80].mxu0  ;;  %v6808_v0 = vpop.f32.mrb[80].mxu1  ;;  %v12653_v20 = vld [vmem:[#allocation13 + $0xa8] ss:$12 sps:$4 sm:$0xff]  }
0x13ef   : > { %11087 = vmatpush3.bf16.msra.mxu1 %v12642_v43  ;;  %v11438_v46 = vadd.f32 %v6702_v40, %v14510_v45  ;;  %v11446_v33 = vadd.f32 %v6808_v0, %v14514_v58  ;;  %v6704_v4 = vpop.f32.mrb[81].mxu0  ;;  %v6810_v36 = vpop.f32.mrb[81].mxu1  ;;  %9271 = vmatprep.subr.bf16.mxu0 %v12645_v2  ;;  %v12657_v0 = vld [vmem:[#allocation13 + $0xb0] ss:$12 sps:$4 sm:$0xff]  }
0x13f0   : > { %v11439_v35 = vadd.f32 %v6704_v4, %v14518_v5  ;;  %v11447_v9 = vadd.f32 %v6810_v36, %v14523_v31  ;;  %11088 = vmatprep.subr.bf16.mxu1 %v12646_v52  ;;  %v6706_v27 = vpop.f32.mrb[82].mxu0  ;;  %v6812_v6 = vpop.f32.mrb[82].mxu1 }
0x13f1   : > { %v11440_v60 = vadd.f32 %v6706_v27, %v14510_v45  ;;  %v11448_v22 = vadd.f32 %v6812_v6, %v14514_v58  ;;  %v6708_v62 = vpop.f32.mrb[83].mxu0  ;;  %v6814_v17 = vpop.f32.mrb[83].mxu1  ;;  %v7251_v23 = vmax.f32 %v11438_v46, 0.0  ;;  %v7253_v55 = vmax.f32 %v11446_v33, 0.0 }
0x13f2   : > { %9272 = vmatpush1.bf16.msra.mxu0 %v12643_v16  ;;  %v11441_v42 = vadd.f32 %v6708_v62, %v14518_v5  ;;  %v11449_v56 = vadd.f32 %v6814_v17, %v14523_v31  ;;  %v7252_v53 = vmax.f32 %v11439_v35, 0.0  ;;  %v7254_v24 = vmax.f32 %v11447_v9, 0.0  ;;  %v12660_v16 = vld [vmem:[#allocation13 + $0xc4] ss:$12 sps:$4 sm:$0xff]  }
0x13f3   : > { %v7263_v15 = vmax.f32 %v11440_v60, 0.0  ;;  %v7265_v18 = vmax.f32 %v11448_v22, 0.0  ;;  %11089 = vmatpush3.bf16.msra.mxu1 %v12647_v47  ;;  %9273 = vmatprep.subr.bf16.mxu0 %v12650_v26  ;;  %v12661_v47 = vld [vmem:[#allocation13 + $0x248] ss:$12 sps:$4 sm:$0xff]   ;;  %v12658_v60 = vld [vmem:[#allocation13 + $0xc0] ss:$12 sps:$4 sm:$0xff]  }
0x13f4   : > { %v7264_v30 = vmax.f32 %v11441_v42, 0.0  ;;  %v7266_v37 = vmax.f32 %v11449_v56, 0.0  ;;  %11090 = vmatprep.subr.bf16.mxu1 %v12651_v8  ;;  %v12662_v22 = vld [vmem:[#allocation13 + $0x188] ss:$12 sps:$4 sm:$0xff]  }
0x13f5   : > { %v14533_v61 = vpack.c.bf16 %v7263_v15, %v7251_v23  ;;  %v14535_v28 = vpack.c.bf16 %v7265_v18, %v7253_v55  ;;  %v12666_v55 = vld [vmem:[#allocation13 + $0x260] ss:$12 sps:$4 sm:$0xff]  }
0x13f6   : > { %v7300_v54 = vpack.c.bf16 %v7264_v30, %v7252_v53  ;;  %v14537_v12 = vpack.c.bf16 %v7266_v37, %v7254_v24  ;;  %9274 = vmatpush1.bf16.msra.mxu0 %v12648_v48  ;;  %v6712_v14 = vpop.f32.mrb[84].mxu0  ;;  %v6818_v34 = vpop.f32.mrb[84].mxu1  ;;  %v12665_v48 = vld [vmem:[#allocation13 + $0xdc] ss:$12 sps:$4 sm:$0xff]   ;;  %v12667_v53 = vld [vmem:[#allocation13 + $0x1a0] ss:$12 sps:$4 sm:$0xff]  }
0x13f7   : > { %11091 = vmatpush3.bf16.msra.mxu1 %v12652_v13  ;;  %v11442_v43 = vadd.f32 %v6712_v14, %v14510_v45  ;;  %v11450_v2 = vadd.f32 %v6818_v34, %v14514_v58  ;;  %v6714_v52 = vpop.f32.mrb[85].mxu0  ;;  %v6820_v40 = vpop.f32.mrb[85].mxu1  ;;  %9275 = vmatprep.subr.bf16.mxu0 %v12655_v38  ;;  %v12663_v38 = vld [vmem:[#allocation13 + $0xd8] ss:$12 sps:$4 sm:$0xff]   ;;  %v12670_v24 = vld [vmem:[#allocation13 + $0xf4] ss:$12 sps:$4 sm:$0xff]  }
0x13f8   : > { %v11443_v46 = vadd.f32 %v6714_v52, %v14518_v5  ;;  %v11451_v33 = vadd.f32 %v6820_v40, %v14523_v31  ;;  %11092 = vmatprep.subr.bf16.mxu1 %v12656_v29  ;;  %v6716_v4 = vpop.f32.mrb[86].mxu0  ;;  %v6822_v36 = vpop.f32.mrb[86].mxu1  ;;  %9293 = vmatprep.mubr.bf16.mxu0 %v7300_v54  ;;  %v12671_v30 = vld [vmem:[#allocation13 + $0x278] ss:$12 sps:$4 sm:$0xff]   ;;  %v12668_v37 = vld [vmem:[#allocation13 + $0xf0] ss:$12 sps:$4 sm:$0xff]  }
0x13f9   : > { %v11444_v26 = vadd.f32 %v6716_v4, %v14510_v45  ;;  %v11452_v35 = vadd.f32 %v6822_v36, %v14514_v58  ;;  %9611 = vmatprep.mubr.bf16.mxu1 %v7300_v54  ;;  %v6718_v9 = vpop.f32.mrb[87].mxu0  ;;  %v6824_v27 = vpop.f32.mrb[87].mxu1  ;;  %v7275_v62 = vmax.f32 %v11442_v43, 0.0  ;;  %v7277_v17 = vmax.f32 %v11450_v2, 0.0  ;;  %v12672_v29 = vld [vmem:[#allocation13 + $0x1b8] ss:$12 sps:$4 sm:$0xff]  }
0x13fa   : > { %9276 = vmatpush1.bf16.msra.mxu0 %v12653_v20  ;;  %v11445_v6 = vadd.f32 %v6718_v9, %v14518_v5  ;;  %v11453_v8 = vadd.f32 %v6824_v27, %v14523_v31  ;;  %v7276_v45 = vmax.f32 %v11443_v46, 0.0  ;;  %v7278_v13 = vmax.f32 %v11451_v33, 0.0  ;;  %v12675_v54 = vld [vmem:[#allocation13 + $0x10c] ss:$12 sps:$4 sm:$0xff]   ;;  %v12676_v14 = vld [vmem:[#allocation13 + $0x290] ss:$12 sps:$4 sm:$0xff]  }
0x13fb   : > { %v7287_v42 = vmax.f32 %v11444_v26, 0.0  ;;  %v7289_v56 = vmax.f32 %v11452_v35, 0.0  ;;  %11093 = vmatpush3.bf16.msra.mxu1 %v12657_v0  ;;  %9277 = vmatprep.subr.bf16.mxu0 %v12660_v16  ;;  %v12673_v34 = vld [vmem:[#allocation13 + $0x108] ss:$12 sps:$4 sm:$0xff]   ;;  %v12677_v20 = vld [vmem:[#allocation13 + $0x1d0] ss:$12 sps:$4 sm:$0xff]  }
0x13fc   : > { %v7288_v58 = vmax.f32 %v11445_v6, 0.0  ;;  %v7290_v23 = vmax.f32 %v11453_v8, 0.0  ;;  %11106 = vmatprep.subr.bf16.mxu1 %v12661_v47  ;;  %v12680_v43 = vld [vmem:[#allocation13 + $0x124] ss:$12 sps:$4 sm:$0xff]   ;;  %v12681_v2 = vld [vmem:[#allocation13 + $0x2a8] ss:$12 sps:$4 sm:$0xff]  }
0x13fd   : > { %v14547_v15 = vpack.c.bf16 %v7287_v42, %v7275_v62  ;;  %v14549_v5 = vpack.c.bf16 %v7289_v56, %v7277_v17  ;;  %v12678_v52 = vld [vmem:[#allocation13 + $0x120] ss:$12 sps:$4 sm:$0xff]   ;;  %v12682_v40 = vld [vmem:[#allocation13 + $0x1e8] ss:$12 sps:$4 sm:$0xff]   ;;  %v12683_v46 = vld [vmem:[#allocation13 + $0x138] ss:$12 sps:$4 sm:$0xff]  }
0x13fe   : > { %v14551_v31 = vpack.c.bf16 %v7288_v58, %v7276_v45  ;;  %v14553_v18 = vpack.c.bf16 %v7290_v23, %v7278_v13  ;;  %9612 = vmatmul.mubr.bf16.vlgmr.msra.gmra.mrb[104].mxu1 %v14533_v61  ;;  %9278 = vmatpush1.bf16.msra.mxu0 %v12658_v60  ;;  %v12685_v0 = vld [vmem:[#allocation13 + $0x13c] ss:$12 sps:$4 sm:$0xff]   ;;  %v12686_v16 = vld [vmem:[#allocation13 + $0x2c0] ss:$12 sps:$4 sm:$0xff]   ;;  %v12691_v36 = vld [vmem:[#allocation13 + $0x2d8] ss:$12 sps:$4 sm:$0xff]  }
0x13ff   : > { %11107 = vmatpush3.bf16.msra.mxu1 %v12662_v22  ;;  %9279 = vmatprep.subr.bf16.mxu0 %v12665_v48  ;;  %v12687_v33 = vld [vmem:[#allocation13 + $0x200] ss:$12 sps:$4 sm:$0xff]   ;;  %v12688_v47 = vld [vmem:[#allocation13 + $0x150] ss:$12 sps:$4 sm:$0xff]   ;;  %v12692_v26 = vld [vmem:[#allocation13 + $0x218] ss:$12 sps:$4 sm:$0xff]  }
0x1400   : > { %11108 = vmatprep.subr.bf16.mxu1 %v12666_v55  ;;  %9619 = vmatprep.mubr.bf16.mxu1 %v14551_v31  ;;  %v12690_v4 = vld [vmem:[#allocation13 + $0x154] ss:$12 sps:$4 sm:$0xff]   ;;  %v12695_v35 = vld [vmem:[#allocation13 + $0x16c] ss:$12 sps:$4 sm:$0xff]   ;;  %v12696_v9 = vld [vmem:[#allocation13 + $0x2f0] ss:$12 sps:$4 sm:$0xff]  }
0x1401   : > { %v12693_v27 = vld [vmem:[#allocation13 + $0x168] ss:$12 sps:$4 sm:$0xff]   ;;  %v12697_v6 = vld [vmem:[#allocation13 + $0x230] ss:$12 sps:$4 sm:$0xff]   ;;  %v12698_v22 = vld [vmem:[#allocation13 + $0x180] ss:$12 sps:$4 sm:$0xff]  }
0x1402   : > { %9280 = vmatpush1.bf16.msra.mxu0 %v12663_v38  ;;  %v12700_v8 = vld [vmem:[#allocation13 + $0x184] ss:$12 sps:$4 sm:$0xff]   ;;  %v12722_v60 = vld [vmem:[#allocation13 + $0x3c8] ss:$12 sps:$4 sm:$0xff]   ;;  %v12727_v42 = vld [vmem:[#allocation13 + $0x3e0] ss:$12 sps:$4 sm:$0xff]  }
0x1403   : > { %11109 = vmatpush3.bf16.msra.mxu1 %v12667_v53  ;;  %9281 = vmatprep.subr.bf16.mxu0 %v12670_v24  ;;  %v12703_v62 = vld [vmem:[#allocation13 + $0x19c] ss:$12 sps:$4 sm:$0xff]   ;;  %v12701_v56 = vld [vmem:[#allocation13 + $0x198] ss:$12 sps:$4 sm:$0xff]   ;;  %v12706_v48 = vld [vmem:[#allocation13 + $0x1b4] ss:$12 sps:$4 sm:$0xff]  }
0x1404   : > { %11110 = vmatprep.subr.bf16.mxu1 %v12671_v30  ;;  %v12723_v17 = vld [vmem:[#allocation13 + $0x308] ss:$12 sps:$4 sm:$0xff]   ;;  %v12728_v45 = vld [vmem:[#allocation13 + $0x320] ss:$12 sps:$4 sm:$0xff]   ;;  %v12732_v13 = vld [vmem:[#allocation13 + $0x3f8] ss:$12 sps:$4 sm:$0xff]  }
0x1405   : > { %v12704_v58 = vld [vmem:[#allocation13 + $0x1b0] ss:$12 sps:$4 sm:$0xff]   ;;  %v12709_v23 = vld [vmem:[#allocation13 + $0x1cc] ss:$12 sps:$4 sm:$0xff]   ;;  %v12742_v24 = vld [vmem:[#allocation13 + $0x428] ss:$12 sps:$4 sm:$0xff]  }
0x1406   : > { %9620 = vmatmul.mubr.bf16.gmra.mrb[108].mxu1 %v14547_v15  ;;  %9282 = vmatpush1.bf16.msra.mxu0 %v12668_v37  ;;  %v12737_v55 = vld [vmem:[#allocation13 + $0x410] ss:$12 sps:$4 sm:$0xff]   ;;  %v12710_v30 = vld [vmem:[#allocation13 + $0x1e0] ss:$12 sps:$4 sm:$0xff]  }
0x1407   : > { %11111 = vmatpush3.bf16.msra.mxu1 %v12672_v29  ;;  %9660 = vmatprep.mubr.bf16.mxu1 %v14537_v12  ;;  %v12712_v38 = vld [vmem:[#allocation13 + $0x1e4] ss:$12 sps:$4 sm:$0xff]   ;;  %v12715_v37 = vld [vmem:[#allocation13 + $0x1fc] ss:$12 sps:$4 sm:$0xff]   ;;  %v12747_v29 = vld [vmem:[#allocation13 + $0x440] ss:$12 sps:$4 sm:$0xff]  }
0x1408   : > { %9283 = vmatprep.subr.bf16.mxu0 %v12675_v54  ;;  %11112 = vmatprep.subr.bf16.mxu1 %v12676_v14  ;;  %v12738_v53 = vld [vmem:[#allocation13 + $0x350] ss:$12 sps:$4 sm:$0xff]   ;;  %v12713_v54 = vld [vmem:[#allocation13 + $0x1f8] ss:$12 sps:$4 sm:$0xff]   ;;  %v12748_v14 = vld [vmem:[#allocation13 + $0x380] ss:$12 sps:$4 sm:$0xff]  }
0x140a   : > { %9284 = vmatpush1.bf16.msra.mxu0 %v12673_v34  ;;  %v12752_v34 = vld [vmem:[#allocation13 + $0x458] ss:$12 sps:$4 sm:$0xff]  }
0x140b   : > { %11113 = vmatpush3.bf16.msra.mxu1 %v12677_v20  ;;  %9285 = vmatprep.subr.bf16.mxu0 %v12680_v43  ;;  %v12716_v20 = vld [vmem:[#allocation13 + $0x210] ss:$12 sps:$4 sm:$0xff]   ;;  %v12721_v43 = vld [vmem:[#allocation13 + $0x22c] ss:$12 sps:$4 sm:$0xff]  }
0x140c   : > { %11114 = vmatprep.subr.bf16.mxu1 %v12681_v2  ;;  %v12753_v2 = vld [vmem:[#allocation13 + $0x398] ss:$12 sps:$4 sm:$0xff]  }
0x140e   : > { %9286 = vmatpush1.bf16.msra.mxu0 %v12678_v52  ;;  %v12757_v52 = vld [vmem:[#allocation13 + $0x470] ss:$12 sps:$4 sm:$0xff]  }
0x140f   : > { %11115 = vmatpush3.bf16.msra.mxu1 %v12682_v40  ;;  %9287 = vmatprep.subr.bf16.mxu0 %v12685_v0  ;;  %v12719_v40 = vld [vmem:[#allocation13 + $0x228] ss:$12 sps:$4 sm:$0xff]   ;;  %v12726_v0 = vld [vmem:[#allocation13 + $0x244] ss:$12 sps:$4 sm:$0xff]  }
0x1410   : > { %11116 = vmatprep.subr.bf16.mxu1 %v12686_v16  ;;  %v12758_v16 = vld [vmem:[#allocation13 + $0x3b0] ss:$12 sps:$4 sm:$0xff]  }
0x1412   : > { %9288 = vmatpush1.bf16.msra.mxu0 %v12683_v46  ;;  %v12762_v46 = vld [vmem:[#allocation13 + $0x548] ss:$12 sps:$4 sm:$0xff]  }
0x1413   : > { %11117 = vmatpush3.bf16.msra.mxu1 %v12687_v33  ;;  %9289 = vmatprep.subr.bf16.mxu0 %v12690_v4  ;;  %v12724_v33 = vld [vmem:[#allocation13 + $0x240] ss:$12 sps:$4 sm:$0xff]   ;;  %v12731_v4 = vld [vmem:[#allocation13 + $0x25c] ss:$12 sps:$4 sm:$0xff]  }
0x1414   : > { %11118 = vmatprep.subr.bf16.mxu1 %v12691_v36  ;;  %v12729_v36 = vld [vmem:[#allocation13 + $0x258] ss:$12 sps:$4 sm:$0xff]  }
0x1416   : > { %9290 = vmatpush1.bf16.msra.mxu0 %v12688_v47  ;;  %v12736_v47 = vld [vmem:[#allocation13 + $0x274] ss:$12 sps:$4 sm:$0xff]  }
0x1417   : > { %11119 = vmatpush3.bf16.msra.mxu1 %v12692_v26  ;;  %9291 = vmatprep.subr.bf16.mxu0 %v12695_v35  ;;  %v12734_v26 = vld [vmem:[#allocation13 + $0x270] ss:$12 sps:$4 sm:$0xff]   ;;  %v12741_v35 = vld [vmem:[#allocation13 + $0x28c] ss:$12 sps:$4 sm:$0xff]  }
0x1418   : > { %11120 = vmatprep.subr.bf16.mxu1 %v12696_v9  ;;  %v12739_v9 = vld [vmem:[#allocation13 + $0x288] ss:$12 sps:$4 sm:$0xff]  }
0x141a   : > { %9292 = vmatpush1.bf16.msra.mxu0 %v12693_v27  ;;  %v12746_v27 = vld [vmem:[#allocation13 + $0x2a4] ss:$12 sps:$4 sm:$0xff]  }
0x141b   : > { %11121 = vmatpush3.bf16.msra.mxu1 %v12697_v6  ;;  %9314 = vmatprep.subr.bf16.mxu0 %v12700_v8  ;;  %v5133_v6 = vsub.s32 4, %v13778_v1  ;;  %v5141_v8 = vsub.s32 6, %v13778_v1 }
0x141c   : > { %11134 = vmatprep.subr.bf16.mxu1 %v12722_v60  ;;  %v5137_v60 = vsub.s32 5, %v13778_v1 }
0x141d   : > { %9294 = vmatmul.mubr.bf16.vlgmr.msra.gmra.mrb[104].mxu0 %v14533_v61  ;;  %v12733_v61 = vld [vmem:[#allocation13 + $0x338] ss:$12 sps:$4 sm:$0xff]  }
0x141e   : > { %9661 = vmatmul.mubr.bf16.vlgmr.msra.gmra.mrb[112].mxu1 %v14535_v28  ;;  %9303 = vmatprep.mubr.bf16.mxu0 %v14551_v31  ;;  %v12707_v31 = vld [vmem:[#allocation13 + $0x1c8] ss:$12 sps:$4 sm:$0xff]  }
0x141f   : > { %9315 = vmatpush1.bf16.msra.mxu0 %v12698_v22  ;;  %9668 = vmatprep.mubr.bf16.mxu1 %v14553_v18  ;;  %v5145_v22 = vsub.s32 7, %v13778_v1  ;;  %v12858_v1 = vld [vmem:[#allocation13 + $0x510] ss:$12 sps:$4 sm:$0xff]  }
0x1420   : > { %9316 = vmatprep.subr.bf16.mxu0 %v12703_v62  ;;  %11135 = vmatpush3.bf16.msra.mxu1 %v12723_v17  ;;  %v12744_v62 = vld [vmem:[#allocation13 + $0x2a0] ss:$12 sps:$4 sm:$0xff]   ;;  %v5134_v17 = vrot.slane %v14505_v32, %v5133_v6 }
0x1421   : > { %11136 = vmatprep.subr.bf16.mxu1 %v12727_v42  ;;  %v12751_v42 = vld [vmem:[#allocation13 + $0x2bc] ss:$12 sps:$4 sm:$0xff]  }
0x1423   : > { %9317 = vmatpush1.bf16.msra.mxu0 %v12701_v56  ;;  %v5142_v56 = vrot.slane %v14505_v32, %v5141_v8 }
0x1424   : > { %9318 = vmatprep.subr.bf16.mxu0 %v12706_v48  ;;  %11137 = vmatpush3.bf16.msra.mxu1 %v12728_v45  ;;  %v5138_v48 = vrot.slane %v14505_v32, %v5137_v60  ;;  %v14574_v45 = vrot.slane %v14505_v32, %v5145_v22 }
0x1425   : > { %9304 = vmatmul.mubr.bf16.gmra.mrb[108].mxu0 %v14547_v15  ;;  %11138 = vmatprep.subr.bf16.mxu1 %v12732_v13  ;;  %v12743_v15 = vld [vmem:[#allocation13 + $0x368] ss:$12 sps:$4 sm:$0xff]  }
0x1426   : > { %9669 = vmatmul.mubr.bf16.gmra.mrb[116].mxu1 %v14549_v5  ;;  %9346 = vmatprep.mubr.bf16.mxu0 %v14537_v12  ;;  %v12718_v12 = vld [vmem:[#allocation13 + $0x214] ss:$12 sps:$4 sm:$0xff]  }
0x1427   : > { %9319 = vmatpush1.bf16.msra.mxu0 %v12704_v58  ;;  %v12749_v58 = vld [vmem:[#allocation13 + $0x2b8] ss:$12 sps:$4 sm:$0xff]  }
0x1428   : > { %9320 = vmatprep.subr.bf16.mxu0 %v12709_v23  ;;  %11139 = vmatpush3.bf16.msra.mxu1 %v12733_v61 }
0x1429   : > { %11140 = vmatprep.subr.bf16.mxu1 %v12737_v55 }
0x142b   : > { %9321 = vmatpush1.bf16.msra.mxu0 %v12707_v31  ;;  %v12756_v31 = vld [vmem:[#allocation13 + $0x2d4] ss:$12 sps:$4 sm:$0xff]  }
0x142c   : > { %9322 = vmatprep.subr.bf16.mxu0 %v12712_v38  ;;  %11141 = vmatpush3.bf16.msra.mxu1 %v12738_v53 }
0x142d   : > { %11142 = vmatprep.subr.bf16.mxu1 %v12742_v24 }
0x142f   : > { %9323 = vmatpush1.bf16.msra.mxu0 %v12710_v30 }
0x1430   : > { %9324 = vmatprep.subr.bf16.mxu0 %v12715_v37  ;;  %11143 = vmatpush3.bf16.msra.mxu1 %v12743_v15 }
0x1431   : > { %11144 = vmatprep.subr.bf16.mxu1 %v12747_v29 }
0x1433   : > { %9325 = vmatpush1.bf16.msra.mxu0 %v12713_v54 }
0x1434   : > { %9326 = vmatprep.subr.bf16.mxu0 %v12718_v12  ;;  %11145 = vmatpush3.bf16.msra.mxu1 %v12748_v14 }
0x1435   : > { %11146 = vmatprep.subr.bf16.mxu1 %v12752_v34  ;;  %v12754_v34 = vld [vmem:[#allocation13 + $0x2d0] ss:$12 sps:$4 sm:$0xff]  }
0x1437   : > { %9327 = vmatpush1.bf16.msra.mxu0 %v12716_v20 }
0x1438   : > { %9328 = vmatprep.subr.bf16.mxu0 %v12721_v43  ;;  %11147 = vmatpush3.bf16.msra.mxu1 %v12753_v2 }
0x1439   : > { %11148 = vmatprep.subr.bf16.mxu1 %v12757_v52  ;;  %v12761_v52 = vld [vmem:[#allocation13 + $0x2ec] ss:$12 sps:$4 sm:$0xff]  }
0x143b   : > { %9329 = vmatpush1.bf16.msra.mxu0 %v12719_v40 }
0x143c   : > { %9330 = vmatprep.subr.bf16.mxu0 %v12726_v0  ;;  %11149 = vmatpush3.bf16.msra.mxu1 %v12758_v16 }
0x143d   : > { %11162 = vmatprep.subr.bf16.mxu1 %v12762_v46 }
0x143f   : > { %9331 = vmatpush1.bf16.msra.mxu0 %v12724_v33 }
0x1440   : > { %9332 = vmatprep.subr.bf16.mxu0 %v12731_v4 }
0x1443   : > { %9333 = vmatpush1.bf16.msra.mxu0 %v12729_v36 }
0x1444   : > { %9334 = vmatprep.subr.bf16.mxu0 %v12736_v47 }
0x1447   : > { %9335 = vmatpush1.bf16.msra.mxu0 %v12734_v26 }
0x1448   : > { %9336 = vmatprep.subr.bf16.mxu0 %v12741_v35 }
0x144b   : > { %9337 = vmatpush1.bf16.msra.mxu0 %v12739_v9  ;;  %v12759_v9 = vld [vmem:[#allocation13 + $0x2e8] ss:$12 sps:$4 sm:$0xff]  }
0x144c   : > { %9338 = vmatprep.subr.bf16.mxu0 %v12746_v27  ;;  %v12763_v27 = vld [vmem:[#allocation13 + $0x488] ss:$12 sps:$4 sm:$0xff]  }
0x144f   : > { %9339 = vmatpush1.bf16.msra.mxu0 %v12744_v62  ;;  %v6914_v13 = vpop.f32.mrb[88].mxu0  ;;  %v12766_v62 = vld [vmem:[#allocation13 + $0x304] ss:$12 sps:$4 sm:$0xff]  }
0x1450   : > { %v11454_v23 = vadd.f32 %v6914_v13, %v5134_v17  ;;  %v7020_v61 = vpop.f32.mrb[88].mxu1  ;;  %v6916_v55 = vpop.f32.mrb[89].mxu0  ;;  %9340 = vmatprep.subr.bf16.mxu0 %v12751_v42  ;;  %v12767_v42 = vld [vmem:[#allocation13 + $0x560] ss:$12 sps:$4 sm:$0xff]  }
0x1451   : > { %v11462_v38 = vadd.f32 %v7020_v61, %v5142_v56  ;;  %v11455_v53 = vadd.f32 %v6916_v55, %v5138_v48  ;;  %v7022_v24 = vpop.f32.mrb[89].mxu1  ;;  %v6918_v30 = vpop.f32.mrb[90].mxu0 }
0x1452   : > { %v11463_v37 = vadd.f32 %v7022_v24, %v14574_v45  ;;  %v11456_v15 = vadd.f32 %v6918_v30, %v5134_v17  ;;  %v7024_v29 = vpop.f32.mrb[90].mxu1  ;;  %v6920_v54 = vpop.f32.mrb[91].mxu0  ;;  %v7255_v20 = vmax.f32 %v11454_v23, 0.0 }
0x1453   : > { %v11464_v12 = vadd.f32 %v7024_v29, %v5142_v56  ;;  %9341 = vmatpush1.bf16.msra.mxu0 %v12749_v58  ;;  %v11457_v32 = vadd.f32 %v6920_v54, %v5138_v48  ;;  %v7026_v14 = vpop.f32.mrb[91].mxu1  ;;  %v7257_v40 = vmax.f32 %v11462_v38, 0.0  ;;  %v7256_v0 = vmax.f32 %v11455_v53, 0.0 }
0x1454   : > { %v7267_v43 = vmax.f32 %v11456_v15, 0.0  ;;  %v11465_v2 = vadd.f32 %v7026_v14, %v14574_v45  ;;  %9342 = vmatprep.subr.bf16.mxu0 %v12756_v31  ;;  %v7258_v33 = vmax.f32 %v11463_v37, 0.0  ;;  %v12764_v15 = vld [vmem:[#allocation13 + $0x300] ss:$12 sps:$4 sm:$0xff]   ;;  %v12771_v14 = vld [vmem:[#allocation13 + $0x31c] ss:$12 sps:$4 sm:$0xff]  }
0x1455   : > { %v7269_v16 = vmax.f32 %v11464_v12, 0.0  ;;  %v7268_v46 = vmax.f32 %v11457_v32, 0.0  ;;  %v12768_v32 = vld [vmem:[#allocation13 + $0x4a0] ss:$12 sps:$4 sm:$0xff]  }
0x1456   : > { %v14578_v4 = vpack.c.bf16 %v7267_v43, %v7255_v20  ;;  %v7270_v36 = vmax.f32 %v11465_v2, 0.0  ;;  %v12772_v2 = vld [vmem:[#allocation13 + $0x578] ss:$12 sps:$4 sm:$0xff]  }
0x1457   : > { %v14580_v47 = vpack.c.bf16 %v7269_v16, %v7257_v40  ;;  %v14582_v26 = vpack.c.bf16 %v7268_v46, %v7256_v0  ;;  %9343 = vmatpush1.bf16.msra.mxu0 %v12754_v34  ;;  %v6924_v35 = vpop.f32.mrb[92].mxu0  ;;  %v12773_v46 = vld [vmem:[#allocation13 + $0x4b8] ss:$12 sps:$4 sm:$0xff]  }
0x1458   : > { %v14584_v6 = vpack.c.bf16 %v7270_v36, %v7258_v33  ;;  %v11458_v8 = vadd.f32 %v6924_v35, %v5134_v17  ;;  %v7030_v60 = vpop.f32.mrb[92].mxu1  ;;  %v6926_v22 = vpop.f32.mrb[93].mxu0  ;;  %9344 = vmatprep.subr.bf16.mxu0 %v12761_v52  ;;  %v12776_v33 = vld [vmem:[#allocation13 + $0x334] ss:$12 sps:$4 sm:$0xff]   ;;  %v12777_v36 = vld [vmem:[#allocation13 + $0x590] ss:$12 sps:$4 sm:$0xff]  }
0x1459   : > { %v11466_v13 = vadd.f32 %v7030_v60, %v5142_v56  ;;  %v11459_v58 = vadd.f32 %v6926_v22, %v5138_v48  ;;  %v7032_v23 = vpop.f32.mrb[93].mxu1  ;;  %v6928_v61 = vpop.f32.mrb[94].mxu0  ;;  %9709 = vmatprep.mubr.bf16.mxu1 %v14582_v26  ;;  %v12781_v35 = vld [vmem:[#allocation13 + $0x34c] ss:$12 sps:$4 sm:$0xff]   ;;  %v12786_v60 = vld [vmem:[#allocation13 + $0x364] ss:$12 sps:$4 sm:$0xff]  }
0x145a   : > { %v11467_v55 = vadd.f32 %v7032_v23, %v14574_v45  ;;  %v11460_v31 = vadd.f32 %v6928_v61, %v5134_v17  ;;  %v7034_v38 = vpop.f32.mrb[94].mxu1  ;;  %v6930_v53 = vpop.f32.mrb[95].mxu0  ;;  %9710 = vmatmul.mubr.bf16.vlgmr.msra.gmra.mrb[120].mxu1 %v14578_v4  ;;  %v7279_v29 = vmax.f32 %v11458_v8, 0.0  ;;  %v12783_v8 = vld [vmem:[#allocation13 + $0x4e8] ss:$12 sps:$4 sm:$0xff]  }
0x145b   : > { %v11468_v24 = vadd.f32 %v7034_v38, %v5142_v56  ;;  %9345 = vmatpush1.bf16.msra.mxu0 %v12759_v9  ;;  %v11461_v30 = vadd.f32 %v6930_v53, %v5138_v48  ;;  %v7036_v37 = vpop.f32.mrb[95].mxu1  ;;  %11163 = vmatpush3.bf16.msra.mxu1 %v12763_v27  ;;  %v7281_v34 = vmax.f32 %v11466_v13, 0.0  ;;  %v7280_v17 = vmax.f32 %v11459_v58, 0.0  ;;  %v12782_v9 = vld [vmem:[#allocation13 + $0x5a8] ss:$12 sps:$4 sm:$0xff]  }
0x145c   : > { %v7291_v54 = vmax.f32 %v11460_v31, 0.0  ;;  %v11469_v12 = vadd.f32 %v7036_v37, %v14574_v45  ;;  %9367 = vmatprep.subr.bf16.mxu0 %v12766_v62  ;;  %11164 = vmatprep.subr.bf16.mxu1 %v12767_v42  ;;  %v7282_v52 = vmax.f32 %v11467_v55, 0.0  ;;  %v12769_v45 = vld [vmem:[#allocation13 + $0x318] ss:$12 sps:$4 sm:$0xff]   ;;  %v12779_v27 = vld [vmem:[#allocation13 + $0x348] ss:$12 sps:$4 sm:$0xff]  }
0x145d   : > { %v7293_v20 = vmax.f32 %v11468_v24, 0.0  ;;  %v7292_v43 = vmax.f32 %v11461_v30, 0.0  ;;  %v12787_v22 = vld [vmem:[#allocation13 + $0x5c0] ss:$12 sps:$4 sm:$0xff]   ;;  %v12791_v13 = vld [vmem:[#allocation13 + $0x37c] ss:$12 sps:$4 sm:$0xff]  }
0x145e   : > { %v14590_v56 = vpack.c.bf16 %v7291_v54, %v7279_v29  ;;  %v7294_v48 = vmax.f32 %v11469_v12, 0.0  ;;  %9347 = vmatmul.mubr.bf16.vlgmr.msra.gmra.mrb[104].mxu0 %v14535_v28  ;;  %v12774_v28 = vld [vmem:[#allocation13 + $0x330] ss:$12 sps:$4 sm:$0xff]   ;;  %v12784_v62 = vld [vmem:[#allocation13 + $0x360] ss:$12 sps:$4 sm:$0xff]  }
0x145f   : > { %v14593_v40 = vpack.c.bf16 %v7293_v20, %v7281_v34  ;;  %v14595_v0 = vpack.c.bf16 %v7292_v43, %v7280_v17  ;;  %9356 = vmatprep.mubr.bf16.mxu0 %v14553_v18  ;;  %9368 = vmatpush1.bf16.msra.mxu0 %v12764_v15  ;;  %v12778_v18 = vld [vmem:[#allocation13 + $0x4d0] ss:$12 sps:$4 sm:$0xff]   ;;  %v12788_v42 = vld [vmem:[#allocation13 + $0x500] ss:$12 sps:$4 sm:$0xff]   ;;  %v12792_v58 = vld [vmem:[#allocation13 + $0x5d8] ss:$12 sps:$4 sm:$0xff]  }
0x1460   : > { %v14598_v16 = vpack.c.bf16 %v7294_v48, %v7282_v52  ;;  %11165 = vmatpush3.bf16.msra.mxu1 %v12768_v32  ;;  %9369 = vmatprep.subr.bf16.mxu0 %v12771_v14  ;;  %v12796_v23 = vld [vmem:[#allocation13 + $0x394] ss:$12 sps:$4 sm:$0xff]   ;;  %v12797_v61 = vld [vmem:[#allocation13 + $0x5f0] ss:$12 sps:$4 sm:$0xff]   ;;  %v12801_v38 = vld [vmem:[#allocation13 + $0x3ac] ss:$12 sps:$4 sm:$0xff]  }
0x1461   : > { %9717 = vmatprep.mubr.bf16.mxu1 %v14595_v0  ;;  %11166 = vmatprep.subr.bf16.mxu1 %v12772_v2  ;;  %v12794_v55 = vld [vmem:[#allocation13 + $0x390] ss:$12 sps:$4 sm:$0xff]   ;;  %v12826_v53 = vld [vmem:[#allocation13 + $0x6c8] ss:$12 sps:$4 sm:$0xff]   ;;  %v12831_v15 = vld [vmem:[#allocation13 + $0x6e0] ss:$12 sps:$4 sm:$0xff]  }
0x1462   : > { %9718 = vmatmul.mubr.bf16.gmra.mrb[124].mxu1 %v14590_v56  ;;  %v12798_v31 = vld [vmem:[#allocation13 + $0x530] ss:$12 sps:$4 sm:$0xff]   ;;  %v12799_v24 = vld [vmem:[#allocation13 + $0x3a8] ss:$12 sps:$4 sm:$0xff]   ;;  %v12802_v29 = vld [vmem:[#allocation13 + $0x3c0] ss:$12 sps:$4 sm:$0xff]  }
0x1463   : > { %9370 = vmatpush1.bf16.msra.mxu0 %v12769_v45  ;;  %9758 = vmatprep.mubr.bf16.mxu1 %v14584_v6  ;;  %v12804_v30 = vld [vmem:[#allocation13 + $0x3c4] ss:$12 sps:$4 sm:$0xff]   ;;  %v12827_v37 = vld [vmem:[#allocation13 + $0x608] ss:$12 sps:$4 sm:$0xff]   ;;  %v12832_v12 = vld [vmem:[#allocation13 + $0x620] ss:$12 sps:$4 sm:$0xff]  }
0x1464   : > { %11167 = vmatpush3.bf16.msra.mxu1 %v12773_v46  ;;  %9371 = vmatprep.subr.bf16.mxu0 %v12776_v33  ;;  %v12807_v54 = vld [vmem:[#allocation13 + $0x3dc] ss:$12 sps:$4 sm:$0xff]   ;;  %v12836_v32 = vld [vmem:[#allocation13 + $0x6f8] ss:$12 sps:$4 sm:$0xff]   ;;  %v12810_v34 = vld [vmem:[#allocation13 + $0x3f4] ss:$12 sps:$4 sm:$0xff]  }
0x1465   : > { %11168 = vmatprep.subr.bf16.mxu1 %v12777_v36  ;;  %v12805_v14 = vld [vmem:[#allocation13 + $0x3d8] ss:$12 sps:$4 sm:$0xff]   ;;  %v12841_v20 = vld [vmem:[#allocation13 + $0x710] ss:$12 sps:$4 sm:$0xff]   ;;  %v12846_v48 = vld [vmem:[#allocation13 + $0x728] ss:$12 sps:$4 sm:$0xff]  }
0x1466   : > { %9357 = vmatmul.mubr.bf16.gmra.mrb[108].mxu0 %v14549_v5  ;;  %v12789_v5 = vld [vmem:[#allocation13 + $0x378] ss:$12 sps:$4 sm:$0xff]   ;;  %v12808_v43 = vld [vmem:[#allocation13 + $0x3f0] ss:$12 sps:$4 sm:$0xff]   ;;  %v12811_v45 = vld [vmem:[#allocation13 + $0x408] ss:$12 sps:$4 sm:$0xff]  }
0x1467   : > { %9372 = vmatpush1.bf16.msra.mxu0 %v12774_v28  ;;  %9399 = vmatprep.mubr.bf16.mxu0 %v14582_v26  ;;  %v12793_v26 = vld [vmem:[#allocation13 + $0x518] ss:$12 sps:$4 sm:$0xff]   ;;  %v12842_v52 = vld [vmem:[#allocation13 + $0x650] ss:$12 sps:$4 sm:$0xff]   ;;  %v12847_v33 = vld [vmem:[#allocation13 + $0x668] ss:$12 sps:$4 sm:$0xff]  }
0x1468   : > { %11169 = vmatpush3.bf16.msra.mxu1 %v12778_v18  ;;  %9373 = vmatprep.subr.bf16.mxu0 %v12781_v35  ;;  %v12837_v17 = vld [vmem:[#allocation13 + $0x638] ss:$12 sps:$4 sm:$0xff]   ;;  %v12851_v36 = vld [vmem:[#allocation13 + $0x740] ss:$12 sps:$4 sm:$0xff]   ;;  %v12819_v18 = vld [vmem:[#allocation13 + $0x43c] ss:$12 sps:$4 sm:$0xff]  }
0x1469   : > { %11170 = vmatprep.subr.bf16.mxu1 %v12782_v9  ;;  %v12813_v2 = vld [vmem:[#allocation13 + $0x40c] ss:$12 sps:$4 sm:$0xff]   ;;  %v12816_v46 = vld [vmem:[#allocation13 + $0x424] ss:$12 sps:$4 sm:$0xff]  }
0x146a   : > { %v12814_v28 = vld [vmem:[#allocation13 + $0x420] ss:$12 sps:$4 sm:$0xff]   ;;  %v12856_v9 = vld [vmem:[#allocation13 + $0x758] ss:$12 sps:$4 sm:$0xff]  }
0x146b   : > { %9374 = vmatpush1.bf16.msra.mxu0 %v12779_v27  ;;  %v12852_v35 = vld [vmem:[#allocation13 + $0x680] ss:$12 sps:$4 sm:$0xff]   ;;  %v12817_v27 = vld [vmem:[#allocation13 + $0x438] ss:$12 sps:$4 sm:$0xff]  }
0x146c   : > { %11171 = vmatpush3.bf16.msra.mxu1 %v12783_v8  ;;  %9375 = vmatprep.subr.bf16.mxu0 %v12786_v60  ;;  %v12822_v8 = vld [vmem:[#allocation13 + $0x454] ss:$12 sps:$4 sm:$0xff]   ;;  %v12857_v60 = vld [vmem:[#allocation13 + $0x698] ss:$12 sps:$4 sm:$0xff]  }
0x146d   : > { %11172 = vmatprep.subr.bf16.mxu1 %v12787_v22  ;;  %v12861_v22 = vld [vmem:[#allocation13 + $0x770] ss:$12 sps:$4 sm:$0xff]  }
0x146f   : > { %9376 = vmatpush1.bf16.msra.mxu0 %v12784_v62  ;;  %v12820_v62 = vld [vmem:[#allocation13 + $0x450] ss:$12 sps:$4 sm:$0xff]  }
0x1470   : > { %11173 = vmatpush3.bf16.msra.mxu1 %v12788_v42  ;;  %9377 = vmatprep.subr.bf16.mxu0 %v12791_v13  ;;  %v12825_v42 = vld [vmem:[#allocation13 + $0x46c] ss:$12 sps:$4 sm:$0xff]   ;;  %v12862_v13 = vld [vmem:[#allocation13 + $0x6b0] ss:$12 sps:$4 sm:$0xff]  }
0x1471   : > { %11174 = vmatprep.subr.bf16.mxu1 %v12792_v58  ;;  %v12866_v58 = vld [vmem:[#allocation13 + $0x848] ss:$12 sps:$4 sm:$0xff]  }
0x1473   : > { %9378 = vmatpush1.bf16.msra.mxu0 %v12789_v5  ;;  %v12823_v5 = vld [vmem:[#allocation13 + $0x468] ss:$12 sps:$4 sm:$0xff]  }
0x1474   : > { %11175 = vmatpush3.bf16.msra.mxu1 %v12793_v26  ;;  %9379 = vmatprep.subr.bf16.mxu0 %v12796_v23  ;;  %v12830_v26 = vld [vmem:[#allocation13 + $0x484] ss:$12 sps:$4 sm:$0xff]   ;;  %v12828_v23 = vld [vmem:[#allocation13 + $0x480] ss:$12 sps:$4 sm:$0xff]  }
0x1475   : > { %11176 = vmatprep.subr.bf16.mxu1 %v12797_v61  ;;  %v12835_v61 = vld [vmem:[#allocation13 + $0x49c] ss:$12 sps:$4 sm:$0xff]  }
0x1477   : > { %9380 = vmatpush1.bf16.msra.mxu0 %v12794_v55  ;;  %v12833_v55 = vld [vmem:[#allocation13 + $0x498] ss:$12 sps:$4 sm:$0xff]  }
0x1478   : > { %11177 = vmatpush3.bf16.msra.mxu1 %v12798_v31  ;;  %9381 = vmatprep.subr.bf16.mxu0 %v12801_v38  ;;  %v12840_v31 = vld [vmem:[#allocation13 + $0x4b4] ss:$12 sps:$4 sm:$0xff]   ;;  %v12838_v38 = vld [vmem:[#allocation13 + $0x4b0] ss:$12 sps:$4 sm:$0xff]  }
0x1479   : > { %11190 = vmatprep.subr.bf16.mxu1 %v12826_v53  ;;  %v12845_v53 = vld [vmem:[#allocation13 + $0x4cc] ss:$12 sps:$4 sm:$0xff]  }
0x147b   : > { %9382 = vmatpush1.bf16.msra.mxu0 %v12799_v24  ;;  %9759 = vmatmul.mubr.bf16.vlgmr.msra.gmra.mrb[128].mxu1 %v14580_v47  ;;  %v12843_v24 = vld [vmem:[#allocation13 + $0x4c8] ss:$12 sps:$4 sm:$0xff]  }
0x147c   : > { %9766 = vmatprep.mubr.bf16.mxu1 %v14598_v16  ;;  %9383 = vmatprep.subr.bf16.mxu0 %v12804_v30  ;;  %v12850_v30 = vld [vmem:[#allocation13 + $0x4e4] ss:$12 sps:$4 sm:$0xff]  }
0x147d   : > { %11191 = vmatpush3.bf16.msra.mxu1 %v12827_v37  ;;  %v5112_v37 = vld [vmem:[#allocation11 + $0x8] sm:$0xf] }
0x147e   : > { %11192 = vmatprep.subr.bf16.mxu1 %v12831_v15  ;;  %v5150_v15 = vrot.slane %v5112_v37, %v13788_v11 }
0x147f   : > { %9384 = vmatpush1.bf16.msra.mxu0 %v12802_v29  ;;  %v5158_v29 = vrot.slane %v5112_v37, %v13853_v41 }
0x1480   : > { %9385 = vmatprep.subr.bf16.mxu0 %v12807_v54  ;;  %v5154_v54 = vrot.slane %v5112_v37, %v13785_v10 }
0x1481   : > { %11193 = vmatpush3.bf16.msra.mxu1 %v12832_v12 }
0x1482   : > { %11194 = vmatprep.subr.bf16.mxu1 %v12836_v32  ;;  %v12860_v32 = vld [vmem:[#allocation13 + $0x514] ss:$12 sps:$4 sm:$0xff]  }
0x1483   : > { %9386 = vmatpush1.bf16.msra.mxu0 %v12805_v14  ;;  %9767 = vmatmul.mubr.bf16.gmra.mrb[132].mxu1 %v14593_v40 }
0x1484   : > { %9387 = vmatprep.subr.bf16.mxu0 %v12810_v34 }
0x1485   : > { %11195 = vmatpush3.bf16.msra.mxu1 %v12837_v17 }
0x1486   : > { %11196 = vmatprep.subr.bf16.mxu1 %v12841_v20 }
0x1487   : > { %9388 = vmatpush1.bf16.msra.mxu0 %v12808_v43 }
0x1488   : > { %9389 = vmatprep.subr.bf16.mxu0 %v12813_v2 }
0x1489   : > { %11197 = vmatpush3.bf16.msra.mxu1 %v12842_v52 }
0x148a   : > { %11198 = vmatprep.subr.bf16.mxu1 %v12846_v48 }
0x148b   : > { %9390 = vmatpush1.bf16.msra.mxu0 %v12811_v45 }
0x148c   : > { %9391 = vmatprep.subr.bf16.mxu0 %v12816_v46 }
0x148d   : > { %11199 = vmatpush3.bf16.msra.mxu1 %v12847_v33 }
0x148e   : > { %11200 = vmatprep.subr.bf16.mxu1 %v12851_v36 }
0x148f   : > { %9392 = vmatpush1.bf16.msra.mxu0 %v12814_v28 }
0x1490   : > { %9393 = vmatprep.subr.bf16.mxu0 %v12819_v18  ;;  %v12865_v18 = vld [vmem:[#allocation13 + $0x52c] ss:$12 sps:$4 sm:$0xff]  }
0x1491   : > { %11201 = vmatpush3.bf16.msra.mxu1 %v12852_v35 }
0x1492   : > { %11202 = vmatprep.subr.bf16.mxu1 %v12856_v9 }
0x1493   : > { %9394 = vmatpush1.bf16.msra.mxu0 %v12817_v27 }
0x1494   : > { %9395 = vmatprep.subr.bf16.mxu0 %v12822_v8 }
0x1495   : > { %11203 = vmatpush3.bf16.msra.mxu1 %v12857_v60 }
0x1496   : > { %11204 = vmatprep.subr.bf16.mxu1 %v12861_v22 }
0x1497   : > { %9396 = vmatpush1.bf16.msra.mxu0 %v12820_v62 }
0x1498   : > { %9397 = vmatprep.subr.bf16.mxu0 %v12825_v42 }
0x1499   : > { %11205 = vmatpush3.bf16.msra.mxu1 %v12862_v13 }
0x149a   : > { %11218 = vmatprep.subr.bf16.mxu1 %v12866_v58 }
0x149b   : > { %9398 = vmatpush1.bf16.msra.mxu0 %v12823_v5  ;;  %v12863_v5 = vld [vmem:[#allocation13 + $0x528] ss:$12 sps:$4 sm:$0xff]  }
0x149c   : > { %9420 = vmatprep.subr.bf16.mxu0 %v12830_v26 }
0x149e   : > { %9400 = vmatmul.mubr.bf16.vlgmr.msra.gmra.mrb[104].mxu0 %v14578_v4  ;;  %v12848_v4 = vld [vmem:[#allocation13 + $0x4e0] ss:$12 sps:$4 sm:$0xff]  }
0x149f   : > { %9409 = vmatprep.mubr.bf16.mxu0 %v14595_v0  ;;  %9421 = vmatpush1.bf16.msra.mxu0 %v12828_v23  ;;  %v12855_v0 = vld [vmem:[#allocation13 + $0x4fc] ss:$12 sps:$4 sm:$0xff]  }
0x14a0   : > { %9422 = vmatprep.subr.bf16.mxu0 %v12835_v61 }
0x14a3   : > { %9423 = vmatpush1.bf16.msra.mxu0 %v12833_v55  ;;  %v12867_v55 = vld [vmem:[#allocation13 + $0x788] ss:$12 sps:$4 sm:$0xff]  }
0x14a4   : > { %9424 = vmatprep.subr.bf16.mxu0 %v12840_v31  ;;  %v12870_v31 = vld [vmem:[#allocation13 + $0x544] ss:$12 sps:$4 sm:$0xff]  }
0x14a6   : > { %9410 = vmatmul.mubr.bf16.gmra.mrb[108].mxu0 %v14590_v56  ;;  %v14617_v56 = vrot.slane %v5112_v37, %v5129_v21  ;;  %v12871_v37 = vld [vmem:[#allocation13 + $0x860] ss:$12 sps:$4 sm:$0xff]  }
0x14a7   : > { %9425 = vmatpush1.bf16.msra.mxu0 %v12838_v38  ;;  %9452 = vmatprep.mubr.bf16.mxu0 %v14584_v6  ;;  %v12853_v6 = vld [vmem:[#allocation13 + $0x4f8] ss:$12 sps:$4 sm:$0xff]  }
0x14a8   : > { %9426 = vmatprep.subr.bf16.mxu0 %v12845_v53 }
0x14ab   : > { %9427 = vmatpush1.bf16.msra.mxu0 %v12843_v24 }
0x14ac   : > { %9428 = vmatprep.subr.bf16.mxu0 %v12850_v30 }
0x14af   : > { %9429 = vmatpush1.bf16.msra.mxu0 %v12848_v4 }
0x14b0   : > { %v7126_v12 = vpop.f32.mrb[96].mxu0  ;;  %9430 = vmatprep.subr.bf16.mxu0 %v12855_v0 }
0x14b1   : > { %v11470_v14 = vadd.f32 %v7126_v12, %v5150_v15  ;;  %v7232_v34 = vpop.f32.mrb[96].mxu1  ;;  %v7128_v17 = vpop.f32.mrb[97].mxu0 }
0x14b2   : > { %v11478_v20 = vadd.f32 %v7232_v34, %v5158_v29  ;;  %v11471_v43 = vadd.f32 %v7128_v17, %v5154_v54  ;;  %v7234_v2 = vpop.f32.mrb[97].mxu1  ;;  %v7130_v52 = vpop.f32.mrb[98].mxu0 }
0x14b3   : > { %v11479_v48 = vadd.f32 %v7234_v2, %v14617_v56  ;;  %v11472_v45 = vadd.f32 %v7130_v52, %v5150_v15  ;;  %v7236_v46 = vpop.f32.mrb[98].mxu1  ;;  %9431 = vmatpush1.bf16.msra.mxu0 %v12853_v6  ;;  %v7132_v33 = vpop.f32.mrb[99].mxu0  ;;  %v7259_v35 = vmax.f32 %v11470_v14, 0.0 }
0x14b4   : > { %v11480_v21 = vadd.f32 %v7236_v46, %v5158_v29  ;;  %v11473_v36 = vadd.f32 %v7132_v33, %v5154_v54  ;;  %v7238_v28 = vpop.f32.mrb[99].mxu1  ;;  %9432 = vmatprep.subr.bf16.mxu0 %v12860_v32  ;;  %v7261_v8 = vmax.f32 %v11478_v20, 0.0  ;;  %v7260_v60 = vmax.f32 %v11471_v43, 0.0  ;;  %v12868_v20 = vld [vmem:[#allocation13 + $0x540] ss:$12 sps:$4 sm:$0xff]  }
0x14b5   : > { %v7271_v9 = vmax.f32 %v11472_v45, 0.0  ;;  %v11481_v27 = vadd.f32 %v7238_v28, %v14617_v56  ;;  %v7262_v42 = vmax.f32 %v11479_v48, 0.0  ;;  %v12872_v48 = vld [vmem:[#allocation13 + $0x7a0] ss:$12 sps:$4 sm:$0xff]   ;;  %v12875_v45 = vld [vmem:[#allocation13 + $0x55c] ss:$12 sps:$4 sm:$0xff]  }
0x14b6   : > { %v7273_v22 = vmax.f32 %v11480_v21, 0.0  ;;  %v7272_v62 = vmax.f32 %v11473_v36, 0.0  ;;  %v12876_v21 = vld [vmem:[#allocation13 + $0x878] ss:$12 sps:$4 sm:$0xff]  }
0x14b7   : > { %v14621_v13 = vpack.c.bf16 %v7271_v9, %v7259_v35  ;;  %v7274_v58 = vmax.f32 %v11481_v27, 0.0  ;;  %9433 = vmatpush1.bf16.msra.mxu0 %v12858_v1 }
0x14b8   : > { %v14623_v26 = vpack.c.bf16 %v7273_v22, %v7261_v8  ;;  %v14625_v23 = vpack.c.bf16 %v7272_v62, %v7260_v60  ;;  %v7136_v61 = vpop.f32.mrb[100].mxu0  ;;  %9434 = vmatprep.subr.bf16.mxu0 %v12865_v18  ;;  %v12877_v60 = vld [vmem:[#allocation13 + $0x7b8] ss:$12 sps:$4 sm:$0xff]   ;;  %v12880_v22 = vld [vmem:[#allocation13 + $0x574] ss:$12 sps:$4 sm:$0xff]  }
0x14b9   : > { %v14627_v38 = vpack.c.bf16 %v7274_v58, %v7262_v42  ;;  %v11474_v53 = vadd.f32 %v7136_v61, %v5150_v15  ;;  %v7242_v24 = vpop.f32.mrb[100].mxu1  ;;  %v7138_v30 = vpop.f32.mrb[101].mxu0  ;;  %v12881_v62 = vld [vmem:[#allocation13 + $0x890] ss:$12 sps:$4 sm:$0xff]   ;;  %v12886_v61 = vld [vmem:[#allocation13 + $0x8a8] ss:$12 sps:$4 sm:$0xff]  }
0x14ba   : > { %v11482_v4 = vadd.f32 %v7242_v24, %v5158_v29  ;;  %v11475_v0 = vadd.f32 %v7138_v30, %v5154_v54  ;;  %v7244_v6 = vpop.f32.mrb[101].mxu1  ;;  %v7140_v12 = vpop.f32.mrb[102].mxu0  ;;  %9807 = vmatprep.mubr.bf16.mxu1 %v14625_v23  ;;  %v12878_v42 = vld [vmem:[#allocation13 + $0x570] ss:$12 sps:$4 sm:$0xff]   ;;  %v12891_v24 = vld [vmem:[#allocation13 + $0x8c0] ss:$12 sps:$4 sm:$0xff]  }
0x14bb   : > { %v11483_v32 = vadd.f32 %v7244_v6, %v14617_v56  ;;  %v11476_v14 = vadd.f32 %v7140_v12, %v5150_v15  ;;  %v7246_v34 = vpop.f32.mrb[102].mxu1  ;;  %9435 = vmatpush1.bf16.msra.mxu0 %v12863_v5  ;;  %v7142_v17 = vpop.f32.mrb[103].mxu0  ;;  %9808 = vmatmul.mubr.bf16.vlgmr.msra.gmra.mrb[136].mxu1 %v14621_v13  ;;  %v7283_v46 = vmax.f32 %v11474_v53, 0.0  ;;  %v12882_v58 = vld [vmem:[#allocation13 + $0x7d0] ss:$12 sps:$4 sm:$0xff]  }
0x14bc   : > { %v11484_v43 = vadd.f32 %v7246_v34, %v5158_v29  ;;  %v11477_v2 = vadd.f32 %v7142_v17, %v5154_v54  ;;  %v7248_v52 = vpop.f32.mrb[103].mxu1  ;;  %11219 = vmatpush3.bf16.msra.mxu1 %v12867_v55  ;;  %9436 = vmatprep.subr.bf16.mxu0 %v12870_v31  ;;  %v7285_v15 = vmax.f32 %v11482_v4, 0.0  ;;  %v7284_v36 = vmax.f32 %v11475_v0, 0.0  ;;  %v12873_v54 = vld [vmem:[#allocation13 + $0x558] ss:$12 sps:$4 sm:$0xff]  }
0x14bd   : > { %v7295_v33 = vmax.f32 %v11476_v14, 0.0  ;;  %v11485_v1 = vadd.f32 %v7248_v52, %v14617_v56  ;;  %11220 = vmatprep.subr.bf16.mxu1 %v12871_v37  ;;  %v7286_v35 = vmax.f32 %v11483_v32, 0.0  ;;  %v12885_v5 = vld [vmem:[#allocation13 + $0x58c] ss:$12 sps:$4 sm:$0xff]   ;;  %v12883_v55 = vld [vmem:[#allocation13 + $0x588] ss:$12 sps:$4 sm:$0xff]  }
0x14be   : > { %v7297_v28 = vmax.f32 %v11484_v43, 0.0  ;;  %v7296_v18 = vmax.f32 %v11477_v2, 0.0  ;;  %v12887_v31 = vld [vmem:[#allocation13 + $0x7e8] ss:$12 sps:$4 sm:$0xff]   ;;  %v12890_v53 = vld [vmem:[#allocation13 + $0x5a4] ss:$12 sps:$4 sm:$0xff]  }
0x14bf   : > { %v14633_v9 = vpack.c.bf16 %v7295_v33, %v7283_v46  ;;  %v7298_v29 = vmax.f32 %v11485_v1, 0.0  ;;  %9437 = vmatpush1.bf16.msra.mxu0 %v12868_v20  ;;  %v12888_v30 = vld [vmem:[#allocation13 + $0x5a0] ss:$12 sps:$4 sm:$0xff]   ;;  %v12895_v4 = vld [vmem:[#allocation13 + $0x5bc] ss:$12 sps:$4 sm:$0xff]  }
0x14c0   : > { %v14635_v27 = vpack.c.bf16 %v7297_v28, %v7285_v15  ;;  %v14637_v8 = vpack.c.bf16 %v7296_v18, %v7284_v36  ;;  %11221 = vmatpush3.bf16.msra.mxu1 %v12872_v48  ;;  %9438 = vmatprep.subr.bf16.mxu0 %v12875_v45  ;;  %v12892_v37 = vld [vmem:[#allocation13 + $0x800] ss:$12 sps:$4 sm:$0xff]   ;;  %v12896_v0 = vld [vmem:[#allocation13 + $0x8d8] ss:$12 sps:$4 sm:$0xff]   ;;  %v12901_v34 = vld [vmem:[#allocation13 + $0x8f0] ss:$12 sps:$4 sm:$0xff]  }
0x14c1   : > { %v14639_v56 = vpack.c.bf16 %v7298_v29, %v7286_v35  ;;  %11222 = vmatprep.subr.bf16.mxu1 %v12876_v21  ;;  %v12893_v6 = vld [vmem:[#allocation13 + $0x5b8] ss:$12 sps:$4 sm:$0xff]   ;;  %v12900_v32 = vld [vmem:[#allocation13 + $0x5d4] ss:$12 sps:$4 sm:$0xff]   ;;  %v12898_v2 = vld [vmem:[#allocation13 + $0x5d0] ss:$12 sps:$4 sm:$0xff]  }
0x14c2   : > { %9815 = vmatprep.mubr.bf16.mxu1 %v14637_v8  ;;  %v12897_v12 = vld [vmem:[#allocation13 + $0x818] ss:$12 sps:$4 sm:$0xff]   ;;  %v12902_v48 = vld [vmem:[#allocation13 + $0x830] ss:$12 sps:$4 sm:$0xff]   ;;  %v12903_v33 = vld [vmem:[#allocation13 + $0x5e8] ss:$12 sps:$4 sm:$0xff]  }
0x14c3   : > { %9439 = vmatpush1.bf16.msra.mxu0 %v12873_v54  ;;  %9816 = vmatmul.mubr.bf16.gmra.mrb[140].mxu1 %v14633_v9  ;;  %v12905_v45 = vld [vmem:[#allocation13 + $0x5ec] ss:$12 sps:$4 sm:$0xff]   ;;  %v12908_v1 = vld [vmem:[#allocation13 + $0x604] ss:$12 sps:$4 sm:$0xff]   ;;  %v12911_v29 = vld [vmem:[#allocation13 + $0x61c] ss:$12 sps:$4 sm:$0xff]  }
0x14c4   : > { %11223 = vmatpush3.bf16.msra.mxu1 %v12877_v60  ;;  %9856 = vmatprep.mubr.bf16.mxu1 %v14627_v38  ;;  %v12906_v18 = vld [vmem:[#allocation13 + $0x600] ss:$12 sps:$4 sm:$0xff]   ;;  %v12909_v60 = vld [vmem:[#allocation13 + $0x618] ss:$12 sps:$4 sm:$0xff]  }
0x14c5   : > { %9440 = vmatprep.subr.bf16.mxu0 %v12880_v22  ;;  %11224 = vmatprep.subr.bf16.mxu1 %v12881_v62  ;;  %v12914_v22 = vld [vmem:[#allocation13 + $0x634] ss:$12 sps:$4 sm:$0xff]   ;;  %v12912_v62 = vld [vmem:[#allocation13 + $0x630] ss:$12 sps:$4 sm:$0xff]  }
0x14c7   : > { %9441 = vmatpush1.bf16.msra.mxu0 %v12878_v42  ;;  %v12917_v42 = vld [vmem:[#allocation13 + $0x64c] ss:$12 sps:$4 sm:$0xff]  }
0x14c8   : > { %11225 = vmatpush3.bf16.msra.mxu1 %v12882_v58  ;;  %9442 = vmatprep.subr.bf16.mxu0 %v12885_v5  ;;  %v12915_v58 = vld [vmem:[#allocation13 + $0x648] ss:$12 sps:$4 sm:$0xff]  }
0x14c9   : > { %11226 = vmatprep.subr.bf16.mxu1 %v12886_v61  ;;  %v14651_v5 = vld [vmem:[#allocation5 + $0x5] ss:$8 sm:$0x7] }
0x14ca   : > { %v12923_v61 = vld [vmem:[#allocation13 + $0x67c] ss:$12 sps:$4 sm:$0xff]  }
0x14cb   : > { %9443 = vmatpush1.bf16.msra.mxu0 %v12883_v55  ;;  %v7721_v55 = vrot.slane %v14651_v5, %v13853_v41  ;;  %v12927_v41 = vld [vmem:[#allocation13 + $0x6a8] ss:$12 sps:$4 sm:$0xff]  }
0x14cc   : > { %11227 = vmatpush3.bf16.msra.mxu1 %v12887_v31  ;;  %9444 = vmatprep.subr.bf16.mxu0 %v12890_v53  ;;  %v12921_v31 = vld [vmem:[#allocation13 + $0x678] ss:$12 sps:$4 sm:$0xff]   ;;  %v12926_v53 = vld [vmem:[#allocation13 + $0x694] ss:$12 sps:$4 sm:$0xff]  }
0x14cd   : > { %11228 = vmatprep.subr.bf16.mxu1 %v12891_v24 }
0x14cf   : > { %9445 = vmatpush1.bf16.msra.mxu0 %v12888_v30 }
0x14d0   : > { %11229 = vmatpush3.bf16.msra.mxu1 %v12892_v37  ;;  %9446 = vmatprep.subr.bf16.mxu0 %v12895_v4  ;;  %v12924_v4 = vld [vmem:[#allocation13 + $0x690] ss:$12 sps:$4 sm:$0xff]  }
0x14d1   : > { %v11094_v14 = vpop.f32.mrb[104].mxu1  ;;  %11230 = vmatprep.subr.bf16.mxu1 %v12896_v0 }
0x14d2   : > { %v11095_v17 = vpop.f32.mrb[105].mxu1 }
0x14d3   : > { %v11096_v20 = vadd.f32 %v11095_v17, %v11094_v14  ;;  %9447 = vmatpush1.bf16.msra.mxu0 %v12893_v6  ;;  %v11097_v43 = vpop.f32.mrb[106].mxu1  ;;  %v12929_v6 = vld [vmem:[#allocation13 + $0x6ac] ss:$12 sps:$4 sm:$0xff]   ;;  %v12932_v17 = vld [vmem:[#allocation13 + $0x6c4] ss:$12 sps:$4 sm:$0xff]  }
0x14d4   : > { %v11098_v52 = vpop.f32.mrb[107].mxu1  ;;  %11231 = vmatpush3.bf16.msra.mxu1 %v12897_v12  ;;  %9448 = vmatprep.subr.bf16.mxu0 %v12900_v32 }
0x14d5   : > { %v11099_v46 = vadd.f32 %v11098_v52, %v11097_v43  ;;  %11232 = vmatprep.subr.bf16.mxu1 %v12901_v34  ;;  %v9614_v30 = vadd.f32 %v11096_v20, %v7721_v55 }
0x14d7   : > { %9449 = vmatpush1.bf16.msra.mxu0 %v12898_v2  ;;  %v9617_v12 = vadd.f32 %v11099_v46, %v7721_v55 }
0x14d8   : > { %11233 = vmatpush3.bf16.msra.mxu1 %v12902_v48  ;;  %9450 = vmatprep.subr.bf16.mxu0 %v12905_v45  ;;  %v12930_v45 = vld [vmem:[#allocation13 + $0x6c0] ss:$12 sps:$4 sm:$0xff]  }
0x14d9   : > { %v11100_v21 = vpop.f32.mrb[108].mxu1 }
0x14da   : > { %v11101_v15 = vpop.f32.mrb[109].mxu1 }
0x14db   : > { %v11102_v36 = vadd.f32 %v11101_v15, %v11100_v21  ;;  %9451 = vmatpush1.bf16.msra.mxu0 %v12903_v33  ;;  %v11103_v28 = vpop.f32.mrb[110].mxu1  ;;  %9857 = vmatmul.mubr.bf16.vlgmr.msra.gmra.mrb[144].mxu1 %v14623_v26 }
0x14dc   : > { %v11104_v35 = vpop.f32.mrb[111].mxu1  ;;  %9864 = vmatprep.mubr.bf16.mxu1 %v14639_v56  ;;  %9473 = vmatprep.subr.bf16.mxu0 %v12908_v1  ;;  %v12935_v1 = vld [vmem:[#allocation13 + $0x6dc] ss:$12 sps:$4 sm:$0xff]  }
0x14dd   : > { %v11105_v54 = vadd.f32 %v11104_v35, %v11103_v28  ;;  %v9622_v20 = vadd.f32 %v11102_v36, %v7721_v55  ;;  %v12938_v35 = vld [vmem:[#allocation13 + $0x6f4] ss:$12 sps:$4 sm:$0xff]   ;;  %v12941_v36 = vld [vmem:[#allocation13 + $0x70c] ss:$12 sps:$4 sm:$0xff]  }
0x14de   : > { %9453 = vmatmul.mubr.bf16.vlgmr.msra.gmra.mrb[104].mxu0 %v14580_v47  ;;  %v12920_v47 = vld [vmem:[#allocation13 + $0x664] ss:$12 sps:$4 sm:$0xff]  }
0x14df   : > { %9462 = vmatprep.mubr.bf16.mxu0 %v14598_v16  ;;  %9474 = vmatpush1.bf16.msra.mxu0 %v12906_v18  ;;  %v12918_v16 = vld [vmem:[#allocation13 + $0x660] ss:$12 sps:$4 sm:$0xff]   ;;  %v9625_v46 = vadd.f32 %v11105_v54, %v7721_v55  ;;  %v12933_v18 = vld [vmem:[#allocation13 + $0x6d8] ss:$12 sps:$4 sm:$0xff]   ;;  %v12947_v54 = vld [vmem:[#allocation13 + $0x73c] ss:$12 sps:$4 sm:$0xff]  }
0x14e0   : > { %9475 = vmatprep.subr.bf16.mxu0 %v12911_v29  ;;  %v12936_v29 = vld [vmem:[#allocation13 + $0x6f0] ss:$12 sps:$4 sm:$0xff]  }
0x14e1   : > { %v12956_v55 = vld [vmem:[#allocation13 + $0x784] ss:$12 sps:$4 sm:$0xff]  }
0x14e3   : > { %9476 = vmatpush1.bf16.msra.mxu0 %v12909_v60  ;;  %9865 = vmatmul.mubr.bf16.gmra.mrb[148].mxu1 %v14635_v27  ;;  %v12939_v60 = vld [vmem:[#allocation13 + $0x708] ss:$12 sps:$4 sm:$0xff]  }
0x14e4   : > { %9477 = vmatprep.subr.bf16.mxu0 %v12914_v22  ;;  %v12944_v22 = vld [vmem:[#allocation13 + $0x724] ss:$12 sps:$4 sm:$0xff]  }
0x14e6   : > { %9463 = vmatmul.mubr.bf16.gmra.mrb[108].mxu0 %v14593_v40 }
0x14e7   : > { %9478 = vmatpush1.bf16.msra.mxu0 %v12912_v62  ;;  %9505 = vmatprep.mubr.bf16.mxu0 %v14625_v23  ;;  %v12942_v62 = vld [vmem:[#allocation13 + $0x720] ss:$12 sps:$4 sm:$0xff]  }
0x14e8   : > { %9479 = vmatprep.subr.bf16.mxu0 %v12917_v42  ;;  %v12945_v42 = vld [vmem:[#allocation13 + $0x738] ss:$12 sps:$4 sm:$0xff]  }
0x14eb   : > { %9480 = vmatpush1.bf16.msra.mxu0 %v12915_v58  ;;  %v12950_v58 = vld [vmem:[#allocation13 + $0x754] ss:$12 sps:$4 sm:$0xff]  }
0x14ec   : > { %9481 = vmatprep.subr.bf16.mxu0 %v12920_v47  ;;  %v12948_v47 = vld [vmem:[#allocation13 + $0x750] ss:$12 sps:$4 sm:$0xff]  }
0x14ef   : > { %9482 = vmatpush1.bf16.msra.mxu0 %v12918_v16  ;;  %v12953_v16 = vld [vmem:[#allocation13 + $0x76c] ss:$12 sps:$4 sm:$0xff]  }
0x14f0   : > { %9483 = vmatprep.subr.bf16.mxu0 %v12923_v61  ;;  %v12951_v61 = vld [vmem:[#allocation13 + $0x768] ss:$12 sps:$4 sm:$0xff]  }
0x14f1   : > { %v11122_v40 = vpop.f32.mrb[112].mxu1 }
0x14f2   : > { %v11123_v24 = vpop.f32.mrb[113].mxu1 }
0x14f3   : > { %v11124_v23 = vadd.f32 %v11123_v24, %v11122_v40  ;;  %9484 = vmatpush1.bf16.msra.mxu0 %v12921_v31  ;;  %v11125_v37 = vpop.f32.mrb[114].mxu1  ;;  %v12954_v31 = vld [vmem:[#allocation13 + $0x780] ss:$12 sps:$4 sm:$0xff]   ;;  %v12957_v40 = vld [vmem:[#allocation13 + $0x798] ss:$12 sps:$4 sm:$0xff]  }
0x14f4   : > { %v11126_v0 = vpop.f32.mrb[115].mxu1  ;;  %9485 = vmatprep.subr.bf16.mxu0 %v12926_v53  ;;  %v12959_v53 = vld [vmem:[#allocation13 + $0x79c] ss:$12 sps:$4 sm:$0xff]   ;;  %v12962_v24 = vld [vmem:[#allocation13 + $0x7b4] ss:$12 sps:$4 sm:$0xff]  }
0x14f5   : > { %v14655_v32 = vadd.f32 %v11124_v23, %v9614_v30  ;;  %v11127_v14 = vadd.f32 %v11126_v0, %v11125_v37  ;;  %v12960_v30 = vld [vmem:[#allocation13 + $0x7b0] ss:$12 sps:$4 sm:$0xff]   ;;  %v12965_v23 = vld [vmem:[#allocation13 + $0x7cc] ss:$12 sps:$4 sm:$0xff]   ;;  %v12963_v37 = vld [vmem:[#allocation13 + $0x7c8] ss:$12 sps:$4 sm:$0xff]  }
0x14f7   : > { %v14657_v34 = vadd.f32 %v11127_v14, %v9617_v12  ;;  %9486 = vmatpush1.bf16.msra.mxu0 %v12924_v4  ;;  %v12968_v4 = vld [vmem:[#allocation13 + $0x7e4] ss:$12 sps:$4 sm:$0xff]  }
0x14f8   : > { %9487 = vmatprep.subr.bf16.mxu0 %v12929_v6 }
0x14f9   : > { %v11128_v43 = vpop.f32.mrb[116].mxu1 }
0x14fa   : > { %v11129_v2 = vpop.f32.mrb[117].mxu1 }
0x14fb   : > { %v11130_v52 = vadd.f32 %v11129_v2, %v11128_v43  ;;  %9488 = vmatpush1.bf16.msra.mxu0 %v12927_v41  ;;  %v11131_v48 = vpop.f32.mrb[118].mxu1  ;;  %v12969_v41 = vld [vmem:[#allocation13 + $0x7f8] ss:$12 sps:$4 sm:$0xff]   ;;  %v12974_v43 = vld [vmem:[#allocation13 + $0x814] ss:$12 sps:$4 sm:$0xff]  }
0x14fc   : > { %v11132_v33 = vpop.f32.mrb[119].mxu1  ;;  %9489 = vmatprep.subr.bf16.mxu0 %v12932_v17 }
0x14fd   : > { %v14659_v21 = vadd.f32 %v11130_v52, %v9622_v20  ;;  %v11133_v15 = vadd.f32 %v11132_v33, %v11131_v48  ;;  %v12972_v20 = vld [vmem:[#allocation13 + $0x810] ss:$12 sps:$4 sm:$0xff]   ;;  %v12977_v52 = vld [vmem:[#allocation13 + $0x82c] ss:$12 sps:$4 sm:$0xff]  }
0x14ff   : > { %v14661_v28 = vadd.f32 %v11133_v15, %v9625_v46  ;;  %9490 = vmatpush1.bf16.msra.mxu0 %v12930_v45  ;;  %v12975_v46 = vld [vmem:[#allocation13 + $0x828] ss:$12 sps:$4 sm:$0xff]  }
0x1500   : > { %9491 = vmatprep.subr.bf16.mxu0 %v12935_v1 }
0x1503   : > { %9492 = vmatpush1.bf16.msra.mxu0 %v12933_v18  ;;  %v12980_v18 = vld [vmem:[#allocation13 + $0x844] ss:$12 sps:$4 sm:$0xff]  }
0x1504   : > { %9493 = vmatprep.subr.bf16.mxu0 %v12938_v35 }
0x1507   : > { %9494 = vmatpush1.bf16.msra.mxu0 %v12936_v29 }
0x1508   : > { %9495 = vmatprep.subr.bf16.mxu0 %v12941_v36  ;;  %v12983_v36 = vld [vmem:[#allocation13 + $0x85c] ss:$12 sps:$4 sm:$0xff]  }
0x150b   : > { %9496 = vmatpush1.bf16.msra.mxu0 %v12939_v60  ;;  %v12981_v60 = vld [vmem:[#allocation13 + $0x858] ss:$12 sps:$4 sm:$0xff]  }
0x150c   : > { %9497 = vmatprep.subr.bf16.mxu0 %v12944_v22  ;;  %v12986_v22 = vld [vmem:[#allocation13 + $0x874] ss:$12 sps:$4 sm:$0xff]  }
0x150f   : > { %9498 = vmatpush1.bf16.msra.mxu0 %v12942_v62  ;;  %v12984_v62 = vld [vmem:[#allocation13 + $0x870] ss:$12 sps:$4 sm:$0xff]  }
0x1510   : > { %9499 = vmatprep.subr.bf16.mxu0 %v12947_v54  ;;  %v12989_v54 = vld [vmem:[#allocation13 + $0x88c] ss:$12 sps:$4 sm:$0xff]  }
0x1513   : > { %9500 = vmatpush1.bf16.msra.mxu0 %v12945_v42  ;;  %v12987_v42 = vld [vmem:[#allocation13 + $0x888] ss:$12 sps:$4 sm:$0xff]  }
0x1514   : > { %9501 = vmatprep.subr.bf16.mxu0 %v12950_v58  ;;  %v12992_v58 = vld [vmem:[#allocation13 + $0x8a4] ss:$12 sps:$4 sm:$0xff]  }
0x1517   : > { %9502 = vmatpush1.bf16.msra.mxu0 %v12948_v47 }
0x1518   : > { %9503 = vmatprep.subr.bf16.mxu0 %v12953_v16 }
0x151b   : > { %9504 = vmatpush1.bf16.msra.mxu0 %v12951_v61  ;;  %v12993_v61 = vld [vmem:[#allocation13 + $0x8b8] ss:$12 sps:$4 sm:$0xff]  }
0x151c   : > { %9526 = vmatprep.subr.bf16.mxu0 %v12956_v55 }
0x151e   : > { %9506 = vmatmul.mubr.bf16.vlgmr.msra.gmra.mrb[104].mxu0 %v14621_v13  ;;  %v12966_v13 = vld [vmem:[#allocation13 + $0x7e0] ss:$12 sps:$4 sm:$0xff]  }
0x151f   : > { %9515 = vmatprep.mubr.bf16.mxu0 %v14637_v8  ;;  %9527 = vmatpush1.bf16.msra.mxu0 %v12954_v31  ;;  %v12971_v8 = vld [vmem:[#allocation13 + $0x7fc] ss:$12 sps:$4 sm:$0xff]  }
0x1520   : > { %9528 = vmatprep.subr.bf16.mxu0 %v12959_v53  ;;  %v12998_v53 = vld [vmem:[#allocation13 + $0x8d4] ss:$12 sps:$4 sm:$0xff]  }
0x1523   : > { %9529 = vmatpush1.bf16.msra.mxu0 %v12957_v40 }
0x1524   : > { %9530 = vmatprep.subr.bf16.mxu0 %v12962_v24 }
0x1526   : > { %9516 = vmatmul.mubr.bf16.gmra.mrb[108].mxu0 %v14633_v9 }
0x1527   : > { %9531 = vmatpush1.bf16.msra.mxu0 %v12960_v30  ;;  %9558 = vmatprep.mubr.bf16.mxu0 %v14627_v38 }
0x1528   : > { %9532 = vmatprep.subr.bf16.mxu0 %v12965_v23  ;;  %v12996_v23 = vld [vmem:[#allocation13 + $0x8d0] ss:$12 sps:$4 sm:$0xff]  }
0x152b   : > { %9533 = vmatpush1.bf16.msra.mxu0 %v12963_v37 }
0x152c   : > { %9534 = vmatprep.subr.bf16.mxu0 %v12968_v4  ;;  %v13001_v4 = vld [vmem:[#allocation13 + $0x8ec] ss:$12 sps:$4 sm:$0xff]  }
0x152d   : > { %v11150_v0 = vpop.f32.mrb[120].mxu1 }
0x152e   : > { %v11151_v6 = vpop.f32.mrb[121].mxu1 }
0x152f   : > { %9535 = vmatpush1.bf16.msra.mxu0 %v12966_v13  ;;  %v11152_v12 = vadd.f32 %v11151_v6, %v11150_v0  ;;  %v11153_v14 = vpop.f32.mrb[122].mxu1  ;;  %v12999_v0 = vld [vmem:[#allocation13 + $0x8e8] ss:$12 sps:$4 sm:$0xff]  }
0x1530   : > { %9536 = vmatprep.subr.bf16.mxu0 %v12971_v8  ;;  %v11154_v17 = vpop.f32.mrb[123].mxu1 }
0x1531   : > { %v9712_v9 = vadd.f32 %v11152_v12, %v14655_v32  ;;  %v11155_v2 = vadd.f32 %v11154_v17, %v11153_v14 }
0x1533   : > { %v9715_v38 = vadd.f32 %v11155_v2, %v14657_v34  ;;  %9537 = vmatpush1.bf16.msra.mxu0 %v12969_v41  ;;  %v12978_v34 = vld [vmem:[#allocation13 + $0x840] ss:$12 sps:$4 sm:$0xff]  }
0x1534   : > { %9538 = vmatprep.subr.bf16.mxu0 %v12974_v43 }
0x1535   : > { %v11156_v48 = vpop.f32.mrb[124].mxu1 }
0x1536   : > { %v11157_v45 = vpop.f32.mrb[125].mxu1 }
0x1537   : > { %9539 = vmatpush1.bf16.msra.mxu0 %v12972_v20  ;;  %v11158_v33 = vadd.f32 %v11157_v45, %v11156_v48  ;;  %v11159_v1 = vpop.f32.mrb[126].mxu1 }
0x1538   : > { %9540 = vmatprep.subr.bf16.mxu0 %v12977_v52  ;;  %v11160_v15 = vpop.f32.mrb[127].mxu1 }
0x1539   : > { %v9720_v35 = vadd.f32 %v11158_v33, %v14659_v21  ;;  %v11161_v29 = vadd.f32 %v11160_v15, %v11159_v1  ;;  %v12990_v21 = vld [vmem:[#allocation13 + $0x8a0] ss:$12 sps:$4 sm:$0xff]  }
0x153b   : > { %v9723_v32 = vadd.f32 %v11161_v29, %v14661_v28  ;;  %9541 = vmatpush1.bf16.msra.mxu0 %v12975_v46  ;;  %v12995_v28 = vld [vmem:[#allocation13 + $0x8bc] ss:$12 sps:$4 sm:$0xff]  }
0x153c   : > { %9542 = vmatprep.subr.bf16.mxu0 %v12980_v18 }
0x153f   : > { %9543 = vmatpush1.bf16.msra.mxu0 %v12978_v34 }
0x1540   : > { %9544 = vmatprep.subr.bf16.mxu0 %v12983_v36 }
0x1543   : > { %9545 = vmatpush1.bf16.msra.mxu0 %v12981_v60 }
0x1544   : > { %9546 = vmatprep.subr.bf16.mxu0 %v12986_v22 }
0x1547   : > { %9547 = vmatpush1.bf16.msra.mxu0 %v12984_v62 }
0x1548   : > { %9548 = vmatprep.subr.bf16.mxu0 %v12989_v54 }
0x154b   : > { %9549 = vmatpush1.bf16.msra.mxu0 %v12987_v42 }
0x154c   : > { %9550 = vmatprep.subr.bf16.mxu0 %v12992_v58 }
0x154e   : > { %v11178_v47 = vpop.f32.mrb[128].mxu1 }
0x154f   : > { %9551 = vmatpush1.bf16.msra.mxu0 %v12990_v21  ;;  %v11179_v16 = vpop.f32.mrb[129].mxu1 }
0x1550   : > { %v11180_v55 = vadd.f32 %v11179_v16, %v11178_v47  ;;  %v11181_v31 = vpop.f32.mrb[130].mxu1  ;;  %9552 = vmatprep.subr.bf16.mxu0 %v12995_v28 }
0x1551   : > { %v11182_v40 = vpop.f32.mrb[131].mxu1 }
0x1552   : > { %v9761_v24 = vadd.f32 %v11180_v55, %v9712_v9  ;;  %v11183_v30 = vadd.f32 %v11182_v40, %v11181_v31 }
0x1553   : > { %9553 = vmatpush1.bf16.msra.mxu0 %v12993_v61 }
0x1554   : > { %v9764_v37 = vadd.f32 %v11183_v30, %v9715_v38  ;;  %9554 = vmatprep.subr.bf16.mxu0 %v12998_v53 }
0x1556   : > { %v11184_v13 = vpop.f32.mrb[132].mxu1 }
0x1557   : > { %9555 = vmatpush1.bf16.msra.mxu0 %v12996_v23  ;;  %v11185_v8 = vpop.f32.mrb[133].mxu1 }
0x1558   : > { %v11186_v6 = vadd.f32 %v11185_v8, %v11184_v13  ;;  %v11187_v12 = vpop.f32.mrb[134].mxu1  ;;  %9556 = vmatprep.subr.bf16.mxu0 %v13001_v4 }
0x1559   : > { %v11188_v14 = vpop.f32.mrb[135].mxu1 }
0x155a   : > { %v9769_v41 = vadd.f32 %v11186_v6, %v9720_v35  ;;  %v11189_v17 = vadd.f32 %v11188_v14, %v11187_v12 }
0x155b   : > { %9557 = vmatpush1.bf16.msra.mxu0 %v12999_v0 }
0x155c   : > { %v9772_v43 = vadd.f32 %v11189_v17, %v9723_v32 }
0x155e   : > { %9559 = vmatmul.mubr.bf16.vlgmr.msra.gmra.mrb[104].mxu0 %v14623_v26 }
0x155f   : > { %9568 = vmatprep.mubr.bf16.mxu0 %v14639_v56 }
0x1566   : > { %9569 = vmatmul.mubr.bf16.gmra.mrb[108].mxu0 %v14635_v27 }
0x158e   : > { %v11206_v9 = vpop.f32.mrb[136].mxu1 }
0x158f   : > { %v11207_v2 = vpop.f32.mrb[137].mxu1 }
0x1590   : > { %v11208_v38 = vadd.f32 %v11207_v2, %v11206_v9  ;;  %v11209_v20 = vpop.f32.mrb[138].mxu1 }
0x1591   : > { %v11210_v52 = vpop.f32.mrb[139].mxu1 }
0x1592   : > { %v9810_v48 = vadd.f32 %v11208_v38, %v9761_v24  ;;  %v11211_v45 = vadd.f32 %v11210_v52, %v11209_v20  ;;  %v7717_v24 = vrot.slane %v14651_v5, %v13785_v10 }
0x1594   : > { %v9813_v33 = vadd.f32 %v11211_v45, %v9764_v37 }
0x1596   : > { %v11212_v1 = vpop.f32.mrb[140].mxu1 }
0x1597   : > { %v11213_v46 = vpop.f32.mrb[141].mxu1 }
0x1598   : > { %v11214_v15 = vadd.f32 %v11213_v46, %v11212_v1  ;;  %v11215_v18 = vpop.f32.mrb[142].mxu1 }
0x1599   : > { %v11216_v35 = vpop.f32.mrb[143].mxu1 }
0x159a   : > { %v9818_v29 = vadd.f32 %v11214_v15, %v9769_v41  ;;  %v11217_v26 = vadd.f32 %v11216_v35, %v11215_v18 }
0x159c   : > { %v9821_v32 = vadd.f32 %v11217_v26, %v9772_v43 }
0x15ae   : > { %v11234_v56 = vpop.f32.mrb[144].mxu1 }
0x15af   : > { %v11235_v34 = vpop.f32.mrb[145].mxu1 }
0x15b0   : > { %v11236_v27 = vadd.f32 %v11235_v34, %v11234_v56  ;;  %v11237_v36 = vpop.f32.mrb[146].mxu1 }
0x15b1   : > { %v11238_v60 = vpop.f32.mrb[147].mxu1 }
0x15b2   : > { %v9859_v22 = vadd.f32 %v11236_v27, %v9810_v48  ;;  %v11239_v62 = vadd.f32 %v11238_v60, %v11237_v36 }
0x15b4   : > { %v9875_v54 = vadd.f32 %v9859_v22, %v14314_v49  ;;  %v9862_v42 = vadd.f32 %v11239_v62, %v9813_v33 }
0x15b6   : > { %9887 = vst [vmem:[%s14677_s14 + $0x10] sm:$0xff] %v9875_v54  ;;  %v9878_v58 = vadd.f32 %v9862_v42, %v14327_v39  ;;  %v11240_v21 = vpop.f32.mrb[148].mxu1  ;;  %v7713_v39 = vrot.slane %v14651_v5, %v13788_v11 }
0x15b7   : > { %v11241_v28 = vpop.f32.mrb[149].mxu1 }
0x15b8   : > { %9890 = vst [vmem:[%s14677_s14 + $0x28] sm:$0xff] %v9878_v58  ;;  %v11242_v47 = vadd.f32 %v11241_v28, %v11240_v21  ;;  %v11243_v16 = vpop.f32.mrb[150].mxu1 }
0x15b9   : > { %v11244_v61 = vpop.f32.mrb[151].mxu1 }
0x15ba   : > { %v9867_v55 = vadd.f32 %v11242_v47, %v9818_v29  ;;  %v11245_v31 = vadd.f32 %v11244_v61, %v11243_v16 }
0x15bc   : > { %v9881_v49 = vadd.f32 %v9867_v55, %v14364_v63  ;;  %v9870_v53 = vadd.f32 %v11245_v31, %v9821_v32 }
0x15be   : > { %9893 = vst [vmem:[%s14677_s14 + $0x40] sm:$0xff] %v9881_v49  ;;  %v9884_v40 = vadd.f32 %v9870_v53, %v14350_v44 }
0x15c0   : > { %9896 = vst [vmem:[%s14677_s14 + $0x58] sm:$0xff] %v9884_v40 }
0x1631   : > { %v9560_v30 = vpop.f32.mrb[104].mxu0 }
0x1632   : > { %v11486_v23 = vadd.f32 %v9560_v30, %v7713_v39  ;;  %v9562_v37 = vpop.f32.mrb[105].mxu0 }
0x1633   : > { %v11487_v4 = vadd.f32 %v9562_v37, %v7717_v24  ;;  %v9564_v63 = vpop.f32.mrb[106].mxu0 }
0x1634   : > { %v9873_v13 = vadd.f32 %v11486_v23, %v14294_v3  ;;  %v11488_v8 = vadd.f32 %v9564_v63, %v7713_v39  ;;  %v9566_v44 = vpop.f32.mrb[107].mxu0 }
0x1635   : > { %v9874_v0 = vadd.f32 %v11487_v4, %v14297_v19  ;;  %v11489_v6 = vadd.f32 %v9566_v44, %v7717_v24 }
0x1636   : > { %9885 = vst [vmem:[%s14677_s14] sm:$0xff] %v9873_v13  ;;  %v9876_v11 = vadd.f32 %v11488_v8, %v14302_v59 }
0x1637   : > { %9886 = vst [vmem:[%s14677_s14 + $0x8] sm:$0xff] %v9874_v0  ;;  %v9877_v10 = vadd.f32 %v11489_v6, %v14305_v7 }
0x1638   : > { %9888 = vst [vmem:[%s14677_s14 + $0x18] sm:$0xff] %v9876_v11 }
0x1639   : > { %9889 = vst [vmem:[%s14677_s14 + $0x20] sm:$0xff] %v9877_v10  ;;  %v9570_v5 = vpop.f32.mrb[108].mxu0 }
0x163a   : > { %v11490_v12 = vadd.f32 %v9570_v5, %v7713_v39  ;;  %v9572_v14 = vpop.f32.mrb[109].mxu0 }
0x163b   : > { %v11491_v3 = vadd.f32 %v9572_v14, %v7717_v24  ;;  %v9574_v19 = vpop.f32.mrb[110].mxu0 }
0x163c   : > { %v9879_v41 = vadd.f32 %v11490_v12, %v14342_v57  ;;  %v11492_v59 = vadd.f32 %v9574_v19, %v7713_v39  ;;  %v9576_v17 = vpop.f32.mrb[111].mxu0 }
0x163d   : > { %v9880_v7 = vadd.f32 %v11491_v3, %v14347_v51  ;;  %v11493_v43 = vadd.f32 %v9576_v17, %v7717_v24 }
0x163e   : > { %9891 = vst [vmem:[%s14677_s14 + $0x30] sm:$0xff] %v9879_v41  ;;  %v9882_v9 = vadd.f32 %v11492_v59, %v14319_v50 }
0x163f   : > { %9892 = vst [vmem:[%s14677_s14 + $0x38] sm:$0xff] %v9880_v7  ;;  %v9883_v57 = vadd.f32 %v11493_v43, %v14324_v25 }
0x1640   : > { %9894 = vst [vmem:[%s14677_s14 + $0x48] sm:$0xff] %v9882_v9 }
0x1641   : > { %9895 = vst [vmem:[%s14677_s14 + $0x50] sm:$0xff] %v9883_v57 }
0x1642   : > { %13349 = shalt.err (!%p13346_p8)
}
0x1643   : > { %s13350_s23 = scalar_lea.hbm %s14707_s30, 1536  ;;  %s13354_s8 = scalar_lea.hbm %s14764_s7, 3072 }
0x1644   : > { %p13351_p13 = scmp.ne.s32.totalorder %s14707_s30, %s13350_s23  ;;  %p13355_p9 = scmp.lt.u32.totalorder %s14707_s30, %s14764_s7 }
0x1645   : > { %p13356_p6 = scmp.lt.u32.totalorder %s13354_s8, %s13350_s23  ;;  %p13358_p10 = scmp.lt.u32.totalorder %s13350_s23, %s14707_s30 }
0x1646   : > { %p13352_p0 = pnand %p13351_p13, %p14787_p12 }
0x1647   : > { %p13357_p11 = por %p13356_p6, %p13355_p9 }
0x1648   : > { %p13353_p2 = pneg %p13352_p0 }
0x1649   : > { %p13359_p5 = por %p13358_p10, %p13357_p11 }
0x164b   : > { %p13360_p7 = pnand %p13359_p5, %p13353_p2 }
0x164d   : > { %13363 = shalt.err (!%p13360_p7)
}
0x164e   : > { %s13437_s20 = smov 384   ;;  %s13438_s11 = smov 24  }
0x164f   : > { %11652 = dma.vmem_to_hbm [thread:$0]  (%p14787_p12), %s14709_s10, 1536, %s14707_s30, %s9898_s16, %s13437_s20, %s13437_s20, %s13438_s11  }
0x1650 PF: > { %s9927_s18 = sand.u32 1, %s13402_s24   ;;  %p14788_p4 = scmp.ne.s32.totalorder %s14778_s15, 0 }
0x1651   : > { %p14789_p1 = scmp.ge.s32.totalorder %s13414_s27, 2  ;;  %s9928_s1 = scalar_lea.sflag [#allocation4], %s9927_s18 }
0x1653   : > { %p11678_p3 = pnand %p14789_p1, %p14788_p4 }
0x1655   : > { %13397 = dma.done.wait (!%p11678_p3), %s9928_s1, 1536  }
0x1656   : > { %13399 = vsyncadd (!%p11678_p3), %s9928_s1, 4294965760  ;;  %p23_p8 = scmp.ge.s32.totalorder %s13654_s19, 4   ;;  %s14790_s24 = smov %s13406_s25 }
0x1657   : > { %s14791_s25 = smov %s13410_s26  ;;  %s14792_s26 = smov %s13665_s12 }
0x1658   : > { %s14793_s27 = smov %s13654_s19  ;;  %25 = sbr.rel (!%p23_p8) target bundleno = 10 (0xa), region = 122 }
0x165f   :  { %9933 = vsyncpa [#allocation3], 1 }
0x1660   :  { %9935 = vsyncpa [#allocation3 + $0x1], 1 }
0x1661   :  { %9936 = vsyncpa [#allocation6], 1 }
0x1662   :  { %9937 = vsyncpa [#allocation9], 1 }
0x1663   :  { %9938 = vsyncpa [#allocation12], 1 }
0x1664   :  { %9939 = vsyncpa [#allocation4], 1 }
0x1665   :  { %9941 = vsyncpa [#allocation4 + $0x1], 1 }

</bundles_post_ra>
